<compile_context>
chip_gen: v6e
topology: v6e:2x2x1
jax: 0.10.0
libtpu: 0.0.40
codegen_flags: <defaults>
</compile_context>

<pallas_src>
import jax
import jax.numpy as jnp
from jax.experimental import pallas as pl
from jax.experimental.pallas import tpu as pltpu

K_IN = 3 * 32 * 32      # 3072
H1 = 1024
H2 = 512
NUM_CLASSES = 10
PAD_CLASSES = 128       # lane-dense padded class dim
NEG_INF = -1e30         # padded-class bias -> exp() underflows to 0 in the softmax


def mlp_cifar10_kernel(x_ref, w1_ref, b1_ref, w2_ref, b2_ref, w3_ref, b3_ref, out_ref):
    # fc1: bf16 x bf16 -> f32 accumulation on the MXU, bias + relu on the VPU.
    h1 = jnp.dot(x_ref[...], w1_ref[...], preferred_element_type=jnp.float32)
    h1 = jnp.maximum(h1 + b1_ref[...], 0.0)

    # fc2 / fc3: feed bf16 activations straight into the bf16 weights (no upcasts).
    h2 = jnp.dot(h1.astype(jnp.bfloat16), w2_ref[...], preferred_element_type=jnp.float32)
    h2 = jnp.maximum(h2 + b2_ref[...], 0.0)

    logits = jnp.dot(h2.astype(jnp.bfloat16), w3_ref[...], preferred_element_type=jnp.float32)
    logits = logits + b3_ref[...]

    # Stable log_softmax over the 128-lane padded class dim; padded classes carry a
    # -1e30 bias so they contribute exp(.) == 0 to the denominator.
    m = jnp.max(logits, axis=-1, keepdims=True)
    shifted = logits - m
    lse = jnp.log(jnp.sum(jnp.exp(shifted), axis=-1, keepdims=True))
    out_ref[...] = shifted - lse


def _round_up(x, m):
    return (x + m - 1) // m * m


def mlp_cifar10_forward(x, prepared_params):
    """x: (B, 3, 32, 32) float32. Returns (B, 10) log-probabilities."""
    w1, b1, w2, b2, w3p, b3p = prepared_params
    B = x.shape[0]
    # bf16 in the wrapper: halves x HBM->VMEM bytes, removes the in-kernel cast.
    x_flat = x.reshape(B, K_IN).astype(jnp.bfloat16)

    # Batch tile: 256-row tiles for large batches (MXU-width friendly, fewer grid
    # steps), single sublane-aligned tile otherwise.
    if B >= 256:
        tm = 256
    elif B >= 128:
        tm = 128
    else:
        tm = _round_up(B, 8)
    b_pad = _round_up(B, tm)
    if b_pad != B:
        x_flat = jnp.pad(x_flat, ((0, b_pad - B), (0, 0)))

    grid = (b_pad // tm,)

    flops = 2 * b_pad * (K_IN * H1 + H1 * H2 + H2 * PAD_CLASSES)
    bytes_accessed = (
        x_flat.size * 2                                   # bf16 input
        + (w1.size + w2.size + w3p.size) * 2              # bf16 weights
        + (b1.size + b2.size + b3p.size) * 4              # f32 biases
        + b_pad * PAD_CLASSES * 4                         # f32 output
    )

    out = pl.pallas_call(
        mlp_cifar10_kernel,
        out_shape=jax.ShapeDtypeStruct((b_pad, PAD_CLASSES), jnp.float32),
        grid_spec=pltpu.PrefetchScalarGridSpec(
            num_scalar_prefetch=0,
            grid=grid,
            in_specs=[
                pl.BlockSpec((tm, K_IN), lambda m: (m, 0)),           # x tile
                pl.BlockSpec((K_IN, H1), lambda m: (0, 0)),           # w1 (resident)
                pl.BlockSpec((1, H1), lambda m: (0, 0)),              # b1 (resident)
                pl.BlockSpec((H1, H2), lambda m: (0, 0)),             # w2 (resident)
                pl.BlockSpec((1, H2), lambda m: (0, 0)),              # b2 (resident)
                pl.BlockSpec((H2, PAD_CLASSES), lambda m: (0, 0)),    # w3 padded (resident)
                pl.BlockSpec((1, PAD_CLASSES), lambda m: (0, 0)),     # b3 padded (resident)
            ],
            out_specs=pl.BlockSpec((tm, PAD_CLASSES), lambda m: (m, 0)),
        ),
        compiler_params=pltpu.CompilerParams(
            dimension_semantics=("parallel",),
            vmem_limit_bytes=32 << 20,   # fits all generations incl. v7x (64 MiB physical)
        ),
        cost_estimate=pl.CostEstimate(
            flops=flops,
            transcendentals=b_pad * PAD_CLASSES,          # exp in the softmax
            bytes_accessed=bytes_accessed,
        ),
    )(x_flat, w1, b1, w2, b2, w3p, b3p)

    return out[:B, :NUM_CLASSES]


def init_params(key):
    """PyTorch nn.Linear default init (uniform +/- 1/sqrt(fan_in)); weights (in, out) f32."""
    dims = [(K_IN, H1), (H1, H2), (H2, NUM_CLASSES)]
    params = []
    for i, (fan_in, fan_out) in enumerate(dims):
        kw, kb = jax.random.split(jax.random.fold_in(key, i))
        bound = 1.0 / (fan_in ** 0.5)
        w = jax.random.uniform(kw, (fan_in, fan_out), jnp.float32, -bound, bound)
        b = jax.random.uniform(kb, (1, fan_out), jnp.float32, -bound, bound)
        params.extend([w, b])
    return tuple(params)


def prepare_params(params):
    """Kernel-side layout: bf16 weights (halves weight HBM bytes), f32 biases,
    fc3 padded 10 -> 128 classes (zero weights, -1e30 bias for padded columns)."""
    w1, b1, w2, b2, w3, b3 = params
    w3p = jnp.zeros((H2, PAD_CLASSES), jnp.bfloat16)
    w3p = w3p.at[:, :NUM_CLASSES].set(w3.astype(jnp.bfloat16))
    b3p = jnp.full((1, PAD_CLASSES), NEG_INF, jnp.float32)
    b3p = b3p.at[:, :NUM_CLASSES].set(b3)
    return (w1.astype(jnp.bfloat16), b1, w2.astype(jnp.bfloat16), b2, w3p, b3p)


def reference_forward(x, prepared_params):
    """Pure-JAX reference mirroring the kernel's bf16 math (bf16 weights + activations,
    f32 accumulation)."""
    w1, b1, w2, b2, w3p, b3p = prepared_params
    xf = x.reshape(x.shape[0], K_IN).astype(jnp.bfloat16)
    h1 = jnp.maximum(
        jnp.dot(xf, w1, preferred_element_type=jnp.float32) + b1, 0.0)
    h2 = jnp.maximum(
        jnp.dot(h1.astype(jnp.bfloat16), w2, preferred_element_type=jnp.float32) + b2, 0.0)
    logits = jnp.dot(h2.astype(jnp.bfloat16), w3p[:, :NUM_CLASSES],
                     preferred_element_type=jnp.float32) + b3p[:, :NUM_CLASSES]
    return jax.nn.log_softmax(logits, axis=1)


if __name__ == "__main__":
    key = jax.random.PRNGKey(0)
    kx, kp = jax.random.split(key)

    batch = 8  # small batch; 3x32x32 input shape is fixed by the module
    x = jax.random.normal(kx, (batch, 3, 32, 32), dtype=jnp.float32)
    params = prepare_params(init_params(kp))

    out = jax.block_until_ready(mlp_cifar10_forward(x, params))
    ref = reference_forward(x, params)

    assert out.shape == (batch, NUM_CLASSES)
    assert jnp.allclose(out, ref, atol=2e-3, rtol=2e-3), float(jnp.max(jnp.abs(out - ref)))

    print("KERNEL_OK")
</pallas_src>

<mosaic_0001>
module attributes {stable_mosaic.version = 11 : i64} {
  func.func @mlp_cifar10_kernel(%arg0: i32, %arg1: memref<8x3072xbf16, #tpu.memory_space<vmem>>, %arg2: memref<3072x1024xbf16, #tpu.memory_space<vmem>>, %arg3: memref<1x1024xf32, #tpu.memory_space<vmem>>, %arg4: memref<1024x512xbf16, #tpu.memory_space<vmem>>, %arg5: memref<1x512xf32, #tpu.memory_space<vmem>>, %arg6: memref<512x128xbf16, #tpu.memory_space<vmem>>, %arg7: memref<1x128xf32, #tpu.memory_space<vmem>>, %arg8: memref<8x128xf32, #tpu.memory_space<vmem>>) attributes {dimension_semantics = [#tpu.dimension_semantics<parallel>], iteration_bounds = array<i64: 1>, scalar_prefetch = 0 : i64, scratch_operands = 0 : i64, tpu.core_type = #tpu.core_type<tc>, window_params = [{transform_indices = @transform_0, window_bounds = array<i64: 8, 3072>}, {pipeline_mode = #tpu.pipeline_mode<synchronous>, transform_indices = @transform_1, window_bounds = array<i64: 3072, 1024>}, {pipeline_mode = #tpu.pipeline_mode<synchronous>, transform_indices = @transform_2, window_bounds = array<i64: 1, 1024>}, {pipeline_mode = #tpu.pipeline_mode<synchronous>, transform_indices = @transform_3, window_bounds = array<i64: 1024, 512>}, {pipeline_mode = #tpu.pipeline_mode<synchronous>, transform_indices = @transform_4, window_bounds = array<i64: 1, 512>}, {pipeline_mode = #tpu.pipeline_mode<synchronous>, transform_indices = @transform_5, window_bounds = array<i64: 512, 128>}, {pipeline_mode = #tpu.pipeline_mode<synchronous>, transform_indices = @transform_6, window_bounds = array<i64: 1, 128>}, {transform_indices = @transform_7, window_bounds = array<i64: 8, 128>}]} {
    %c0 = arith.constant 0 : index
    %c0_0 = arith.constant 0 : index
    %0 = vector.load %arg1[%c0, %c0_0] : memref<8x3072xbf16, #tpu.memory_space<vmem>>, vector<8x3072xbf16>
    %c0_1 = arith.constant 0 : index
    %c0_2 = arith.constant 0 : index
    %1 = vector.load %arg2[%c0_1, %c0_2] : memref<3072x1024xbf16, #tpu.memory_space<vmem>>, vector<3072x1024xbf16>
    %cst = arith.constant dense<0.000000e+00> : vector<8x1024xf32>
    %2 = tpu.matmul %0, %1, %cst {dimension_numbers = #tpu.dot_dimension_numbers<[1], [0], [0], [1], [0, 0, 1, 1], [], []>} : vector<8x3072xbf16>, vector<3072x1024xbf16>, vector<8x1024xf32> -> vector<8x1024xf32>
    %c0_3 = arith.constant 0 : index
    %c0_4 = arith.constant 0 : index
    %3 = vector.load %arg3[%c0_3, %c0_4] : memref<1x1024xf32, #tpu.memory_space<vmem>>, vector<1x1024xf32>
    %4 = vector.broadcast %3 : vector<1x1024xf32> to vector<8x1024xf32>
    %5 = arith.addf %2, %4 : vector<8x1024xf32>
    %cst_5 = arith.constant 0.000000e+00 : f32
    %6 = vector.broadcast %cst_5 : f32 to vector<8x1024xf32>
    %7 = arith.maximumf %5, %6 : vector<8x1024xf32>
    %8 = arith.truncf %7 : vector<8x1024xf32> to vector<8x1024xbf16>
    %c0_6 = arith.constant 0 : index
    %c0_7 = arith.constant 0 : index
    %9 = vector.load %arg4[%c0_6, %c0_7] : memref<1024x512xbf16, #tpu.memory_space<vmem>>, vector<1024x512xbf16>
    %cst_8 = arith.constant dense<0.000000e+00> : vector<8x512xf32>
    %10 = tpu.matmul %8, %9, %cst_8 {dimension_numbers = #tpu.dot_dimension_numbers<[1], [0], [0], [1], [0, 0, 1, 1], [], []>} : vector<8x1024xbf16>, vector<1024x512xbf16>, vector<8x512xf32> -> vector<8x512xf32>
    %c0_9 = arith.constant 0 : index
    %c0_10 = arith.constant 0 : index
    %11 = vector.load %arg5[%c0_9, %c0_10] : memref<1x512xf32, #tpu.memory_space<vmem>>, vector<1x512xf32>
    %12 = vector.broadcast %11 : vector<1x512xf32> to vector<8x512xf32>
    %13 = arith.addf %10, %12 : vector<8x512xf32>
    %cst_11 = arith.constant 0.000000e+00 : f32
    %14 = vector.broadcast %cst_11 : f32 to vector<8x512xf32>
    %15 = arith.maximumf %13, %14 : vector<8x512xf32>
    %16 = arith.truncf %15 : vector<8x512xf32> to vector<8x512xbf16>
    %c0_12 = arith.constant 0 : index
    %c0_13 = arith.constant 0 : index
    %17 = vector.load %arg6[%c0_12, %c0_13] : memref<512x128xbf16, #tpu.memory_space<vmem>>, vector<512x128xbf16>
    %cst_14 = arith.constant dense<0.000000e+00> : vector<8x128xf32>
    %18 = tpu.matmul %16, %17, %cst_14 {dimension_numbers = #tpu.dot_dimension_numbers<[1], [0], [0], [1], [0, 0, 1, 1], [], []>} : vector<8x512xbf16>, vector<512x128xbf16>, vector<8x128xf32> -> vector<8x128xf32>
    %c0_15 = arith.constant 0 : index
    %c0_16 = arith.constant 0 : index
    %19 = vector.load %arg7[%c0_15, %c0_16] : memref<1x128xf32, #tpu.memory_space<vmem>>, vector<1x128xf32>
    %20 = vector.broadcast %19 : vector<1x128xf32> to vector<8x128xf32>
    %21 = arith.addf %18, %20 : vector<8x128xf32>
    %cst_17 = arith.constant dense<0xFF800000> : vector<8xf32>
    %22 = vector.multi_reduction <maximumf>, %21, %cst_17 [1] : vector<8x128xf32> to vector<8xf32>
    %23 = vector.shape_cast %22 : vector<8xf32> to vector<8x1xf32>
    %24 = vector.broadcast %23 : vector<8x1xf32> to vector<8x128xf32>
    %25 = arith.subf %21, %24 : vector<8x128xf32>
    %26 = math.exp %25 : vector<8x128xf32>
    %cst_18 = arith.constant dense<0.000000e+00> : vector<8xf32>
    %27 = vector.multi_reduction <add>, %26, %cst_18 [1] : vector<8x128xf32> to vector<8xf32>
    %28 = vector.shape_cast %27 : vector<8xf32> to vector<8x1xf32>
    %29 = math.log %28 : vector<8x1xf32>
    %30 = vector.broadcast %29 : vector<8x1xf32> to vector<8x128xf32>
    %31 = arith.subf %25, %30 : vector<8x128xf32>
    %c0_19 = arith.constant 0 : index
    %c0_20 = arith.constant 0 : index
    %32 = vector.load %arg8[%c0_19, %c0_20] : memref<8x128xf32, #tpu.memory_space<vmem>>, vector<8x128xf32>
    tpu.vector_store %arg8[%c0_19, %c0_20], %31 {strides = array<i32>} : memref<8x128xf32, #tpu.memory_space<vmem>>, vector<8x128xf32>,
    return
  }
  func.func @transform_0(%arg0: i32) -> (i32, i32) {
    %c0_i32 = arith.constant 0 : i32
    %c0_i32_0 = arith.constant 0 : i32
    return %arg0, %c0_i32 : i32, i32
  }
  func.func @transform_1(%arg0: i32) -> (i32, i32) {
    %c0_i32 = arith.constant 0 : i32
    %c0_i32_0 = arith.constant 0 : i32
    %c0_i32_1 = arith.constant 0 : i32
    return %c0_i32, %c0_i32_0 : i32, i32
  }
  func.func @transform_2(%arg0: i32) -> (i32, i32) {
    %c0_i32 = arith.constant 0 : i32
    %c0_i32_0 = arith.constant 0 : i32
    %c0_i32_1 = arith.constant 0 : i32
    return %c0_i32, %c0_i32_0 : i32, i32
  }
  func.func @transform_3(%arg0: i32) -> (i32, i32) {
    %c0_i32 = arith.constant 0 : i32
    %c0_i32_0 = arith.constant 0 : i32
    %c0_i32_1 = arith.constant 0 : i32
    return %c0_i32, %c0_i32_0 : i32, i32
  }
  func.func @transform_4(%arg0: i32) -> (i32, i32) {
    %c0_i32 = arith.constant 0 : i32
    %c0_i32_0 = arith.constant 0 : i32
    %c0_i32_1 = arith.constant 0 : i32
    return %c0_i32, %c0_i32_0 : i32, i32
  }
  func.func @transform_5(%arg0: i32) -> (i32, i32) {
    %c0_i32 = arith.constant 0 : i32
    %c0_i32_0 = arith.constant 0 : i32
    %c0_i32_1 = arith.constant 0 : i32
    return %c0_i32, %c0_i32_0 : i32, i32
  }
  func.func @transform_6(%arg0: i32) -> (i32, i32) {
    %c0_i32 = arith.constant 0 : i32
    %c0_i32_0 = arith.constant 0 : i32
    %c0_i32_1 = arith.constant 0 : i32
    return %c0_i32, %c0_i32_0 : i32, i32
  }
  func.func @transform_7(%arg0: i32) -> (i32, i32) {
    %c0_i32 = arith.constant 0 : i32
    %c0_i32_0 = arith.constant 0 : i32
    return %arg0, %c0_i32 : i32, i32
  }
}

</mosaic_0001>

<bundles_post_ra>
// kernel: tpu_custom_call.1
= control target key start
LH: loop header
LB: loop body
LE: loop exit
PB: predicated region body
PF: predicated region fallthrough
CT: control target
= control target key end

     0   :  { %12 = vsyncpa [#allocation3], 0  ;;  %s16748_s0 = inlined_call_operand.hbm [shape: bf16[8,3072], index: 0, kind: input, shape index: {}]   ;;  %s16749_s1 = inlined_call_operand.hbm [shape: bf16[3072,1024], index: 1, kind: input, shape index: {}]   ;;  %s16750_s2 = inlined_call_operand.hbm [shape: f32[1,1024], index: 2, kind: input, shape index: {}]   ;;  %s16751_s3 = inlined_call_operand.hbm [shape: bf16[1024,512], index: 3, kind: input, shape index: {}]   ;;  %s16752_s4 = inlined_call_operand.hbm [shape: f32[1,512], index: 4, kind: input, shape index: {}]   ;;  %s16753_s5 = inlined_call_operand.hbm [shape: bf16[512,128], index: 5, kind: input, shape index: {}]   ;;  %s16754_s6 = inlined_call_operand.hbm [shape: f32[1,128], index: 6, kind: input, shape index: {}]   ;;  %s16755_s7 = inlined_call_operand.hbm [shape: f32[8,128], index: 7, kind: output, shape index: {}]  }
   0x1   :  { %13 = vsyncpa [#allocation6], 0 }
   0x2   :  { %14 = vsyncpa [#allocation9], 0 }
   0x3   :  { %15 = vsyncpa [#allocation12], 0 }
   0x4   :  { %16 = vsyncpa [#allocation4], 0  ;;  %s16243_s24 = smov [#allocation5]  }
   0x5   :  { %s32_s25 = sshll.u32 %s16243_s24, 4  ;;  %s33_s25 = int_to_ptr.vmem [resolvable:$true] %s32_s25 }
   0x6   :  { %s16081_s26 = scalar_lea.vmem %s33_s25, 196608  ;;  %p16086_p1 = scmp.lt.s32.totalorder %s33_s25, %s33_s25 }
   0x7   :  { %p16082_p0 = scmp.ne.s32.totalorder %s33_s25, %s16081_s26  ;;  %p16087_p2 = scmp.lt.s32.totalorder %s16081_s26, %s16081_s26 }
   0x9   :  { %p16088_p3 = por %p16087_p2, %p16086_p1 }
   0xb   :  { %p16089_p4 = pnand %p16088_p3, %p16082_p0 }
   0xd   :  { %16092 = shalt.err (!%p16089_p4)
}
   0xe   :  { %s16244_s27 = smov 512   ;;  %s16245_s28 = smov 32  }
   0xf   :  { %38 = dma.hbm_to_vmem [thread:$0]  %s16749_s1, 196608, %s33_s25, [#allocation6], %s16244_s27, %s16244_s27, %s16245_s28  }
  0x10   :  { %s16246_s8 = smov [#allocation8]  }
  0x11   :  { %s54_s9 = sshll.u32 %s16246_s8, 4  ;;  %s55_s9 = int_to_ptr.vmem [resolvable:$true] %s54_s9 }
  0x12   :  { %s16101_s10 = scalar_lea.vmem %s55_s9, 32768  ;;  %p16106_p6 = scmp.lt.s32.totalorder %s55_s9, %s55_s9 }
  0x13   :  { %p16102_p5 = scmp.ne.s32.totalorder %s55_s9, %s16101_s10  ;;  %p16107_p7 = scmp.lt.s32.totalorder %s16101_s10, %s16101_s10 }
  0x15   :  { %p16108_p8 = por %p16107_p7, %p16106_p6 }
  0x17   :  { %p16109_p9 = pnand %p16108_p8, %p16102_p5 }
  0x19   :  { %16112 = shalt.err (!%p16109_p9)
}
  0x1a   :  { %s16247_s11 = smov 256   ;;  %s16248_s12 = smov 16  }
  0x1b   :  { %60 = dma.hbm_to_vmem [thread:$0]  %s16751_s3, 32768, %s55_s9, [#allocation9], %s16247_s11, %s16247_s11, %s16248_s12  }
  0x1c   :  { %s16249_s15 = smov [#allocation11]  }
  0x1d   :  { %s76_s16 = sshll.u32 %s16249_s15, 4  ;;  %s77_s16 = int_to_ptr.vmem [resolvable:$true] %s76_s16 }
  0x1e   :  { %s16121_s1 = scalar_lea.vmem %s77_s16, 4096  ;;  %p16126_p11 = scmp.lt.s32.totalorder %s77_s16, %s77_s16 }
  0x1f   :  { %p16122_p10 = scmp.ne.s32.totalorder %s77_s16, %s16121_s1  ;;  %p16127_p12 = scmp.lt.s32.totalorder %s16121_s1, %s16121_s1 }
  0x21   :  { %p16128_p13 = por %p16127_p12, %p16126_p11 }
  0x23   :  { %p16129_p0 = pnand %p16128_p13, %p16122_p10 }
  0x25   :  { %16132 = shalt.err (!%p16129_p0)
}
  0x26   :  { %s16250_s17 = smov 64   ;;  %s16251_s18 = smov 4  }
  0x27   :  { %82 = dma.hbm_to_vmem [thread:$0]  %s16753_s5, 4096, %s77_s16, [#allocation12], %s16250_s17, %s16250_s17, %s16251_s18  }
  0x28   :  { %s16252_s21 = smov [#allocation2]   ;;  %s16253_s3 = smov [#allocation7]  }
  0x29   :  { %s23_s22 = sshll.u32 %s16252_s21, 4  ;;  %s45_s23 = sshll.u32 %s16253_s3, 4  ;;  %s24_s22 = int_to_ptr.vmem [resolvable:$true] %s23_s22  ;;  %s46_s23 = int_to_ptr.vmem [resolvable:$true] %s45_s23 }
  0x2a   :  { %s16141_s24 = scalar_lea.vmem %s24_s22, 1536  ;;  %p16146_p2 = scmp.lt.s32.totalorder %s24_s22, %s24_s22 }
  0x2b   :  { %p16142_p1 = scmp.ne.s32.totalorder %s24_s22, %s16141_s24  ;;  %p16147_p3 = scmp.lt.s32.totalorder %s16141_s24, %s16141_s24 }
  0x2d   :  { %p16148_p4 = por %p16147_p3, %p16146_p2 }
  0x2f   :  { %p16149_p5 = pnand %p16148_p4, %p16142_p1 }
  0x31   :  { %16152 = shalt.err (!%p16149_p5)
}
  0x32   :  { %26 = dma.hbm_to_vmem [thread:$0]  %s16748_s0, 1536, %s24_s22, [#allocation3]  }
  0x33   :  { %s16161_s27 = scalar_lea.vmem %s46_s23, 128  ;;  %p16166_p7 = scmp.lt.s32.totalorder %s46_s23, %s46_s23 }
  0x34   :  { %p16162_p6 = scmp.ne.s32.totalorder %s46_s23, %s16161_s27  ;;  %p16167_p8 = scmp.lt.s32.totalorder %s16161_s27, %s16161_s27 }
  0x36   :  { %p16168_p9 = por %p16167_p8, %p16166_p7 }
  0x38   :  { %p16169_p10 = pnand %p16168_p9, %p16162_p6 }
  0x3a   :  { %16172 = shalt.err (!%p16169_p10)
}
  0x3b   :  { %48 = dma.hbm_to_vmem [thread:$0]  %s16750_s2, 128, %s46_s23, [#allocation6]  }
  0x3c   :  { %s16254_s29 = smov [#allocation10]   ;;  %s16255_s8 = smov [#allocation13]  }
  0x3d   :  { %s67_s30 = sshll.u32 %s16254_s29, 4  ;;  %s89_s9 = sshll.u32 %s16255_s8, 4  ;;  %s68_s30 = int_to_ptr.vmem [resolvable:$true] %s67_s30  ;;  %s90_s9 = int_to_ptr.vmem [resolvable:$true] %s89_s9 }
  0x3e   :  { %s16181_s10 = scalar_lea.vmem %s68_s30, 64  ;;  %p16186_p12 = scmp.lt.s32.totalorder %s68_s30, %s68_s30 }
  0x3f   :  { %p16182_p11 = scmp.ne.s32.totalorder %s68_s30, %s16181_s10  ;;  %p16187_p13 = scmp.lt.s32.totalorder %s16181_s10, %s16181_s10 }
  0x41   :  { %p16188_p0 = por %p16187_p13, %p16186_p12 }
  0x43   :  { %p16189_p1 = pnand %p16188_p0, %p16182_p11 }
  0x45   :  { %16192 = shalt.err (!%p16189_p1)
}
  0x46   :  { %70 = dma.hbm_to_vmem [thread:$0]  %s16752_s4, 64, %s68_s30, [#allocation9]  }
  0x47   :  { %s16201_s12 = scalar_lea.vmem %s90_s9, 16  ;;  %s16205_s2 = scalar_lea.vmem %s90_s9, 32 }
  0x48   :  { %p16202_p2 = scmp.ne.s32.totalorder %s90_s9, %s16201_s12  ;;  %p16206_p3 = scmp.lt.s32.totalorder %s90_s9, %s90_s9 }
  0x49   :  { %p16207_p4 = scmp.lt.s32.totalorder %s16205_s2, %s16201_s12 }
  0x4b   :  { %p16208_p5 = por %p16207_p4, %p16206_p3 }
  0x4d   :  { %p16209_p6 = pnand %p16208_p5, %p16202_p2 }
  0x4f   :  { %16212 = shalt.err (!%p16209_p6)
}
  0x50   :  { %92 = dma.hbm_to_vmem [thread:$0]  %s16754_s6, 16, %s90_s9, [#allocation12]  }
  0x51   :  { %16233 = dma.done.wait [#allocation3], 1536  }
  0x52   :  { %16234 = vsyncadd [#allocation3], 4294965760 }
  0x53   :  { %16235 = dma.done.wait [#allocation6], 196736  }
  0x54   :  { %16236 = vsyncadd [#allocation6], 4294770560 }
  0x55   :  { %16237 = dma.done.wait [#allocation9], 32832  }
  0x56   :  { %16238 = vsyncadd [#allocation9], 4294934464 }
  0x57   :  { %16239 = dma.done.wait [#allocation12], 4112  }
  0x58   :  { %16240 = vsyncadd [#allocation12], 4294963184  ;;  %v183_v0 = vld [vmem:[#allocation5 + $0x1c0] sm:$0xff]  ;;  %v16320_v54 = vld [vmem:[#allocation2 + $0x8] sm:$0xff]  ;;  %s16256_s4 = smov [#allocation14]  }
  0x59   :  { %v187_v1 = vld [vmem:[#allocation5 + $0x1e0] sm:$0xff]  ;;  %v16328_v59 = vcombine.high %v16320_v54, %v16320_v54  ;;  %s13707_s6 = sshll.u32 %s16256_s4, 4  ;;  %s13708_s6 = int_to_ptr.vmem [resolvable:$true] %s13707_s6 }
  0x5a   :  { %v311_v2 = vld [vmem:[#allocation5 + $0x5c0] sm:$0xff]  ;;  %v13800_v3 = vcombine.high %v183_v0, %v187_v1  ;;  %v13799_v5 = vcombine.low %v183_v0, %v187_v1  ;;  %s16213_s15 = scalar_lea.vmem %s13708_s6, 128  ;;  %p16218_p8 = scmp.lt.s32.totalorder %s13708_s6, %s13708_s6 }
  0x5b   :  { %v315_v4 = vld [vmem:[#allocation5 + $0x5e0] sm:$0xff]  ;;  %9542 = vmatprep.mubr.bf16.mxu1 %v16328_v59  ;;  %p16214_p7 = scmp.ne.s32.totalorder %s13708_s6, %s16213_s15  ;;  %p16219_p9 = scmp.lt.s32.totalorder %s16213_s15, %s16213_s15 }
  0x5c   :  { %v175_v6 = vld [vmem:[#allocation5 + $0x180] sm:$0xff]  ;;  %v13928_v8 = vcombine.high %v311_v2, %v315_v4  ;;  %v13927_v9 = vcombine.low %v311_v2, %v315_v4  ;;  %9469 = vmatprep.subr.bf16.mxu0 %v13800_v3 }
  0x5d   :  { %v179_v7 = vld [vmem:[#allocation5 + $0x1a0] sm:$0xff]  ;;  %9470 = vmatpush1.bf16.msra.mxu0 %v13799_v5  ;;  %p16220_p10 = por %p16219_p9, %p16218_p8 }
  0x5e   :  { %v13792_v10 = vcombine.high %v175_v6, %v179_v7  ;;  %v303_v11 = vld [vmem:[#allocation5 + $0x580] sm:$0xff]  ;;  %9510 = vmatprep.subr.bf16.mxu1 %v13928_v8  ;;  %v13791_v18 = vcombine.low %v175_v6, %v179_v7 }
  0x5f   :  { %v307_v12 = vld [vmem:[#allocation5 + $0x5a0] sm:$0xff]  ;;  %9511 = vmatpush1.bf16.msra.mxu1 %v13927_v9  ;;  %p16221_p11 = pnand %p16220_p10, %p16214_p7 }
  0x60   :  { %v167_v13 = vld [vmem:[#allocation5 + $0x140] sm:$0xff]  ;;  %v13920_v14 = vcombine.high %v303_v11, %v307_v12  ;;  %9471 = vmatprep.subr.bf16.mxu0 %v13792_v10  ;;  %v13919_v19 = vcombine.low %v303_v11, %v307_v12 }
  0x61   :  { %v171_v15 = vld [vmem:[#allocation5 + $0x160] sm:$0xff]  ;;  %9472 = vmatpush1.bf16.msra.mxu0 %v13791_v18 }
  0x62   :  { %v295_v16 = vld [vmem:[#allocation5 + $0x540] sm:$0xff]  ;;  %v13784_v20 = vcombine.high %v167_v13, %v171_v15  ;;  %9512 = vmatprep.subr.bf16.mxu1 %v13920_v14  ;;  %v13783_v26 = vcombine.low %v167_v13, %v171_v15 }
  0x63   :  { %v299_v17 = vld [vmem:[#allocation5 + $0x560] sm:$0xff]  ;;  %9513 = vmatpush1.bf16.msra.mxu1 %v13919_v19 }
  0x64   :  { %v13912_v21 = vcombine.high %v295_v16, %v299_v17  ;;  %v159_v22 = vld [vmem:[#allocation5 + $0x100] sm:$0xff]  ;;  %9473 = vmatprep.subr.bf16.mxu0 %v13784_v20  ;;  %v13911_v27 = vcombine.low %v295_v16, %v299_v17 }
  0x65   :  { %v163_v23 = vld [vmem:[#allocation5 + $0x120] sm:$0xff]  ;;  %9474 = vmatpush1.bf16.msra.mxu0 %v13783_v26 }
  0x66   :  { %v287_v24 = vld [vmem:[#allocation5 + $0x500] sm:$0xff]  ;;  %v13776_v28 = vcombine.high %v159_v22, %v163_v23  ;;  %9514 = vmatprep.subr.bf16.mxu1 %v13912_v21  ;;  %v13775_v34 = vcombine.low %v159_v22, %v163_v23 }
  0x67   :  { %v291_v25 = vld [vmem:[#allocation5 + $0x520] sm:$0xff]  ;;  %9515 = vmatpush1.bf16.msra.mxu1 %v13911_v27 }
  0x68   :  { %v13904_v29 = vcombine.high %v287_v24, %v291_v25  ;;  %v151_v30 = vld [vmem:[#allocation5 + $0xc0] sm:$0xff]  ;;  %9475 = vmatprep.subr.bf16.mxu0 %v13776_v28  ;;  %v13903_v35 = vcombine.low %v287_v24, %v291_v25 }
  0x69   :  { %v155_v31 = vld [vmem:[#allocation5 + $0xe0] sm:$0xff]  ;;  %9476 = vmatpush1.bf16.msra.mxu0 %v13775_v34 }
  0x6a   :  { %v279_v32 = vld [vmem:[#allocation5 + $0x4c0] sm:$0xff]  ;;  %v13768_v36 = vcombine.high %v151_v30, %v155_v31  ;;  %9516 = vmatprep.subr.bf16.mxu1 %v13904_v29  ;;  %v13767_v42 = vcombine.low %v151_v30, %v155_v31 }
  0x6b   :  { %v283_v33 = vld [vmem:[#allocation5 + $0x4e0] sm:$0xff]  ;;  %9517 = vmatpush1.bf16.msra.mxu1 %v13903_v35 }
  0x6c   :  { %v13896_v37 = vcombine.high %v279_v32, %v283_v33  ;;  %v143_v38 = vld [vmem:[#allocation5 + $0x80] sm:$0xff]  ;;  %9477 = vmatprep.subr.bf16.mxu0 %v13768_v36  ;;  %v13895_v43 = vcombine.low %v279_v32, %v283_v33 }
  0x6d   :  { %v147_v39 = vld [vmem:[#allocation5 + $0xa0] sm:$0xff]  ;;  %9478 = vmatpush1.bf16.msra.mxu0 %v13767_v42 }
  0x6e   :  { %v271_v40 = vld [vmem:[#allocation5 + $0x480] sm:$0xff]  ;;  %v13760_v44 = vcombine.high %v143_v38, %v147_v39  ;;  %9518 = vmatprep.subr.bf16.mxu1 %v13896_v37  ;;  %v13759_v50 = vcombine.low %v143_v38, %v147_v39 }
  0x6f   :  { %v275_v41 = vld [vmem:[#allocation5 + $0x4a0] sm:$0xff]  ;;  %9519 = vmatpush1.bf16.msra.mxu1 %v13895_v43 }
  0x70   :  { %v13888_v45 = vcombine.high %v271_v40, %v275_v41  ;;  %v135_v46 = vld [vmem:[#allocation5 + $0x40] sm:$0xff]  ;;  %9479 = vmatprep.subr.bf16.mxu0 %v13760_v44  ;;  %v13887_v51 = vcombine.low %v271_v40, %v275_v41 }
  0x71   :  { %v139_v47 = vld [vmem:[#allocation5 + $0x60] sm:$0xff]  ;;  %9480 = vmatpush1.bf16.msra.mxu0 %v13759_v50 }
  0x72   :  { %v263_v48 = vld [vmem:[#allocation5 + $0x440] sm:$0xff]  ;;  %v13752_v52 = vcombine.high %v135_v46, %v139_v47  ;;  %9520 = vmatprep.subr.bf16.mxu1 %v13888_v45  ;;  %v13751_v62 = vcombine.low %v135_v46, %v139_v47 }
  0x73   :  { %v267_v49 = vld [vmem:[#allocation5 + $0x460] sm:$0xff]  ;;  %9521 = vmatpush1.bf16.msra.mxu1 %v13887_v51 }
  0x74   :  { %v16318_v53 = vld [vmem:[#allocation2] sm:$0xff]  ;;  %v13880_v55 = vcombine.high %v263_v48, %v267_v49  ;;  %9481 = vmatprep.subr.bf16.mxu0 %v13752_v52  ;;  %v13879_v63 = vcombine.low %v263_v48, %v267_v49 }
  0x75   :  { %v127_v56 = vld [vmem:[#allocation5] sm:$0xff]  ;;  %v16324_v58 = vcombine.high %v16318_v53, %v16318_v53  ;;  %9482 = vmatpush1.bf16.msra.mxu0 %v13751_v62 }
  0x76   :  { %v131_v57 = vld [vmem:[#allocation5 + $0x20] sm:$0xff]  ;;  %9522 = vmatprep.subr.bf16.mxu1 %v13880_v55 }
  0x77   :  { %v255_v60 = vld [vmem:[#allocation5 + $0x400] sm:$0xff]  ;;  %9501 = vmatprep.mubr.bf16.mxu0 %v16324_v58  ;;  %v13744_v0 = vcombine.high %v127_v56, %v131_v57  ;;  %v13743_v6 = vcombine.low %v127_v56, %v131_v57  ;;  %9523 = vmatpush1.bf16.msra.mxu1 %v13879_v63 }
  0x78   :  { %v259_v61 = vld [vmem:[#allocation5 + $0x420] sm:$0xff] }
  0x79   :  { %v13872_v1 = vcombine.high %v255_v60, %v259_v61  ;;  %v247_v2 = vld [vmem:[#allocation5 + $0x3c0] sm:$0xff]  ;;  %9483 = vmatprep.subr.bf16.mxu0 %v13744_v0  ;;  %v13871_v7 = vcombine.low %v255_v60, %v259_v61 }
  0x7a   :  { %v251_v3 = vld [vmem:[#allocation5 + $0x3e0] sm:$0xff]  ;;  %9484 = vmatpush1.bf16.msra.mxu0 %v13743_v6 }
  0x7b   :  { %v375_v4 = vld [vmem:[#allocation5 + $0x7c0] sm:$0xff]  ;;  %v13864_v8 = vcombine.high %v247_v2, %v251_v3  ;;  %9524 = vmatprep.subr.bf16.mxu1 %v13872_v1  ;;  %v13863_v14 = vcombine.low %v247_v2, %v251_v3 }
  0x7c   :  { %v379_v5 = vld [vmem:[#allocation5 + $0x7e0] sm:$0xff]  ;;  %9525 = vmatpush1.bf16.msra.mxu1 %v13871_v7 }
  0x7d   :  { %v13992_v9 = vcombine.high %v375_v4, %v379_v5  ;;  %v239_v10 = vld [vmem:[#allocation5 + $0x380] sm:$0xff]  ;;  %9485 = vmatprep.subr.bf16.mxu0 %v13864_v8  ;;  %v13991_v15 = vcombine.low %v375_v4, %v379_v5 }
  0x7e   :  { %v243_v11 = vld [vmem:[#allocation5 + $0x3a0] sm:$0xff]  ;;  %9486 = vmatpush2.bf16.msra.mxu0 %v13863_v14 }
  0x7f   :  { %v367_v12 = vld [vmem:[#allocation5 + $0x780] sm:$0xff]  ;;  %v13856_v16 = vcombine.high %v239_v10, %v243_v11  ;;  %9526 = vmatprep.subr.bf16.mxu1 %v13992_v9  ;;  %v13855_v22 = vcombine.low %v239_v10, %v243_v11 }
  0x80   :  { %v371_v13 = vld [vmem:[#allocation5 + $0x7a0] sm:$0xff]  ;;  %9527 = vmatpush2.bf16.msra.mxu1 %v13991_v15 }
  0x81   :  { %v13984_v17 = vcombine.high %v367_v12, %v371_v13  ;;  %v231_v18 = vld [vmem:[#allocation5 + $0x340] sm:$0xff]  ;;  %9487 = vmatprep.subr.bf16.mxu0 %v13856_v16  ;;  %v13983_v23 = vcombine.low %v367_v12, %v371_v13  ;;  %v16334_v16 = vcombine.low %v16318_v53, %v16318_v53 }
  0x82   :  { %v235_v19 = vld [vmem:[#allocation5 + $0x360] sm:$0xff]  ;;  %9488 = vmatpush2.bf16.msra.mxu0 %v13855_v22  ;;  %v16342_v22 = vld [vmem:[#allocation2 + $0x18] sm:$0xff] }
  0x83   :  { %v359_v20 = vld [vmem:[#allocation5 + $0x740] sm:$0xff]  ;;  %v13848_v24 = vcombine.high %v231_v18, %v235_v19  ;;  %9528 = vmatprep.subr.bf16.mxu1 %v13984_v17  ;;  %v13847_v30 = vcombine.low %v231_v18, %v235_v19  ;;  %v16336_v19 = vld [vmem:[#allocation2 + $0x10] sm:$0xff] }
  0x84   :  { %v363_v21 = vld [vmem:[#allocation5 + $0x760] sm:$0xff]  ;;  %9529 = vmatpush2.bf16.msra.mxu1 %v13983_v23 }
  0x85   :  { %v13976_v25 = vcombine.high %v359_v20, %v363_v21  ;;  %v223_v26 = vld [vmem:[#allocation5 + $0x300] sm:$0xff]  ;;  %9489 = vmatprep.subr.bf16.mxu0 %v13848_v24  ;;  %v13975_v31 = vcombine.low %v359_v20, %v363_v21  ;;  %v16340_v20 = vcombine.low %v16320_v54, %v16320_v54 }
  0x86   :  { %v227_v27 = vld [vmem:[#allocation5 + $0x320] sm:$0xff]  ;;  %9490 = vmatpush2.bf16.msra.mxu0 %v13847_v30 }
  0x87   :  { %v351_v28 = vld [vmem:[#allocation5 + $0x700] sm:$0xff]  ;;  %v13840_v32 = vcombine.high %v223_v26, %v227_v27  ;;  %9530 = vmatprep.subr.bf16.mxu1 %v13976_v25  ;;  %v13839_v38 = vcombine.low %v223_v26, %v227_v27 }
  0x88   :  { %v355_v29 = vld [vmem:[#allocation5 + $0x720] sm:$0xff]  ;;  %9531 = vmatpush2.bf16.msra.mxu1 %v13975_v31 }
  0x89   :  { %v13968_v33 = vcombine.high %v351_v28, %v355_v29  ;;  %v215_v34 = vld [vmem:[#allocation5 + $0x2c0] sm:$0xff]  ;;  %9491 = vmatprep.subr.bf16.mxu0 %v13840_v32  ;;  %v13967_v39 = vcombine.low %v351_v28, %v355_v29  ;;  %v16346_v28 = vcombine.high %v16336_v19, %v16336_v19  ;;  %v16351_v29 = vcombine.high %v16342_v22, %v16342_v22 }
  0x8a   :  { %v219_v35 = vld [vmem:[#allocation5 + $0x2e0] sm:$0xff]  ;;  %9492 = vmatpush2.bf16.msra.mxu0 %v13839_v38 }
  0x8b   :  { %v343_v36 = vld [vmem:[#allocation5 + $0x6c0] sm:$0xff]  ;;  %v13832_v40 = vcombine.high %v215_v34, %v219_v35  ;;  %9532 = vmatprep.subr.bf16.mxu1 %v13968_v33  ;;  %v13831_v46 = vcombine.low %v215_v34, %v219_v35 }
  0x8c   :  { %v347_v37 = vld [vmem:[#allocation5 + $0x6e0] sm:$0xff]  ;;  %9533 = vmatpush2.bf16.msra.mxu1 %v13967_v39 }
  0x8d   :  { %v13960_v41 = vcombine.high %v343_v36, %v347_v37  ;;  %v207_v42 = vld [vmem:[#allocation5 + $0x280] sm:$0xff]  ;;  %9493 = vmatprep.subr.bf16.mxu0 %v13832_v40  ;;  %v13959_v47 = vcombine.low %v343_v36, %v347_v37 }
  0x8e   :  { %v211_v43 = vld [vmem:[#allocation5 + $0x2a0] sm:$0xff]  ;;  %9494 = vmatpush2.bf16.msra.mxu0 %v13831_v46 }
  0x8f   :  { %v335_v44 = vld [vmem:[#allocation5 + $0x680] sm:$0xff]  ;;  %v13824_v48 = vcombine.high %v207_v42, %v211_v43  ;;  %9534 = vmatprep.subr.bf16.mxu1 %v13960_v41  ;;  %v13823_v56 = vcombine.low %v207_v42, %v211_v43 }
  0x90   :  { %v339_v45 = vld [vmem:[#allocation5 + $0x6a0] sm:$0xff]  ;;  %9535 = vmatpush2.bf16.msra.mxu1 %v13959_v47 }
  0x91   :  { %v13952_v49 = vcombine.high %v335_v44, %v339_v45  ;;  %v199_v50 = vld [vmem:[#allocation5 + $0x240] sm:$0xff]  ;;  %9495 = vmatprep.subr.bf16.mxu0 %v13824_v48  ;;  %v13951_v57 = vcombine.low %v335_v44, %v339_v45 }
  0x92   :  { %v203_v51 = vld [vmem:[#allocation5 + $0x260] sm:$0xff]  ;;  %9496 = vmatpush2.bf16.msra.mxu0 %v13823_v56 }
  0x93   :  { %v327_v52 = vld [vmem:[#allocation5 + $0x640] sm:$0xff]  ;;  %v13816_v60 = vcombine.high %v199_v50, %v203_v51  ;;  %9536 = vmatprep.subr.bf16.mxu1 %v13952_v49  ;;  %v13815_v2 = vcombine.low %v199_v50, %v203_v51 }
  0x94   :  { %v331_v55 = vld [vmem:[#allocation5 + $0x660] sm:$0xff]  ;;  %9537 = vmatpush2.bf16.msra.mxu1 %v13951_v57 }
  0x95   :  { %v13944_v61 = vcombine.high %v327_v52, %v331_v55  ;;  %v191_v62 = vld [vmem:[#allocation5 + $0x200] sm:$0xff]  ;;  %9497 = vmatprep.subr.bf16.mxu0 %v13816_v60  ;;  %v13943_v3 = vcombine.low %v327_v52, %v331_v55 }
  0x96   :  { %v195_v63 = vld [vmem:[#allocation5 + $0x220] sm:$0xff]  ;;  %9498 = vmatpush2.bf16.msra.mxu0 %v13815_v2 }
  0x97   :  { %v319_v0 = vld [vmem:[#allocation5 + $0x600] sm:$0xff]  ;;  %v13808_v4 = vcombine.high %v191_v62, %v195_v63  ;;  %9538 = vmatprep.subr.bf16.mxu1 %v13944_v61  ;;  %v13807_v10 = vcombine.low %v191_v62, %v195_v63 }
  0x98   :  { %v323_v1 = vld [vmem:[#allocation5 + $0x620] sm:$0xff]  ;;  %9539 = vmatpush2.bf16.msra.mxu1 %v13943_v3 }
  0x99   :  { %v13936_v5 = vcombine.high %v319_v0, %v323_v1  ;;  %v439_v6 = vld [vmem:[#allocation5 + $0x9c0] sm:$0xff]  ;;  %9499 = vmatprep.subr.bf16.mxu0 %v13808_v4  ;;  %v13935_v11 = vcombine.low %v319_v0, %v323_v1 }
  0x9a   :  { %v443_v7 = vld [vmem:[#allocation5 + $0x9e0] sm:$0xff]  ;;  %9500 = vmatpush2.bf16.msra.mxu0 %v13807_v10 }
  0x9b   :  { %v567_v8 = vld [vmem:[#allocation5 + $0xdc0] sm:$0xff]  ;;  %v14056_v12 = vcombine.high %v439_v6, %v443_v7  ;;  %9540 = vmatprep.subr.bf16.mxu1 %v13936_v5  ;;  %v14055_v21 = vcombine.low %v439_v6, %v443_v7 }
  0x9c   :  { %v571_v9 = vld [vmem:[#allocation5 + $0xde0] sm:$0xff]  ;;  %9541 = vmatpush2.bf16.msra.mxu1 %v13935_v11 }
  0x9d   :  { %v14184_v13 = vcombine.high %v567_v8, %v571_v9  ;;  %v431_v14 = vld [vmem:[#allocation5 + $0x980] sm:$0xff]  ;;  %9551 = vmatprep.subr.bf16.mxu0 %v14056_v12  ;;  %v14183_v23 = vcombine.low %v567_v8, %v571_v9  ;;  %9502 = vmatmul.mubr.bf16.vlgmr.msra.gmra.mxu0 %v16334_v16 }
  0x9e   :  { %v435_v15 = vld [vmem:[#allocation5 + $0x9a0] sm:$0xff]  ;;  %9552 = vmatpush1.bf16.msra.mxu0 %v14055_v21  ;;  %9583 = vmatprep.mubr.bf16.mxu0 %v16346_v28 }
  0x9f   :  { %v559_v17 = vld [vmem:[#allocation5 + $0xd80] sm:$0xff]  ;;  %v14048_v24 = vcombine.high %v431_v14, %v435_v15  ;;  %9592 = vmatprep.subr.bf16.mxu1 %v14184_v13  ;;  %9543 = vmatmul.mubr.bf16.vlgmr.msra.gmra.mxu1 %v16340_v20  ;;  %v14047_v30 = vcombine.low %v431_v14, %v435_v15 }
  0xa0   :  { %v563_v18 = vld [vmem:[#allocation5 + $0xda0] sm:$0xff]  ;;  %9593 = vmatpush1.bf16.msra.mxu1 %v14183_v23  ;;  %9624 = vmatprep.mubr.bf16.mxu1 %v16351_v29 }
  0xa1   :  { %v14176_v25 = vcombine.high %v559_v17, %v563_v18  ;;  %v423_v53 = vld [vmem:[#allocation5 + $0x940] sm:$0xff]  ;;  %9553 = vmatprep.subr.bf16.mxu0 %v14048_v24  ;;  %v14175_v31 = vcombine.low %v559_v17, %v563_v18 }
  0xa2   :  { %v427_v26 = vld [vmem:[#allocation5 + $0x960] sm:$0xff]  ;;  %9554 = vmatpush1.bf16.msra.mxu0 %v14047_v30 }
  0xa3   :  { %v551_v27 = vld [vmem:[#allocation5 + $0xd40] sm:$0xff]  ;;  %v14040_v32 = vcombine.high %v423_v53, %v427_v26  ;;  %9594 = vmatprep.subr.bf16.mxu1 %v14176_v25  ;;  %v14039_v38 = vcombine.low %v423_v53, %v427_v26 }
  0xa4   :  { %v555_v54 = vld [vmem:[#allocation5 + $0xd60] sm:$0xff]  ;;  %9595 = vmatpush1.bf16.msra.mxu1 %v14175_v31 }
  0xa5   :  { %v415_v33 = vld [vmem:[#allocation5 + $0x900] sm:$0xff]  ;;  %v14168_v36 = vcombine.high %v551_v27, %v555_v54  ;;  %9555 = vmatprep.subr.bf16.mxu0 %v14040_v32  ;;  %v14167_v39 = vcombine.low %v551_v27, %v555_v54 }
  0xa6   :  { %v419_v34 = vld [vmem:[#allocation5 + $0x920] sm:$0xff]  ;;  %9556 = vmatpush1.bf16.msra.mxu0 %v14039_v38 }
  0xa7   :  { %v543_v35 = vld [vmem:[#allocation5 + $0xd00] sm:$0xff]  ;;  %v14032_v40 = vcombine.high %v415_v33, %v419_v34  ;;  %9596 = vmatprep.subr.bf16.mxu1 %v14168_v36  ;;  %v14031_v46 = vcombine.low %v415_v33, %v419_v34 }
  0xa8   :  { %v547_v37 = vld [vmem:[#allocation5 + $0xd20] sm:$0xff]  ;;  %9597 = vmatpush1.bf16.msra.mxu1 %v14167_v39 }
  0xa9   :  { %v407_v41 = vld [vmem:[#allocation5 + $0x8c0] sm:$0xff]  ;;  %v14160_v44 = vcombine.high %v543_v35, %v547_v37  ;;  %9557 = vmatprep.subr.bf16.mxu0 %v14032_v40  ;;  %v14159_v47 = vcombine.low %v543_v35, %v547_v37 }
  0xaa   :  { %v411_v42 = vld [vmem:[#allocation5 + $0x8e0] sm:$0xff]  ;;  %9558 = vmatpush1.bf16.msra.mxu0 %v14031_v46 }
  0xab   :  { %v535_v43 = vld [vmem:[#allocation5 + $0xcc0] sm:$0xff]  ;;  %v14024_v48 = vcombine.high %v407_v41, %v411_v42  ;;  %9598 = vmatprep.subr.bf16.mxu1 %v14160_v44  ;;  %v14023_v56 = vcombine.low %v407_v41, %v411_v42 }
  0xac   :  { %v539_v45 = vld [vmem:[#allocation5 + $0xce0] sm:$0xff]  ;;  %9599 = vmatpush1.bf16.msra.mxu1 %v14159_v47 }
  0xad   :  { %v399_v49 = vld [vmem:[#allocation5 + $0x880] sm:$0xff]  ;;  %v14152_v52 = vcombine.high %v535_v43, %v539_v45  ;;  %9559 = vmatprep.subr.bf16.mxu0 %v14024_v48  ;;  %v14151_v57 = vcombine.low %v535_v43, %v539_v45 }
  0xae   :  { %v403_v50 = vld [vmem:[#allocation5 + $0x8a0] sm:$0xff]  ;;  %9560 = vmatpush1.bf16.msra.mxu0 %v14023_v56 }
  0xaf   :  { %v527_v51 = vld [vmem:[#allocation5 + $0xc80] sm:$0xff]  ;;  %v14016_v60 = vcombine.high %v399_v49, %v403_v50  ;;  %9600 = vmatprep.subr.bf16.mxu1 %v14152_v52  ;;  %v14015_v2 = vcombine.low %v399_v49, %v403_v50 }
  0xb0   :  { %v531_v55 = vld [vmem:[#allocation5 + $0xca0] sm:$0xff]  ;;  %9601 = vmatpush1.bf16.msra.mxu1 %v14151_v57 }
  0xb1   :  { %v391_v61 = vld [vmem:[#allocation5 + $0x840] sm:$0xff]  ;;  %v14144_v0 = vcombine.high %v527_v51, %v531_v55  ;;  %9561 = vmatprep.subr.bf16.mxu0 %v14016_v60  ;;  %v14143_v3 = vcombine.low %v527_v51, %v531_v55 }
  0xb2   :  { %v395_v62 = vld [vmem:[#allocation5 + $0x860] sm:$0xff]  ;;  %9562 = vmatpush1.bf16.msra.mxu0 %v14015_v2 }
  0xb3   :  { %v519_v63 = vld [vmem:[#allocation5 + $0xc40] sm:$0xff]  ;;  %v14008_v4 = vcombine.high %v391_v61, %v395_v62  ;;  %9602 = vmatprep.subr.bf16.mxu1 %v14144_v0  ;;  %v14007_v10 = vcombine.low %v391_v61, %v395_v62 }
  0xb4   :  { %v523_v1 = vld [vmem:[#allocation5 + $0xc60] sm:$0xff]  ;;  %9603 = vmatpush1.bf16.msra.mxu1 %v14143_v3 }
  0xb5   :  { %v383_v5 = vld [vmem:[#allocation5 + $0x800] sm:$0xff]  ;;  %v14136_v8 = vcombine.high %v519_v63, %v523_v1  ;;  %9563 = vmatprep.subr.bf16.mxu0 %v14008_v4  ;;  %v14135_v11 = vcombine.low %v519_v63, %v523_v1 }
  0xb6   :  { %v387_v6 = vld [vmem:[#allocation5 + $0x820] sm:$0xff]  ;;  %9564 = vmatpush1.bf16.msra.mxu0 %v14007_v10 }
  0xb7   :  { %v511_v7 = vld [vmem:[#allocation5 + $0xc00] sm:$0xff]  ;;  %v14000_v12 = vcombine.high %v383_v5, %v387_v6  ;;  %9604 = vmatprep.subr.bf16.mxu1 %v14136_v8  ;;  %v13999_v21 = vcombine.low %v383_v5, %v387_v6 }
  0xb8   :  { %v515_v9 = vld [vmem:[#allocation5 + $0xc20] sm:$0xff]  ;;  %9605 = vmatpush1.bf16.msra.mxu1 %v14135_v11 }
  0xb9   :  { %v503_v13 = vld [vmem:[#allocation5 + $0xbc0] sm:$0xff]  ;;  %v14128_v17 = vcombine.high %v511_v7, %v515_v9  ;;  %9565 = vmatprep.subr.bf16.mxu0 %v14000_v12  ;;  %v14127_v23 = vcombine.low %v511_v7, %v515_v9 }
  0xba   :  { %v507_v14 = vld [vmem:[#allocation5 + $0xbe0] sm:$0xff]  ;;  %9566 = vmatpush1.bf16.msra.mxu0 %v13999_v21 }
  0xbb   :  { %v631_v15 = vld [vmem:[#allocation5 + $0xfc0] sm:$0xff]  ;;  %v14120_v24 = vcombine.high %v503_v13, %v507_v14  ;;  %9606 = vmatprep.subr.bf16.mxu1 %v14128_v17  ;;  %v14119_v30 = vcombine.low %v503_v13, %v507_v14 }
  0xbc   :  { %v635_v18 = vld [vmem:[#allocation5 + $0xfe0] sm:$0xff]  ;;  %9607 = vmatpush1.bf16.msra.mxu1 %v14127_v23 }
  0xbd   :  { %v495_v25 = vld [vmem:[#allocation5 + $0xb80] sm:$0xff]  ;;  %v14248_v27 = vcombine.high %v631_v15, %v635_v18  ;;  %9567 = vmatprep.subr.bf16.mxu0 %v14120_v24  ;;  %v14247_v31 = vcombine.low %v631_v15, %v635_v18 }
  0xbe   :  { %v499_v53 = vld [vmem:[#allocation5 + $0xba0] sm:$0xff]  ;;  %9568 = vmatpush2.bf16.msra.mxu0 %v14119_v30 }
  0xbf   :  { %v623_v26 = vld [vmem:[#allocation5 + $0xf80] sm:$0xff]  ;;  %v14112_v32 = vcombine.high %v495_v25, %v499_v53  ;;  %9608 = vmatprep.subr.bf16.mxu1 %v14248_v27  ;;  %v14111_v38 = vcombine.low %v495_v25, %v499_v53 }
  0xc0   :  { %v627_v54 = vld [vmem:[#allocation5 + $0xfa0] sm:$0xff]  ;;  %9609 = vmatpush2.bf16.msra.mxu1 %v14247_v31 }
  0xc1   :  { %v487_v33 = vld [vmem:[#allocation5 + $0xb40] sm:$0xff]  ;;  %v14240_v36 = vcombine.high %v623_v26, %v627_v54  ;;  %9569 = vmatprep.subr.bf16.mxu0 %v14112_v32  ;;  %v14239_v39 = vcombine.low %v623_v26, %v627_v54 }
  0xc2   :  { %v491_v34 = vld [vmem:[#allocation5 + $0xb60] sm:$0xff]  ;;  %9570 = vmatpush2.bf16.msra.mxu0 %v14111_v38 }
  0xc3   :  { %v615_v35 = vld [vmem:[#allocation5 + $0xf40] sm:$0xff]  ;;  %v14104_v40 = vcombine.high %v487_v33, %v491_v34  ;;  %9610 = vmatprep.subr.bf16.mxu1 %v14240_v36  ;;  %v14103_v46 = vcombine.low %v487_v33, %v491_v34 }
  0xc4   :  { %v619_v37 = vld [vmem:[#allocation5 + $0xf60] sm:$0xff]  ;;  %9611 = vmatpush2.bf16.msra.mxu1 %v14239_v39  ;;  %v16360_v39 = vcombine.low %v16336_v19, %v16336_v19 }
  0xc5   :  { %v479_v41 = vld [vmem:[#allocation5 + $0xb00] sm:$0xff]  ;;  %v14232_v44 = vcombine.high %v615_v35, %v619_v37  ;;  %9571 = vmatprep.subr.bf16.mxu0 %v14104_v40  ;;  %v14231_v47 = vcombine.low %v615_v35, %v619_v37  ;;  %v16364_v40 = vcombine.low %v16342_v22, %v16342_v22 }
  0xc6   :  { %v483_v42 = vld [vmem:[#allocation5 + $0xb20] sm:$0xff]  ;;  %9572 = vmatpush2.bf16.msra.mxu0 %v14103_v46 }
  0xc7   :  { %v607_v43 = vld [vmem:[#allocation5 + $0xf00] sm:$0xff]  ;;  %v14096_v48 = vcombine.high %v479_v41, %v483_v42  ;;  %9612 = vmatprep.subr.bf16.mxu1 %v14232_v44  ;;  %v14095_v56 = vcombine.low %v479_v41, %v483_v42  ;;  %v16366_v42 = vld [vmem:[#allocation2 + $0x28] sm:$0xff] }
  0xc8   :  { %v611_v45 = vld [vmem:[#allocation5 + $0xf20] sm:$0xff]  ;;  %9613 = vmatpush2.bf16.msra.mxu1 %v14231_v47  ;;  %v16375_v22 = vcombine.high %v16366_v42, %v16366_v42 }
  0xc9   :  { %v471_v49 = vld [vmem:[#allocation5 + $0xac0] sm:$0xff]  ;;  %v14224_v52 = vcombine.high %v607_v43, %v611_v45  ;;  %9573 = vmatprep.subr.bf16.mxu0 %v14096_v48  ;;  %v14223_v57 = vcombine.low %v607_v43, %v611_v45 }
  0xca   :  { %v475_v50 = vld [vmem:[#allocation5 + $0xae0] sm:$0xff]  ;;  %9574 = vmatpush2.bf16.msra.mxu0 %v14095_v56 }
  0xcb   :  { %v599_v51 = vld [vmem:[#allocation5 + $0xec0] sm:$0xff]  ;;  %v14088_v60 = vcombine.high %v471_v49, %v475_v50  ;;  %9614 = vmatprep.subr.bf16.mxu1 %v14224_v52  ;;  %v14087_v2 = vcombine.low %v471_v49, %v475_v50 }
  0xcc   :  { %v603_v55 = vld [vmem:[#allocation5 + $0xee0] sm:$0xff]  ;;  %9615 = vmatpush2.bf16.msra.mxu1 %v14223_v57 }
  0xcd   :  { %v463_v61 = vld [vmem:[#allocation5 + $0xa80] sm:$0xff]  ;;  %v14216_v0 = vcombine.high %v599_v51, %v603_v55  ;;  %9575 = vmatprep.subr.bf16.mxu0 %v14088_v60  ;;  %v14215_v3 = vcombine.low %v599_v51, %v603_v55 }
  0xce   :  { %v467_v62 = vld [vmem:[#allocation5 + $0xaa0] sm:$0xff]  ;;  %9576 = vmatpush2.bf16.msra.mxu0 %v14087_v2 }
  0xcf   :  { %v591_v63 = vld [vmem:[#allocation5 + $0xe80] sm:$0xff]  ;;  %v14080_v4 = vcombine.high %v463_v61, %v467_v62  ;;  %9616 = vmatprep.subr.bf16.mxu1 %v14216_v0  ;;  %v14079_v10 = vcombine.low %v463_v61, %v467_v62 }
  0xd0   :  { %v595_v1 = vld [vmem:[#allocation5 + $0xea0] sm:$0xff]  ;;  %9617 = vmatpush2.bf16.msra.mxu1 %v14215_v3 }
  0xd1   :  { %v455_v5 = vld [vmem:[#allocation5 + $0xa40] sm:$0xff]  ;;  %v14208_v8 = vcombine.high %v591_v63, %v595_v1  ;;  %9577 = vmatprep.subr.bf16.mxu0 %v14080_v4  ;;  %v14207_v11 = vcombine.low %v591_v63, %v595_v1 }
  0xd2   :  { %v459_v6 = vld [vmem:[#allocation5 + $0xa60] sm:$0xff]  ;;  %9578 = vmatpush2.bf16.msra.mxu0 %v14079_v10 }
  0xd3   :  { %v583_v7 = vld [vmem:[#allocation5 + $0xe40] sm:$0xff]  ;;  %v14072_v12 = vcombine.high %v455_v5, %v459_v6  ;;  %9618 = vmatprep.subr.bf16.mxu1 %v14208_v8  ;;  %v14071_v21 = vcombine.low %v455_v5, %v459_v6 }
  0xd4   :  { %v587_v9 = vld [vmem:[#allocation5 + $0xe60] sm:$0xff]  ;;  %9619 = vmatpush2.bf16.msra.mxu1 %v14207_v11 }
  0xd5   :  { %v447_v13 = vld [vmem:[#allocation5 + $0xa00] sm:$0xff]  ;;  %v14200_v17 = vcombine.high %v583_v7, %v587_v9  ;;  %9579 = vmatprep.subr.bf16.mxu0 %v14072_v12  ;;  %v14199_v23 = vcombine.low %v583_v7, %v587_v9 }
  0xd6   :  { %v451_v14 = vld [vmem:[#allocation5 + $0xa20] sm:$0xff]  ;;  %9580 = vmatpush2.bf16.msra.mxu0 %v14071_v21 }
  0xd7   :  { %v575_v15 = vld [vmem:[#allocation5 + $0xe00] sm:$0xff]  ;;  %v14064_v24 = vcombine.high %v447_v13, %v451_v14  ;;  %9620 = vmatprep.subr.bf16.mxu1 %v14200_v17  ;;  %v14063_v30 = vcombine.low %v447_v13, %v451_v14 }
  0xd8   :  { %v579_v18 = vld [vmem:[#allocation5 + $0xe20] sm:$0xff]  ;;  %9621 = vmatpush2.bf16.msra.mxu1 %v14199_v23 }
  0xd9   :  { %v695_v25 = vld [vmem:[#allocation5 + $0x11c0] sm:$0xff]  ;;  %v14192_v27 = vcombine.high %v575_v15, %v579_v18  ;;  %9581 = vmatprep.subr.bf16.mxu0 %v14064_v24  ;;  %v14191_v32 = vcombine.low %v575_v15, %v579_v18 }
  0xda   :  { %v699_v53 = vld [vmem:[#allocation5 + $0x11e0] sm:$0xff]  ;;  %9582 = vmatpush2.bf16.msra.mxu0 %v14063_v30 }
  0xdb   :  { %v823_v26 = vld [vmem:[#allocation5 + $0x15c0] sm:$0xff]  ;;  %v14312_v33 = vcombine.high %v695_v25, %v699_v53  ;;  %9622 = vmatprep.subr.bf16.mxu1 %v14192_v27  ;;  %v14311_v41 = vcombine.low %v695_v25, %v699_v53 }
  0xdc   :  { %v827_v54 = vld [vmem:[#allocation5 + $0x15e0] sm:$0xff]  ;;  %9623 = vmatpush2.bf16.msra.mxu1 %v14191_v32 }
  0xdd   :  { %v687_v31 = vld [vmem:[#allocation5 + $0x1180] sm:$0xff]  ;;  %v14440_v37 = vcombine.high %v823_v26, %v827_v54  ;;  %9633 = vmatprep.subr.bf16.mxu0 %v14312_v33  ;;  %v14439_v43 = vcombine.low %v823_v26, %v827_v54  ;;  %9584 = vmatmul.mubr.bf16.vlgmr.msra.gmra.mxu0 %v16360_v39 }
  0xde   :  { %v691_v34 = vld [vmem:[#allocation5 + $0x11a0] sm:$0xff]  ;;  %9634 = vmatpush1.bf16.msra.mxu0 %v14311_v41 }
  0xdf   :  { %v815_v35 = vld [vmem:[#allocation5 + $0x1580] sm:$0xff]  ;;  %v14304_v44 = vcombine.high %v687_v31, %v691_v34  ;;  %9674 = vmatprep.subr.bf16.mxu1 %v14440_v37  ;;  %9625 = vmatmul.mubr.bf16.vlgmr.msra.gmra.mxu1 %v16364_v40  ;;  %v14303_v50 = vcombine.low %v687_v31, %v691_v34 }
  0xe0   :  { %v819_v36 = vld [vmem:[#allocation5 + $0x15a0] sm:$0xff]  ;;  %9675 = vmatpush1.bf16.msra.mxu1 %v14439_v43  ;;  %9706 = vmatprep.mubr.bf16.mxu1 %v16375_v22 }
  0xe1   :  { %v16356_v38 = vld [vmem:[#allocation2 + $0x20] sm:$0xff]  ;;  %v14432_v47 = vcombine.high %v815_v35, %v819_v36  ;;  %9635 = vmatprep.subr.bf16.mxu0 %v14304_v44  ;;  %v14431_v51 = vcombine.low %v815_v35, %v819_v36 }
  0xe2   :  { %v679_v45 = vld [vmem:[#allocation5 + $0x1140] sm:$0xff]  ;;  %v16370_v19 = vcombine.high %v16356_v38, %v16356_v38  ;;  %9636 = vmatpush1.bf16.msra.mxu0 %v14303_v50 }
  0xe3   :  { %v683_v46 = vld [vmem:[#allocation5 + $0x1160] sm:$0xff]  ;;  %9676 = vmatprep.subr.bf16.mxu1 %v14432_v47 }
  0xe4   :  { %v807_v48 = vld [vmem:[#allocation5 + $0x1540] sm:$0xff]  ;;  %v14296_v52 = vcombine.high %v679_v45, %v683_v46  ;;  %9665 = vmatprep.mubr.bf16.mxu0 %v16370_v19  ;;  %v14295_v62 = vcombine.low %v679_v45, %v683_v46  ;;  %9677 = vmatpush1.bf16.msra.mxu1 %v14431_v51 }
  0xe5   :  { %v811_v49 = vld [vmem:[#allocation5 + $0x1560] sm:$0xff] }
  0xe6   :  { %v671_v55 = vld [vmem:[#allocation5 + $0x1100] sm:$0xff]  ;;  %v14424_v60 = vcombine.high %v807_v48, %v811_v49  ;;  %9637 = vmatprep.subr.bf16.mxu0 %v14296_v52  ;;  %v14423_v63 = vcombine.low %v807_v48, %v811_v49 }
  0xe7   :  { %v675_v56 = vld [vmem:[#allocation5 + $0x1120] sm:$0xff]  ;;  %9638 = vmatpush1.bf16.msra.mxu0 %v14295_v62 }
  0xe8   :  { %v799_v57 = vld [vmem:[#allocation5 + $0x1500] sm:$0xff]  ;;  %v14288_v0 = vcombine.high %v671_v55, %v675_v56  ;;  %9678 = vmatprep.subr.bf16.mxu1 %v14424_v60  ;;  %v14287_v6 = vcombine.low %v671_v55, %v675_v56 }
  0xe9   :  { %v803_v61 = vld [vmem:[#allocation5 + $0x1520] sm:$0xff]  ;;  %9679 = vmatpush1.bf16.msra.mxu1 %v14423_v63 }
  0xea   :  { %v663_v1 = vld [vmem:[#allocation5 + $0x10c0] sm:$0xff]  ;;  %v14416_v4 = vcombine.high %v799_v57, %v803_v61  ;;  %9639 = vmatprep.subr.bf16.mxu0 %v14288_v0  ;;  %v14415_v7 = vcombine.low %v799_v57, %v803_v61 }
  0xeb   :  { %v667_v2 = vld [vmem:[#allocation5 + $0x10e0] sm:$0xff]  ;;  %9640 = vmatpush1.bf16.msra.mxu0 %v14287_v6 }
  0xec   :  { %v791_v3 = vld [vmem:[#allocation5 + $0x14c0] sm:$0xff]  ;;  %v14280_v8 = vcombine.high %v663_v1, %v667_v2  ;;  %9680 = vmatprep.subr.bf16.mxu1 %v14416_v4  ;;  %v14279_v14 = vcombine.low %v663_v1, %v667_v2 }
  0xed   :  { %v795_v5 = vld [vmem:[#allocation5 + $0x14e0] sm:$0xff]  ;;  %9681 = vmatpush1.bf16.msra.mxu1 %v14415_v7 }
  0xee   :  { %v655_v9 = vld [vmem:[#allocation5 + $0x1080] sm:$0xff]  ;;  %v14408_v12 = vcombine.high %v791_v3, %v795_v5  ;;  %9641 = vmatprep.subr.bf16.mxu0 %v14280_v8  ;;  %v14407_v15 = vcombine.low %v791_v3, %v795_v5 }
  0xef   :  { %v659_v10 = vld [vmem:[#allocation5 + $0x10a0] sm:$0xff]  ;;  %9642 = vmatpush1.bf16.msra.mxu0 %v14279_v14 }
  0xf0   :  { %v783_v11 = vld [vmem:[#allocation5 + $0x1480] sm:$0xff]  ;;  %v14272_v17 = vcombine.high %v655_v9, %v659_v10  ;;  %9682 = vmatprep.subr.bf16.mxu1 %v14408_v12  ;;  %v14271_v53 = vcombine.low %v655_v9, %v659_v10 }
  0xf1   :  { %v787_v13 = vld [vmem:[#allocation5 + $0x14a0] sm:$0xff]  ;;  %9683 = vmatpush1.bf16.msra.mxu1 %v14407_v15 }
  0xf2   :  { %v647_v18 = vld [vmem:[#allocation5 + $0x1040] sm:$0xff]  ;;  %v14400_v24 = vcombine.high %v783_v11, %v787_v13  ;;  %9643 = vmatprep.subr.bf16.mxu0 %v14272_v17  ;;  %v14399_v26 = vcombine.low %v783_v11, %v787_v13 }
  0xf3   :  { %v651_v21 = vld [vmem:[#allocation5 + $0x1060] sm:$0xff]  ;;  %9644 = vmatpush1.bf16.msra.mxu0 %v14271_v53 }
  0xf4   :  { %v775_v23 = vld [vmem:[#allocation5 + $0x1440] sm:$0xff]  ;;  %v14264_v27 = vcombine.high %v647_v18, %v651_v21  ;;  %9684 = vmatprep.subr.bf16.mxu1 %v14400_v24  ;;  %v14263_v34 = vcombine.low %v647_v18, %v651_v21 }
  0xf5   :  { %v779_v25 = vld [vmem:[#allocation5 + $0x1460] sm:$0xff]  ;;  %9685 = vmatpush1.bf16.msra.mxu1 %v14399_v26 }
  0xf6   :  { %v639_v54 = vld [vmem:[#allocation5 + $0x1000] sm:$0xff]  ;;  %v14392_v32 = vcombine.high %v775_v23, %v779_v25  ;;  %9645 = vmatprep.subr.bf16.mxu0 %v14264_v27  ;;  %v14391_v35 = vcombine.low %v775_v23, %v779_v25 }
  0xf7   :  { %v643_v30 = vld [vmem:[#allocation5 + $0x1020] sm:$0xff]  ;;  %9646 = vmatpush1.bf16.msra.mxu0 %v14263_v34 }
  0xf8   :  { %v767_v31 = vld [vmem:[#allocation5 + $0x1400] sm:$0xff]  ;;  %v14256_v36 = vcombine.high %v639_v54, %v643_v30  ;;  %9686 = vmatprep.subr.bf16.mxu1 %v14392_v32  ;;  %v14255_v46 = vcombine.low %v639_v54, %v643_v30 }
  0xf9   :  { %v771_v33 = vld [vmem:[#allocation5 + $0x1420] sm:$0xff]  ;;  %9687 = vmatpush1.bf16.msra.mxu1 %v14391_v35 }
  0xfa   :  { %v759_v37 = vld [vmem:[#allocation5 + $0x13c0] sm:$0xff]  ;;  %v14384_v44 = vcombine.high %v767_v31, %v771_v33  ;;  %9647 = vmatprep.subr.bf16.mxu0 %v14256_v36  ;;  %v14383_v47 = vcombine.low %v767_v31, %v771_v33 }
  0xfb   :  { %v763_v41 = vld [vmem:[#allocation5 + $0x13e0] sm:$0xff]  ;;  %9648 = vmatpush1.bf16.msra.mxu0 %v14255_v46 }
  0xfc   :  { %v887_v43 = vld [vmem:[#allocation5 + $0x17c0] sm:$0xff]  ;;  %v14376_v48 = vcombine.high %v759_v37, %v763_v41  ;;  %9688 = vmatprep.subr.bf16.mxu1 %v14384_v44  ;;  %v14375_v56 = vcombine.low %v759_v37, %v763_v41 }
  0xfd   :  { %v891_v45 = vld [vmem:[#allocation5 + $0x17e0] sm:$0xff]  ;;  %9689 = vmatpush1.bf16.msra.mxu1 %v14383_v47 }
  0xfe   :  { %v751_v49 = vld [vmem:[#allocation5 + $0x1380] sm:$0xff]  ;;  %v14504_v52 = vcombine.high %v887_v43, %v891_v45  ;;  %9649 = vmatprep.subr.bf16.mxu0 %v14376_v48  ;;  %v14503_v57 = vcombine.low %v887_v43, %v891_v45 }
  0xff   :  { %v755_v50 = vld [vmem:[#allocation5 + $0x13a0] sm:$0xff]  ;;  %9650 = vmatpush2.bf16.msra.mxu0 %v14375_v56 }
 0x100   :  { %v879_v51 = vld [vmem:[#allocation5 + $0x1780] sm:$0xff]  ;;  %v14368_v60 = vcombine.high %v751_v49, %v755_v50  ;;  %9690 = vmatprep.subr.bf16.mxu1 %v14504_v52  ;;  %v14367_v2 = vcombine.low %v751_v49, %v755_v50 }
 0x101   :  { %v883_v55 = vld [vmem:[#allocation5 + $0x17a0] sm:$0xff]  ;;  %9691 = vmatpush2.bf16.msra.mxu1 %v14503_v57 }
 0x102   :  { %v743_v61 = vld [vmem:[#allocation5 + $0x1340] sm:$0xff]  ;;  %v14496_v0 = vcombine.high %v879_v51, %v883_v55  ;;  %9651 = vmatprep.subr.bf16.mxu0 %v14368_v60  ;;  %v14495_v3 = vcombine.low %v879_v51, %v883_v55 }
 0x103   :  { %v747_v62 = vld [vmem:[#allocation5 + $0x1360] sm:$0xff]  ;;  %9652 = vmatpush2.bf16.msra.mxu0 %v14367_v2 }
 0x104   :  { %v871_v63 = vld [vmem:[#allocation5 + $0x1740] sm:$0xff]  ;;  %v14360_v4 = vcombine.high %v743_v61, %v747_v62  ;;  %9692 = vmatprep.subr.bf16.mxu1 %v14496_v0  ;;  %v14359_v10 = vcombine.low %v743_v61, %v747_v62 }
 0x105   :  { %v875_v1 = vld [vmem:[#allocation5 + $0x1760] sm:$0xff]  ;;  %9693 = vmatpush2.bf16.msra.mxu1 %v14495_v3 }
 0x106   :  { %v735_v5 = vld [vmem:[#allocation5 + $0x1300] sm:$0xff]  ;;  %v14488_v8 = vcombine.high %v871_v63, %v875_v1  ;;  %9653 = vmatprep.subr.bf16.mxu0 %v14360_v4  ;;  %v14487_v11 = vcombine.low %v871_v63, %v875_v1 }
 0x107   :  { %v739_v6 = vld [vmem:[#allocation5 + $0x1320] sm:$0xff]  ;;  %9654 = vmatpush2.bf16.msra.mxu0 %v14359_v10  ;;  %v16390_v10 = vld [vmem:[#allocation2 + $0x38] sm:$0xff] }
 0x108   :  { %v863_v7 = vld [vmem:[#allocation5 + $0x1700] sm:$0xff]  ;;  %v14352_v12 = vcombine.high %v735_v5, %v739_v6  ;;  %9694 = vmatprep.subr.bf16.mxu1 %v14488_v8  ;;  %v14351_v21 = vcombine.low %v735_v5, %v739_v6  ;;  %v16380_v6 = vld [vmem:[#allocation2 + $0x30] sm:$0xff]  ;;  %v16388_v8 = vcombine.low %v16366_v42, %v16366_v42  ;;  %v16399_v42 = vcombine.high %v16390_v10, %v16390_v10 }
 0x109   :  { %v867_v9 = vld [vmem:[#allocation5 + $0x1720] sm:$0xff]  ;;  %9695 = vmatpush2.bf16.msra.mxu1 %v14487_v11 }
 0x10a   :  { %v727_v13 = vld [vmem:[#allocation5 + $0x12c0] sm:$0xff]  ;;  %v14480_v17 = vcombine.high %v863_v7, %v867_v9  ;;  %9655 = vmatprep.subr.bf16.mxu0 %v14352_v12  ;;  %v14479_v23 = vcombine.low %v863_v7, %v867_v9  ;;  %v16384_v7 = vcombine.low %v16356_v38, %v16356_v38  ;;  %v16394_v38 = vcombine.high %v16380_v6, %v16380_v6 }
 0x10b   :  { %v731_v14 = vld [vmem:[#allocation5 + $0x12e0] sm:$0xff]  ;;  %9656 = vmatpush2.bf16.msra.mxu0 %v14351_v21 }
 0x10c   :  { %v855_v15 = vld [vmem:[#allocation5 + $0x16c0] sm:$0xff]  ;;  %v14344_v24 = vcombine.high %v727_v13, %v731_v14  ;;  %9696 = vmatprep.subr.bf16.mxu1 %v14480_v17  ;;  %v14343_v30 = vcombine.low %v727_v13, %v731_v14 }
 0x10d   :  { %v859_v18 = vld [vmem:[#allocation5 + $0x16e0] sm:$0xff]  ;;  %9697 = vmatpush2.bf16.msra.mxu1 %v14479_v23 }
 0x10e   :  { %v719_v25 = vld [vmem:[#allocation5 + $0x1280] sm:$0xff]  ;;  %v14472_v27 = vcombine.high %v855_v15, %v859_v18  ;;  %9657 = vmatprep.subr.bf16.mxu0 %v14344_v24  ;;  %v14471_v31 = vcombine.low %v855_v15, %v859_v18 }
 0x10f   :  { %v723_v53 = vld [vmem:[#allocation5 + $0x12a0] sm:$0xff]  ;;  %9658 = vmatpush2.bf16.msra.mxu0 %v14343_v30 }
 0x110   :  { %v847_v26 = vld [vmem:[#allocation5 + $0x1680] sm:$0xff]  ;;  %v14336_v32 = vcombine.high %v719_v25, %v723_v53  ;;  %9698 = vmatprep.subr.bf16.mxu1 %v14472_v27  ;;  %v14335_v41 = vcombine.low %v719_v25, %v723_v53 }
 0x111   :  { %v851_v54 = vld [vmem:[#allocation5 + $0x16a0] sm:$0xff]  ;;  %9699 = vmatpush2.bf16.msra.mxu1 %v14471_v31 }
 0x112   :  { %v711_v33 = vld [vmem:[#allocation5 + $0x1240] sm:$0xff]  ;;  %v14464_v36 = vcombine.high %v847_v26, %v851_v54  ;;  %9659 = vmatprep.subr.bf16.mxu0 %v14336_v32  ;;  %v14463_v43 = vcombine.low %v847_v26, %v851_v54 }
 0x113   :  { %v715_v34 = vld [vmem:[#allocation5 + $0x1260] sm:$0xff]  ;;  %9660 = vmatpush2.bf16.msra.mxu0 %v14335_v41 }
 0x114   :  { %v839_v35 = vld [vmem:[#allocation5 + $0x1640] sm:$0xff]  ;;  %v14328_v44 = vcombine.high %v711_v33, %v715_v34  ;;  %9700 = vmatprep.subr.bf16.mxu1 %v14464_v36  ;;  %v14327_v50 = vcombine.low %v711_v33, %v715_v34 }
 0x115   :  { %v843_v37 = vld [vmem:[#allocation5 + $0x1660] sm:$0xff]  ;;  %9701 = vmatpush2.bf16.msra.mxu1 %v14463_v43 }
 0x116   :  { %v703_v45 = vld [vmem:[#allocation5 + $0x1200] sm:$0xff]  ;;  %v14456_v48 = vcombine.high %v839_v35, %v843_v37  ;;  %9661 = vmatprep.subr.bf16.mxu0 %v14328_v44  ;;  %v14455_v51 = vcombine.low %v839_v35, %v843_v37 }
 0x117   :  { %v707_v46 = vld [vmem:[#allocation5 + $0x1220] sm:$0xff]  ;;  %9662 = vmatpush2.bf16.msra.mxu0 %v14327_v50 }
 0x118   :  { %v831_v47 = vld [vmem:[#allocation5 + $0x1600] sm:$0xff]  ;;  %v14320_v52 = vcombine.high %v703_v45, %v707_v46  ;;  %9702 = vmatprep.subr.bf16.mxu1 %v14456_v48  ;;  %v14319_v62 = vcombine.low %v703_v45, %v707_v46 }
 0x119   :  { %v835_v49 = vld [vmem:[#allocation5 + $0x1620] sm:$0xff]  ;;  %9703 = vmatpush2.bf16.msra.mxu1 %v14455_v51 }
 0x11a   :  { %v951_v55 = vld [vmem:[#allocation5 + $0x19c0] sm:$0xff]  ;;  %v14448_v60 = vcombine.high %v831_v47, %v835_v49  ;;  %9663 = vmatprep.subr.bf16.mxu0 %v14320_v52  ;;  %v14447_v0 = vcombine.low %v831_v47, %v835_v49 }
 0x11b   :  { %v955_v56 = vld [vmem:[#allocation5 + $0x19e0] sm:$0xff]  ;;  %9664 = vmatpush2.bf16.msra.mxu0 %v14319_v62 }
 0x11c   :  { %v1079_v57 = vld [vmem:[#allocation5 + $0x1dc0] sm:$0xff]  ;;  %v14568_v1 = vcombine.high %v951_v55, %v955_v56  ;;  %9704 = vmatprep.subr.bf16.mxu1 %v14448_v60  ;;  %v14567_v9 = vcombine.low %v951_v55, %v955_v56 }
 0x11d   :  { %v1083_v61 = vld [vmem:[#allocation5 + $0x1de0] sm:$0xff]  ;;  %9705 = vmatpush2.bf16.msra.mxu1 %v14447_v0 }
 0x11e   :  { %v943_v63 = vld [vmem:[#allocation5 + $0x1980] sm:$0xff]  ;;  %v14696_v5 = vcombine.high %v1079_v57, %v1083_v61  ;;  %9715 = vmatprep.subr.bf16.mxu0 %v14568_v1  ;;  %v14695_v11 = vcombine.low %v1079_v57, %v1083_v61  ;;  %9666 = vmatmul.mubr.bf16.vlgmr.msra.gmra.mxu0 %v16384_v7 }
 0x11f   :  { %v947_v2 = vld [vmem:[#allocation5 + $0x19a0] sm:$0xff]  ;;  %9716 = vmatpush1.bf16.msra.mxu0 %v14567_v9  ;;  %9747 = vmatprep.mubr.bf16.mxu0 %v16394_v38 }
 0x120   :  { %v1071_v3 = vld [vmem:[#allocation5 + $0x1d80] sm:$0xff]  ;;  %v14560_v12 = vcombine.high %v943_v63, %v947_v2  ;;  %9756 = vmatprep.subr.bf16.mxu1 %v14696_v5  ;;  %9707 = vmatmul.mubr.bf16.vlgmr.msra.gmra.mxu1 %v16388_v8  ;;  %v14559_v21 = vcombine.low %v943_v63, %v947_v2 }
 0x121   :  { %v1075_v4 = vld [vmem:[#allocation5 + $0x1da0] sm:$0xff]  ;;  %9757 = vmatpush1.bf16.msra.mxu1 %v14695_v11  ;;  %9788 = vmatprep.mubr.bf16.mxu1 %v16399_v42 }
 0x122   :  { %v935_v13 = vld [vmem:[#allocation5 + $0x1940] sm:$0xff]  ;;  %v14688_v17 = vcombine.high %v1071_v3, %v1075_v4  ;;  %9717 = vmatprep.subr.bf16.mxu0 %v14560_v12  ;;  %v14687_v23 = vcombine.low %v1071_v3, %v1075_v4 }
 0x123   :  { %v939_v14 = vld [vmem:[#allocation5 + $0x1960] sm:$0xff]  ;;  %9718 = vmatpush1.bf16.msra.mxu0 %v14559_v21 }
 0x124   :  { %v1063_v15 = vld [vmem:[#allocation5 + $0x1d40] sm:$0xff]  ;;  %v14552_v24 = vcombine.high %v935_v13, %v939_v14  ;;  %9758 = vmatprep.subr.bf16.mxu1 %v14688_v17  ;;  %v14551_v30 = vcombine.low %v935_v13, %v939_v14 }
 0x125   :  { %v1067_v18 = vld [vmem:[#allocation5 + $0x1d60] sm:$0xff]  ;;  %9759 = vmatpush1.bf16.msra.mxu1 %v14687_v23 }
 0x126   :  { %v927_v25 = vld [vmem:[#allocation5 + $0x1900] sm:$0xff]  ;;  %v14680_v27 = vcombine.high %v1063_v15, %v1067_v18  ;;  %9719 = vmatprep.subr.bf16.mxu0 %v14552_v24  ;;  %v14679_v31 = vcombine.low %v1063_v15, %v1067_v18 }
 0x127   :  { %v931_v53 = vld [vmem:[#allocation5 + $0x1920] sm:$0xff]  ;;  %9720 = vmatpush1.bf16.msra.mxu0 %v14551_v30 }
 0x128   :  { %v1055_v26 = vld [vmem:[#allocation5 + $0x1d00] sm:$0xff]  ;;  %v14544_v32 = vcombine.high %v927_v25, %v931_v53  ;;  %9760 = vmatprep.subr.bf16.mxu1 %v14680_v27  ;;  %v14543_v41 = vcombine.low %v927_v25, %v931_v53 }
 0x129   :  { %v1059_v54 = vld [vmem:[#allocation5 + $0x1d20] sm:$0xff]  ;;  %9761 = vmatpush1.bf16.msra.mxu1 %v14679_v31 }
 0x12a   :  { %v919_v33 = vld [vmem:[#allocation5 + $0x18c0] sm:$0xff]  ;;  %v14672_v36 = vcombine.high %v1055_v26, %v1059_v54  ;;  %9721 = vmatprep.subr.bf16.mxu0 %v14544_v32  ;;  %v14671_v43 = vcombine.low %v1055_v26, %v1059_v54 }
 0x12b   :  { %v923_v34 = vld [vmem:[#allocation5 + $0x18e0] sm:$0xff]  ;;  %9722 = vmatpush1.bf16.msra.mxu0 %v14543_v41 }
 0x12c   :  { %v1047_v35 = vld [vmem:[#allocation5 + $0x1cc0] sm:$0xff]  ;;  %v14536_v44 = vcombine.high %v919_v33, %v923_v34  ;;  %9762 = vmatprep.subr.bf16.mxu1 %v14672_v36  ;;  %v14535_v50 = vcombine.low %v919_v33, %v923_v34 }
 0x12d   :  { %v1051_v37 = vld [vmem:[#allocation5 + $0x1ce0] sm:$0xff]  ;;  %9763 = vmatpush1.bf16.msra.mxu1 %v14671_v43 }
 0x12e   :  { %v911_v45 = vld [vmem:[#allocation5 + $0x1880] sm:$0xff]  ;;  %v14664_v48 = vcombine.high %v1047_v35, %v1051_v37  ;;  %9723 = vmatprep.subr.bf16.mxu0 %v14536_v44  ;;  %v14663_v51 = vcombine.low %v1047_v35, %v1051_v37 }
 0x12f   :  { %v915_v46 = vld [vmem:[#allocation5 + $0x18a0] sm:$0xff]  ;;  %9724 = vmatpush1.bf16.msra.mxu0 %v14535_v50 }
 0x130   :  { %v1039_v47 = vld [vmem:[#allocation5 + $0x1c80] sm:$0xff]  ;;  %v14528_v52 = vcombine.high %v911_v45, %v915_v46  ;;  %9764 = vmatprep.subr.bf16.mxu1 %v14664_v48  ;;  %v14527_v62 = vcombine.low %v911_v45, %v915_v46 }
 0x131   :  { %v1043_v49 = vld [vmem:[#allocation5 + $0x1ca0] sm:$0xff]  ;;  %9765 = vmatpush1.bf16.msra.mxu1 %v14663_v51 }
 0x132   :  { %v903_v55 = vld [vmem:[#allocation5 + $0x1840] sm:$0xff]  ;;  %v14656_v60 = vcombine.high %v1039_v47, %v1043_v49  ;;  %9725 = vmatprep.subr.bf16.mxu0 %v14528_v52  ;;  %v14655_v63 = vcombine.low %v1039_v47, %v1043_v49 }
 0x133   :  { %v907_v56 = vld [vmem:[#allocation5 + $0x1860] sm:$0xff]  ;;  %9726 = vmatpush1.bf16.msra.mxu0 %v14527_v62 }
 0x134   :  { %v1031_v57 = vld [vmem:[#allocation5 + $0x1c40] sm:$0xff]  ;;  %v14520_v0 = vcombine.high %v903_v55, %v907_v56  ;;  %9766 = vmatprep.subr.bf16.mxu1 %v14656_v60  ;;  %v14519_v9 = vcombine.low %v903_v55, %v907_v56 }
 0x135   :  { %v1035_v61 = vld [vmem:[#allocation5 + $0x1c60] sm:$0xff]  ;;  %9767 = vmatpush1.bf16.msra.mxu1 %v14655_v63 }
 0x136   :  { %v895_v1 = vld [vmem:[#allocation5 + $0x1800] sm:$0xff]  ;;  %v14648_v4 = vcombine.high %v1031_v57, %v1035_v61  ;;  %9727 = vmatprep.subr.bf16.mxu0 %v14520_v0  ;;  %v14647_v11 = vcombine.low %v1031_v57, %v1035_v61 }
 0x137   :  { %v899_v2 = vld [vmem:[#allocation5 + $0x1820] sm:$0xff]  ;;  %9728 = vmatpush1.bf16.msra.mxu0 %v14519_v9 }
 0x138   :  { %v1023_v3 = vld [vmem:[#allocation5 + $0x1c00] sm:$0xff]  ;;  %v14512_v12 = vcombine.high %v895_v1, %v899_v2  ;;  %9768 = vmatprep.subr.bf16.mxu1 %v14648_v4  ;;  %v14511_v21 = vcombine.low %v895_v1, %v899_v2 }
 0x139   :  { %v1027_v5 = vld [vmem:[#allocation5 + $0x1c20] sm:$0xff]  ;;  %9769 = vmatpush1.bf16.msra.mxu1 %v14647_v11 }
 0x13a   :  { %v1015_v13 = vld [vmem:[#allocation5 + $0x1bc0] sm:$0xff]  ;;  %v14640_v17 = vcombine.high %v1023_v3, %v1027_v5  ;;  %9729 = vmatprep.subr.bf16.mxu0 %v14512_v12  ;;  %v14639_v23 = vcombine.low %v1023_v3, %v1027_v5 }
 0x13b   :  { %v1019_v14 = vld [vmem:[#allocation5 + $0x1be0] sm:$0xff]  ;;  %9730 = vmatpush1.bf16.msra.mxu0 %v14511_v21 }
 0x13c   :  { %v1143_v15 = vld [vmem:[#allocation5 + $0x1fc0] sm:$0xff]  ;;  %v14632_v24 = vcombine.high %v1015_v13, %v1019_v14  ;;  %9770 = vmatprep.subr.bf16.mxu1 %v14640_v17  ;;  %v14631_v30 = vcombine.low %v1015_v13, %v1019_v14 }
 0x13d   :  { %v1147_v18 = vld [vmem:[#allocation5 + $0x1fe0] sm:$0xff]  ;;  %9771 = vmatpush1.bf16.msra.mxu1 %v14639_v23  ;;  %v1665_v23 = vlaneseq }
 0x13e   :  { %v1007_v25 = vld [vmem:[#allocation5 + $0x1b80] sm:$0xff]  ;;  %v14760_v27 = vcombine.high %v1143_v15, %v1147_v18  ;;  %9731 = vmatprep.subr.bf16.mxu0 %v14632_v24  ;;  %v14759_v31 = vcombine.low %v1143_v15, %v1147_v18 }
 0x13f   :  { %v1011_v53 = vld [vmem:[#allocation5 + $0x1ba0] sm:$0xff]  ;;  %9732 = vmatpush2.bf16.msra.mxu0 %v14631_v30 }
 0x140   :  { %v1135_v26 = vld [vmem:[#allocation5 + $0x1f80] sm:$0xff]  ;;  %v14624_v32 = vcombine.high %v1007_v25, %v1011_v53  ;;  %9772 = vmatprep.subr.bf16.mxu1 %v14760_v27  ;;  %v14623_v41 = vcombine.low %v1007_v25, %v1011_v53 }
 0x141   :  { %v1139_v54 = vld [vmem:[#allocation5 + $0x1fa0] sm:$0xff]  ;;  %9773 = vmatpush2.bf16.msra.mxu1 %v14759_v31 }
 0x142   :  { %v999_v33 = vld [vmem:[#allocation5 + $0x1b40] sm:$0xff]  ;;  %v14752_v36 = vcombine.high %v1135_v26, %v1139_v54  ;;  %9733 = vmatprep.subr.bf16.mxu0 %v14624_v32  ;;  %v14751_v43 = vcombine.low %v1135_v26, %v1139_v54  ;;  %v16404_v32 = vshrl.u32 %v1665_v23, 7 }
 0x143   :  { %v1003_v34 = vld [vmem:[#allocation5 + $0x1b60] sm:$0xff]  ;;  %9734 = vmatpush2.bf16.msra.mxu0 %v14623_v41 }
 0x144   :  { %v1127_v35 = vld [vmem:[#allocation5 + $0x1f40] sm:$0xff]  ;;  %v14616_v44 = vcombine.high %v999_v33, %v1003_v34  ;;  %9774 = vmatprep.subr.bf16.mxu1 %v14752_v36  ;;  %v14615_v50 = vcombine.low %v999_v33, %v1003_v34 }
 0x145   :  { %v1131_v37 = vld [vmem:[#allocation5 + $0x1f60] sm:$0xff]  ;;  %9775 = vmatpush2.bf16.msra.mxu1 %v14751_v43 }
 0x146   :  { %v14744_v45 = vcombine.high %v1127_v35, %v1131_v37  ;;  %v991_v46 = vld [vmem:[#allocation5 + $0x1b00] sm:$0xff]  ;;  %9735 = vmatprep.subr.bf16.mxu0 %v14616_v44  ;;  %v14743_v51 = vcombine.low %v1127_v35, %v1131_v37 }
 0x147   :  { %v995_v47 = vld [vmem:[#allocation5 + $0x1b20] sm:$0xff]  ;;  %9736 = vmatpush2.bf16.msra.mxu0 %v14615_v50  ;;  %v1671_v50 = vsub.s32 1, %v16404_v32 }
 0x148   :  { %v1119_v48 = vld [vmem:[#allocation5 + $0x1f00] sm:$0xff]  ;;  %v14608_v52 = vcombine.high %v991_v46, %v995_v47  ;;  %9776 = vmatprep.subr.bf16.mxu1 %v14744_v45  ;;  %v14607_v62 = vcombine.low %v991_v46, %v995_v47  ;;  %v1667_v45 = vsub.s32 0, %v16404_v32 }
 0x149   :  { %v1123_v49 = vld [vmem:[#allocation5 + $0x1f20] sm:$0xff]  ;;  %9777 = vmatpush2.bf16.msra.mxu1 %v14743_v51 }
 0x14a   :  { %v14736_v55 = vcombine.high %v1119_v48, %v1123_v49  ;;  %v983_v56 = vld [vmem:[#allocation5 + $0x1ac0] sm:$0xff]  ;;  %9737 = vmatprep.subr.bf16.mxu0 %v14608_v52  ;;  %v14735_v63 = vcombine.low %v1119_v48, %v1123_v49 }
 0x14b   :  { %v987_v57 = vld [vmem:[#allocation5 + $0x1ae0] sm:$0xff]  ;;  %9738 = vmatpush2.bf16.msra.mxu0 %v14607_v62  ;;  %v16418_v62 = vcombine.low %v16390_v10, %v16390_v10 }
 0x14c   :  { %v1111_v60 = vld [vmem:[#allocation5 + $0x1ec0] sm:$0xff]  ;;  %v14600_v0 = vcombine.high %v983_v56, %v987_v57  ;;  %9778 = vmatprep.subr.bf16.mxu1 %v14736_v55  ;;  %v14599_v9 = vcombine.low %v983_v56, %v987_v57  ;;  %v16410_v55 = vcombine.low %v16380_v6, %v16380_v6 }
 0x14d   :  { %v1115_v61 = vld [vmem:[#allocation5 + $0x1ee0] sm:$0xff]  ;;  %9779 = vmatpush2.bf16.msra.mxu1 %v14735_v63 }
 0x14e   :  { %v14728_v1 = vcombine.high %v1111_v60, %v1115_v61  ;;  %v975_v2 = vld [vmem:[#allocation5 + $0x1a80] sm:$0xff]  ;;  %9739 = vmatprep.subr.bf16.mxu0 %v14600_v0  ;;  %v14727_v11 = vcombine.low %v1111_v60, %v1115_v61  ;;  %v16420_v0 = vld [vmem:[#allocation2 + $0x48] sm:$0xff] }
 0x14f   :  { %v979_v3 = vld [vmem:[#allocation5 + $0x1aa0] sm:$0xff]  ;;  %9740 = vmatpush2.bf16.msra.mxu0 %v14599_v9 }
 0x150   :  { %v1103_v4 = vld [vmem:[#allocation5 + $0x1e80] sm:$0xff]  ;;  %v14592_v12 = vcombine.high %v975_v2, %v979_v3  ;;  %9780 = vmatprep.subr.bf16.mxu1 %v14728_v1  ;;  %v14591_v21 = vcombine.low %v975_v2, %v979_v3 }
 0x151   :  { %v1107_v5 = vld [vmem:[#allocation5 + $0x1ea0] sm:$0xff]  ;;  %9781 = vmatpush2.bf16.msra.mxu1 %v14727_v11 }
 0x152   :  { %v14720_v13 = vcombine.high %v1103_v4, %v1107_v5  ;;  %v967_v14 = vld [vmem:[#allocation5 + $0x1a40] sm:$0xff]  ;;  %9741 = vmatprep.subr.bf16.mxu0 %v14592_v12  ;;  %v14719_v24 = vcombine.low %v1103_v4, %v1107_v5 }
 0x153   :  { %v971_v15 = vld [vmem:[#allocation5 + $0x1a60] sm:$0xff]  ;;  %9742 = vmatpush2.bf16.msra.mxu0 %v14591_v21 }
 0x154   :  { %v1095_v17 = vld [vmem:[#allocation5 + $0x1e40] sm:$0xff]  ;;  %v14584_v25 = vcombine.high %v967_v14, %v971_v15  ;;  %9782 = vmatprep.subr.bf16.mxu1 %v14720_v13  ;;  %v14583_v31 = vcombine.low %v967_v14, %v971_v15  ;;  %v16431_v13 = vcombine.high %v16420_v0, %v16420_v0 }
 0x155   :  { %v1099_v18 = vld [vmem:[#allocation5 + $0x1e60] sm:$0xff]  ;;  %9783 = vmatpush2.bf16.msra.mxu1 %v14719_v24 }
 0x156   :  { %v14712_v53 = vcombine.high %v1095_v17, %v1099_v18  ;;  %v959_v26 = vld [vmem:[#allocation5 + $0x1a00] sm:$0xff]  ;;  %9743 = vmatprep.subr.bf16.mxu0 %v14584_v25  ;;  %v14711_v33 = vcombine.low %v1095_v17, %v1099_v18 }
 0x157   :  { %v963_v27 = vld [vmem:[#allocation5 + $0x1a20] sm:$0xff]  ;;  %9744 = vmatpush2.bf16.msra.mxu0 %v14583_v31 }
 0x158   :  { %v1087_v54 = vld [vmem:[#allocation5 + $0x1e00] sm:$0xff]  ;;  %v14576_v34 = vcombine.high %v959_v26, %v963_v27  ;;  %9784 = vmatprep.subr.bf16.mxu1 %v14712_v53  ;;  %v14575_v44 = vcombine.low %v959_v26, %v963_v27 }
 0x159   :  { %v1091_v30 = vld [vmem:[#allocation5 + $0x1e20] sm:$0xff]  ;;  %9785 = vmatpush2.bf16.msra.mxu1 %v14711_v33 }
 0x15a   :  { %v14704_v35 = vcombine.high %v1087_v54, %v1091_v30  ;;  %v1207_v36 = vld [vmem:[#allocation5 + $0x21c0] sm:$0xff]  ;;  %9745 = vmatprep.subr.bf16.mxu0 %v14576_v34  ;;  %v14703_v46 = vcombine.low %v1087_v54, %v1091_v30 }
 0x15b   :  { %v1211_v37 = vld [vmem:[#allocation5 + $0x21e0] sm:$0xff]  ;;  %9746 = vmatpush2.bf16.msra.mxu0 %v14575_v44 }
 0x15c   :  { %v1335_v41 = vld [vmem:[#allocation5 + $0x25c0] sm:$0xff]  ;;  %v14824_v48 = vcombine.high %v1207_v36, %v1211_v37  ;;  %9786 = vmatprep.subr.bf16.mxu1 %v14704_v35  ;;  %v14823_v63 = vcombine.low %v1207_v36, %v1211_v37 }
 0x15d   :  { %v1339_v43 = vld [vmem:[#allocation5 + $0x25e0] sm:$0xff]  ;;  %9787 = vmatpush2.bf16.msra.mxu1 %v14703_v46  ;;  %v9503_v10 = vpop.f32.mrf.mxu0 }
 0x15e   :  { %v1663_v47 = vld [vmem:[#allocation7] sm:$0xff]  ;;  %v14952_v49 = vcombine.high %v1335_v41, %v1339_v43  ;;  %9797 = vmatprep.subr.bf16.mxu0 %v14824_v48  ;;  %v14951_v1 = vcombine.low %v1335_v41, %v1339_v43  ;;  %9748 = vmatmul.mubr.bf16.vlgmr.msra.gmra.mxu0 %v16410_v55 }
 0x15f   :  { %v1199_v51 = vld [vmem:[#allocation5 + $0x2180] sm:$0xff]  ;;  %v1668_v61 = vrot.slane %v1663_v47, %v1667_v45  ;;  %v1672_v2 = vrot.slane %v1663_v47, %v1671_v50  ;;  %v9544_v15 = vpop.f32.mrf.mxu1  ;;  %9798 = vmatpush1.bf16.msra.mxu0 %v14823_v63  ;;  %v9505_v18 = vpop.f32.mrf.mxu0 }
 0x160   :  { %v1203_v52 = vld [vmem:[#allocation5 + $0x21a0] sm:$0xff]  ;;  %9838 = vmatprep.subr.bf16.mxu1 %v14952_v49  ;;  %9789 = vmatmul.mubr.bf16.vlgmr.msra.gmra.mxu1 %v16418_v62 }
 0x161   :  { %v1327_v56 = vld [vmem:[#allocation5 + $0x2580] sm:$0xff]  ;;  %v14816_v6 = vcombine.high %v1199_v51, %v1203_v52  ;;  %v9504_v14 = vadd.f32 %v9503_v10, %v1668_v61  ;;  %v14815_v17 = vcombine.low %v1199_v51, %v1203_v52  ;;  %9839 = vmatpush1.bf16.msra.mxu1 %v14951_v1  ;;  %v9506_v25 = vadd.f32 %v9505_v18, %v1672_v2  ;;  %v9546_v53 = vpop.f32.mrf.mxu1  ;;  %v9507_v30 = vpop.f32.mrf.mxu0 }
 0x162   :  { %v1331_v57 = vld [vmem:[#allocation5 + $0x25a0] sm:$0xff]  ;;  %9870 = vmatprep.mubr.bf16.mxu1 %v16431_v13 }
 0x163   :  { %v16412_v60 = vld [vmem:[#allocation2 + $0x40] sm:$0xff]  ;;  %v14944_v3 = vcombine.high %v1327_v56, %v1331_v57  ;;  %9799 = vmatprep.subr.bf16.mxu0 %v14816_v6  ;;  %v14943_v21 = vcombine.low %v1327_v56, %v1331_v57  ;;  %v16434_v24 = vadd.f32 %v9544_v15, %v9504_v14  ;;  %v16438_v34 = vadd.f32 %v9546_v53, %v9506_v25  ;;  %v9548_v35 = vpop.f32.mrf.mxu1  ;;  %v9508_v37 = vpop.f32.mrf.mxu0 }
 0x164   :  { %v1191_v4 = vld [vmem:[#allocation5 + $0x2140] sm:$0xff]  ;;  %v16426_v9 = vcombine.high %v16412_v60, %v16412_v60  ;;  %9800 = vmatpush1.bf16.msra.mxu0 %v14815_v17 }
 0x165   :  { %v1195_v5 = vld [vmem:[#allocation5 + $0x2160] sm:$0xff]  ;;  %9840 = vmatprep.subr.bf16.mxu1 %v14944_v3  ;;  %v9549_v44 = vpop.f32.mrf.mxu1 }
 0x166   :  { %v1319_v11 = vld [vmem:[#allocation5 + $0x2540] sm:$0xff]  ;;  %v14808_v23 = vcombine.high %v1191_v4, %v1195_v5  ;;  %9829 = vmatprep.mubr.bf16.mxu0 %v16426_v9  ;;  %v14807_v36 = vcombine.low %v1191_v4, %v1195_v5  ;;  %9841 = vmatpush1.bf16.msra.mxu1 %v14943_v21 }
 0x167   :  { %v1323_v12 = vld [vmem:[#allocation5 + $0x2560] sm:$0xff] }
 0x168   :  { %v14936_v26 = vcombine.high %v1319_v11, %v1323_v12  ;;  %v1183_v27 = vld [vmem:[#allocation5 + $0x2100] sm:$0xff]  ;;  %9801 = vmatprep.subr.bf16.mxu0 %v14808_v23  ;;  %v14935_v41 = vcombine.low %v1319_v11, %v1323_v12 }
 0x169   :  { %v1187_v54 = vld [vmem:[#allocation5 + $0x2120] sm:$0xff]  ;;  %9802 = vmatpush1.bf16.msra.mxu0 %v14807_v36 }
 0x16a   :  { %v1311_v31 = vld [vmem:[#allocation5 + $0x2500] sm:$0xff]  ;;  %v14800_v43 = vcombine.high %v1183_v27, %v1187_v54  ;;  %9842 = vmatprep.subr.bf16.mxu1 %v14936_v26  ;;  %v14799_v52 = vcombine.low %v1183_v27, %v1187_v54 }
 0x16b   :  { %v1315_v33 = vld [vmem:[#allocation5 + $0x2520] sm:$0xff]  ;;  %9843 = vmatpush1.bf16.msra.mxu1 %v14935_v41 }
 0x16c   :  { %v14928_v46 = vcombine.high %v1311_v31, %v1315_v33  ;;  %v1175_v47 = vld [vmem:[#allocation5 + $0x20c0] sm:$0xff]  ;;  %9803 = vmatprep.subr.bf16.mxu0 %v14800_v43  ;;  %v14927_v56 = vcombine.low %v1311_v31, %v1315_v33 }
 0x16d   :  { %v1179_v48 = vld [vmem:[#allocation5 + $0x20e0] sm:$0xff]  ;;  %9804 = vmatpush1.bf16.msra.mxu0 %v14799_v52 }
 0x16e   :  { %v1303_v49 = vld [vmem:[#allocation5 + $0x24c0] sm:$0xff]  ;;  %v14792_v57 = vcombine.high %v1175_v47, %v1179_v48  ;;  %9844 = vmatprep.subr.bf16.mxu1 %v14928_v46  ;;  %v14791_v3 = vcombine.low %v1175_v47, %v1179_v48 }
 0x16f   :  { %v1307_v51 = vld [vmem:[#allocation5 + $0x24e0] sm:$0xff]  ;;  %9845 = vmatpush1.bf16.msra.mxu1 %v14927_v56 }
 0x170   :  { %v14920_v61 = vcombine.high %v1303_v49, %v1307_v51  ;;  %v1167_v63 = vld [vmem:[#allocation5 + $0x2080] sm:$0xff]  ;;  %9805 = vmatprep.subr.bf16.mxu0 %v14792_v57  ;;  %v14919_v4 = vcombine.low %v1303_v49, %v1307_v51 }
 0x171   :  { %v1171_v1 = vld [vmem:[#allocation5 + $0x20a0] sm:$0xff]  ;;  %9806 = vmatpush1.bf16.msra.mxu0 %v14791_v3 }
 0x172   :  { %v1295_v6 = vld [vmem:[#allocation5 + $0x2480] sm:$0xff]  ;;  %v14784_v5 = vcombine.high %v1167_v63, %v1171_v1  ;;  %9846 = vmatprep.subr.bf16.mxu1 %v14920_v61  ;;  %v14783_v17 = vcombine.low %v1167_v63, %v1171_v1 }
 0x173   :  { %v1299_v2 = vld [vmem:[#allocation5 + $0x24a0] sm:$0xff]  ;;  %9847 = vmatpush1.bf16.msra.mxu1 %v14919_v4 }
 0x174   :  { %v14912_v10 = vcombine.high %v1295_v6, %v1299_v2  ;;  %v1159_v11 = vld [vmem:[#allocation5 + $0x2040] sm:$0xff]  ;;  %9807 = vmatprep.subr.bf16.mxu0 %v14784_v5  ;;  %v14911_v18 = vcombine.low %v1295_v6, %v1299_v2 }
 0x175   :  { %v1163_v12 = vld [vmem:[#allocation5 + $0x2060] sm:$0xff]  ;;  %9808 = vmatpush1.bf16.msra.mxu0 %v14783_v17 }
 0x176   :  { %v1287_v14 = vld [vmem:[#allocation5 + $0x2440] sm:$0xff]  ;;  %v14776_v21 = vcombine.high %v1159_v11, %v1163_v12  ;;  %9848 = vmatprep.subr.bf16.mxu1 %v14912_v10  ;;  %v14775_v54 = vcombine.low %v1159_v11, %v1163_v12 }
 0x177   :  { %v1291_v15 = vld [vmem:[#allocation5 + $0x2460] sm:$0xff]  ;;  %9849 = vmatpush1.bf16.msra.mxu1 %v14911_v18 }
 0x178   :  { %v14904_v23 = vcombine.high %v1287_v14, %v1291_v15  ;;  %v1151_v25 = vld [vmem:[#allocation5 + $0x2000] sm:$0xff]  ;;  %9809 = vmatprep.subr.bf16.mxu0 %v14776_v21  ;;  %v14903_v30 = vcombine.low %v1287_v14, %v1291_v15 }
 0x179   :  { %v1155_v53 = vld [vmem:[#allocation5 + $0x2020] sm:$0xff]  ;;  %9810 = vmatpush1.bf16.msra.mxu0 %v14775_v54 }
 0x17a   :  { %v1279_v26 = vld [vmem:[#allocation5 + $0x2400] sm:$0xff]  ;;  %v14768_v31 = vcombine.high %v1151_v25, %v1155_v53  ;;  %9850 = vmatprep.subr.bf16.mxu1 %v14904_v23  ;;  %v14767_v43 = vcombine.low %v1151_v25, %v1155_v53 }
 0x17b   :  { %v1283_v27 = vld [vmem:[#allocation5 + $0x2420] sm:$0xff]  ;;  %9851 = vmatpush1.bf16.msra.mxu1 %v14903_v30 }
 0x17c   :  { %v14896_v33 = vcombine.high %v1279_v26, %v1283_v27  ;;  %v1271_v35 = vld [vmem:[#allocation5 + $0x23c0] sm:$0xff]  ;;  %9811 = vmatprep.subr.bf16.mxu0 %v14768_v31  ;;  %v14895_v44 = vcombine.low %v1279_v26, %v1283_v27 }
 0x17d   :  { %v1275_v36 = vld [vmem:[#allocation5 + $0x23e0] sm:$0xff]  ;;  %9812 = vmatpush1.bf16.msra.mxu0 %v14767_v43 }
 0x17e   :  { %v1399_v37 = vld [vmem:[#allocation5 + $0x27c0] sm:$0xff]  ;;  %v14888_v46 = vcombine.high %v1271_v35, %v1275_v36  ;;  %9852 = vmatprep.subr.bf16.mxu1 %v14896_v33  ;;  %v14887_v56 = vcombine.low %v1271_v35, %v1275_v36 }
 0x17f   :  { %v1403_v41 = vld [vmem:[#allocation5 + $0x27e0] sm:$0xff]  ;;  %9853 = vmatpush1.bf16.msra.mxu1 %v14895_v44 }
 0x180   :  { %v15016_v47 = vcombine.high %v1399_v37, %v1403_v41  ;;  %v1263_v48 = vld [vmem:[#allocation5 + $0x2380] sm:$0xff]  ;;  %9813 = vmatprep.subr.bf16.mxu0 %v14888_v46  ;;  %v15015_v57 = vcombine.low %v1399_v37, %v1403_v41 }
 0x181   :  { %v1267_v49 = vld [vmem:[#allocation5 + $0x23a0] sm:$0xff]  ;;  %9814 = vmatpush2.bf16.msra.mxu0 %v14887_v56 }
 0x182   :  { %v1391_v51 = vld [vmem:[#allocation5 + $0x2780] sm:$0xff]  ;;  %v14880_v61 = vcombine.high %v1263_v48, %v1267_v49  ;;  %9854 = vmatprep.subr.bf16.mxu1 %v15016_v47  ;;  %v14879_v4 = vcombine.low %v1263_v48, %v1267_v49 }
 0x183   :  { %v1395_v52 = vld [vmem:[#allocation5 + $0x27a0] sm:$0xff]  ;;  %9855 = vmatpush2.bf16.msra.mxu1 %v15015_v57 }
 0x184   :  { %v15008_v63 = vcombine.high %v1391_v51, %v1395_v52  ;;  %v1255_v1 = vld [vmem:[#allocation5 + $0x2340] sm:$0xff]  ;;  %9815 = vmatprep.subr.bf16.mxu0 %v14880_v61  ;;  %v15007_v5 = vcombine.low %v1391_v51, %v1395_v52 }
 0x185   :  { %v1259_v6 = vld [vmem:[#allocation5 + $0x2360] sm:$0xff]  ;;  %9816 = vmatpush2.bf16.msra.mxu0 %v14879_v4 }
 0x186   :  { %v1383_v2 = vld [vmem:[#allocation5 + $0x2740] sm:$0xff]  ;;  %v14872_v10 = vcombine.high %v1255_v1, %v1259_v6  ;;  %9856 = vmatprep.subr.bf16.mxu1 %v15008_v63  ;;  %v14871_v18 = vcombine.low %v1255_v1, %v1259_v6 }
 0x187   :  { %v1387_v3 = vld [vmem:[#allocation5 + $0x2760] sm:$0xff]  ;;  %9857 = vmatpush2.bf16.msra.mxu1 %v15007_v5 }
 0x188   :  { %v15000_v11 = vcombine.high %v1383_v2, %v1387_v3  ;;  %v1247_v12 = vld [vmem:[#allocation5 + $0x2300] sm:$0xff]  ;;  %9817 = vmatprep.subr.bf16.mxu0 %v14872_v10  ;;  %v14999_v21 = vcombine.low %v1383_v2, %v1387_v3 }
 0x189   :  { %v1251_v14 = vld [vmem:[#allocation5 + $0x2320] sm:$0xff]  ;;  %9818 = vmatpush2.bf16.msra.mxu0 %v14871_v18 }
 0x18a   :  { %v1375_v15 = vld [vmem:[#allocation5 + $0x2700] sm:$0xff]  ;;  %v14864_v23 = vcombine.high %v1247_v12, %v1251_v14  ;;  %9858 = vmatprep.subr.bf16.mxu1 %v15000_v11  ;;  %v14863_v30 = vcombine.low %v1247_v12, %v1251_v14 }
 0x18b   :  { %v1379_v17 = vld [vmem:[#allocation5 + $0x2720] sm:$0xff]  ;;  %9859 = vmatpush2.bf16.msra.mxu1 %v14999_v21 }
 0x18c   :  { %v14992_v25 = vcombine.high %v1375_v15, %v1379_v17  ;;  %v1239_v53 = vld [vmem:[#allocation5 + $0x22c0] sm:$0xff]  ;;  %9819 = vmatprep.subr.bf16.mxu0 %v14864_v23  ;;  %v14991_v31 = vcombine.low %v1375_v15, %v1379_v17 }
 0x18d   :  { %v1243_v26 = vld [vmem:[#allocation5 + $0x22e0] sm:$0xff]  ;;  %9820 = vmatpush2.bf16.msra.mxu0 %v14863_v30 }
 0x18e   :  { %v1367_v27 = vld [vmem:[#allocation5 + $0x26c0] sm:$0xff]  ;;  %v14856_v33 = vcombine.high %v1239_v53, %v1243_v26  ;;  %9860 = vmatprep.subr.bf16.mxu1 %v14992_v25  ;;  %v14855_v44 = vcombine.low %v1239_v53, %v1243_v26 }
 0x18f   :  { %v1371_v54 = vld [vmem:[#allocation5 + $0x26e0] sm:$0xff]  ;;  %9861 = vmatpush2.bf16.msra.mxu1 %v14991_v31 }
 0x190   :  { %v14984_v35 = vcombine.high %v1367_v27, %v1371_v54  ;;  %v1231_v36 = vld [vmem:[#allocation5 + $0x2280] sm:$0xff]  ;;  %9821 = vmatprep.subr.bf16.mxu0 %v14856_v33  ;;  %v14983_v46 = vcombine.low %v1367_v27, %v1371_v54  ;;  %v16442_v54 = vcombine.low %v16412_v60, %v16412_v60  ;;  %v16444_v33 = vld [vmem:[#allocation2 + $0x50] sm:$0xff] }
 0x191   :  { %v1235_v37 = vld [vmem:[#allocation5 + $0x22a0] sm:$0xff]  ;;  %9822 = vmatpush2.bf16.msra.mxu0 %v14855_v44 }
 0x192   :  { %v1359_v41 = vld [vmem:[#allocation5 + $0x2680] sm:$0xff]  ;;  %v14848_v47 = vcombine.high %v1231_v36, %v1235_v37  ;;  %9862 = vmatprep.subr.bf16.mxu1 %v14984_v35  ;;  %v14847_v57 = vcombine.low %v1231_v36, %v1235_v37  ;;  %v16448_v35 = vcombine.low %v16420_v0, %v16420_v0  ;;  %v16450_v37 = vld [vmem:[#allocation2 + $0x58] sm:$0xff] }
 0x193   :  { %v1363_v43 = vld [vmem:[#allocation5 + $0x26a0] sm:$0xff]  ;;  %9863 = vmatpush2.bf16.msra.mxu1 %v14983_v46 }
 0x194   :  { %v14976_v48 = vcombine.high %v1359_v41, %v1363_v43  ;;  %v1223_v49 = vld [vmem:[#allocation5 + $0x2240] sm:$0xff]  ;;  %9823 = vmatprep.subr.bf16.mxu0 %v14848_v47  ;;  %v14975_v61 = vcombine.low %v1359_v41, %v1363_v43  ;;  %v16454_v47 = vcombine.high %v16444_v33, %v16444_v33 }
 0x195   :  { %v1227_v51 = vld [vmem:[#allocation5 + $0x2260] sm:$0xff]  ;;  %9824 = vmatpush2.bf16.msra.mxu0 %v14847_v57 }
 0x196   :  { %v1351_v52 = vld [vmem:[#allocation5 + $0x2640] sm:$0xff]  ;;  %v14840_v63 = vcombine.high %v1223_v49, %v1227_v51  ;;  %9864 = vmatprep.subr.bf16.mxu1 %v14976_v48  ;;  %v14839_v5 = vcombine.low %v1223_v49, %v1227_v51  ;;  %v16459_v51 = vcombine.high %v16450_v37, %v16450_v37 }
 0x197   :  { %v1355_v56 = vld [vmem:[#allocation5 + $0x2660] sm:$0xff]  ;;  %9865 = vmatpush2.bf16.msra.mxu1 %v14975_v61 }
 0x198   :  { %v14968_v1 = vcombine.high %v1351_v52, %v1355_v56  ;;  %v1215_v6 = vld [vmem:[#allocation5 + $0x2200] sm:$0xff]  ;;  %9825 = vmatprep.subr.bf16.mxu0 %v14840_v63  ;;  %v14967_v10 = vcombine.low %v1351_v52, %v1355_v56 }
 0x199   :  { %v1219_v2 = vld [vmem:[#allocation5 + $0x2220] sm:$0xff]  ;;  %9826 = vmatpush2.bf16.msra.mxu0 %v14839_v5 }
 0x19a   :  { %v1343_v3 = vld [vmem:[#allocation5 + $0x2600] sm:$0xff]  ;;  %v14832_v11 = vcombine.high %v1215_v6, %v1219_v2  ;;  %9866 = vmatprep.subr.bf16.mxu1 %v14968_v1  ;;  %v14831_v21 = vcombine.low %v1215_v6, %v1219_v2 }
 0x19b   :  { %v1347_v4 = vld [vmem:[#allocation5 + $0x2620] sm:$0xff]  ;;  %9867 = vmatpush2.bf16.msra.mxu1 %v14967_v10 }
 0x19c   :  { %v14960_v12 = vcombine.high %v1343_v3, %v1347_v4  ;;  %v1463_v14 = vld [vmem:[#allocation5 + $0x29c0] sm:$0xff]  ;;  %9827 = vmatprep.subr.bf16.mxu0 %v14832_v11  ;;  %v14959_v23 = vcombine.low %v1343_v3, %v1347_v4 }
 0x19d   :  { %v1467_v15 = vld [vmem:[#allocation5 + $0x29e0] sm:$0xff]  ;;  %9828 = vmatpush2.bf16.msra.mxu0 %v14831_v21  ;;  %v9585_v48 = vpop.f32.mrf.mxu0 }
 0x19e   :  { %v1591_v17 = vld [vmem:[#allocation5 + $0x2dc0] sm:$0xff]  ;;  %v15080_v25 = vcombine.high %v1463_v14, %v1467_v15  ;;  %9868 = vmatprep.subr.bf16.mxu1 %v14960_v12  ;;  %v15079_v36 = vcombine.low %v1463_v14, %v1467_v15  ;;  %v9586_v52 = vadd.f32 %v9585_v48, %v16434_v24 }
 0x19f   :  { %v1595_v18 = vld [vmem:[#allocation5 + $0x2de0] sm:$0xff]  ;;  %9869 = vmatpush2.bf16.msra.mxu1 %v14959_v23  ;;  %v9626_v56 = vpop.f32.mrf.mxu1  ;;  %v9587_v61 = vpop.f32.mrf.mxu0 }
 0x1a0   :  { %v15208_v53 = vcombine.high %v1591_v17, %v1595_v18  ;;  %v1455_v26 = vld [vmem:[#allocation5 + $0x2980] sm:$0xff]  ;;  %9879 = vmatprep.subr.bf16.mxu0 %v15080_v25  ;;  %v15207_v41 = vcombine.low %v1591_v17, %v1595_v18  ;;  %9830 = vmatmul.mubr.bf16.vlgmr.msra.gmra.mxu0 %v16442_v54  ;;  %v16463_v6 = vadd.f32 %v9626_v56, %v9586_v52 }
 0x1a1   :  { %v1459_v27 = vld [vmem:[#allocation5 + $0x29a0] sm:$0xff]  ;;  %9880 = vmatpush1.bf16.msra.mxu0 %v15079_v36  ;;  %v9588_v2 = vadd.f32 %v9587_v61, %v16438_v34  ;;  %v9628_v3 = vpop.f32.mrf.mxu1  ;;  %9911 = vmatprep.mubr.bf16.mxu0 %v16454_v47  ;;  %v9589_v24 = vpop.f32.mrf.mxu0 }
 0x1a2   :  { %v1583_v30 = vld [vmem:[#allocation5 + $0x2d80] sm:$0xff]  ;;  %v15072_v43 = vcombine.high %v1455_v26, %v1459_v27  ;;  %9920 = vmatprep.subr.bf16.mxu1 %v15208_v53  ;;  %9871 = vmatmul.mubr.bf16.vlgmr.msra.gmra.mxu1 %v16448_v35  ;;  %v15071_v57 = vcombine.low %v1455_v26, %v1459_v27 }
 0x1a3   :  { %v1587_v31 = vld [vmem:[#allocation5 + $0x2da0] sm:$0xff]  ;;  %9921 = vmatpush1.bf16.msra.mxu1 %v15207_v41  ;;  %9952 = vmatprep.mubr.bf16.mxu1 %v16459_v51  ;;  %v16468_v14 = vadd.f32 %v9628_v3, %v9588_v2  ;;  %v9630_v15 = vpop.f32.mrf.mxu1  ;;  %v9590_v18 = vpop.f32.mrf.mxu0 }
 0x1a4   :  { %v15200_v44 = vcombine.high %v1583_v30, %v1587_v31  ;;  %v1447_v60 = vld [vmem:[#allocation5 + $0x2940] sm:$0xff]  ;;  %9881 = vmatprep.subr.bf16.mxu0 %v15072_v43  ;;  %v15199_v63 = vcombine.low %v1583_v30, %v1587_v31 }
 0x1a5   :  { %v1451_v46 = vld [vmem:[#allocation5 + $0x2960] sm:$0xff]  ;;  %9882 = vmatpush1.bf16.msra.mxu0 %v15071_v57  ;;  %v9631_v23 = vpop.f32.mrf.mxu1 }
 0x1a6   :  { %v1575_v0 = vld [vmem:[#allocation5 + $0x2d40] sm:$0xff]  ;;  %v15064_v1 = vcombine.high %v1447_v60, %v1451_v46  ;;  %9922 = vmatprep.subr.bf16.mxu1 %v15200_v44  ;;  %v15063_v17 = vcombine.low %v1447_v60, %v1451_v46 }
 0x1a7   :  { %v1579_v49 = vld [vmem:[#allocation5 + $0x2d60] sm:$0xff]  ;;  %9923 = vmatpush1.bf16.msra.mxu1 %v15199_v63 }
 0x1a8   :  { %v15192_v4 = vcombine.high %v1575_v0, %v1579_v49  ;;  %v1439_v5 = vld [vmem:[#allocation5 + $0x2900] sm:$0xff]  ;;  %9883 = vmatprep.subr.bf16.mxu0 %v15064_v1  ;;  %v15191_v34 = vcombine.low %v1575_v0, %v1579_v49 }
 0x1a9   :  { %v1443_v10 = vld [vmem:[#allocation5 + $0x2920] sm:$0xff]  ;;  %9884 = vmatpush1.bf16.msra.mxu0 %v15063_v17 }
 0x1aa   :  { %v1567_v11 = vld [vmem:[#allocation5 + $0x2d00] sm:$0xff]  ;;  %v15056_v21 = vcombine.high %v1439_v5, %v1443_v10  ;;  %9924 = vmatprep.subr.bf16.mxu1 %v15192_v4  ;;  %v15055_v31 = vcombine.low %v1439_v5, %v1443_v10 }
 0x1ab   :  { %v1571_v12 = vld [vmem:[#allocation5 + $0x2d20] sm:$0xff]  ;;  %9925 = vmatpush1.bf16.msra.mxu1 %v15191_v34 }
 0x1ac   :  { %v15184_v25 = vcombine.high %v1567_v11, %v1571_v12  ;;  %v1431_v53 = vld [vmem:[#allocation5 + $0x28c0] sm:$0xff]  ;;  %9885 = vmatprep.subr.bf16.mxu0 %v15056_v21  ;;  %v15183_v36 = vcombine.low %v1567_v11, %v1571_v12 }
 0x1ad   :  { %v1435_v26 = vld [vmem:[#allocation5 + $0x28e0] sm:$0xff]  ;;  %9886 = vmatpush1.bf16.msra.mxu0 %v15055_v31 }
 0x1ae   :  { %v1559_v27 = vld [vmem:[#allocation5 + $0x2cc0] sm:$0xff]  ;;  %v15048_v41 = vcombine.high %v1431_v53, %v1435_v26  ;;  %9926 = vmatprep.subr.bf16.mxu1 %v15184_v25  ;;  %v15047_v0 = vcombine.low %v1431_v53, %v1435_v26 }
 0x1af   :  { %v1563_v30 = vld [vmem:[#allocation5 + $0x2ce0] sm:$0xff]  ;;  %9927 = vmatpush1.bf16.msra.mxu1 %v15183_v36 }
 0x1b0   :  { %v15176_v43 = vcombine.high %v1559_v27, %v1563_v30  ;;  %v1423_v44 = vld [vmem:[#allocation5 + $0x2880] sm:$0xff]  ;;  %9887 = vmatprep.subr.bf16.mxu0 %v15048_v41  ;;  %v15175_v49 = vcombine.low %v1559_v27, %v1563_v30 }
 0x1b1   :  { %v1427_v60 = vld [vmem:[#allocation5 + $0x28a0] sm:$0xff]  ;;  %9888 = vmatpush1.bf16.msra.mxu0 %v15047_v0 }
 0x1b2   :  { %v1551_v46 = vld [vmem:[#allocation5 + $0x2c80] sm:$0xff]  ;;  %v15040_v52 = vcombine.high %v1423_v44, %v1427_v60  ;;  %9928 = vmatprep.subr.bf16.mxu1 %v15176_v43  ;;  %v15039_v2 = vcombine.low %v1423_v44, %v1427_v60 }
 0x1b3   :  { %v1555_v48 = vld [vmem:[#allocation5 + $0x2ca0] sm:$0xff]  ;;  %9929 = vmatpush1.bf16.msra.mxu1 %v15175_v49 }
 0x1b4   :  { %v15168_v56 = vcombine.high %v1551_v46, %v1555_v48  ;;  %v1415_v57 = vld [vmem:[#allocation5 + $0x2840] sm:$0xff]  ;;  %9889 = vmatprep.subr.bf16.mxu0 %v15040_v52  ;;  %v15167_v3 = vcombine.low %v1551_v46, %v1555_v48 }
 0x1b5   :  { %v1419_v61 = vld [vmem:[#allocation5 + $0x2860] sm:$0xff]  ;;  %9890 = vmatpush1.bf16.msra.mxu0 %v15039_v2 }
 0x1b6   :  { %v1543_v63 = vld [vmem:[#allocation5 + $0x2c40] sm:$0xff]  ;;  %v15032_v4 = vcombine.high %v1415_v57, %v1419_v61  ;;  %9930 = vmatprep.subr.bf16.mxu1 %v15168_v56  ;;  %v15031_v15 = vcombine.low %v1415_v57, %v1419_v61 }
 0x1b7   :  { %v1547_v1 = vld [vmem:[#allocation5 + $0x2c60] sm:$0xff]  ;;  %9931 = vmatpush1.bf16.msra.mxu1 %v15167_v3 }
 0x1b8   :  { %v15160_v5 = vcombine.high %v1543_v63, %v1547_v1  ;;  %v1407_v10 = vld [vmem:[#allocation5 + $0x2800] sm:$0xff]  ;;  %9891 = vmatprep.subr.bf16.mxu0 %v15032_v4  ;;  %v15159_v17 = vcombine.low %v1543_v63, %v1547_v1 }
 0x1b9   :  { %v1411_v24 = vld [vmem:[#allocation5 + $0x2820] sm:$0xff]  ;;  %9892 = vmatpush1.bf16.msra.mxu0 %v15031_v15 }
 0x1ba   :  { %v1535_v11 = vld [vmem:[#allocation5 + $0x2c00] sm:$0xff]  ;;  %v15024_v18 = vcombine.high %v1407_v10, %v1411_v24  ;;  %9932 = vmatprep.subr.bf16.mxu1 %v15160_v5  ;;  %v15023_v26 = vcombine.low %v1407_v10, %v1411_v24 }
 0x1bb   :  { %v1539_v12 = vld [vmem:[#allocation5 + $0x2c20] sm:$0xff]  ;;  %9933 = vmatpush1.bf16.msra.mxu1 %v15159_v17 }
 0x1bc   :  { %v15152_v34 = vcombine.high %v1535_v11, %v1539_v12  ;;  %v1527_v21 = vld [vmem:[#allocation5 + $0x2bc0] sm:$0xff]  ;;  %9893 = vmatprep.subr.bf16.mxu0 %v15024_v18  ;;  %v15151_v27 = vcombine.low %v1535_v11, %v1539_v12 }
 0x1bd   :  { %v1531_v23 = vld [vmem:[#allocation5 + $0x2be0] sm:$0xff]  ;;  %9894 = vmatpush1.bf16.msra.mxu0 %v15023_v26 }
 0x1be   :  { %v1655_v25 = vld [vmem:[#allocation5 + $0x2fc0] sm:$0xff]  ;;  %v15144_v30 = vcombine.high %v1527_v21, %v1531_v23  ;;  %9934 = vmatprep.subr.bf16.mxu1 %v15152_v34  ;;  %v15143_v60 = vcombine.low %v1527_v21, %v1531_v23 }
 0x1bf   :  { %v1659_v53 = vld [vmem:[#allocation5 + $0x2fe0] sm:$0xff]  ;;  %9935 = vmatpush1.bf16.msra.mxu1 %v15151_v27 }
 0x1c0   :  { %v15272_v31 = vcombine.high %v1655_v25, %v1659_v53  ;;  %v1519_v36 = vld [vmem:[#allocation5 + $0x2b80] sm:$0xff]  ;;  %9895 = vmatprep.subr.bf16.mxu0 %v15144_v30  ;;  %v15271_v46 = vcombine.low %v1655_v25, %v1659_v53 }
 0x1c1   :  { %v1523_v41 = vld [vmem:[#allocation5 + $0x2ba0] sm:$0xff]  ;;  %9896 = vmatpush2.bf16.msra.mxu0 %v15143_v60 }
 0x1c2   :  { %v1647_v43 = vld [vmem:[#allocation5 + $0x2f80] sm:$0xff]  ;;  %v15136_v48 = vcombine.high %v1519_v36, %v1523_v41  ;;  %9936 = vmatprep.subr.bf16.mxu1 %v15272_v31  ;;  %v15135_v61 = vcombine.low %v1519_v36, %v1523_v41 }
 0x1c3   :  { %v1651_v44 = vld [vmem:[#allocation5 + $0x2fa0] sm:$0xff]  ;;  %9937 = vmatpush2.bf16.msra.mxu1 %v15271_v46 }
 0x1c4   :  { %v15264_v0 = vcombine.high %v1647_v43, %v1651_v44  ;;  %v1511_v49 = vld [vmem:[#allocation5 + $0x2b40] sm:$0xff]  ;;  %9897 = vmatprep.subr.bf16.mxu0 %v15136_v48  ;;  %v15263_v63 = vcombine.low %v1647_v43, %v1651_v44 }
 0x1c5   :  { %v1515_v52 = vld [vmem:[#allocation5 + $0x2b60] sm:$0xff]  ;;  %9898 = vmatpush2.bf16.msra.mxu0 %v15135_v61 }
 0x1c6   :  { %v1639_v56 = vld [vmem:[#allocation5 + $0x2f40] sm:$0xff]  ;;  %v15128_v1 = vcombine.high %v1511_v49, %v1515_v52  ;;  %9938 = vmatprep.subr.bf16.mxu1 %v15264_v0  ;;  %v15127_v24 = vcombine.low %v1511_v49, %v1515_v52 }
 0x1c7   :  { %v1643_v57 = vld [vmem:[#allocation5 + $0x2f60] sm:$0xff]  ;;  %9939 = vmatpush2.bf16.msra.mxu1 %v15263_v63 }
 0x1c8   :  { %v15256_v2 = vcombine.high %v1639_v56, %v1643_v57  ;;  %v1503_v3 = vld [vmem:[#allocation5 + $0x2b00] sm:$0xff]  ;;  %9899 = vmatprep.subr.bf16.mxu0 %v15128_v1  ;;  %v15255_v11 = vcombine.low %v1639_v56, %v1643_v57 }
 0x1c9   :  { %v1507_v4 = vld [vmem:[#allocation5 + $0x2b20] sm:$0xff]  ;;  %9900 = vmatpush2.bf16.msra.mxu0 %v15127_v24 }
 0x1ca   :  { %v1631_v5 = vld [vmem:[#allocation5 + $0x2f00] sm:$0xff]  ;;  %v15120_v12 = vcombine.high %v1503_v3, %v1507_v4  ;;  %9940 = vmatprep.subr.bf16.mxu1 %v15256_v2  ;;  %v15119_v23 = vcombine.low %v1503_v3, %v1507_v4 }
 0x1cb   :  { %v1635_v10 = vld [vmem:[#allocation5 + $0x2f20] sm:$0xff]  ;;  %9941 = vmatpush2.bf16.msra.mxu1 %v15255_v11  ;;  %v184_v11 = vld [vmem:[#allocation5 + $0x1c8] sm:$0xff] }
 0x1cc   :  { %v15248_v15 = vcombine.high %v1631_v5, %v1635_v10  ;;  %v1495_v17 = vld [vmem:[#allocation5 + $0x2ac0] sm:$0xff]  ;;  %9901 = vmatprep.subr.bf16.mxu0 %v15120_v12  ;;  %v15247_v25 = vcombine.low %v1631_v5, %v1635_v10  ;;  %v188_v12 = vld [vmem:[#allocation5 + $0x1e8] sm:$0xff] }
 0x1cd   :  { %v1499_v18 = vld [vmem:[#allocation5 + $0x2ae0] sm:$0xff]  ;;  %9902 = vmatpush2.bf16.msra.mxu0 %v15119_v23 }
 0x1ce   :  { %v1623_v34 = vld [vmem:[#allocation5 + $0x2ec0] sm:$0xff]  ;;  %v15112_v53 = vcombine.high %v1495_v17, %v1499_v18  ;;  %9942 = vmatprep.subr.bf16.mxu1 %v15248_v15  ;;  %v15111_v41 = vcombine.low %v1495_v17, %v1499_v18  ;;  %v312_v15 = vld [vmem:[#allocation5 + $0x5c8] sm:$0xff] }
 0x1cf   :  { %v1627_v21 = vld [vmem:[#allocation5 + $0x2ee0] sm:$0xff]  ;;  %9943 = vmatpush2.bf16.msra.mxu1 %v15247_v25  ;;  %v316_v17 = vld [vmem:[#allocation5 + $0x5e8] sm:$0xff] }
 0x1d0   :  { %v15240_v26 = vcombine.high %v1623_v34, %v1627_v21  ;;  %v1487_v27 = vld [vmem:[#allocation5 + $0x2a80] sm:$0xff]  ;;  %9903 = vmatprep.subr.bf16.mxu0 %v15112_v53  ;;  %v15239_v43 = vcombine.low %v1623_v34, %v1627_v21  ;;  %v13802_v21 = vcombine.high %v184_v11, %v188_v12  ;;  %v13930_v23 = vcombine.high %v312_v15, %v316_v17  ;;  %v176_v25 = vld [vmem:[#allocation5 + $0x188] sm:$0xff] }
 0x1d1   :  { %v1491_v30 = vld [vmem:[#allocation5 + $0x2aa0] sm:$0xff]  ;;  %9904 = vmatpush2.bf16.msra.mxu0 %v15111_v41  ;;  %v180_v53 = vld [vmem:[#allocation5 + $0x1a8] sm:$0xff]  ;;  %v13929_v41 = vcombine.low %v312_v15, %v316_v17 }
 0x1d2   :  { %v1615_v31 = vld [vmem:[#allocation5 + $0x2e80] sm:$0xff]  ;;  %v15104_v44 = vcombine.high %v1487_v27, %v1491_v30  ;;  %9944 = vmatprep.subr.bf16.mxu1 %v15240_v26  ;;  %v15103_v52 = vcombine.low %v1487_v27, %v1491_v30  ;;  %v16472_v26 = vcombine.low %v16444_v33, %v16444_v33  ;;  %v304_v27 = vld [vmem:[#allocation5 + $0x588] sm:$0xff] }
 0x1d3   :  { %v1619_v36 = vld [vmem:[#allocation5 + $0x2ea0] sm:$0xff]  ;;  %9945 = vmatpush2.bf16.msra.mxu1 %v15239_v43  ;;  %v308_v30 = vld [vmem:[#allocation5 + $0x5a8] sm:$0xff]  ;;  %v13794_v43 = vcombine.high %v176_v25, %v180_v53 }
 0x1d4   :  { %v15232_v60 = vcombine.high %v1615_v31, %v1619_v36  ;;  %v1479_v46 = vld [vmem:[#allocation5 + $0x2a40] sm:$0xff]  ;;  %9905 = vmatprep.subr.bf16.mxu0 %v15104_v44  ;;  %v15231_v56 = vcombine.low %v1615_v31, %v1619_v36  ;;  %v16476_v31 = vcombine.low %v16450_v37, %v16450_v37  ;;  %v13801_v36 = vcombine.low %v184_v11, %v188_v12  ;;  %v296_v33 = vld [vmem:[#allocation5 + $0x548] sm:$0xff] }
 0x1d5   :  { %v1483_v48 = vld [vmem:[#allocation5 + $0x2a60] sm:$0xff]  ;;  %9906 = vmatpush2.bf16.msra.mxu0 %v15103_v52  ;;  %v13922_v44 = vcombine.high %v304_v27, %v308_v30  ;;  %v13793_v37 = vcombine.low %v176_v25, %v180_v53  ;;  %v156_v25 = vld [vmem:[#allocation5 + $0xe8] sm:$0xff] }
 0x1d6   :  { %v1607_v0 = vld [vmem:[#allocation5 + $0x2e40] sm:$0xff]  ;;  %v15096_v57 = vcombine.high %v1479_v46, %v1483_v48  ;;  %9946 = vmatprep.subr.bf16.mxu1 %v15232_v60  ;;  %v15095_v4 = vcombine.low %v1479_v46, %v1483_v48  ;;  %v168_v60 = vld [vmem:[#allocation5 + $0x148] sm:$0xff] }
 0x1d7   :  { %v1611_v49 = vld [vmem:[#allocation5 + $0x2e60] sm:$0xff]  ;;  %9947 = vmatpush2.bf16.msra.mxu1 %v15231_v56  ;;  %v172_v46 = vld [vmem:[#allocation5 + $0x168] sm:$0xff] }
 0x1d8   :  { %v15224_v61 = vcombine.high %v1607_v0, %v1611_v49  ;;  %v1471_v63 = vld [vmem:[#allocation5 + $0x2a00] sm:$0xff]  ;;  %9907 = vmatprep.subr.bf16.mxu0 %v15096_v57  ;;  %v15223_v5 = vcombine.low %v1607_v0, %v1611_v49  ;;  %v300_v0 = vld [vmem:[#allocation5 + $0x568] sm:$0xff]  ;;  %v13921_v57 = vcombine.low %v304_v27, %v308_v30  ;;  %v13785_v15 = vcombine.low %v168_v60, %v172_v46 }
 0x1d9   :  { %v1475_v1 = vld [vmem:[#allocation5 + $0x2a20] sm:$0xff]  ;;  %9908 = vmatpush2.bf16.msra.mxu0 %v15095_v4  ;;  %v160_v4 = vld [vmem:[#allocation5 + $0x108] sm:$0xff] }
 0x1da   :  { %v1599_v2 = vld [vmem:[#allocation5 + $0x2e00] sm:$0xff]  ;;  %v15088_v10 = vcombine.high %v1471_v63, %v1475_v1  ;;  %9948 = vmatprep.subr.bf16.mxu1 %v15224_v61  ;;  %v15087_v18 = vcombine.low %v1471_v63, %v1475_v1  ;;  %v13786_v61 = vcombine.high %v168_v60, %v172_v46  ;;  %v280_v53 = vld [vmem:[#allocation5 + $0x4c8] sm:$0xff] }
 0x1db   :  { %v1603_v3 = vld [vmem:[#allocation5 + $0x2e20] sm:$0xff]  ;;  %9949 = vmatpush2.bf16.msra.mxu1 %v15223_v5  ;;  %v164_v5 = vld [vmem:[#allocation5 + $0x128] sm:$0xff] }
 0x1dc   :  { %v15216_v24 = vcombine.high %v1599_v2, %v1603_v3  ;;  %9909 = vmatprep.subr.bf16.mxu0 %v15088_v10  ;;  %v15215_v34 = vcombine.low %v1599_v2, %v1603_v3  ;;  %v13914_v3 = vcombine.high %v296_v33, %v300_v0  ;;  %v288_v10 = vld [vmem:[#allocation5 + $0x508] sm:$0xff]  ;;  %v13777_v30 = vcombine.low %v160_v4, %v164_v5 }
 0x1dd   :  { %9910 = vmatpush2.bf16.msra.mxu0 %v15087_v18  ;;  %v13778_v18 = vcombine.high %v160_v4, %v164_v5  ;;  %v284_v27 = vld [vmem:[#allocation5 + $0x4e8] sm:$0xff] }
 0x1de   :  { %9950 = vmatprep.subr.bf16.mxu1 %v15216_v24  ;;  %9961 = vmatprep.subr.bf16.mxu0 %v13802_v21  ;;  %v9667_v48 = vpop.f32.mrf.mxu0  ;;  %v292_v24 = vld [vmem:[#allocation5 + $0x528] sm:$0xff] }
 0x1df   :  { %9951 = vmatpush2.bf16.msra.mxu1 %v15215_v34  ;;  %v9668_v49 = vadd.f32 %v9667_v48, %v16463_v6  ;;  %v13906_v21 = vcombine.high %v288_v10, %v292_v24  ;;  %v148_v60 = vld [vmem:[#allocation5 + $0xa8] sm:$0xff] }
 0x1e0   :  { %10002 = vmatprep.subr.bf16.mxu1 %v13930_v23  ;;  %9912 = vmatmul.mubr.bf16.vlgmr.msra.gmra.mxu0 %v16472_v26  ;;  %v9708_v52 = vpop.f32.mrf.mxu1  ;;  %v9669_v56 = vpop.f32.mrf.mxu0  ;;  %v152_v23 = vld [vmem:[#allocation5 + $0xc8] sm:$0xff] }
 0x1e1   :  { %9962 = vmatpush1.bf16.msra.mxu0 %v13801_v36  ;;  %v16481_v63 = vadd.f32 %v9708_v52, %v9668_v49  ;;  %v9670_v1 = vadd.f32 %v9669_v56, %v16468_v14  ;;  %9993 = vmatprep.mubr.bf16.mxu0 %v16324_v58  ;;  %v13913_v14 = vcombine.low %v296_v33, %v300_v0  ;;  %v272_v46 = vld [vmem:[#allocation5 + $0x488] sm:$0xff] }
 0x1e2   :  { %9953 = vmatmul.mubr.bf16.vlgmr.msra.gmra.mxu1 %v16476_v31  ;;  %9963 = vmatprep.subr.bf16.mxu0 %v13794_v43  ;;  %v9710_v2 = vpop.f32.mrf.mxu1  ;;  %v9671_v6 = vpop.f32.mrf.mxu0  ;;  %v13905_v36 = vcombine.low %v288_v10, %v292_v24  ;;  %v13898_v43 = vcombine.high %v280_v53, %v284_v27  ;;  %v276_v48 = vld [vmem:[#allocation5 + $0x4a8] sm:$0xff]  ;;  %v13769_v33 = vcombine.low %v152_v23, %v156_v25 }
 0x1e3   :  { %10003 = vmatpush1.bf16.msra.mxu1 %v13929_v41  ;;  %10034 = vmatprep.mubr.bf16.mxu1 %v16328_v59  ;;  %v16486_v11 = vadd.f32 %v9710_v2, %v9670_v1  ;;  %v13770_v41 = vcombine.high %v152_v23, %v156_v25  ;;  %v13897_v0 = vcombine.low %v280_v53, %v284_v27  ;;  %v140_v56 = vld [vmem:[#allocation5 + $0x68] sm:$0xff] }
 0x1e4   :  { %10004 = vmatprep.subr.bf16.mxu1 %v13922_v44  ;;  %v9712_v12 = vpop.f32.mrf.mxu1  ;;  %v9672_v17 = vpop.f32.mrf.mxu0  ;;  %v144_v44 = vld [vmem:[#allocation5 + $0x88] sm:$0xff]  ;;  %v13890_v52 = vcombine.high %v272_v46, %v276_v48  ;;  %v13889_v2 = vcombine.low %v272_v46, %v276_v48 }
 0x1e5   :  { %9964 = vmatpush1.bf16.msra.mxu0 %v13793_v37  ;;  %v13762_v49 = vcombine.high %v144_v44, %v148_v60  ;;  %v136_v37 = vld [vmem:[#allocation5 + $0x48] sm:$0xff]  ;;  %v13761_v1 = vcombine.low %v144_v44, %v148_v60 }
 0x1e6   :  { %9965 = vmatprep.subr.bf16.mxu0 %v13786_v61  ;;  %v9713_v34 = vpop.f32.mrf.mxu1  ;;  %v268_v61 = vld [vmem:[#allocation5 + $0x468] sm:$0xff]  ;;  %v13753_v12 = vcombine.low %v136_v37, %v140_v56 }
 0x1e7   :  { %10005 = vmatpush1.bf16.msra.mxu1 %v13921_v57  ;;  %v264_v57 = vld [vmem:[#allocation5 + $0x448] sm:$0xff] }
 0x1e8   :  { %10006 = vmatprep.subr.bf16.mxu1 %v13914_v3  ;;  %v13754_v3 = vcombine.high %v136_v37, %v140_v56  ;;  %v13882_v4 = vcombine.high %v264_v57, %v268_v61  ;;  %v128_v5 = vld [vmem:[#allocation5 + $0x8] sm:$0xff] }
 0x1e9   :  { %9966 = vmatpush1.bf16.msra.mxu0 %v13785_v15  ;;  %v132_v6 = vld [vmem:[#allocation5 + $0x28] sm:$0xff]  ;;  %v13881_v15 = vcombine.low %v264_v57, %v268_v61 }
 0x1ea   :  { %9967 = vmatprep.subr.bf16.mxu0 %v13778_v18  ;;  %v256_v10 = vld [vmem:[#allocation5 + $0x408] sm:$0xff]  ;;  %v13746_v17 = vcombine.high %v128_v5, %v132_v6  ;;  %v13745_v25 = vcombine.low %v128_v5, %v132_v6 }
 0x1eb   :  { %10007 = vmatpush1.bf16.msra.mxu1 %v13913_v14  ;;  %v260_v24 = vld [vmem:[#allocation5 + $0x428] sm:$0xff] }
 0x1ec   :  { %10008 = vmatprep.subr.bf16.mxu1 %v13906_v21  ;;  %v13874_v14 = vcombine.high %v256_v10, %v260_v24  ;;  %v248_v18 = vld [vmem:[#allocation5 + $0x3c8] sm:$0xff]  ;;  %v13873_v53 = vcombine.low %v256_v10, %v260_v24 }
 0x1ed   :  { %9968 = vmatpush1.bf16.msra.mxu0 %v13777_v30  ;;  %v252_v34 = vld [vmem:[#allocation5 + $0x3e8] sm:$0xff] }
 0x1ee   :  { %9969 = vmatprep.subr.bf16.mxu0 %v13770_v41  ;;  %v376_v21 = vld [vmem:[#allocation5 + $0x7c8] sm:$0xff]  ;;  %v13866_v27 = vcombine.high %v248_v18, %v252_v34  ;;  %v13865_v60 = vcombine.low %v248_v18, %v252_v34 }
 0x1ef   :  { %10009 = vmatpush1.bf16.msra.mxu1 %v13905_v36  ;;  %v380_v23 = vld [vmem:[#allocation5 + $0x7e8] sm:$0xff] }
 0x1f0   :  { %10010 = vmatprep.subr.bf16.mxu1 %v13898_v43  ;;  %v13994_v30 = vcombine.high %v376_v21, %v380_v23  ;;  %v240_v36 = vld [vmem:[#allocation5 + $0x388] sm:$0xff]  ;;  %v13993_v46 = vcombine.low %v376_v21, %v380_v23 }
 0x1f1   :  { %9970 = vmatpush1.bf16.msra.mxu0 %v13769_v33  ;;  %v244_v41 = vld [vmem:[#allocation5 + $0x3a8] sm:$0xff] }
 0x1f2   :  { %9971 = vmatprep.subr.bf16.mxu0 %v13762_v49  ;;  %v368_v43 = vld [vmem:[#allocation5 + $0x788] sm:$0xff]  ;;  %v13858_v48 = vcombine.high %v240_v36, %v244_v41  ;;  %v13857_v56 = vcombine.low %v240_v36, %v244_v41 }
 0x1f3   :  { %10011 = vmatpush1.bf16.msra.mxu1 %v13897_v0  ;;  %v372_v44 = vld [vmem:[#allocation5 + $0x7a8] sm:$0xff] }
 0x1f4   :  { %10012 = vmatprep.subr.bf16.mxu1 %v13890_v52  ;;  %v13986_v33 = vcombine.high %v368_v43, %v372_v44  ;;  %v232_v0 = vld [vmem:[#allocation5 + $0x348] sm:$0xff]  ;;  %v13985_v57 = vcombine.low %v368_v43, %v372_v44 }
 0x1f5   :  { %9972 = vmatpush1.bf16.msra.mxu0 %v13761_v1  ;;  %v236_v49 = vld [vmem:[#allocation5 + $0x368] sm:$0xff] }
 0x1f6   :  { %9973 = vmatprep.subr.bf16.mxu0 %v13754_v3  ;;  %v360_v52 = vld [vmem:[#allocation5 + $0x748] sm:$0xff]  ;;  %v13850_v61 = vcombine.high %v232_v0, %v236_v49  ;;  %v13849_v6 = vcombine.low %v232_v0, %v236_v49 }
 0x1f7   :  { %10013 = vmatpush1.bf16.msra.mxu1 %v13889_v2  ;;  %v364_v37 = vld [vmem:[#allocation5 + $0x768] sm:$0xff] }
 0x1f8   :  { %10014 = vmatprep.subr.bf16.mxu1 %v13882_v4  ;;  %v13978_v1 = vcombine.high %v360_v52, %v364_v37  ;;  %v224_v2 = vld [vmem:[#allocation5 + $0x308] sm:$0xff]  ;;  %v13977_v10 = vcombine.low %v360_v52, %v364_v37 }
 0x1f9   :  { %9974 = vmatpush1.bf16.msra.mxu0 %v13753_v12  ;;  %v228_v3 = vld [vmem:[#allocation5 + $0x328] sm:$0xff] }
 0x1fa   :  { %9975 = vmatprep.subr.bf16.mxu0 %v13746_v17  ;;  %v352_v4 = vld [vmem:[#allocation5 + $0x708] sm:$0xff]  ;;  %v13842_v24 = vcombine.high %v224_v2, %v228_v3  ;;  %v13841_v34 = vcombine.low %v224_v2, %v228_v3 }
 0x1fb   :  { %10015 = vmatpush1.bf16.msra.mxu1 %v13881_v15  ;;  %v356_v5 = vld [vmem:[#allocation5 + $0x728] sm:$0xff] }
 0x1fc   :  { %10016 = vmatprep.subr.bf16.mxu1 %v13874_v14  ;;  %v13970_v12 = vcombine.high %v352_v4, %v356_v5  ;;  %v216_v15 = vld [vmem:[#allocation5 + $0x2c8] sm:$0xff]  ;;  %v13969_v21 = vcombine.low %v352_v4, %v356_v5 }
 0x1fd   :  { %9976 = vmatpush1.bf16.msra.mxu0 %v13745_v25  ;;  %v220_v17 = vld [vmem:[#allocation5 + $0x2e8] sm:$0xff] }
 0x1fe   :  { %9977 = vmatprep.subr.bf16.mxu0 %v13866_v27  ;;  %v344_v14 = vld [vmem:[#allocation5 + $0x6c8] sm:$0xff]  ;;  %v13834_v23 = vcombine.high %v216_v15, %v220_v17  ;;  %v13833_v41 = vcombine.low %v216_v15, %v220_v17 }
 0x1ff   :  { %10017 = vmatpush1.bf16.msra.mxu1 %v13873_v53  ;;  %v348_v18 = vld [vmem:[#allocation5 + $0x6e8] sm:$0xff] }
 0x200   :  { %10018 = vmatprep.subr.bf16.mxu1 %v13994_v30  ;;  %v13962_v25 = vcombine.high %v344_v14, %v348_v18  ;;  %v208_v53 = vld [vmem:[#allocation5 + $0x288] sm:$0xff]  ;;  %v13961_v43 = vcombine.low %v344_v14, %v348_v18 }
 0x201   :  { %9978 = vmatpush2.bf16.msra.mxu0 %v13865_v60  ;;  %v212_v27 = vld [vmem:[#allocation5 + $0x2a8] sm:$0xff] }
 0x202   :  { %9979 = vmatprep.subr.bf16.mxu0 %v13858_v48  ;;  %v336_v30 = vld [vmem:[#allocation5 + $0x688] sm:$0xff]  ;;  %v13826_v44 = vcombine.high %v208_v53, %v212_v27  ;;  %v13825_v49 = vcombine.low %v208_v53, %v212_v27 }
 0x203   :  { %10019 = vmatpush2.bf16.msra.mxu1 %v13993_v46  ;;  %v340_v36 = vld [vmem:[#allocation5 + $0x6a8] sm:$0xff] }
 0x204   :  { %10020 = vmatprep.subr.bf16.mxu1 %v13986_v33  ;;  %v13954_v60 = vcombine.high %v336_v30, %v340_v36  ;;  %v200_v46 = vld [vmem:[#allocation5 + $0x248] sm:$0xff]  ;;  %v13953_v52 = vcombine.low %v336_v30, %v340_v36 }
 0x205   :  { %9980 = vmatpush2.bf16.msra.mxu0 %v13857_v56  ;;  %v204_v48 = vld [vmem:[#allocation5 + $0x268] sm:$0xff] }
 0x206   :  { %9981 = vmatprep.subr.bf16.mxu0 %v13850_v61  ;;  %v328_v33 = vld [vmem:[#allocation5 + $0x648] sm:$0xff]  ;;  %v13818_v37 = vcombine.high %v200_v46, %v204_v48  ;;  %v13817_v3 = vcombine.low %v200_v46, %v204_v48 }
 0x207   :  { %10021 = vmatpush2.bf16.msra.mxu1 %v13985_v57  ;;  %v332_v0 = vld [vmem:[#allocation5 + $0x668] sm:$0xff] }
 0x208   :  { %10022 = vmatprep.subr.bf16.mxu1 %v13978_v1  ;;  %v13946_v56 = vcombine.high %v328_v33, %v332_v0  ;;  %v192_v57 = vld [vmem:[#allocation5 + $0x208] sm:$0xff]  ;;  %v13945_v4 = vcombine.low %v328_v33, %v332_v0 }
 0x209   :  { %9982 = vmatpush2.bf16.msra.mxu0 %v13849_v6  ;;  %v196_v61 = vld [vmem:[#allocation5 + $0x228] sm:$0xff] }
 0x20a   :  { %9983 = vmatprep.subr.bf16.mxu0 %v13842_v24  ;;  %v320_v1 = vld [vmem:[#allocation5 + $0x608] sm:$0xff]  ;;  %v13810_v5 = vcombine.high %v192_v57, %v196_v61  ;;  %v13809_v17 = vcombine.low %v192_v57, %v196_v61 }
 0x20b   :  { %10023 = vmatpush2.bf16.msra.mxu1 %v13977_v10  ;;  %v324_v2 = vld [vmem:[#allocation5 + $0x628] sm:$0xff] }
 0x20c   :  { %10024 = vmatprep.subr.bf16.mxu1 %v13970_v12  ;;  %v13938_v6 = vcombine.high %v320_v1, %v324_v2  ;;  %v440_v10 = vld [vmem:[#allocation5 + $0x9c8] sm:$0xff]  ;;  %v13937_v14 = vcombine.low %v320_v1, %v324_v2 }
 0x20d   :  { %9984 = vmatpush2.bf16.msra.mxu0 %v13841_v34  ;;  %v444_v24 = vld [vmem:[#allocation5 + $0x9e8] sm:$0xff] }
 0x20e   :  { %9985 = vmatprep.subr.bf16.mxu0 %v13834_v23  ;;  %v568_v12 = vld [vmem:[#allocation5 + $0xdc8] sm:$0xff]  ;;  %v14058_v18 = vcombine.high %v440_v10, %v444_v24  ;;  %v14057_v27 = vcombine.low %v440_v10, %v444_v24 }
 0x20f   :  { %10025 = vmatpush2.bf16.msra.mxu1 %v13969_v21  ;;  %v572_v15 = vld [vmem:[#allocation5 + $0xde8] sm:$0xff] }
 0x210   :  { %10026 = vmatprep.subr.bf16.mxu1 %v13962_v25  ;;  %v14186_v34 = vcombine.high %v568_v12, %v572_v15  ;;  %v432_v21 = vld [vmem:[#allocation5 + $0x988] sm:$0xff]  ;;  %v14185_v30 = vcombine.low %v568_v12, %v572_v15 }
 0x211   :  { %9986 = vmatpush2.bf16.msra.mxu0 %v13833_v41  ;;  %v436_v23 = vld [vmem:[#allocation5 + $0x9a8] sm:$0xff] }
 0x212   :  { %9987 = vmatprep.subr.bf16.mxu0 %v13826_v44  ;;  %v560_v25 = vld [vmem:[#allocation5 + $0xd88] sm:$0xff]  ;;  %v14050_v36 = vcombine.high %v432_v21, %v436_v23 }
 0x213   :  { %10027 = vmatpush2.bf16.msra.mxu1 %v13961_v43  ;;  %v564_v53 = vld [vmem:[#allocation5 + $0xda8] sm:$0xff] }
 0x214   :  { %10028 = vmatprep.subr.bf16.mxu1 %v13954_v60  ;;  %v14178_v41 = vcombine.high %v560_v25, %v564_v53  ;;  %v424_v43 = vld [vmem:[#allocation5 + $0x948] sm:$0xff] }
 0x215   :  { %9988 = vmatpush2.bf16.msra.mxu0 %v13825_v49  ;;  %v428_v44 = vld [vmem:[#allocation5 + $0x968] sm:$0xff]  ;;  %v14049_v49 = vcombine.low %v432_v21, %v436_v23 }
 0x216   :  { %9989 = vmatprep.subr.bf16.mxu0 %v13818_v37  ;;  %v552_v46 = vld [vmem:[#allocation5 + $0xd48] sm:$0xff]  ;;  %v14177_v37 = vcombine.low %v560_v25, %v564_v53  ;;  %v14041_v12 = vcombine.low %v424_v43, %v428_v44 }
 0x217   :  { %10029 = vmatpush2.bf16.msra.mxu1 %v13953_v52  ;;  %v556_v48 = vld [vmem:[#allocation5 + $0xd68] sm:$0xff] }
 0x218   :  { %10030 = vmatprep.subr.bf16.mxu1 %v13946_v56  ;;  %v14042_v56 = vcombine.high %v424_v43, %v428_v44  ;;  %v14170_v2 = vcombine.high %v552_v46, %v556_v48  ;;  %v412_v21 = vld [vmem:[#allocation5 + $0x8e8] sm:$0xff] }
 0x219   :  { %9990 = vmatpush2.bf16.msra.mxu0 %v13817_v3  ;;  %v416_v3 = vld [vmem:[#allocation5 + $0x908] sm:$0xff] }
 0x21a   :  { %9991 = vmatprep.subr.bf16.mxu0 %v13810_v5  ;;  %v544_v5 = vld [vmem:[#allocation5 + $0xd08] sm:$0xff] }
 0x21b   :  { %10031 = vmatpush2.bf16.msra.mxu1 %v13945_v4  ;;  %v420_v4 = vld [vmem:[#allocation5 + $0x928] sm:$0xff] }
 0x21c   :  { %10032 = vmatprep.subr.bf16.mxu1 %v13938_v6  ;;  %v548_v6 = vld [vmem:[#allocation5 + $0xd28] sm:$0xff]  ;;  %v14033_v53 = vcombine.low %v416_v3, %v420_v4 }
 0x21d   :  { %9992 = vmatpush2.bf16.msra.mxu0 %v13809_v17  ;;  %v14034_v17 = vcombine.high %v416_v3, %v420_v4  ;;  %v536_v23 = vld [vmem:[#allocation5 + $0xcc8] sm:$0xff] }
 0x21e   :  { %10043 = vmatprep.subr.bf16.mxu0 %v14058_v18  ;;  %v9749_v60 = vpop.f32.mrf.mxu0  ;;  %v14162_v18 = vcombine.high %v544_v5, %v548_v6  ;;  %v540_v25 = vld [vmem:[#allocation5 + $0xce8] sm:$0xff] }
 0x21f   :  { %10033 = vmatpush2.bf16.msra.mxu1 %v13937_v14  ;;  %v9750_v33 = vadd.f32 %v9749_v60, %v16481_v63  ;;  %v404_v43 = vld [vmem:[#allocation5 + $0x8a8] sm:$0xff] }
 0x220   :  { %10084 = vmatprep.subr.bf16.mxu1 %v14186_v34  ;;  %9994 = vmatmul.mubr.bf16.vlgmr.msra.gmra.mxu0 %v16334_v16  ;;  %v9790_v0 = vpop.f32.mrf.mxu1  ;;  %v9751_v52 = vpop.f32.mrf.mxu0  ;;  %v408_v34 = vld [vmem:[#allocation5 + $0x8c8] sm:$0xff] }
 0x221   :  { %10044 = vmatpush1.bf16.msra.mxu0 %v14057_v27  ;;  %v16491_v57 = vadd.f32 %v9790_v0, %v9750_v33  ;;  %v9752_v61 = vadd.f32 %v9751_v52, %v16486_v11  ;;  %10075 = vmatprep.mubr.bf16.mxu0 %v16346_v28  ;;  %v14169_v11 = vcombine.low %v552_v46, %v556_v48  ;;  %v528_v44 = vld [vmem:[#allocation5 + $0xc88] sm:$0xff] }
 0x222   :  { %10035 = vmatmul.mubr.bf16.vlgmr.msra.gmra.mxu1 %v16340_v20  ;;  %10045 = vmatprep.subr.bf16.mxu0 %v14050_v36  ;;  %v9792_v1 = vpop.f32.mrf.mxu1  ;;  %v9753_v63 = vpop.f32.mrf.mxu0  ;;  %v14161_v27 = vcombine.low %v544_v5, %v548_v6  ;;  %v14154_v36 = vcombine.high %v536_v23, %v540_v25  ;;  %v532_v60 = vld [vmem:[#allocation5 + $0xca8] sm:$0xff]  ;;  %v14025_v46 = vcombine.low %v408_v34, %v412_v21 }
 0x223   :  { %10085 = vmatpush1.bf16.msra.mxu1 %v14185_v30  ;;  %10116 = vmatprep.mubr.bf16.mxu1 %v16351_v29  ;;  %v16496_v10 = vadd.f32 %v9792_v1, %v9752_v61  ;;  %v14026_v30 = vcombine.high %v408_v34, %v412_v21  ;;  %v14153_v48 = vcombine.low %v536_v23, %v540_v25  ;;  %v396_v52 = vld [vmem:[#allocation5 + $0x868] sm:$0xff] }
 0x224   :  { %10086 = vmatprep.subr.bf16.mxu1 %v14178_v41  ;;  %v9794_v24 = vpop.f32.mrf.mxu1  ;;  %v9754_v15 = vpop.f32.mrf.mxu0  ;;  %v400_v41 = vld [vmem:[#allocation5 + $0x888] sm:$0xff]  ;;  %v14146_v0 = vcombine.high %v528_v44, %v532_v60  ;;  %v14145_v1 = vcombine.low %v528_v44, %v532_v60 }
 0x225   :  { %10046 = vmatpush1.bf16.msra.mxu0 %v14049_v49  ;;  %v14018_v33 = vcombine.high %v400_v41, %v404_v43  ;;  %v392_v49 = vld [vmem:[#allocation5 + $0x848] sm:$0xff]  ;;  %v14017_v61 = vcombine.low %v400_v41, %v404_v43 }
 0x226   :  { %10047 = vmatprep.subr.bf16.mxu0 %v14042_v56  ;;  %v9795_v14 = vpop.f32.mrf.mxu1  ;;  %v524_v56 = vld [vmem:[#allocation5 + $0xc68] sm:$0xff]  ;;  %v14009_v24 = vcombine.low %v392_v49, %v396_v52 }
 0x227   :  { %10087 = vmatpush1.bf16.msra.mxu1 %v14177_v37  ;;  %v520_v37 = vld [vmem:[#allocation5 + $0xc48] sm:$0xff] }
 0x228   :  { %10088 = vmatprep.subr.bf16.mxu1 %v14170_v2  ;;  %v14010_v2 = vcombine.high %v392_v49, %v396_v52  ;;  %v14138_v3 = vcombine.high %v520_v37, %v524_v56  ;;  %v384_v4 = vld [vmem:[#allocation5 + $0x808] sm:$0xff] }
 0x229   :  { %10048 = vmatpush1.bf16.msra.mxu0 %v14041_v12  ;;  %v388_v63 = vld [vmem:[#allocation5 + $0x828] sm:$0xff]  ;;  %v14137_v12 = vcombine.low %v520_v37, %v524_v56 }
 0x22a   :  { %10049 = vmatprep.subr.bf16.mxu0 %v14034_v17  ;;  %v512_v5 = vld [vmem:[#allocation5 + $0xc08] sm:$0xff]  ;;  %v14002_v15 = vcombine.high %v384_v4, %v388_v63  ;;  %v14001_v21 = vcombine.low %v384_v4, %v388_v63 }
 0x22b   :  { %10089 = vmatpush1.bf16.msra.mxu1 %v14169_v11  ;;  %v516_v6 = vld [vmem:[#allocation5 + $0xc28] sm:$0xff] }
 0x22c   :  { %10090 = vmatprep.subr.bf16.mxu1 %v14162_v18  ;;  %v14130_v11 = vcombine.high %v512_v5, %v516_v6  ;;  %v504_v17 = vld [vmem:[#allocation5 + $0xbc8] sm:$0xff]  ;;  %v14129_v23 = vcombine.low %v512_v5, %v516_v6 }
 0x22d   :  { %10050 = vmatpush1.bf16.msra.mxu0 %v14033_v53  ;;  %v508_v14 = vld [vmem:[#allocation5 + $0xbe8] sm:$0xff] }
 0x22e   :  { %10051 = vmatprep.subr.bf16.mxu0 %v14026_v30  ;;  %v632_v18 = vld [vmem:[#allocation5 + $0xfc8] sm:$0xff]  ;;  %v14122_v25 = vcombine.high %v504_v17, %v508_v14  ;;  %v14121_v43 = vcombine.low %v504_v17, %v508_v14 }
 0x22f   :  { %10091 = vmatpush1.bf16.msra.mxu1 %v14161_v27  ;;  %v636_v34 = vld [vmem:[#allocation5 + $0xfe8] sm:$0xff] }
 0x230   :  { %10092 = vmatprep.subr.bf16.mxu1 %v14154_v36  ;;  %v14250_v53 = vcombine.high %v632_v18, %v636_v34  ;;  %v496_v27 = vld [vmem:[#allocation5 + $0xb88] sm:$0xff]  ;;  %v14249_v44 = vcombine.low %v632_v18, %v636_v34 }
 0x231   :  { %10052 = vmatpush1.bf16.msra.mxu0 %v14025_v46  ;;  %v500_v30 = vld [vmem:[#allocation5 + $0xba8] sm:$0xff] }
 0x232   :  { %10053 = vmatprep.subr.bf16.mxu0 %v14018_v33  ;;  %v624_v36 = vld [vmem:[#allocation5 + $0xf88] sm:$0xff]  ;;  %v14114_v60 = vcombine.high %v496_v27, %v500_v30  ;;  %v14113_v52 = vcombine.low %v496_v27, %v500_v30 }
 0x233   :  { %10093 = vmatpush1.bf16.msra.mxu1 %v14153_v48  ;;  %v628_v41 = vld [vmem:[#allocation5 + $0xfa8] sm:$0xff] }
 0x234   :  { %10094 = vmatprep.subr.bf16.mxu1 %v14146_v0  ;;  %v14242_v46 = vcombine.high %v624_v36, %v628_v41  ;;  %v488_v48 = vld [vmem:[#allocation5 + $0xb48] sm:$0xff]  ;;  %v14241_v37 = vcombine.low %v624_v36, %v628_v41 }
 0x235   :  { %10054 = vmatpush1.bf16.msra.mxu0 %v14017_v61  ;;  %v492_v33 = vld [vmem:[#allocation5 + $0xb68] sm:$0xff] }
 0x236   :  { %10055 = vmatprep.subr.bf16.mxu0 %v14010_v2  ;;  %v616_v0 = vld [vmem:[#allocation5 + $0xf48] sm:$0xff]  ;;  %v14106_v56 = vcombine.high %v488_v48, %v492_v33  ;;  %v14105_v63 = vcombine.low %v488_v48, %v492_v33 }
 0x237   :  { %10095 = vmatpush1.bf16.msra.mxu1 %v14145_v1  ;;  %v620_v49 = vld [vmem:[#allocation5 + $0xf68] sm:$0xff] }
 0x238   :  { %10096 = vmatprep.subr.bf16.mxu1 %v14138_v3  ;;  %v14234_v61 = vcombine.high %v616_v0, %v620_v49  ;;  %v480_v1 = vld [vmem:[#allocation5 + $0xb08] sm:$0xff]  ;;  %v14233_v5 = vcombine.low %v616_v0, %v620_v49 }
 0x239   :  { %10056 = vmatpush1.bf16.msra.mxu0 %v14009_v24  ;;  %v484_v2 = vld [vmem:[#allocation5 + $0xb28] sm:$0xff] }
 0x23a   :  { %10057 = vmatprep.subr.bf16.mxu0 %v14002_v15  ;;  %v608_v3 = vld [vmem:[#allocation5 + $0xf08] sm:$0xff]  ;;  %v14098_v6 = vcombine.high %v480_v1, %v484_v2  ;;  %v14097_v14 = vcombine.low %v480_v1, %v484_v2 }
 0x23b   :  { %10097 = vmatpush1.bf16.msra.mxu1 %v14137_v12  ;;  %v612_v4 = vld [vmem:[#allocation5 + $0xf28] sm:$0xff] }
 0x23c   :  { %10098 = vmatprep.subr.bf16.mxu1 %v14130_v11  ;;  %v14226_v24 = vcombine.high %v608_v3, %v612_v4  ;;  %v472_v12 = vld [vmem:[#allocation5 + $0xac8] sm:$0xff]  ;;  %v14225_v18 = vcombine.low %v608_v3, %v612_v4 }
 0x23d   :  { %10058 = vmatpush1.bf16.msra.mxu0 %v14001_v21  ;;  %v476_v15 = vld [vmem:[#allocation5 + $0xae8] sm:$0xff] }
 0x23e   :  { %10059 = vmatprep.subr.bf16.mxu0 %v14122_v25  ;;  %v600_v11 = vld [vmem:[#allocation5 + $0xec8] sm:$0xff]  ;;  %v14090_v34 = vcombine.high %v472_v12, %v476_v15  ;;  %v14089_v30 = vcombine.low %v472_v12, %v476_v15 }
 0x23f   :  { %10099 = vmatpush1.bf16.msra.mxu1 %v14129_v23  ;;  %v604_v17 = vld [vmem:[#allocation5 + $0xee8] sm:$0xff] }
 0x240   :  { %10100 = vmatprep.subr.bf16.mxu1 %v14250_v53  ;;  %v14218_v21 = vcombine.high %v600_v11, %v604_v17  ;;  %v464_v23 = vld [vmem:[#allocation5 + $0xa88] sm:$0xff]  ;;  %v14217_v36 = vcombine.low %v600_v11, %v604_v17 }
 0x241   :  { %10060 = vmatpush2.bf16.msra.mxu0 %v14121_v43  ;;  %v468_v25 = vld [vmem:[#allocation5 + $0xaa8] sm:$0xff] }
 0x242   :  { %10061 = vmatprep.subr.bf16.mxu0 %v14114_v60  ;;  %v592_v53 = vld [vmem:[#allocation5 + $0xe88] sm:$0xff]  ;;  %v14082_v41 = vcombine.high %v464_v23, %v468_v25  ;;  %v14081_v33 = vcombine.low %v464_v23, %v468_v25 }
 0x243   :  { %10101 = vmatpush2.bf16.msra.mxu1 %v14249_v44  ;;  %v596_v27 = vld [vmem:[#allocation5 + $0xea8] sm:$0xff] }
 0x244   :  { %10102 = vmatprep.subr.bf16.mxu1 %v14242_v46  ;;  %v14210_v43 = vcombine.high %v592_v53, %v596_v27  ;;  %v456_v44 = vld [vmem:[#allocation5 + $0xa48] sm:$0xff]  ;;  %v14209_v0 = vcombine.low %v592_v53, %v596_v27 }
 0x245   :  { %10062 = vmatpush2.bf16.msra.mxu0 %v14113_v52  ;;  %v460_v60 = vld [vmem:[#allocation5 + $0xa68] sm:$0xff] }
 0x246   :  { %10063 = vmatprep.subr.bf16.mxu0 %v14106_v56  ;;  %v584_v46 = vld [vmem:[#allocation5 + $0xe48] sm:$0xff]  ;;  %v14074_v49 = vcombine.high %v456_v44, %v460_v60  ;;  %v14073_v2 = vcombine.low %v456_v44, %v460_v60 }
 0x247   :  { %10103 = vmatpush2.bf16.msra.mxu1 %v14241_v37  ;;  %v588_v48 = vld [vmem:[#allocation5 + $0xe68] sm:$0xff] }
 0x248   :  { %10104 = vmatprep.subr.bf16.mxu1 %v14234_v61  ;;  %v14202_v52 = vcombine.high %v584_v46, %v588_v48  ;;  %v448_v37 = vld [vmem:[#allocation5 + $0xa08] sm:$0xff]  ;;  %v14201_v3 = vcombine.low %v584_v46, %v588_v48 }
 0x249   :  { %10064 = vmatpush2.bf16.msra.mxu0 %v14105_v63  ;;  %v452_v56 = vld [vmem:[#allocation5 + $0xa28] sm:$0xff] }
 0x24a   :  { %10065 = vmatprep.subr.bf16.mxu0 %v14098_v6  ;;  %v576_v61 = vld [vmem:[#allocation5 + $0xe08] sm:$0xff]  ;;  %v14066_v4 = vcombine.high %v448_v37, %v452_v56  ;;  %v14065_v15 = vcombine.low %v448_v37, %v452_v56 }
 0x24b   :  { %10105 = vmatpush2.bf16.msra.mxu1 %v14233_v5  ;;  %v580_v1 = vld [vmem:[#allocation5 + $0xe28] sm:$0xff] }
 0x24c   :  { %10106 = vmatprep.subr.bf16.mxu1 %v14226_v24  ;;  %v14194_v63 = vcombine.high %v576_v61, %v580_v1  ;;  %v696_v5 = vld [vmem:[#allocation5 + $0x11c8] sm:$0xff]  ;;  %v14193_v11 = vcombine.low %v576_v61, %v580_v1 }
 0x24d   :  { %10066 = vmatpush2.bf16.msra.mxu0 %v14097_v14  ;;  %v700_v6 = vld [vmem:[#allocation5 + $0x11e8] sm:$0xff] }
 0x24e   :  { %10067 = vmatprep.subr.bf16.mxu0 %v14090_v34  ;;  %v824_v24 = vld [vmem:[#allocation5 + $0x15c8] sm:$0xff]  ;;  %v14314_v17 = vcombine.high %v696_v5, %v700_v6  ;;  %v14313_v25 = vcombine.low %v696_v5, %v700_v6 }
 0x24f   :  { %10107 = vmatpush2.bf16.msra.mxu1 %v14225_v18  ;;  %v828_v12 = vld [vmem:[#allocation5 + $0x15e8] sm:$0xff] }
 0x250   :  { %10108 = vmatprep.subr.bf16.mxu1 %v14218_v21  ;;  %v14442_v14 = vcombine.high %v824_v24, %v828_v12  ;;  %v688_v18 = vld [vmem:[#allocation5 + $0x1188] sm:$0xff]  ;;  %v14441_v53 = vcombine.low %v824_v24, %v828_v12 }
 0x251   :  { %10068 = vmatpush2.bf16.msra.mxu0 %v14089_v30  ;;  %v692_v34 = vld [vmem:[#allocation5 + $0x11a8] sm:$0xff] }
 0x252   :  { %10069 = vmatprep.subr.bf16.mxu0 %v14082_v41  ;;  %v816_v21 = vld [vmem:[#allocation5 + $0x1588] sm:$0xff]  ;;  %v14306_v27 = vcombine.high %v688_v18, %v692_v34 }
 0x253   :  { %10109 = vmatpush2.bf16.msra.mxu1 %v14217_v36  ;;  %v820_v23 = vld [vmem:[#allocation5 + $0x15a8] sm:$0xff] }
 0x254   :  { %10110 = vmatprep.subr.bf16.mxu1 %v14210_v43  ;;  %v14434_v30 = vcombine.high %v816_v21, %v820_v23  ;;  %v680_v36 = vld [vmem:[#allocation5 + $0x1148] sm:$0xff] }
 0x255   :  { %10070 = vmatpush2.bf16.msra.mxu0 %v14081_v33  ;;  %v684_v41 = vld [vmem:[#allocation5 + $0x1168] sm:$0xff]  ;;  %v14305_v33 = vcombine.low %v688_v18, %v692_v34 }
 0x256   :  { %10071 = vmatprep.subr.bf16.mxu0 %v14074_v49  ;;  %v808_v44 = vld [vmem:[#allocation5 + $0x1548] sm:$0xff]  ;;  %v14433_v49 = vcombine.low %v816_v21, %v820_v23  ;;  %v14297_v24 = vcombine.low %v680_v36, %v684_v41 }
 0x257   :  { %10111 = vmatpush2.bf16.msra.mxu1 %v14209_v0  ;;  %v812_v60 = vld [vmem:[#allocation5 + $0x1568] sm:$0xff] }
 0x258   :  { %10112 = vmatprep.subr.bf16.mxu1 %v14202_v52  ;;  %v14298_v52 = vcombine.high %v680_v36, %v684_v41  ;;  %v14426_v1 = vcombine.high %v808_v44, %v812_v60  ;;  %v668_v18 = vld [vmem:[#allocation5 + $0x10e8] sm:$0xff] }
 0x259   :  { %10072 = vmatpush2.bf16.msra.mxu0 %v14073_v2  ;;  %v672_v2 = vld [vmem:[#allocation5 + $0x1108] sm:$0xff] }
 0x25a   :  { %10073 = vmatprep.subr.bf16.mxu0 %v14066_v4  ;;  %v800_v4 = vld [vmem:[#allocation5 + $0x1508] sm:$0xff] }
 0x25b   :  { %10113 = vmatpush2.bf16.msra.mxu1 %v14201_v3  ;;  %v676_v3 = vld [vmem:[#allocation5 + $0x1128] sm:$0xff] }
 0x25c   :  { %10114 = vmatprep.subr.bf16.mxu1 %v14194_v63  ;;  %v804_v63 = vld [vmem:[#allocation5 + $0x1528] sm:$0xff]  ;;  %v14289_v23 = vcombine.low %v672_v2, %v676_v3 }
 0x25d   :  { %10074 = vmatpush2.bf16.msra.mxu0 %v14065_v15  ;;  %v14290_v15 = vcombine.high %v672_v2, %v676_v3  ;;  %v792_v34 = vld [vmem:[#allocation5 + $0x14c8] sm:$0xff] }
 0x25e   :  { %10125 = vmatprep.subr.bf16.mxu0 %v14314_v17  ;;  %v14418_v17 = vcombine.high %v800_v4, %v804_v63  ;;  %v796_v21 = vld [vmem:[#allocation5 + $0x14e8] sm:$0xff] }
 0x25f   :  { %10115 = vmatpush2.bf16.msra.mxu1 %v14193_v11  ;;  %v660_v36 = vld [vmem:[#allocation5 + $0x10a8] sm:$0xff] }
 0x260   :  { %10166 = vmatprep.subr.bf16.mxu1 %v14442_v14  ;;  %v9831_v43 = vpop.f32.mrf.mxu0  ;;  %10076 = vmatmul.mubr.bf16.vlgmr.msra.gmra.mxu0 %v16360_v39  ;;  %v664_v14 = vld [vmem:[#allocation5 + $0x10c8] sm:$0xff] }
 0x261   :  { %v9832_v46 = vadd.f32 %v9831_v43, %v16491_v57  ;;  %10126 = vmatpush1.bf16.msra.mxu0 %v14313_v25  ;;  %10157 = vmatprep.mubr.bf16.mxu0 %v16370_v19  ;;  %v14417_v25 = vcombine.low %v800_v4, %v804_v63  ;;  %v784_v41 = vld [vmem:[#allocation5 + $0x1488] sm:$0xff] }
 0x262   :  { %v9872_v48 = vpop.f32.mrf.mxu1  ;;  %10117 = vmatmul.mubr.bf16.vlgmr.msra.gmra.mxu1 %v16364_v40  ;;  %v9833_v0 = vpop.f32.mrf.mxu0  ;;  %10127 = vmatprep.subr.bf16.mxu0 %v14306_v27  ;;  %v14410_v27 = vcombine.high %v792_v34, %v796_v21  ;;  %v788_v43 = vld [vmem:[#allocation5 + $0x14a8] sm:$0xff] }
 0x263   :  { %10167 = vmatpush1.bf16.msra.mxu1 %v14441_v53  ;;  %v16501_v37 = vadd.f32 %v9872_v48, %v9832_v46  ;;  %v9834_v56 = vadd.f32 %v9833_v0, %v16496_v10  ;;  %10198 = vmatprep.mubr.bf16.mxu1 %v16375_v22  ;;  %v14425_v10 = vcombine.low %v808_v44, %v812_v60  ;;  %v652_v0 = vld [vmem:[#allocation5 + $0x1068] sm:$0xff] }
 0x264   :  { %v9874_v61 = vpop.f32.mrf.mxu1  ;;  %10168 = vmatprep.subr.bf16.mxu1 %v14434_v30  ;;  %v9835_v57 = vpop.f32.mrf.mxu0  ;;  %v14282_v53 = vcombine.high %v664_v14, %v668_v18  ;;  %v656_v30 = vld [vmem:[#allocation5 + $0x1088] sm:$0xff]  ;;  %v14281_v44 = vcombine.low %v664_v14, %v668_v18  ;;  %v14409_v60 = vcombine.low %v792_v34, %v796_v21  ;;  %v14402_v48 = vcombine.high %v784_v41, %v788_v43 }
 0x265   :  { %v16506_v5 = vadd.f32 %v9874_v61, %v9834_v56  ;;  %10128 = vmatpush1.bf16.msra.mxu0 %v14305_v33  ;;  %v14274_v46 = vcombine.high %v656_v30, %v660_v36  ;;  %v648_v33 = vld [vmem:[#allocation5 + $0x1048] sm:$0xff]  ;;  %v14273_v56 = vcombine.low %v656_v30, %v660_v36  ;;  %v14401_v61 = vcombine.low %v784_v41, %v788_v43 }
 0x266   :  { %v9876_v6 = vpop.f32.mrf.mxu1  ;;  %v9836_v12 = vpop.f32.mrf.mxu0  ;;  %10129 = vmatprep.subr.bf16.mxu0 %v14298_v52  ;;  %v780_v52 = vld [vmem:[#allocation5 + $0x1468] sm:$0xff] }
 0x267   :  { %10169 = vmatpush1.bf16.msra.mxu1 %v14433_v49  ;;  %v776_v49 = vld [vmem:[#allocation5 + $0x1448] sm:$0xff]  ;;  %v14265_v6 = vcombine.low %v648_v33, %v652_v0 }
 0x268   :  { %v9877_v11 = vpop.f32.mrf.mxu1  ;;  %10170 = vmatprep.subr.bf16.mxu1 %v14426_v1  ;;  %v14266_v1 = vcombine.high %v648_v33, %v652_v0  ;;  %v14394_v2 = vcombine.high %v776_v49, %v780_v52  ;;  %v640_v3 = vld [vmem:[#allocation5 + $0x1008] sm:$0xff] }
 0x269   :  { %10130 = vmatpush1.bf16.msra.mxu0 %v14297_v24  ;;  %v644_v57 = vld [vmem:[#allocation5 + $0x1028] sm:$0xff]  ;;  %v14393_v24 = vcombine.low %v776_v49, %v780_v52 }
 0x26a   :  { %10131 = vmatprep.subr.bf16.mxu0 %v14290_v15  ;;  %v768_v4 = vld [vmem:[#allocation5 + $0x1408] sm:$0xff]  ;;  %v14258_v12 = vcombine.high %v640_v3, %v644_v57  ;;  %v14257_v18 = vcombine.low %v640_v3, %v644_v57 }
 0x26b   :  { %10171 = vmatpush1.bf16.msra.mxu1 %v14425_v10  ;;  %v772_v63 = vld [vmem:[#allocation5 + $0x1428] sm:$0xff] }
 0x26c   :  { %10172 = vmatprep.subr.bf16.mxu1 %v14418_v17  ;;  %v14386_v10 = vcombine.high %v768_v4, %v772_v63  ;;  %v760_v15 = vld [vmem:[#allocation5 + $0x13c8] sm:$0xff]  ;;  %v14385_v34 = vcombine.low %v768_v4, %v772_v63 }
 0x26d   :  { %10132 = vmatpush1.bf16.msra.mxu0 %v14289_v23  ;;  %v764_v11 = vld [vmem:[#allocation5 + $0x13e8] sm:$0xff] }
 0x26e   :  { %10133 = vmatprep.subr.bf16.mxu0 %v14282_v53  ;;  %v888_v17 = vld [vmem:[#allocation5 + $0x17c8] sm:$0xff]  ;;  %v14378_v21 = vcombine.high %v760_v15, %v764_v11  ;;  %v14377_v36 = vcombine.low %v760_v15, %v764_v11 }
 0x26f   :  { %10173 = vmatpush1.bf16.msra.mxu1 %v14417_v25  ;;  %v892_v14 = vld [vmem:[#allocation5 + $0x17e8] sm:$0xff] }
 0x270   :  { %10174 = vmatprep.subr.bf16.mxu1 %v14410_v27  ;;  %v14506_v23 = vcombine.high %v888_v17, %v892_v14  ;;  %v752_v25 = vld [vmem:[#allocation5 + $0x1388] sm:$0xff]  ;;  %v14505_v41 = vcombine.low %v888_v17, %v892_v14 }
 0x271   :  { %10134 = vmatpush1.bf16.msra.mxu0 %v14281_v44  ;;  %v756_v53 = vld [vmem:[#allocation5 + $0x13a8] sm:$0xff] }
 0x272   :  { %10135 = vmatprep.subr.bf16.mxu0 %v14274_v46  ;;  %v880_v27 = vld [vmem:[#allocation5 + $0x1788] sm:$0xff]  ;;  %v14370_v43 = vcombine.high %v752_v25, %v756_v53  ;;  %v14369_v0 = vcombine.low %v752_v25, %v756_v53 }
 0x273   :  { %10175 = vmatpush1.bf16.msra.mxu1 %v14409_v60  ;;  %v884_v30 = vld [vmem:[#allocation5 + $0x17a8] sm:$0xff] }
 0x274   :  { %10176 = vmatprep.subr.bf16.mxu1 %v14402_v48  ;;  %v14498_v44 = vcombine.high %v880_v27, %v884_v30  ;;  %v744_v60 = vld [vmem:[#allocation5 + $0x1348] sm:$0xff]  ;;  %v14497_v49 = vcombine.low %v880_v27, %v884_v30 }
 0x275   :  { %10136 = vmatpush1.bf16.msra.mxu0 %v14273_v56  ;;  %v748_v46 = vld [vmem:[#allocation5 + $0x1368] sm:$0xff] }
 0x276   :  { %10137 = vmatprep.subr.bf16.mxu0 %v14266_v1  ;;  %v872_v48 = vld [vmem:[#allocation5 + $0x1748] sm:$0xff]  ;;  %v14362_v52 = vcombine.high %v744_v60, %v748_v46  ;;  %v14361_v57 = vcombine.low %v744_v60, %v748_v46 }
 0x277   :  { %10177 = vmatpush1.bf16.msra.mxu1 %v14401_v61  ;;  %v876_v33 = vld [vmem:[#allocation5 + $0x1768] sm:$0xff] }
 0x278   :  { %10178 = vmatprep.subr.bf16.mxu1 %v14394_v2  ;;  %v14490_v56 = vcombine.high %v872_v48, %v876_v33  ;;  %v736_v61 = vld [vmem:[#allocation5 + $0x1308] sm:$0xff]  ;;  %v14489_v4 = vcombine.low %v872_v48, %v876_v33 }
 0x279   :  { %10138 = vmatpush1.bf16.msra.mxu0 %v14265_v6  ;;  %v740_v1 = vld [vmem:[#allocation5 + $0x1328] sm:$0xff] }
 0x27a   :  { %10139 = vmatprep.subr.bf16.mxu0 %v14258_v12  ;;  %v864_v2 = vld [vmem:[#allocation5 + $0x1708] sm:$0xff]  ;;  %v14354_v63 = vcombine.high %v736_v61, %v740_v1  ;;  %v14353_v11 = vcombine.low %v736_v61, %v740_v1 }
 0x27b   :  { %10179 = vmatpush1.bf16.msra.mxu1 %v14393_v24  ;;  %v868_v3 = vld [vmem:[#allocation5 + $0x1728] sm:$0xff] }
 0x27c   :  { %10180 = vmatprep.subr.bf16.mxu1 %v14386_v10  ;;  %v14482_v6 = vcombine.high %v864_v2, %v868_v3  ;;  %v728_v24 = vld [vmem:[#allocation5 + $0x12c8] sm:$0xff]  ;;  %v14481_v17 = vcombine.low %v864_v2, %v868_v3 }
 0x27d   :  { %10140 = vmatpush1.bf16.msra.mxu0 %v14257_v18  ;;  %v732_v12 = vld [vmem:[#allocation5 + $0x12e8] sm:$0xff] }
 0x27e   :  { %10141 = vmatprep.subr.bf16.mxu0 %v14378_v21  ;;  %v856_v10 = vld [vmem:[#allocation5 + $0x16c8] sm:$0xff]  ;;  %v14346_v14 = vcombine.high %v728_v24, %v732_v12  ;;  %v14345_v53 = vcombine.low %v728_v24, %v732_v12 }
 0x27f   :  { %10181 = vmatpush1.bf16.msra.mxu1 %v14385_v34  ;;  %v860_v15 = vld [vmem:[#allocation5 + $0x16e8] sm:$0xff] }
 0x280   :  { %10182 = vmatprep.subr.bf16.mxu1 %v14506_v23  ;;  %v14474_v18 = vcombine.high %v856_v10, %v860_v15  ;;  %v720_v34 = vld [vmem:[#allocation5 + $0x1288] sm:$0xff]  ;;  %v14473_v27 = vcombine.low %v856_v10, %v860_v15 }
 0x281   :  { %10142 = vmatpush2.bf16.msra.mxu0 %v14377_v36  ;;  %v724_v21 = vld [vmem:[#allocation5 + $0x12a8] sm:$0xff] }
 0x282   :  { %10143 = vmatprep.subr.bf16.mxu0 %v14370_v43  ;;  %v848_v23 = vld [vmem:[#allocation5 + $0x1688] sm:$0xff]  ;;  %v14338_v30 = vcombine.high %v720_v34, %v724_v21  ;;  %v14337_v46 = vcombine.low %v720_v34, %v724_v21 }
 0x283   :  { %10183 = vmatpush2.bf16.msra.mxu1 %v14505_v41  ;;  %v852_v25 = vld [vmem:[#allocation5 + $0x16a8] sm:$0xff] }
 0x284   :  { %10184 = vmatprep.subr.bf16.mxu1 %v14498_v44  ;;  %v14466_v36 = vcombine.high %v848_v23, %v852_v25  ;;  %v712_v41 = vld [vmem:[#allocation5 + $0x1248] sm:$0xff]  ;;  %v14465_v48 = vcombine.low %v848_v23, %v852_v25 }
 0x285   :  { %10144 = vmatpush2.bf16.msra.mxu0 %v14369_v0  ;;  %v716_v43 = vld [vmem:[#allocation5 + $0x1268] sm:$0xff] }
 0x286   :  { %10145 = vmatprep.subr.bf16.mxu0 %v14362_v52  ;;  %v840_v44 = vld [vmem:[#allocation5 + $0x1648] sm:$0xff]  ;;  %v14330_v33 = vcombine.high %v712_v41, %v716_v43  ;;  %v14329_v1 = vcombine.low %v712_v41, %v716_v43 }
 0x287   :  { %10185 = vmatpush2.bf16.msra.mxu1 %v14497_v49  ;;  %v844_v60 = vld [vmem:[#allocation5 + $0x1668] sm:$0xff] }
 0x288   :  { %10186 = vmatprep.subr.bf16.mxu1 %v14490_v56  ;;  %v14458_v0 = vcombine.high %v840_v44, %v844_v60  ;;  %v704_v49 = vld [vmem:[#allocation5 + $0x1208] sm:$0xff]  ;;  %v14457_v2 = vcombine.low %v840_v44, %v844_v60 }
 0x289   :  { %10146 = vmatpush2.bf16.msra.mxu0 %v14361_v57  ;;  %v708_v52 = vld [vmem:[#allocation5 + $0x1228] sm:$0xff] }
 0x28a   :  { %10147 = vmatprep.subr.bf16.mxu0 %v14354_v63  ;;  %v832_v56 = vld [vmem:[#allocation5 + $0x1608] sm:$0xff]  ;;  %v14322_v3 = vcombine.high %v704_v49, %v708_v52  ;;  %v14321_v12 = vcombine.low %v704_v49, %v708_v52 }
 0x28b   :  { %10187 = vmatpush2.bf16.msra.mxu1 %v14489_v4  ;;  %v836_v61 = vld [vmem:[#allocation5 + $0x1628] sm:$0xff] }
 0x28c   :  { %10188 = vmatprep.subr.bf16.mxu1 %v14482_v6  ;;  %v14450_v57 = vcombine.high %v832_v56, %v836_v61  ;;  %v952_v4 = vld [vmem:[#allocation5 + $0x19c8] sm:$0xff]  ;;  %v14449_v10 = vcombine.low %v832_v56, %v836_v61 }
 0x28d   :  { %10148 = vmatpush2.bf16.msra.mxu0 %v14353_v11  ;;  %v956_v63 = vld [vmem:[#allocation5 + $0x19e8] sm:$0xff] }
 0x28e   :  { %10149 = vmatprep.subr.bf16.mxu0 %v14346_v14  ;;  %v1080_v6 = vld [vmem:[#allocation5 + $0x1dc8] sm:$0xff]  ;;  %v14570_v15 = vcombine.high %v952_v4, %v956_v63  ;;  %v14569_v21 = vcombine.low %v952_v4, %v956_v63 }
 0x28f   :  { %10189 = vmatpush2.bf16.msra.mxu1 %v14481_v17  ;;  %v1084_v24 = vld [vmem:[#allocation5 + $0x1de8] sm:$0xff] }
 0x290   :  { %10190 = vmatprep.subr.bf16.mxu1 %v14474_v18  ;;  %v14698_v11 = vcombine.high %v1080_v6, %v1084_v24  ;;  %v944_v17 = vld [vmem:[#allocation5 + $0x1988] sm:$0xff]  ;;  %v14697_v23 = vcombine.low %v1080_v6, %v1084_v24 }
 0x291   :  { %10150 = vmatpush2.bf16.msra.mxu0 %v14345_v53  ;;  %v948_v14 = vld [vmem:[#allocation5 + $0x19a8] sm:$0xff] }
 0x292   :  { %10151 = vmatprep.subr.bf16.mxu0 %v14338_v30  ;;  %v1072_v18 = vld [vmem:[#allocation5 + $0x1d88] sm:$0xff]  ;;  %v14562_v25 = vcombine.high %v944_v17, %v948_v14 }
 0x293   :  { %10191 = vmatpush2.bf16.msra.mxu1 %v14473_v27  ;;  %v1076_v34 = vld [vmem:[#allocation5 + $0x1da8] sm:$0xff] }
 0x294   :  { %10192 = vmatprep.subr.bf16.mxu1 %v14466_v36  ;;  %v14690_v53 = vcombine.high %v1072_v18, %v1076_v34  ;;  %v936_v27 = vld [vmem:[#allocation5 + $0x1948] sm:$0xff] }
 0x295   :  { %10152 = vmatpush2.bf16.msra.mxu0 %v14337_v46  ;;  %v940_v30 = vld [vmem:[#allocation5 + $0x1968] sm:$0xff]  ;;  %v14561_v46 = vcombine.low %v944_v17, %v948_v14 }
 0x296   :  { %10153 = vmatprep.subr.bf16.mxu0 %v14330_v33  ;;  %v1064_v41 = vld [vmem:[#allocation5 + $0x1d48] sm:$0xff]  ;;  %v14689_v33 = vcombine.low %v1072_v18, %v1076_v34  ;;  %v14553_v6 = vcombine.low %v936_v27, %v940_v30 }
 0x297   :  { %10193 = vmatpush2.bf16.msra.mxu1 %v14465_v48  ;;  %v1068_v43 = vld [vmem:[#allocation5 + $0x1d68] sm:$0xff] }
 0x298   :  { %10194 = vmatprep.subr.bf16.mxu1 %v14458_v0  ;;  %v14554_v0 = vcombine.high %v936_v27, %v940_v30  ;;  %v14682_v61 = vcombine.high %v1064_v41, %v1068_v43  ;;  %v924_v17 = vld [vmem:[#allocation5 + $0x18e8] sm:$0xff] }
 0x299   :  { %10154 = vmatpush2.bf16.msra.mxu0 %v14329_v1  ;;  %v928_v1 = vld [vmem:[#allocation5 + $0x1908] sm:$0xff] }
 0x29a   :  { %10155 = vmatprep.subr.bf16.mxu0 %v14322_v3  ;;  %v1056_v3 = vld [vmem:[#allocation5 + $0x1d08] sm:$0xff] }
 0x29b   :  { %10195 = vmatpush2.bf16.msra.mxu1 %v14457_v2  ;;  %v932_v2 = vld [vmem:[#allocation5 + $0x1928] sm:$0xff] }
 0x29c   :  { %10196 = vmatprep.subr.bf16.mxu1 %v14450_v57  ;;  %v1060_v57 = vld [vmem:[#allocation5 + $0x1d28] sm:$0xff]  ;;  %v14545_v34 = vcombine.low %v928_v1, %v932_v2 }
 0x29d   :  { %10156 = vmatpush2.bf16.msra.mxu0 %v14321_v12  ;;  %v14546_v12 = vcombine.high %v928_v1, %v932_v2  ;;  %v1048_v14 = vld [vmem:[#allocation5 + $0x1cc8] sm:$0xff] }
 0x29e   :  { %10207 = vmatprep.subr.bf16.mxu0 %v14570_v15  ;;  %v14674_v15 = vcombine.high %v1056_v3, %v1060_v57  ;;  %v1052_v18 = vld [vmem:[#allocation5 + $0x1ce8] sm:$0xff] }
 0x29f   :  { %10197 = vmatpush2.bf16.msra.mxu1 %v14449_v10  ;;  %v916_v27 = vld [vmem:[#allocation5 + $0x18a8] sm:$0xff] }
 0x2a0   :  { %10248 = vmatprep.subr.bf16.mxu1 %v14698_v11  ;;  %v9913_v36 = vpop.f32.mrf.mxu0  ;;  %10158 = vmatmul.mubr.bf16.vlgmr.msra.gmra.mxu0 %v16384_v7  ;;  %v920_v11 = vld [vmem:[#allocation5 + $0x18c8] sm:$0xff] }
 0x2a1   :  { %v9914_v44 = vadd.f32 %v9913_v36, %v16501_v37  ;;  %10208 = vmatpush1.bf16.msra.mxu0 %v14569_v21  ;;  %10239 = vmatprep.mubr.bf16.mxu0 %v16394_v38  ;;  %v14673_v21 = vcombine.low %v1056_v3, %v1060_v57  ;;  %v1040_v30 = vld [vmem:[#allocation5 + $0x1c88] sm:$0xff] }
 0x2a2   :  { %v9954_v60 = vpop.f32.mrf.mxu1  ;;  %10199 = vmatmul.mubr.bf16.vlgmr.msra.gmra.mxu1 %v16388_v8  ;;  %v9915_v48 = vpop.f32.mrf.mxu0  ;;  %10209 = vmatprep.subr.bf16.mxu0 %v14562_v25  ;;  %v14666_v25 = vcombine.high %v1048_v14, %v1052_v18  ;;  %v1044_v36 = vld [vmem:[#allocation5 + $0x1ca8] sm:$0xff] }
 0x2a3   :  { %10249 = vmatpush1.bf16.msra.mxu1 %v14697_v23  ;;  %v16511_v49 = vadd.f32 %v9954_v60, %v9914_v44  ;;  %v9916_v52 = vadd.f32 %v9915_v48, %v16506_v5  ;;  %10280 = vmatprep.mubr.bf16.mxu1 %v16399_v42  ;;  %v14681_v5 = vcombine.low %v1064_v41, %v1068_v43  ;;  %v908_v48 = vld [vmem:[#allocation5 + $0x1868] sm:$0xff] }
 0x2a4   :  { %v9956_v56 = vpop.f32.mrf.mxu1  ;;  %10250 = vmatprep.subr.bf16.mxu1 %v14690_v53  ;;  %v9917_v37 = vpop.f32.mrf.mxu0  ;;  %v14538_v23 = vcombine.high %v920_v11, %v924_v17  ;;  %v912_v53 = vld [vmem:[#allocation5 + $0x1888] sm:$0xff]  ;;  %v14537_v41 = vcombine.low %v920_v11, %v924_v17  ;;  %v14665_v43 = vcombine.low %v1048_v14, %v1052_v18  ;;  %v14658_v60 = vcombine.high %v1040_v30, %v1044_v36 }
 0x2a5   :  { %v16516_v4 = vadd.f32 %v9956_v56, %v9916_v52  ;;  %10210 = vmatpush1.bf16.msra.mxu0 %v14561_v46  ;;  %v14530_v44 = vcombine.high %v912_v53, %v916_v27  ;;  %v904_v46 = vld [vmem:[#allocation5 + $0x1848] sm:$0xff]  ;;  %v14529_v52 = vcombine.low %v912_v53, %v916_v27  ;;  %v14657_v56 = vcombine.low %v1040_v30, %v1044_v36 }
 0x2a6   :  { %v9958_v63 = vpop.f32.mrf.mxu1  ;;  %v9918_v24 = vpop.f32.mrf.mxu0  ;;  %10211 = vmatprep.subr.bf16.mxu0 %v14554_v0  ;;  %v1036_v0 = vld [vmem:[#allocation5 + $0x1c68] sm:$0xff] }
 0x2a7   :  { %10251 = vmatpush1.bf16.msra.mxu1 %v14689_v33  ;;  %v1032_v33 = vld [vmem:[#allocation5 + $0x1c48] sm:$0xff]  ;;  %v14521_v63 = vcombine.low %v904_v46, %v908_v48 }
 0x2a8   :  { %v9959_v10 = vpop.f32.mrf.mxu1  ;;  %10252 = vmatprep.subr.bf16.mxu1 %v14682_v61  ;;  %v14522_v61 = vcombine.high %v904_v46, %v908_v48  ;;  %v14650_v1 = vcombine.high %v1032_v33, %v1036_v0  ;;  %v896_v2 = vld [vmem:[#allocation5 + $0x1808] sm:$0xff] }
 0x2a9   :  { %10212 = vmatpush1.bf16.msra.mxu0 %v14553_v6  ;;  %v900_v37 = vld [vmem:[#allocation5 + $0x1828] sm:$0xff]  ;;  %v14649_v6 = vcombine.low %v1032_v33, %v1036_v0 }
 0x2aa   :  { %10213 = vmatprep.subr.bf16.mxu0 %v14546_v12  ;;  %v1024_v3 = vld [vmem:[#allocation5 + $0x1c08] sm:$0xff]  ;;  %v14514_v24 = vcombine.high %v896_v2, %v900_v37  ;;  %v14513_v17 = vcombine.low %v896_v2, %v900_v37 }
 0x2ab   :  { %10253 = vmatpush1.bf16.msra.mxu1 %v14681_v5  ;;  %v1028_v57 = vld [vmem:[#allocation5 + $0x1c28] sm:$0xff] }
 0x2ac   :  { %10254 = vmatprep.subr.bf16.mxu1 %v14674_v15  ;;  %v14642_v5 = vcombine.high %v1024_v3, %v1028_v57  ;;  %v1016_v12 = vld [vmem:[#allocation5 + $0x1bc8] sm:$0xff]  ;;  %v14641_v14 = vcombine.low %v1024_v3, %v1028_v57 }
 0x2ad   :  { %10214 = vmatpush1.bf16.msra.mxu0 %v14545_v34  ;;  %v1020_v10 = vld [vmem:[#allocation5 + $0x1be8] sm:$0xff] }
 0x2ae   :  { %10215 = vmatprep.subr.bf16.mxu0 %v14538_v23  ;;  %v1144_v15 = vld [vmem:[#allocation5 + $0x1fc8] sm:$0xff]  ;;  %v14634_v18 = vcombine.high %v1016_v12, %v1020_v10  ;;  %v14633_v27 = vcombine.low %v1016_v12, %v1020_v10 }
 0x2af   :  { %10255 = vmatpush1.bf16.msra.mxu1 %v14673_v21  ;;  %v1148_v11 = vld [vmem:[#allocation5 + $0x1fe8] sm:$0xff] }
 0x2b0   :  { %10256 = vmatprep.subr.bf16.mxu1 %v14666_v25  ;;  %v14762_v34 = vcombine.high %v1144_v15, %v1148_v11  ;;  %v1008_v21 = vld [vmem:[#allocation5 + $0x1b88] sm:$0xff]  ;;  %v14761_v30 = vcombine.low %v1144_v15, %v1148_v11 }
 0x2b1   :  { %10216 = vmatpush1.bf16.msra.mxu0 %v14537_v41  ;;  %v1012_v23 = vld [vmem:[#allocation5 + $0x1ba8] sm:$0xff] }
 0x2b2   :  { %10217 = vmatprep.subr.bf16.mxu0 %v14530_v44  ;;  %v1136_v25 = vld [vmem:[#allocation5 + $0x1f88] sm:$0xff]  ;;  %v14626_v36 = vcombine.high %v1008_v21, %v1012_v23  ;;  %v14625_v48 = vcombine.low %v1008_v21, %v1012_v23 }
 0x2b3   :  { %10257 = vmatpush1.bf16.msra.mxu1 %v14665_v43  ;;  %v1140_v53 = vld [vmem:[#allocation5 + $0x1fa8] sm:$0xff] }
 0x2b4   :  { %10258 = vmatprep.subr.bf16.mxu1 %v14658_v60  ;;  %v14754_v41 = vcombine.high %v1136_v25, %v1140_v53  ;;  %v1000_v43 = vld [vmem:[#allocation5 + $0x1b48] sm:$0xff]  ;;  %v14753_v33 = vcombine.low %v1136_v25, %v1140_v53 }
 0x2b5   :  { %10218 = vmatpush1.bf16.msra.mxu0 %v14529_v52  ;;  %v1004_v44 = vld [vmem:[#allocation5 + $0x1b68] sm:$0xff] }
 0x2b6   :  { %10219 = vmatprep.subr.bf16.mxu0 %v14522_v61  ;;  %v1128_v60 = vld [vmem:[#allocation5 + $0x1f48] sm:$0xff]  ;;  %v14618_v0 = vcombine.high %v1000_v43, %v1004_v44  ;;  %v14617_v37 = vcombine.low %v1000_v43, %v1004_v44 }
 0x2b7   :  { %10259 = vmatpush1.bf16.msra.mxu1 %v14657_v56  ;;  %v1132_v46 = vld [vmem:[#allocation5 + $0x1f68] sm:$0xff] }
 0x2b8   :  { %10260 = vmatprep.subr.bf16.mxu1 %v14650_v1  ;;  %v14746_v52 = vcombine.high %v1128_v60, %v1132_v46  ;;  %v992_v56 = vld [vmem:[#allocation5 + $0x1b08] sm:$0xff]  ;;  %v14745_v3 = vcombine.low %v1128_v60, %v1132_v46 }
 0x2b9   :  { %10220 = vmatpush1.bf16.msra.mxu0 %v14521_v63  ;;  %v996_v61 = vld [vmem:[#allocation5 + $0x1b28] sm:$0xff] }
 0x2ba   :  { %10221 = vmatprep.subr.bf16.mxu0 %v14514_v24  ;;  %v1120_v1 = vld [vmem:[#allocation5 + $0x1f08] sm:$0xff]  ;;  %v14610_v57 = vcombine.high %v992_v56, %v996_v61  ;;  %v14609_v10 = vcombine.low %v992_v56, %v996_v61 }
 0x2bb   :  { %10261 = vmatpush1.bf16.msra.mxu1 %v14649_v6  ;;  %v1124_v2 = vld [vmem:[#allocation5 + $0x1f28] sm:$0xff] }
 0x2bc   :  { %10262 = vmatprep.subr.bf16.mxu1 %v14642_v5  ;;  %v14738_v63 = vcombine.high %v1120_v1, %v1124_v2  ;;  %v984_v6 = vld [vmem:[#allocation5 + $0x1ac8] sm:$0xff]  ;;  %v14737_v15 = vcombine.low %v1120_v1, %v1124_v2 }
 0x2bd   :  { %10222 = vmatpush1.bf16.msra.mxu0 %v14513_v17  ;;  %v988_v24 = vld [vmem:[#allocation5 + $0x1ae8] sm:$0xff] }
 0x2be   :  { %10223 = vmatprep.subr.bf16.mxu0 %v14634_v18  ;;  %v1112_v5 = vld [vmem:[#allocation5 + $0x1ec8] sm:$0xff]  ;;  %v14602_v11 = vcombine.high %v984_v6, %v988_v24  ;;  %v14601_v23 = vcombine.low %v984_v6, %v988_v24 }
 0x2bf   :  { %10263 = vmatpush1.bf16.msra.mxu1 %v14641_v14  ;;  %v1116_v12 = vld [vmem:[#allocation5 + $0x1ee8] sm:$0xff] }
 0x2c0   :  { %10264 = vmatprep.subr.bf16.mxu1 %v14762_v34  ;;  %v14730_v17 = vcombine.high %v1112_v5, %v1116_v12  ;;  %v976_v14 = vld [vmem:[#allocation5 + $0x1a88] sm:$0xff]  ;;  %v14729_v25 = vcombine.low %v1112_v5, %v1116_v12  ;;  %v1675_v5 = vsub.s32 2, %v16404_v32 }
 0x2c1   :  { %10224 = vmatpush2.bf16.msra.mxu0 %v14633_v27  ;;  %v980_v18 = vld [vmem:[#allocation5 + $0x1aa8] sm:$0xff] }
 0x2c2   :  { %10225 = vmatprep.subr.bf16.mxu0 %v14626_v36  ;;  %v1104_v34 = vld [vmem:[#allocation5 + $0x1e88] sm:$0xff]  ;;  %v14594_v53 = vcombine.high %v976_v14, %v980_v18  ;;  %v14593_v44 = vcombine.low %v976_v14, %v980_v18 }
 0x2c3   :  { %10265 = vmatpush2.bf16.msra.mxu1 %v14761_v30  ;;  %v1108_v21 = vld [vmem:[#allocation5 + $0x1ea8] sm:$0xff] }
 0x2c4   :  { %10266 = vmatprep.subr.bf16.mxu1 %v14754_v41  ;;  %v14722_v27 = vcombine.high %v1104_v34, %v1108_v21  ;;  %v968_v30 = vld [vmem:[#allocation5 + $0x1a48] sm:$0xff]  ;;  %v14721_v60 = vcombine.low %v1104_v34, %v1108_v21  ;;  %v16070_v21 = vld [vmem:[#allocation7] sm:$0xff] }
 0x2c5   :  { %10226 = vmatpush2.bf16.msra.mxu0 %v14625_v48  ;;  %v972_v36 = vld [vmem:[#allocation5 + $0x1a68] sm:$0xff] }
 0x2c6   :  { %10227 = vmatprep.subr.bf16.mxu0 %v14618_v0  ;;  %v1096_v41 = vld [vmem:[#allocation5 + $0x1e48] sm:$0xff]  ;;  %v14586_v46 = vcombine.high %v968_v30, %v972_v36  ;;  %v14585_v61 = vcombine.low %v968_v30, %v972_v36 }
 0x2c7   :  { %10267 = vmatpush2.bf16.msra.mxu1 %v14753_v33  ;;  %v1100_v43 = vld [vmem:[#allocation5 + $0x1e68] sm:$0xff] }
 0x2c8   :  { %10268 = vmatprep.subr.bf16.mxu1 %v14746_v52  ;;  %v14714_v48 = vcombine.high %v1096_v41, %v1100_v43  ;;  %v960_v33 = vld [vmem:[#allocation5 + $0x1a08] sm:$0xff]  ;;  %v14713_v1 = vcombine.low %v1096_v41, %v1100_v43 }
 0x2c9   :  { %10228 = vmatpush2.bf16.msra.mxu0 %v14617_v37  ;;  %v964_v0 = vld [vmem:[#allocation5 + $0x1a28] sm:$0xff] }
 0x2ca   :  { %10229 = vmatprep.subr.bf16.mxu0 %v14610_v57  ;;  %v1088_v52 = vld [vmem:[#allocation5 + $0x1e08] sm:$0xff]  ;;  %v14578_v2 = vcombine.high %v960_v33, %v964_v0  ;;  %v14577_v24 = vcombine.low %v960_v33, %v964_v0 }
 0x2cb   :  { %10269 = vmatpush2.bf16.msra.mxu1 %v14745_v3  ;;  %v1092_v56 = vld [vmem:[#allocation5 + $0x1e28] sm:$0xff] }
 0x2cc   :  { %10270 = vmatprep.subr.bf16.mxu1 %v14738_v63  ;;  %v14706_v37 = vcombine.high %v1088_v52, %v1092_v56  ;;  %v1208_v3 = vld [vmem:[#allocation5 + $0x21c8] sm:$0xff]  ;;  %v14705_v12 = vcombine.low %v1088_v52, %v1092_v56 }
 0x2cd   :  { %10230 = vmatpush2.bf16.msra.mxu0 %v14609_v10  ;;  %v1212_v57 = vld [vmem:[#allocation5 + $0x21e8] sm:$0xff] }
 0x2ce   :  { %10231 = vmatprep.subr.bf16.mxu0 %v14602_v11  ;;  %v1336_v63 = vld [vmem:[#allocation5 + $0x25c8] sm:$0xff]  ;;  %v14826_v10 = vcombine.high %v1208_v3, %v1212_v57  ;;  %v1679_v11 = vsub.s32 3, %v16404_v32 }
 0x2cf   :  { %10271 = vmatpush2.bf16.msra.mxu1 %v14737_v15  ;;  %v1340_v6 = vld [vmem:[#allocation5 + $0x25e8] sm:$0xff] }
 0x2d0   :  { %10272 = vmatprep.subr.bf16.mxu1 %v14730_v17  ;;  %v14954_v15 = vcombine.high %v1336_v63, %v1340_v6  ;;  %v1200_v17 = vld [vmem:[#allocation5 + $0x2188] sm:$0xff]  ;;  %v1680_v30 = vrot.slane %v16070_v21, %v1679_v11 }
 0x2d1   :  { %10232 = vmatpush2.bf16.msra.mxu0 %v14601_v23  ;;  %v1204_v14 = vld [vmem:[#allocation5 + $0x21a8] sm:$0xff]  ;;  %v1676_v23 = vrot.slane %v16070_v21, %v1675_v5 }
 0x2d2   :  { %10233 = vmatprep.subr.bf16.mxu0 %v14594_v53  ;;  %v1328_v18 = vld [vmem:[#allocation5 + $0x2588] sm:$0xff]  ;;  %v14953_v53 = vcombine.low %v1336_v63, %v1340_v6  ;;  %v14817_v0 = vcombine.low %v1200_v17, %v1204_v14 }
 0x2d3   :  { %10273 = vmatpush2.bf16.msra.mxu1 %v14729_v25  ;;  %v1332_v34 = vld [vmem:[#allocation5 + $0x25a8] sm:$0xff]  ;;  %v14825_v25 = vcombine.low %v1208_v3, %v1212_v57 }
 0x2d4   :  { %10274 = vmatprep.subr.bf16.mxu1 %v14722_v27  ;;  %v14818_v27 = vcombine.high %v1200_v17, %v1204_v14  ;;  %v14946_v36 = vcombine.high %v1328_v18, %v1332_v34  ;;  %v1192_v41 = vld [vmem:[#allocation5 + $0x2148] sm:$0xff]  ;;  %v14945_v56 = vcombine.low %v1328_v18, %v1332_v34 }
 0x2d5   :  { %10234 = vmatpush2.bf16.msra.mxu0 %v14593_v44  ;;  %v1196_v43 = vld [vmem:[#allocation5 + $0x2168] sm:$0xff] }
 0x2d6   :  { %10235 = vmatprep.subr.bf16.mxu0 %v14586_v46  ;;  %v1324_v46 = vld [vmem:[#allocation5 + $0x2568] sm:$0xff]  ;;  %v14809_v17 = vcombine.low %v1192_v41, %v1196_v43 }
 0x2d7   :  { %10275 = vmatpush2.bf16.msra.mxu1 %v14721_v60  ;;  %v1320_v60 = vld [vmem:[#allocation5 + $0x2548] sm:$0xff] }
 0x2d8   :  { %10276 = vmatprep.subr.bf16.mxu1 %v14714_v48  ;;  %v14938_v3 = vcombine.high %v1320_v60, %v1324_v46  ;;  %v1184_v57 = vld [vmem:[#allocation5 + $0x2108] sm:$0xff]  ;;  %v14937_v18 = vcombine.low %v1320_v60, %v1324_v46 }
 0x2d9   :  { %10236 = vmatpush2.bf16.msra.mxu0 %v14585_v61  ;;  %v14810_v61 = vcombine.high %v1192_v41, %v1196_v43  ;;  %v1188_v63 = vld [vmem:[#allocation5 + $0x2128] sm:$0xff] }
 0x2da   :  { %10237 = vmatprep.subr.bf16.mxu0 %v14578_v2  ;;  %v14802_v34 = vcombine.high %v1184_v57, %v1188_v63  ;;  %v1168_v43 = vld [vmem:[#allocation5 + $0x2088] sm:$0xff] }
 0x2db   :  { %10277 = vmatpush2.bf16.msra.mxu1 %v14713_v1  ;;  %v1300_v60 = vld [vmem:[#allocation5 + $0x24a8] sm:$0xff] }
 0x2dc   :  { %10278 = vmatprep.subr.bf16.mxu1 %v14706_v37 }
 0x2dd   :  { %10238 = vmatpush2.bf16.msra.mxu0 %v14577_v24  ;;  %v1312_v24 = vld [vmem:[#allocation5 + $0x2508] sm:$0xff] }
 0x2de   :  { %10289 = vmatprep.subr.bf16.mxu0 %v14826_v10 }
 0x2df   :  { %10279 = vmatpush2.bf16.msra.mxu1 %v14705_v12  ;;  %v1316_v12 = vld [vmem:[#allocation5 + $0x2528] sm:$0xff] }
 0x2e0   :  { %10330 = vmatprep.subr.bf16.mxu1 %v14954_v15  ;;  %v9995_v44 = vpop.f32.mrf.mxu0  ;;  %10240 = vmatmul.mubr.bf16.vlgmr.msra.gmra.mxu0 %v16410_v55 }
 0x2e1   :  { %v9996_v48 = vadd.f32 %v9995_v44, %v1676_v23  ;;  %10290 = vmatpush1.bf16.msra.mxu0 %v14825_v25  ;;  %10321 = vmatprep.mubr.bf16.mxu0 %v16426_v9  ;;  %v14930_v23 = vcombine.high %v1312_v24, %v1316_v12  ;;  %v1176_v25 = vld [vmem:[#allocation5 + $0x20c8] sm:$0xff]  ;;  %v14929_v44 = vcombine.low %v1312_v24, %v1316_v12 }
 0x2e2   :  { %v10036_v33 = vpop.f32.mrf.mxu1  ;;  %10281 = vmatmul.mubr.bf16.vlgmr.msra.gmra.mxu1 %v16418_v62  ;;  %v9997_v52 = vpop.f32.mrf.mxu0  ;;  %10291 = vmatprep.subr.bf16.mxu0 %v14818_v27  ;;  %v1304_v27 = vld [vmem:[#allocation5 + $0x24c8] sm:$0xff] }
 0x2e3   :  { %10331 = vmatpush1.bf16.msra.mxu1 %v14953_v53  ;;  %v16526_v1 = vadd.f32 %v10036_v33, %v9996_v48  ;;  %v9998_v2 = vadd.f32 %v9997_v52, %v1680_v30  ;;  %10362 = vmatprep.mubr.bf16.mxu1 %v16431_v13  ;;  %v1180_v53 = vld [vmem:[#allocation5 + $0x20e8] sm:$0xff] }
 0x2e4   :  { %v10038_v37 = vpop.f32.mrf.mxu1  ;;  %10332 = vmatprep.subr.bf16.mxu1 %v14946_v36  ;;  %v9999_v6 = vpop.f32.mrf.mxu0  ;;  %v1308_v30 = vld [vmem:[#allocation5 + $0x24e8] sm:$0xff]  ;;  %v14801_v36 = vcombine.low %v1184_v57, %v1188_v63  ;;  %v14794_v48 = vcombine.high %v1176_v25, %v1180_v53  ;;  %v14793_v46 = vcombine.low %v1176_v25, %v1180_v53 }
 0x2e5   :  { %v16530_v10 = vadd.f32 %v10038_v37, %v9998_v2  ;;  %10292 = vmatpush1.bf16.msra.mxu0 %v14817_v0  ;;  %v14922_v41 = vcombine.high %v1304_v27, %v1308_v30  ;;  %v1172_v33 = vld [vmem:[#allocation5 + $0x20a8] sm:$0xff]  ;;  %v14921_v52 = vcombine.low %v1304_v27, %v1308_v30 }
 0x2e6   :  { %v10040_v15 = vpop.f32.mrf.mxu1  ;;  %v10000_v14 = vpop.f32.mrf.mxu0  ;;  %10293 = vmatprep.subr.bf16.mxu0 %v14810_v61  ;;  %v1296_v0 = vld [vmem:[#allocation5 + $0x2488] sm:$0xff]  ;;  %v14785_v63 = vcombine.low %v1168_v43, %v1172_v33 }
 0x2e7   :  { %10333 = vmatpush1.bf16.msra.mxu1 %v14945_v56  ;;  %v14786_v56 = vcombine.high %v1168_v43, %v1172_v33  ;;  %v14914_v61 = vcombine.high %v1296_v0, %v1300_v60  ;;  %v1160_v2 = vld [vmem:[#allocation5 + $0x2048] sm:$0xff]  ;;  %v14913_v6 = vcombine.low %v1296_v0, %v1300_v60 }
 0x2e8   :  { %v10041_v21 = vpop.f32.mrf.mxu1  ;;  %10334 = vmatprep.subr.bf16.mxu1 %v14938_v3  ;;  %v1164_v37 = vld [vmem:[#allocation5 + $0x2068] sm:$0xff] }
 0x2e9   :  { %10294 = vmatpush1.bf16.msra.mxu0 %v14809_v17  ;;  %v1288_v3 = vld [vmem:[#allocation5 + $0x2448] sm:$0xff]  ;;  %v14778_v24 = vcombine.high %v1160_v2, %v1164_v37 }
 0x2ea   :  { %10295 = vmatprep.subr.bf16.mxu0 %v14802_v34  ;;  %v1292_v57 = vld [vmem:[#allocation5 + $0x2468] sm:$0xff]  ;;  %v14777_v34 = vcombine.low %v1160_v2, %v1164_v37 }
 0x2eb   :  { %10335 = vmatpush1.bf16.msra.mxu1 %v14937_v18  ;;  %v14906_v12 = vcombine.high %v1288_v3, %v1292_v57  ;;  %v1152_v15 = vld [vmem:[#allocation5 + $0x2008] sm:$0xff]  ;;  %v14905_v21 = vcombine.low %v1288_v3, %v1292_v57 }
 0x2ec   :  { %10336 = vmatprep.subr.bf16.mxu1 %v14930_v23  ;;  %v1156_v17 = vld [vmem:[#allocation5 + $0x2028] sm:$0xff] }
 0x2ed   :  { %10296 = vmatpush1.bf16.msra.mxu0 %v14801_v36  ;;  %v1280_v14 = vld [vmem:[#allocation5 + $0x2408] sm:$0xff]  ;;  %v14770_v23 = vcombine.high %v1152_v15, %v1156_v17 }
 0x2ee   :  { %10297 = vmatprep.subr.bf16.mxu0 %v14794_v48  ;;  %v1284_v18 = vld [vmem:[#allocation5 + $0x2428] sm:$0xff] }
 0x2ef   :  { %10337 = vmatpush1.bf16.msra.mxu1 %v14929_v44  ;;  %v14898_v25 = vcombine.high %v1280_v14, %v1284_v18  ;;  %v1272_v53 = vld [vmem:[#allocation5 + $0x23c8] sm:$0xff]  ;;  %v14769_v44 = vcombine.low %v1152_v15, %v1156_v17  ;;  %v14897_v48 = vcombine.low %v1280_v14, %v1284_v18 }
 0x2f0   :  { %10338 = vmatprep.subr.bf16.mxu1 %v14922_v41  ;;  %v1276_v27 = vld [vmem:[#allocation5 + $0x23e8] sm:$0xff] }
 0x2f1   :  { %10298 = vmatpush1.bf16.msra.mxu0 %v14793_v46  ;;  %v1400_v30 = vld [vmem:[#allocation5 + $0x27c8] sm:$0xff]  ;;  %v14890_v41 = vcombine.high %v1272_v53, %v1276_v27 }
 0x2f2   :  { %10299 = vmatprep.subr.bf16.mxu0 %v14786_v56  ;;  %v1404_v36 = vld [vmem:[#allocation5 + $0x27e8] sm:$0xff] }
 0x2f3   :  { %10339 = vmatpush1.bf16.msra.mxu1 %v14921_v52  ;;  %v15018_v43 = vcombine.high %v1400_v30, %v1404_v36  ;;  %v1264_v33 = vld [vmem:[#allocation5 + $0x2388] sm:$0xff]  ;;  %v14889_v52 = vcombine.low %v1272_v53, %v1276_v27  ;;  %v15017_v56 = vcombine.low %v1400_v30, %v1404_v36 }
 0x2f4   :  { %10340 = vmatprep.subr.bf16.mxu1 %v14914_v61  ;;  %v1268_v0 = vld [vmem:[#allocation5 + $0x23a8] sm:$0xff] }
 0x2f5   :  { %10300 = vmatpush1.bf16.msra.mxu0 %v14785_v63  ;;  %v1392_v60 = vld [vmem:[#allocation5 + $0x2788] sm:$0xff]  ;;  %v14882_v61 = vcombine.high %v1264_v33, %v1268_v0 }
 0x2f6   :  { %10301 = vmatprep.subr.bf16.mxu0 %v14778_v24  ;;  %v1396_v46 = vld [vmem:[#allocation5 + $0x27a8] sm:$0xff] }
 0x2f7   :  { %10341 = vmatpush1.bf16.msra.mxu1 %v14913_v6  ;;  %v15010_v2 = vcombine.high %v1392_v60, %v1396_v46  ;;  %v1256_v37 = vld [vmem:[#allocation5 + $0x2348] sm:$0xff]  ;;  %v14881_v6 = vcombine.low %v1264_v33, %v1268_v0  ;;  %v15009_v24 = vcombine.low %v1392_v60, %v1396_v46 }
 0x2f8   :  { %10342 = vmatprep.subr.bf16.mxu1 %v14906_v12  ;;  %v1260_v3 = vld [vmem:[#allocation5 + $0x2368] sm:$0xff] }
 0x2f9   :  { %10302 = vmatpush1.bf16.msra.mxu0 %v14777_v34  ;;  %v1384_v57 = vld [vmem:[#allocation5 + $0x2748] sm:$0xff]  ;;  %v14874_v12 = vcombine.high %v1256_v37, %v1260_v3 }
 0x2fa   :  { %10303 = vmatprep.subr.bf16.mxu0 %v14770_v23  ;;  %v1388_v63 = vld [vmem:[#allocation5 + $0x2768] sm:$0xff] }
 0x2fb   :  { %10343 = vmatpush1.bf16.msra.mxu1 %v14905_v21  ;;  %v15002_v15 = vcombine.high %v1384_v57, %v1388_v63  ;;  %v1248_v17 = vld [vmem:[#allocation5 + $0x2308] sm:$0xff]  ;;  %v14873_v21 = vcombine.low %v1256_v37, %v1260_v3  ;;  %v15001_v23 = vcombine.low %v1384_v57, %v1388_v63 }
 0x2fc   :  { %10344 = vmatprep.subr.bf16.mxu1 %v14898_v25  ;;  %v1252_v14 = vld [vmem:[#allocation5 + $0x2328] sm:$0xff] }
 0x2fd   :  { %10304 = vmatpush1.bf16.msra.mxu0 %v14769_v44  ;;  %v1376_v18 = vld [vmem:[#allocation5 + $0x2708] sm:$0xff]  ;;  %v14866_v25 = vcombine.high %v1248_v17, %v1252_v14 }
 0x2fe   :  { %10305 = vmatprep.subr.bf16.mxu0 %v14890_v41  ;;  %v1380_v34 = vld [vmem:[#allocation5 + $0x2728] sm:$0xff] }
 0x2ff   :  { %10345 = vmatpush1.bf16.msra.mxu1 %v14897_v48  ;;  %v14994_v53 = vcombine.high %v1376_v18, %v1380_v34  ;;  %v1240_v27 = vld [vmem:[#allocation5 + $0x22c8] sm:$0xff]  ;;  %v14865_v48 = vcombine.low %v1248_v17, %v1252_v14  ;;  %v14993_v41 = vcombine.low %v1376_v18, %v1380_v34 }
 0x300   :  { %10346 = vmatprep.subr.bf16.mxu1 %v15018_v43  ;;  %v1244_v30 = vld [vmem:[#allocation5 + $0x22e8] sm:$0xff] }
 0x301   :  { %10306 = vmatpush2.bf16.msra.mxu0 %v14889_v52  ;;  %v1368_v36 = vld [vmem:[#allocation5 + $0x26c8] sm:$0xff]  ;;  %v14858_v43 = vcombine.high %v1240_v27, %v1244_v30 }
 0x302   :  { %10307 = vmatprep.subr.bf16.mxu0 %v14882_v61  ;;  %v1372_v44 = vld [vmem:[#allocation5 + $0x26e8] sm:$0xff] }
 0x303   :  { %10347 = vmatpush2.bf16.msra.mxu1 %v15017_v56  ;;  %v14986_v33 = vcombine.high %v1368_v36, %v1372_v44  ;;  %v1232_v0 = vld [vmem:[#allocation5 + $0x2288] sm:$0xff]  ;;  %v14857_v56 = vcombine.low %v1240_v27, %v1244_v30  ;;  %v14985_v61 = vcombine.low %v1368_v36, %v1372_v44 }
 0x304   :  { %10348 = vmatprep.subr.bf16.mxu1 %v15010_v2  ;;  %v1236_v60 = vld [vmem:[#allocation5 + $0x22a8] sm:$0xff] }
 0x305   :  { %10308 = vmatpush2.bf16.msra.mxu0 %v14881_v6  ;;  %v1360_v46 = vld [vmem:[#allocation5 + $0x2688] sm:$0xff]  ;;  %v14850_v2 = vcombine.high %v1232_v0, %v1236_v60 }
 0x306   :  { %10309 = vmatprep.subr.bf16.mxu0 %v14874_v12  ;;  %v1364_v52 = vld [vmem:[#allocation5 + $0x26a8] sm:$0xff] }
 0x307   :  { %10349 = vmatpush2.bf16.msra.mxu1 %v15009_v24  ;;  %v14978_v37 = vcombine.high %v1360_v46, %v1364_v52  ;;  %v1224_v3 = vld [vmem:[#allocation5 + $0x2248] sm:$0xff]  ;;  %v14849_v24 = vcombine.low %v1232_v0, %v1236_v60  ;;  %v14977_v12 = vcombine.low %v1360_v46, %v1364_v52 }
 0x308   :  { %10350 = vmatprep.subr.bf16.mxu1 %v15002_v15  ;;  %v1228_v57 = vld [vmem:[#allocation5 + $0x2268] sm:$0xff] }
 0x309   :  { %10310 = vmatpush2.bf16.msra.mxu0 %v14873_v21  ;;  %v1352_v63 = vld [vmem:[#allocation5 + $0x2648] sm:$0xff]  ;;  %v14842_v15 = vcombine.high %v1224_v3, %v1228_v57 }
 0x30a   :  { %10311 = vmatprep.subr.bf16.mxu0 %v14866_v25  ;;  %v1356_v6 = vld [vmem:[#allocation5 + $0x2668] sm:$0xff] }
 0x30b   :  { %10351 = vmatpush2.bf16.msra.mxu1 %v15001_v23  ;;  %v14970_v17 = vcombine.high %v1352_v63, %v1356_v6  ;;  %v1216_v14 = vld [vmem:[#allocation5 + $0x2208] sm:$0xff]  ;;  %v14841_v23 = vcombine.low %v1224_v3, %v1228_v57  ;;  %v14969_v25 = vcombine.low %v1352_v63, %v1356_v6 }
 0x30c   :  { %10352 = vmatprep.subr.bf16.mxu1 %v14994_v53  ;;  %v1220_v18 = vld [vmem:[#allocation5 + $0x2228] sm:$0xff] }
 0x30d   :  { %10312 = vmatpush2.bf16.msra.mxu0 %v14865_v48  ;;  %v1344_v34 = vld [vmem:[#allocation5 + $0x2608] sm:$0xff]  ;;  %v14834_v53 = vcombine.high %v1216_v14, %v1220_v18 }
 0x30e   :  { %10313 = vmatprep.subr.bf16.mxu0 %v14858_v43  ;;  %v1348_v21 = vld [vmem:[#allocation5 + $0x2628] sm:$0xff] }
 0x30f   :  { %10353 = vmatpush2.bf16.msra.mxu1 %v14993_v41  ;;  %v14962_v27 = vcombine.high %v1344_v34, %v1348_v21  ;;  %v1464_v30 = vld [vmem:[#allocation5 + $0x29c8] sm:$0xff]  ;;  %v14833_v41 = vcombine.low %v1216_v14, %v1220_v18  ;;  %v14961_v43 = vcombine.low %v1344_v34, %v1348_v21 }
 0x310   :  { %10354 = vmatprep.subr.bf16.mxu1 %v14986_v33  ;;  %v1468_v36 = vld [vmem:[#allocation5 + $0x29e8] sm:$0xff] }
 0x311   :  { %10314 = vmatpush2.bf16.msra.mxu0 %v14857_v56  ;;  %v1592_v44 = vld [vmem:[#allocation5 + $0x2dc8] sm:$0xff]  ;;  %v15082_v33 = vcombine.high %v1464_v30, %v1468_v36 }
 0x312   :  { %10315 = vmatprep.subr.bf16.mxu0 %v14850_v2  ;;  %v1596_v48 = vld [vmem:[#allocation5 + $0x2de8] sm:$0xff] }
 0x313   :  { %10355 = vmatpush2.bf16.msra.mxu1 %v14985_v61  ;;  %v15210_v0 = vcombine.high %v1592_v44, %v1596_v48  ;;  %v1456_v60 = vld [vmem:[#allocation5 + $0x2988] sm:$0xff]  ;;  %v15081_v61 = vcombine.low %v1464_v30, %v1468_v36  ;;  %v15209_v2 = vcombine.low %v1592_v44, %v1596_v48 }
 0x314   :  { %10356 = vmatprep.subr.bf16.mxu1 %v14978_v37  ;;  %v1460_v46 = vld [vmem:[#allocation5 + $0x29a8] sm:$0xff] }
 0x315   :  { %10316 = vmatpush2.bf16.msra.mxu0 %v14849_v24  ;;  %v1584_v52 = vld [vmem:[#allocation5 + $0x2d88] sm:$0xff]  ;;  %v15074_v37 = vcombine.high %v1456_v60, %v1460_v46  ;;  %v15073_v14 = vcombine.low %v1456_v60, %v1460_v46 }
 0x316   :  { %10317 = vmatprep.subr.bf16.mxu0 %v14842_v15  ;;  %v1588_v56 = vld [vmem:[#allocation5 + $0x2da8] sm:$0xff] }
 0x317   :  { %10357 = vmatpush2.bf16.msra.mxu1 %v14977_v12  ;;  %v15202_v3 = vcombine.high %v1584_v52, %v1588_v56  ;;  %v1448_v57 = vld [vmem:[#allocation5 + $0x2948] sm:$0xff]  ;;  %v15201_v34 = vcombine.low %v1584_v52, %v1588_v56 }
 0x318   :  { %10358 = vmatprep.subr.bf16.mxu1 %v14970_v17  ;;  %v1452_v63 = vld [vmem:[#allocation5 + $0x2968] sm:$0xff] }
 0x319   :  { %10318 = vmatpush2.bf16.msra.mxu0 %v14841_v23  ;;  %v1576_v24 = vld [vmem:[#allocation5 + $0x2d48] sm:$0xff]  ;;  %v15066_v21 = vcombine.high %v1448_v57, %v1452_v63 }
 0x31a   :  { %10319 = vmatprep.subr.bf16.mxu0 %v14834_v53  ;;  %v1580_v12 = vld [vmem:[#allocation5 + $0x2d68] sm:$0xff] }
 0x31b   :  { %10359 = vmatpush2.bf16.msra.mxu1 %v14969_v25  ;;  %v1440_v30 = vld [vmem:[#allocation5 + $0x2908] sm:$0xff] }
 0x31c   :  { %10360 = vmatprep.subr.bf16.mxu1 %v14962_v27  ;;  %v15194_v27 = vcombine.high %v1576_v24, %v1580_v12  ;;  %v1444_v36 = vld [vmem:[#allocation5 + $0x2928] sm:$0xff] }
 0x31d   :  { %10320 = vmatpush2.bf16.msra.mxu0 %v14833_v41  ;;  %v1568_v44 = vld [vmem:[#allocation5 + $0x2d08] sm:$0xff]  ;;  %v15058_v60 = vcombine.high %v1440_v30, %v1444_v36 }
 0x31e   :  { %10371 = vmatprep.subr.bf16.mxu0 %v15082_v33  ;;  %v1572_v48 = vld [vmem:[#allocation5 + $0x2d28] sm:$0xff]  ;;  %v15065_v33 = vcombine.low %v1448_v57, %v1452_v63 }
 0x31f   :  { %10361 = vmatpush2.bf16.msra.mxu1 %v14961_v43  ;;  %v15186_v52 = vcombine.high %v1568_v44, %v1572_v48  ;;  %v1432_v56 = vld [vmem:[#allocation5 + $0x28c8] sm:$0xff] }
 0x320   :  { %10412 = vmatprep.subr.bf16.mxu1 %v15210_v0  ;;  %v10077_v6 = vpop.f32.mrf.mxu0  ;;  %10322 = vmatmul.mubr.bf16.vlgmr.msra.gmra.mxu0 %v16442_v54  ;;  %v1424_v63 = vld [vmem:[#allocation5 + $0x2888] sm:$0xff] }
 0x321   :  { %v10078_v15 = vadd.f32 %v10077_v6, %v16526_v1  ;;  %10372 = vmatpush1.bf16.msra.mxu0 %v15081_v61  ;;  %10403 = vmatprep.mubr.bf16.mxu0 %v16454_v47  ;;  %v1436_v61 = vld [vmem:[#allocation5 + $0x28e8] sm:$0xff]  ;;  %v15185_v6 = vcombine.low %v1568_v44, %v1572_v48 }
 0x322   :  { %v10118_v17 = vpop.f32.mrf.mxu1  ;;  %10363 = vmatmul.mubr.bf16.vlgmr.msra.gmra.mxu1 %v16448_v35  ;;  %v10079_v18 = vpop.f32.mrf.mxu0  ;;  %10373 = vmatprep.subr.bf16.mxu0 %v15074_v37  ;;  %v1564_v37 = vld [vmem:[#allocation5 + $0x2ce8] sm:$0xff] }
 0x323   :  { %10413 = vmatpush1.bf16.msra.mxu1 %v15209_v2  ;;  %v16535_v23 = vadd.f32 %v10118_v17, %v10078_v15  ;;  %v10080_v25 = vadd.f32 %v10079_v18, %v16530_v10  ;;  %10444 = vmatprep.mubr.bf16.mxu1 %v16459_v51  ;;  %v15193_v10 = vcombine.low %v1576_v24, %v1580_v12  ;;  %v1560_v2 = vld [vmem:[#allocation5 + $0x2cc8] sm:$0xff] }
 0x324   :  { %v10120_v53 = vpop.f32.mrf.mxu1  ;;  %10414 = vmatprep.subr.bf16.mxu1 %v15202_v3  ;;  %v10081_v1 = vpop.f32.mrf.mxu0  ;;  %v15057_v3 = vcombine.low %v1440_v30, %v1444_v36  ;;  %v15050_v15 = vcombine.high %v1432_v56, %v1436_v61  ;;  %v15178_v57 = vcombine.high %v1560_v2, %v1564_v37  ;;  %v1428_v17 = vld [vmem:[#allocation5 + $0x28a8] sm:$0xff]  ;;  %v15049_v12 = vcombine.low %v1432_v56, %v1436_v61 }
 0x325   :  { %v16540_v41 = vadd.f32 %v10120_v53, %v10080_v25  ;;  %10374 = vmatpush1.bf16.msra.mxu0 %v15073_v14  ;;  %v1552_v14 = vld [vmem:[#allocation5 + $0x2c88] sm:$0xff]  ;;  %v15177_v18 = vcombine.low %v1560_v2, %v1564_v37  ;;  %v15041_v36 = vcombine.low %v1424_v63, %v1428_v17 }
 0x326   :  { %v10122_v43 = vpop.f32.mrf.mxu1  ;;  %v10082_v0 = vpop.f32.mrf.mxu0  ;;  %10375 = vmatprep.subr.bf16.mxu0 %v15066_v21  ;;  %v1556_v24 = vld [vmem:[#allocation5 + $0x2ca8] sm:$0xff] }
 0x327   :  { %10415 = vmatpush1.bf16.msra.mxu1 %v15201_v34  ;;  %v15042_v34 = vcombine.high %v1424_v63, %v1428_v17  ;;  %v15170_v21 = vcombine.high %v1552_v14, %v1556_v24  ;;  %v1416_v25 = vld [vmem:[#allocation5 + $0x2848] sm:$0xff]  ;;  %v15169_v1 = vcombine.low %v1552_v14, %v1556_v24 }
 0x328   :  { %v10123_v46 = vpop.f32.mrf.mxu1  ;;  %10416 = vmatprep.subr.bf16.mxu1 %v15194_v27  ;;  %v1420_v53 = vld [vmem:[#allocation5 + $0x2868] sm:$0xff] }
 0x329   :  { %10376 = vmatpush1.bf16.msra.mxu0 %v15065_v33  ;;  %v1544_v27 = vld [vmem:[#allocation5 + $0x2c48] sm:$0xff]  ;;  %v15034_v44 = vcombine.high %v1416_v25, %v1420_v53 }
 0x32a   :  { %10377 = vmatprep.subr.bf16.mxu0 %v15058_v60  ;;  %v1548_v30 = vld [vmem:[#allocation5 + $0x2c68] sm:$0xff]  ;;  %v15033_v60 = vcombine.low %v1416_v25, %v1420_v53 }
 0x32b   :  { %10417 = vmatpush1.bf16.msra.mxu1 %v15193_v10  ;;  %v15162_v48 = vcombine.high %v1544_v27, %v1548_v30  ;;  %v1408_v43 = vld [vmem:[#allocation5 + $0x2808] sm:$0xff]  ;;  %v15161_v46 = vcombine.low %v1544_v27, %v1548_v30 }
 0x32c   :  { %10418 = vmatprep.subr.bf16.mxu1 %v15186_v52  ;;  %v1412_v33 = vld [vmem:[#allocation5 + $0x2828] sm:$0xff] }
 0x32d   :  { %10378 = vmatpush1.bf16.msra.mxu0 %v15057_v3  ;;  %v1536_v0 = vld [vmem:[#allocation5 + $0x2c08] sm:$0xff]  ;;  %v15026_v52 = vcombine.high %v1408_v43, %v1412_v33 }
 0x32e   :  { %10379 = vmatprep.subr.bf16.mxu0 %v15050_v15  ;;  %v1540_v10 = vld [vmem:[#allocation5 + $0x2c28] sm:$0xff] }
 0x32f   :  { %10419 = vmatpush1.bf16.msra.mxu1 %v15185_v6  ;;  %v15154_v56 = vcombine.high %v1536_v0, %v1540_v10  ;;  %v1528_v61 = vld [vmem:[#allocation5 + $0x2bc8] sm:$0xff]  ;;  %v15025_v6 = vcombine.low %v1408_v43, %v1412_v33  ;;  %v15153_v15 = vcombine.low %v1536_v0, %v1540_v10 }
 0x330   :  { %10420 = vmatprep.subr.bf16.mxu1 %v15178_v57  ;;  %v1532_v2 = vld [vmem:[#allocation5 + $0x2be8] sm:$0xff] }
 0x331   :  { %10380 = vmatpush1.bf16.msra.mxu0 %v15049_v12  ;;  %v1656_v37 = vld [vmem:[#allocation5 + $0x2fc8] sm:$0xff]  ;;  %v15146_v57 = vcombine.high %v1528_v61, %v1532_v2 }
 0x332   :  { %10381 = vmatprep.subr.bf16.mxu0 %v15042_v34  ;;  %v1660_v3 = vld [vmem:[#allocation5 + $0x2fe8] sm:$0xff] }
 0x333   :  { %10421 = vmatpush1.bf16.msra.mxu1 %v15177_v18  ;;  %v15274_v63 = vcombine.high %v1656_v37, %v1660_v3  ;;  %v1520_v17 = vld [vmem:[#allocation5 + $0x2b88] sm:$0xff]  ;;  %v15145_v18 = vcombine.low %v1528_v61, %v1532_v2  ;;  %v15273_v34 = vcombine.low %v1656_v37, %v1660_v3 }
 0x334   :  { %10422 = vmatprep.subr.bf16.mxu1 %v15170_v21  ;;  %v1524_v14 = vld [vmem:[#allocation5 + $0x2ba8] sm:$0xff] }
 0x335   :  { %10382 = vmatpush1.bf16.msra.mxu0 %v15041_v36  ;;  %v1648_v24 = vld [vmem:[#allocation5 + $0x2f88] sm:$0xff]  ;;  %v15138_v21 = vcombine.high %v1520_v17, %v1524_v14 }
 0x336   :  { %10383 = vmatprep.subr.bf16.mxu0 %v15034_v44  ;;  %v1652_v12 = vld [vmem:[#allocation5 + $0x2fa8] sm:$0xff] }
 0x337   :  { %10423 = vmatpush1.bf16.msra.mxu1 %v15169_v1  ;;  %v15266_v25 = vcombine.high %v1648_v24, %v1652_v12  ;;  %v1512_v53 = vld [vmem:[#allocation5 + $0x2b48] sm:$0xff]  ;;  %v15137_v1 = vcombine.low %v1520_v17, %v1524_v14  ;;  %v15265_v44 = vcombine.low %v1648_v24, %v1652_v12 }
 0x338   :  { %10424 = vmatprep.subr.bf16.mxu1 %v15162_v48  ;;  %v1516_v27 = vld [vmem:[#allocation5 + $0x2b68] sm:$0xff] }
 0x339   :  { %10384 = vmatpush1.bf16.msra.mxu0 %v15033_v60  ;;  %v1640_v30 = vld [vmem:[#allocation5 + $0x2f48] sm:$0xff]  ;;  %v15130_v48 = vcombine.high %v1512_v53, %v1516_v27 }
 0x33a   :  { %10385 = vmatprep.subr.bf16.mxu0 %v15026_v52  ;;  %v1644_v36 = vld [vmem:[#allocation5 + $0x2f68] sm:$0xff] }
 0x33b   :  { %10425 = vmatpush1.bf16.msra.mxu1 %v15161_v46  ;;  %v15258_v43 = vcombine.high %v1640_v30, %v1644_v36  ;;  %v1504_v33 = vld [vmem:[#allocation5 + $0x2b08] sm:$0xff]  ;;  %v15129_v46 = vcombine.low %v1512_v53, %v1516_v27  ;;  %v15257_v52 = vcombine.low %v1640_v30, %v1644_v36 }
 0x33c   :  { %10426 = vmatprep.subr.bf16.mxu1 %v15154_v56  ;;  %v1508_v0 = vld [vmem:[#allocation5 + $0x2b28] sm:$0xff] }
 0x33d   :  { %10386 = vmatpush1.bf16.msra.mxu0 %v15025_v6  ;;  %v1632_v10 = vld [vmem:[#allocation5 + $0x2f08] sm:$0xff]  ;;  %v15122_v56 = vcombine.high %v1504_v33, %v1508_v0 }
 0x33e   :  { %10387 = vmatprep.subr.bf16.mxu0 %v15146_v57  ;;  %v1636_v60 = vld [vmem:[#allocation5 + $0x2f28] sm:$0xff] }
 0x33f   :  { %10427 = vmatpush1.bf16.msra.mxu1 %v15153_v15  ;;  %v15250_v61 = vcombine.high %v1632_v10, %v1636_v60  ;;  %v1496_v2 = vld [vmem:[#allocation5 + $0x2ac8] sm:$0xff]  ;;  %v15121_v15 = vcombine.low %v1504_v33, %v1508_v0  ;;  %v15249_v57 = vcombine.low %v1632_v10, %v1636_v60 }
 0x340   :  { %10428 = vmatprep.subr.bf16.mxu1 %v15274_v63  ;;  %v1500_v37 = vld [vmem:[#allocation5 + $0x2ae8] sm:$0xff] }
 0x341   :  { %10388 = vmatpush2.bf16.msra.mxu0 %v15145_v18  ;;  %v1624_v3 = vld [vmem:[#allocation5 + $0x2ec8] sm:$0xff]  ;;  %v15114_v63 = vcombine.high %v1496_v2, %v1500_v37 }
 0x342   :  { %10389 = vmatprep.subr.bf16.mxu0 %v15138_v21  ;;  %v1628_v6 = vld [vmem:[#allocation5 + $0x2ee8] sm:$0xff] }
 0x343   :  { %10429 = vmatpush2.bf16.msra.mxu1 %v15273_v34  ;;  %v15242_v17 = vcombine.high %v1624_v3, %v1628_v6  ;;  %v1488_v14 = vld [vmem:[#allocation5 + $0x2a88] sm:$0xff]  ;;  %v15113_v34 = vcombine.low %v1496_v2, %v1500_v37  ;;  %v15241_v21 = vcombine.low %v1624_v3, %v1628_v6  ;;  %v185_v37 = vld [vmem:[#allocation5 + $0x1d0] sm:$0xff] }
 0x344   :  { %10430 = vmatprep.subr.bf16.mxu1 %v15266_v25  ;;  %v1492_v24 = vld [vmem:[#allocation5 + $0x2aa8] sm:$0xff]  ;;  %v189_v3 = vld [vmem:[#allocation5 + $0x1f0] sm:$0xff] }
 0x345   :  { %10390 = vmatpush2.bf16.msra.mxu0 %v15137_v1  ;;  %v1616_v12 = vld [vmem:[#allocation5 + $0x2e88] sm:$0xff]  ;;  %v15106_v25 = vcombine.high %v1488_v14, %v1492_v24  ;;  %v313_v6 = vld [vmem:[#allocation5 + $0x5d0] sm:$0xff] }
 0x346   :  { %10391 = vmatprep.subr.bf16.mxu0 %v15130_v48  ;;  %v1620_v18 = vld [vmem:[#allocation5 + $0x2ea8] sm:$0xff] }
 0x347   :  { %10431 = vmatpush2.bf16.msra.mxu1 %v15265_v44  ;;  %v15234_v53 = vcombine.high %v1616_v12, %v1620_v18  ;;  %v1480_v27 = vld [vmem:[#allocation5 + $0x2a48] sm:$0xff]  ;;  %v15105_v44 = vcombine.low %v1488_v14, %v1492_v24  ;;  %v15233_v48 = vcombine.low %v1616_v12, %v1620_v18  ;;  %v177_v24 = vld [vmem:[#allocation5 + $0x190] sm:$0xff] }
 0x348   :  { %10432 = vmatprep.subr.bf16.mxu1 %v15258_v43  ;;  %v1484_v30 = vld [vmem:[#allocation5 + $0x2a68] sm:$0xff]  ;;  %v181_v12 = vld [vmem:[#allocation5 + $0x1b0] sm:$0xff] }
 0x349   :  { %10392 = vmatpush2.bf16.msra.mxu0 %v15129_v46  ;;  %v1608_v36 = vld [vmem:[#allocation5 + $0x2e48] sm:$0xff]  ;;  %v15098_v43 = vcombine.high %v1480_v27, %v1484_v30  ;;  %v305_v18 = vld [vmem:[#allocation5 + $0x590] sm:$0xff] }
 0x34a   :  { %10393 = vmatprep.subr.bf16.mxu0 %v15122_v56  ;;  %v1612_v1 = vld [vmem:[#allocation5 + $0x2e68] sm:$0xff] }
 0x34b   :  { %10433 = vmatpush2.bf16.msra.mxu1 %v15257_v52  ;;  %v15226_v33 = vcombine.high %v1608_v36, %v1612_v1  ;;  %v1472_v0 = vld [vmem:[#allocation5 + $0x2a08] sm:$0xff]  ;;  %v15097_v52 = vcombine.low %v1480_v27, %v1484_v30  ;;  %v15225_v56 = vcombine.low %v1608_v36, %v1612_v1  ;;  %v169_v30 = vld [vmem:[#allocation5 + $0x150] sm:$0xff] }
 0x34c   :  { %10434 = vmatprep.subr.bf16.mxu1 %v15250_v61  ;;  %v1476_v10 = vld [vmem:[#allocation5 + $0x2a28] sm:$0xff]  ;;  %v173_v36 = vld [vmem:[#allocation5 + $0x170] sm:$0xff] }
 0x34d   :  { %10394 = vmatpush2.bf16.msra.mxu0 %v15121_v15  ;;  %v1600_v60 = vld [vmem:[#allocation5 + $0x2e08] sm:$0xff]  ;;  %v15090_v61 = vcombine.high %v1472_v0, %v1476_v10  ;;  %v317_v15 = vld [vmem:[#allocation5 + $0x5f0] sm:$0xff] }
 0x34e   :  { %10395 = vmatprep.subr.bf16.mxu0 %v15114_v63  ;;  %v1604_v46 = vld [vmem:[#allocation5 + $0x2e28] sm:$0xff]  ;;  %v13932_v14 = vcombine.high %v313_v6, %v317_v15 }
 0x34f   :  { %10435 = vmatpush2.bf16.msra.mxu1 %v15249_v57  ;;  %v15218_v2 = vcombine.high %v1600_v60, %v1604_v46  ;;  %v15089_v57 = vcombine.low %v1472_v0, %v1476_v10  ;;  %v15217_v63 = vcombine.low %v1600_v60, %v1604_v46  ;;  %v13795_v0 = vcombine.low %v177_v24, %v181_v12 }
 0x350   :  { %10436 = vmatprep.subr.bf16.mxu1 %v15242_v17  ;;  %v13804_v17 = vcombine.high %v185_v37, %v189_v3  ;;  %v13788_v46 = vcombine.high %v169_v30, %v173_v36 }
 0x351   :  { %10396 = vmatpush2.bf16.msra.mxu0 %v15113_v34  ;;  %v309_v34 = vld [vmem:[#allocation5 + $0x5b0] sm:$0xff] }
 0x352   :  { %10397 = vmatprep.subr.bf16.mxu0 %v15106_v25  ;;  %v13931_v25 = vcombine.low %v313_v6, %v317_v15  ;;  %v13924_v27 = vcombine.high %v305_v18, %v309_v34  ;;  %v13923_v60 = vcombine.low %v305_v18, %v309_v34  ;;  %v289_v6 = vld [vmem:[#allocation5 + $0x510] sm:$0xff] }
 0x353   :  { %10437 = vmatpush2.bf16.msra.mxu1 %v15241_v21  ;;  %v13803_v21 = vcombine.low %v185_v37, %v189_v3  ;;  %v161_v37 = vld [vmem:[#allocation5 + $0x110] sm:$0xff] }
 0x354   :  { %10438 = vmatprep.subr.bf16.mxu1 %v15234_v53  ;;  %v13796_v53 = vcombine.high %v177_v24, %v181_v12  ;;  %v165_v3 = vld [vmem:[#allocation5 + $0x130] sm:$0xff] }
 0x355   :  { %10398 = vmatpush2.bf16.msra.mxu0 %v15105_v44  ;;  %v297_v44 = vld [vmem:[#allocation5 + $0x550] sm:$0xff]  ;;  %v13780_v24 = vcombine.high %v161_v37, %v165_v3 }
 0x356   :  { %10399 = vmatprep.subr.bf16.mxu0 %v15098_v43  ;;  %v293_v15 = vld [vmem:[#allocation5 + $0x530] sm:$0xff] }
 0x357   :  { %10439 = vmatpush2.bf16.msra.mxu1 %v15233_v48  ;;  %v301_v48 = vld [vmem:[#allocation5 + $0x570] sm:$0xff]  ;;  %v13908_v18 = vcombine.high %v289_v6, %v293_v15 }
 0x358   :  { %10440 = vmatprep.subr.bf16.mxu1 %v15226_v33  ;;  %v153_v34 = vld [vmem:[#allocation5 + $0xd0] sm:$0xff] }
 0x359   :  { %10400 = vmatpush2.bf16.msra.mxu0 %v15097_v52 }
 0x35a   :  { %10401 = vmatprep.subr.bf16.mxu0 %v15090_v61 }
 0x35b   :  { %10441 = vmatpush2.bf16.msra.mxu1 %v15225_v56 }
 0x35c   :  { %10442 = vmatprep.subr.bf16.mxu1 %v15218_v2  ;;  %v13916_v2 = vcombine.high %v297_v44, %v301_v48 }
 0x35d   :  { %10402 = vmatpush2.bf16.msra.mxu0 %v15089_v57 }
 0x35e   :  { %10453 = vmatprep.subr.bf16.mxu0 %v13804_v17  ;;  %v13787_v17 = vcombine.low %v169_v30, %v173_v36  ;;  %v145_v36 = vld [vmem:[#allocation5 + $0x90] sm:$0xff] }
 0x35f   :  { %10443 = vmatpush2.bf16.msra.mxu1 %v15217_v63 }
 0x360   :  { %10494 = vmatprep.subr.bf16.mxu1 %v13932_v14  ;;  %v10159_v1 = vpop.f32.mrf.mxu0  ;;  %10404 = vmatmul.mubr.bf16.vlgmr.msra.gmra.mxu0 %v16472_v26 }
 0x361   :  { %v10160_v43 = vadd.f32 %v10159_v1, %v16535_v23  ;;  %10454 = vmatpush1.bf16.msra.mxu0 %v13803_v21  ;;  %10485 = vmatprep.mubr.bf16.mxu0 %v16324_v58  ;;  %v157_v21 = vld [vmem:[#allocation5 + $0xf0] sm:$0xff]  ;;  %v13907_v1 = vcombine.low %v289_v6, %v293_v15 }
 0x362   :  { %v10200_v33 = vpop.f32.mrf.mxu1  ;;  %10445 = vmatmul.mubr.bf16.vlgmr.msra.gmra.mxu1 %v16476_v31  ;;  %v10161_v10 = vpop.f32.mrf.mxu0  ;;  %10455 = vmatprep.subr.bf16.mxu0 %v13796_v53  ;;  %v285_v53 = vld [vmem:[#allocation5 + $0x4f0] sm:$0xff] }
 0x363   :  { %10495 = vmatpush1.bf16.msra.mxu1 %v13931_v25  ;;  %v16545_v52 = vadd.f32 %v10200_v33, %v10160_v43  ;;  %v10162_v56 = vadd.f32 %v10161_v10, %v16540_v41  ;;  %10526 = vmatprep.mubr.bf16.mxu1 %v16328_v59  ;;  %v13915_v41 = vcombine.low %v297_v44, %v301_v48  ;;  %v281_v25 = vld [vmem:[#allocation5 + $0x4d0] sm:$0xff] }
 0x364   :  { %v10202_v61 = vpop.f32.mrf.mxu1  ;;  %10496 = vmatprep.subr.bf16.mxu1 %v13924_v27  ;;  %v10163_v23 = vpop.f32.mrf.mxu0  ;;  %v13779_v27 = vcombine.low %v161_v37, %v165_v3  ;;  %v13772_v43 = vcombine.high %v153_v34, %v157_v21  ;;  %v13900_v30 = vcombine.high %v281_v25, %v285_v53  ;;  %v149_v33 = vld [vmem:[#allocation5 + $0xb0] sm:$0xff]  ;;  %v13771_v48 = vcombine.low %v153_v34, %v157_v21 }
 0x365   :  { %v16550_v57 = vadd.f32 %v10202_v61, %v10162_v56  ;;  %10456 = vmatpush1.bf16.msra.mxu0 %v13795_v0  ;;  %v273_v0 = vld [vmem:[#allocation5 + $0x490] sm:$0xff]  ;;  %v13899_v10 = vcombine.low %v281_v25, %v285_v53  ;;  %v13763_v3 = vcombine.low %v145_v36, %v149_v33 }
 0x366   :  { %v10204_v63 = vpop.f32.mrf.mxu1  ;;  %v10164_v14 = vpop.f32.mrf.mxu0  ;;  %10457 = vmatprep.subr.bf16.mxu0 %v13788_v46  ;;  %v277_v44 = vld [vmem:[#allocation5 + $0x4b0] sm:$0xff] }
 0x367   :  { %10497 = vmatpush1.bf16.msra.mxu1 %v13923_v60  ;;  %v13764_v60 = vcombine.high %v145_v36, %v149_v33  ;;  %v13892_v46 = vcombine.high %v273_v0, %v277_v44  ;;  %v137_v56 = vld [vmem:[#allocation5 + $0x50] sm:$0xff]  ;;  %v13891_v23 = vcombine.low %v273_v0, %v277_v44 }
 0x368   :  { %v10205_v12 = vpop.f32.mrf.mxu1  ;;  %10498 = vmatprep.subr.bf16.mxu1 %v13916_v2  ;;  %v141_v61 = vld [vmem:[#allocation5 + $0x70] sm:$0xff] }
 0x369   :  { %10458 = vmatpush1.bf16.msra.mxu0 %v13787_v17  ;;  %v265_v2 = vld [vmem:[#allocation5 + $0x450] sm:$0xff]  ;;  %v13756_v6 = vcombine.high %v137_v56, %v141_v61 }
 0x36a   :  { %10459 = vmatprep.subr.bf16.mxu0 %v13780_v24  ;;  %v269_v37 = vld [vmem:[#allocation5 + $0x470] sm:$0xff]  ;;  %v13755_v24 = vcombine.low %v137_v56, %v141_v61 }
 0x36b   :  { %10499 = vmatpush1.bf16.msra.mxu1 %v13915_v41  ;;  %v13884_v15 = vcombine.high %v265_v2, %v269_v37  ;;  %v129_v63 = vld [vmem:[#allocation5 + $0x10] sm:$0xff]  ;;  %v13883_v12 = vcombine.low %v265_v2, %v269_v37 }
 0x36c   :  { %10500 = vmatprep.subr.bf16.mxu1 %v13908_v18  ;;  %v133_v17 = vld [vmem:[#allocation5 + $0x30] sm:$0xff] }
 0x36d   :  { %10460 = vmatpush1.bf16.msra.mxu0 %v13779_v27  ;;  %v257_v14 = vld [vmem:[#allocation5 + $0x410] sm:$0xff]  ;;  %v13748_v18 = vcombine.high %v129_v63, %v133_v17 }
 0x36e   :  { %10461 = vmatprep.subr.bf16.mxu0 %v13772_v43  ;;  %v261_v41 = vld [vmem:[#allocation5 + $0x430] sm:$0xff] }
 0x36f   :  { %10501 = vmatpush1.bf16.msra.mxu1 %v13907_v1  ;;  %v13876_v34 = vcombine.high %v257_v14, %v261_v41  ;;  %v249_v21 = vld [vmem:[#allocation5 + $0x3d0] sm:$0xff]  ;;  %v13747_v1 = vcombine.low %v129_v63, %v133_v17  ;;  %v13875_v43 = vcombine.low %v257_v14, %v261_v41 }
 0x370   :  { %10502 = vmatprep.subr.bf16.mxu1 %v13900_v30  ;;  %v253_v25 = vld [vmem:[#allocation5 + $0x3f0] sm:$0xff] }
 0x371   :  { %10462 = vmatpush1.bf16.msra.mxu0 %v13771_v48  ;;  %v377_v53 = vld [vmem:[#allocation5 + $0x7d0] sm:$0xff]  ;;  %v13868_v30 = vcombine.high %v249_v21, %v253_v25 }
 0x372   :  { %10463 = vmatprep.subr.bf16.mxu0 %v13764_v60  ;;  %v381_v27 = vld [vmem:[#allocation5 + $0x7f0] sm:$0xff] }
 0x373   :  { %10503 = vmatpush1.bf16.msra.mxu1 %v13899_v10  ;;  %v13996_v36 = vcombine.high %v377_v53, %v381_v27  ;;  %v241_v33 = vld [vmem:[#allocation5 + $0x390] sm:$0xff]  ;;  %v13867_v10 = vcombine.low %v249_v21, %v253_v25  ;;  %v13995_v60 = vcombine.low %v377_v53, %v381_v27 }
 0x374   :  { %10504 = vmatprep.subr.bf16.mxu1 %v13892_v46  ;;  %v245_v0 = vld [vmem:[#allocation5 + $0x3b0] sm:$0xff] }
 0x375   :  { %10464 = vmatpush1.bf16.msra.mxu0 %v13763_v3  ;;  %v369_v44 = vld [vmem:[#allocation5 + $0x790] sm:$0xff]  ;;  %v13860_v46 = vcombine.high %v241_v33, %v245_v0 }
 0x376   :  { %10465 = vmatprep.subr.bf16.mxu0 %v13756_v6  ;;  %v373_v48 = vld [vmem:[#allocation5 + $0x7b0] sm:$0xff] }
 0x377   :  { %10505 = vmatpush1.bf16.msra.mxu1 %v13891_v23  ;;  %v13988_v56 = vcombine.high %v369_v44, %v373_v48  ;;  %v233_v61 = vld [vmem:[#allocation5 + $0x350] sm:$0xff]  ;;  %v13859_v23 = vcombine.low %v241_v33, %v245_v0  ;;  %v13987_v6 = vcombine.low %v369_v44, %v373_v48 }
 0x378   :  { %10506 = vmatprep.subr.bf16.mxu1 %v13884_v15  ;;  %v237_v2 = vld [vmem:[#allocation5 + $0x370] sm:$0xff] }
 0x379   :  { %10466 = vmatpush1.bf16.msra.mxu0 %v13755_v24  ;;  %v361_v37 = vld [vmem:[#allocation5 + $0x750] sm:$0xff]  ;;  %v13852_v15 = vcombine.high %v233_v61, %v237_v2 }
 0x37a   :  { %10467 = vmatprep.subr.bf16.mxu0 %v13748_v18  ;;  %v365_v3 = vld [vmem:[#allocation5 + $0x770] sm:$0xff] }
 0x37b   :  { %10507 = vmatpush1.bf16.msra.mxu1 %v13883_v12  ;;  %v13980_v63 = vcombine.high %v361_v37, %v365_v3  ;;  %v225_v17 = vld [vmem:[#allocation5 + $0x310] sm:$0xff]  ;;  %v13851_v12 = vcombine.low %v233_v61, %v237_v2  ;;  %v13979_v18 = vcombine.low %v361_v37, %v365_v3 }
 0x37c   :  { %10508 = vmatprep.subr.bf16.mxu1 %v13876_v34  ;;  %v229_v14 = vld [vmem:[#allocation5 + $0x330] sm:$0xff] }
 0x37d   :  { %10468 = vmatpush1.bf16.msra.mxu0 %v13747_v1  ;;  %v353_v41 = vld [vmem:[#allocation5 + $0x710] sm:$0xff]  ;;  %v13844_v34 = vcombine.high %v225_v17, %v229_v14 }
 0x37e   :  { %10469 = vmatprep.subr.bf16.mxu0 %v13868_v30  ;;  %v357_v24 = vld [vmem:[#allocation5 + $0x730] sm:$0xff] }
 0x37f   :  { %10509 = vmatpush1.bf16.msra.mxu1 %v13875_v43  ;;  %v13972_v21 = vcombine.high %v353_v41, %v357_v24  ;;  %v217_v25 = vld [vmem:[#allocation5 + $0x2d0] sm:$0xff]  ;;  %v13843_v43 = vcombine.low %v225_v17, %v229_v14  ;;  %v13971_v30 = vcombine.low %v353_v41, %v357_v24 }
 0x380   :  { %10510 = vmatprep.subr.bf16.mxu1 %v13996_v36  ;;  %v221_v53 = vld [vmem:[#allocation5 + $0x2f0] sm:$0xff] }
 0x381   :  { %10470 = vmatpush2.bf16.msra.mxu0 %v13867_v10  ;;  %v345_v27 = vld [vmem:[#allocation5 + $0x6d0] sm:$0xff]  ;;  %v13836_v36 = vcombine.high %v217_v25, %v221_v53 }
 0x382   :  { %10471 = vmatprep.subr.bf16.mxu0 %v13860_v46  ;;  %v349_v1 = vld [vmem:[#allocation5 + $0x6f0] sm:$0xff] }
 0x383   :  { %10511 = vmatpush2.bf16.msra.mxu1 %v13995_v60  ;;  %v13964_v33 = vcombine.high %v345_v27, %v349_v1  ;;  %v209_v0 = vld [vmem:[#allocation5 + $0x290] sm:$0xff]  ;;  %v13835_v60 = vcombine.low %v217_v25, %v221_v53  ;;  %v13963_v46 = vcombine.low %v345_v27, %v349_v1 }
 0x384   :  { %10512 = vmatprep.subr.bf16.mxu1 %v13988_v56  ;;  %v213_v44 = vld [vmem:[#allocation5 + $0x2b0] sm:$0xff] }
 0x385   :  { %10472 = vmatpush2.bf16.msra.mxu0 %v13859_v23  ;;  %v337_v48 = vld [vmem:[#allocation5 + $0x690] sm:$0xff]  ;;  %v13828_v56 = vcombine.high %v209_v0, %v213_v44 }
 0x386   :  { %10473 = vmatprep.subr.bf16.mxu0 %v13852_v15  ;;  %v341_v10 = vld [vmem:[#allocation5 + $0x6b0] sm:$0xff] }
 0x387   :  { %10513 = vmatpush2.bf16.msra.mxu1 %v13987_v6  ;;  %v13956_v61 = vcombine.high %v337_v48, %v341_v10  ;;  %v201_v2 = vld [vmem:[#allocation5 + $0x250] sm:$0xff]  ;;  %v13827_v6 = vcombine.low %v209_v0, %v213_v44  ;;  %v13955_v15 = vcombine.low %v337_v48, %v341_v10 }
 0x388   :  { %10514 = vmatprep.subr.bf16.mxu1 %v13980_v63  ;;  %v205_v37 = vld [vmem:[#allocation5 + $0x270] sm:$0xff] }
 0x389   :  { %10474 = vmatpush2.bf16.msra.mxu0 %v13851_v12  ;;  %v329_v3 = vld [vmem:[#allocation5 + $0x650] sm:$0xff]  ;;  %v13820_v63 = vcombine.high %v201_v2, %v205_v37 }
 0x38a   :  { %10475 = vmatprep.subr.bf16.mxu0 %v13844_v34  ;;  %v333_v23 = vld [vmem:[#allocation5 + $0x670] sm:$0xff] }
 0x38b   :  { %10515 = vmatpush2.bf16.msra.mxu1 %v13979_v18  ;;  %v13948_v17 = vcombine.high %v329_v3, %v333_v23  ;;  %v193_v14 = vld [vmem:[#allocation5 + $0x210] sm:$0xff]  ;;  %v13819_v18 = vcombine.low %v201_v2, %v205_v37  ;;  %v13947_v34 = vcombine.low %v329_v3, %v333_v23 }
 0x38c   :  { %10516 = vmatprep.subr.bf16.mxu1 %v13972_v21  ;;  %v197_v41 = vld [vmem:[#allocation5 + $0x230] sm:$0xff] }
 0x38d   :  { %10476 = vmatpush2.bf16.msra.mxu0 %v13843_v43  ;;  %v321_v24 = vld [vmem:[#allocation5 + $0x610] sm:$0xff]  ;;  %v13812_v21 = vcombine.high %v193_v14, %v197_v41 }
 0x38e   :  { %10477 = vmatprep.subr.bf16.mxu0 %v13836_v36  ;;  %v325_v12 = vld [vmem:[#allocation5 + $0x630] sm:$0xff] }
 0x38f   :  { %10517 = vmatpush2.bf16.msra.mxu1 %v13971_v30  ;;  %v13940_v25 = vcombine.high %v321_v24, %v325_v12  ;;  %v441_v53 = vld [vmem:[#allocation5 + $0x9d0] sm:$0xff]  ;;  %v13811_v30 = vcombine.low %v193_v14, %v197_v41  ;;  %v13939_v36 = vcombine.low %v321_v24, %v325_v12 }
 0x390   :  { %10518 = vmatprep.subr.bf16.mxu1 %v13964_v33  ;;  %v445_v27 = vld [vmem:[#allocation5 + $0x9f0] sm:$0xff] }
 0x391   :  { %10478 = vmatpush2.bf16.msra.mxu0 %v13835_v60  ;;  %v569_v1 = vld [vmem:[#allocation5 + $0xdd0] sm:$0xff]  ;;  %v14060_v33 = vcombine.high %v441_v53, %v445_v27 }
 0x392   :  { %10479 = vmatprep.subr.bf16.mxu0 %v13828_v56  ;;  %v573_v43 = vld [vmem:[#allocation5 + $0xdf0] sm:$0xff] }
 0x393   :  { %10519 = vmatpush2.bf16.msra.mxu1 %v13963_v46  ;;  %v14188_v0 = vcombine.high %v569_v1, %v573_v43  ;;  %v433_v44 = vld [vmem:[#allocation5 + $0x990] sm:$0xff]  ;;  %v14059_v46 = vcombine.low %v441_v53, %v445_v27  ;;  %v14187_v56 = vcombine.low %v569_v1, %v573_v43 }
 0x394   :  { %10520 = vmatprep.subr.bf16.mxu1 %v13956_v61  ;;  %v437_v48 = vld [vmem:[#allocation5 + $0x9b0] sm:$0xff] }
 0x395   :  { %10480 = vmatpush2.bf16.msra.mxu0 %v13827_v6  ;;  %v561_v10 = vld [vmem:[#allocation5 + $0xd90] sm:$0xff]  ;;  %v14052_v61 = vcombine.high %v433_v44, %v437_v48  ;;  %v14051_v14 = vcombine.low %v433_v44, %v437_v48 }
 0x396   :  { %10481 = vmatprep.subr.bf16.mxu0 %v13820_v63  ;;  %v565_v60 = vld [vmem:[#allocation5 + $0xdb0] sm:$0xff] }
 0x397   :  { %10521 = vmatpush2.bf16.msra.mxu1 %v13955_v15  ;;  %v14180_v2 = vcombine.high %v561_v10, %v565_v60  ;;  %v425_v37 = vld [vmem:[#allocation5 + $0x950] sm:$0xff]  ;;  %v14179_v24 = vcombine.low %v561_v10, %v565_v60 }
 0x398   :  { %10522 = vmatprep.subr.bf16.mxu1 %v13948_v17  ;;  %v429_v3 = vld [vmem:[#allocation5 + $0x970] sm:$0xff] }
 0x399   :  { %10482 = vmatpush2.bf16.msra.mxu0 %v13819_v18  ;;  %v553_v6 = vld [vmem:[#allocation5 + $0xd50] sm:$0xff]  ;;  %v14044_v12 = vcombine.high %v425_v37, %v429_v3 }
 0x39a   :  { %10483 = vmatprep.subr.bf16.mxu0 %v13812_v21  ;;  %v557_v15 = vld [vmem:[#allocation5 + $0xd70] sm:$0xff] }
 0x39b   :  { %10523 = vmatpush2.bf16.msra.mxu1 %v13947_v34  ;;  %v417_v53 = vld [vmem:[#allocation5 + $0x910] sm:$0xff] }
 0x39c   :  { %10524 = vmatprep.subr.bf16.mxu1 %v13940_v25  ;;  %v14172_v25 = vcombine.high %v553_v6, %v557_v15  ;;  %v421_v27 = vld [vmem:[#allocation5 + $0x930] sm:$0xff] }
 0x39d   :  { %10484 = vmatpush2.bf16.msra.mxu0 %v13811_v30  ;;  %v545_v1 = vld [vmem:[#allocation5 + $0xd10] sm:$0xff]  ;;  %v14036_v44 = vcombine.high %v417_v53, %v421_v27 }
 0x39e   :  { %10535 = vmatprep.subr.bf16.mxu0 %v14060_v33  ;;  %v549_v43 = vld [vmem:[#allocation5 + $0xd30] sm:$0xff]  ;;  %v14043_v33 = vcombine.low %v425_v37, %v429_v3 }
 0x39f   :  { %10525 = vmatpush2.bf16.msra.mxu1 %v13939_v36  ;;  %v14164_v10 = vcombine.high %v545_v1, %v549_v43  ;;  %v409_v60 = vld [vmem:[#allocation5 + $0x8d0] sm:$0xff] }
 0x3a0   :  { %10576 = vmatprep.subr.bf16.mxu1 %v14188_v0  ;;  %v10241_v23 = vpop.f32.mrf.mxu0  ;;  %10486 = vmatmul.mubr.bf16.vlgmr.msra.gmra.mxu0 %v16334_v16  ;;  %v401_v3 = vld [vmem:[#allocation5 + $0x890] sm:$0xff] }
 0x3a1   :  { %v10242_v63 = vadd.f32 %v10241_v23, %v16545_v52  ;;  %10536 = vmatpush1.bf16.msra.mxu0 %v14059_v46  ;;  %10567 = vmatprep.mubr.bf16.mxu0 %v16346_v28  ;;  %v413_v46 = vld [vmem:[#allocation5 + $0x8f0] sm:$0xff]  ;;  %v14163_v23 = vcombine.low %v545_v1, %v549_v43 }
 0x3a2   :  { %v10282_v17 = vpop.f32.mrf.mxu1  ;;  %10527 = vmatmul.mubr.bf16.vlgmr.msra.gmra.mxu1 %v16340_v20  ;;  %v10243_v41 = vpop.f32.mrf.mxu0  ;;  %10537 = vmatprep.subr.bf16.mxu0 %v14052_v61  ;;  %v541_v61 = vld [vmem:[#allocation5 + $0xcf0] sm:$0xff] }
 0x3a3   :  { %10577 = vmatpush1.bf16.msra.mxu1 %v14187_v56  ;;  %v16555_v18 = vadd.f32 %v10282_v17, %v10242_v63  ;;  %v10244_v34 = vadd.f32 %v10243_v41, %v16550_v57  ;;  %10608 = vmatprep.mubr.bf16.mxu1 %v16351_v29  ;;  %v14171_v57 = vcombine.low %v553_v6, %v557_v15  ;;  %v537_v56 = vld [vmem:[#allocation5 + $0xcd0] sm:$0xff] }
 0x3a4   :  { %v10284_v21 = vpop.f32.mrf.mxu1  ;;  %10578 = vmatprep.subr.bf16.mxu1 %v14180_v2  ;;  %v10245_v52 = vpop.f32.mrf.mxu0  ;;  %v14035_v2 = vcombine.low %v417_v53, %v421_v27  ;;  %v14028_v63 = vcombine.high %v409_v60, %v413_v46  ;;  %v14156_v37 = vcombine.high %v537_v56, %v541_v61  ;;  %v405_v17 = vld [vmem:[#allocation5 + $0x8b0] sm:$0xff]  ;;  %v14027_v15 = vcombine.low %v409_v60, %v413_v46 }
 0x3a5   :  { %v16560_v30 = vadd.f32 %v10284_v21, %v10244_v34  ;;  %10538 = vmatpush1.bf16.msra.mxu0 %v14051_v14  ;;  %v529_v14 = vld [vmem:[#allocation5 + $0xc90] sm:$0xff]  ;;  %v14155_v41 = vcombine.low %v537_v56, %v541_v61  ;;  %v14019_v27 = vcombine.low %v401_v3, %v405_v17 }
 0x3a6   :  { %v10286_v36 = vpop.f32.mrf.mxu1  ;;  %v10246_v0 = vpop.f32.mrf.mxu0  ;;  %10539 = vmatprep.subr.bf16.mxu0 %v14044_v12  ;;  %v533_v6 = vld [vmem:[#allocation5 + $0xcb0] sm:$0xff] }
 0x3a7   :  { %10579 = vmatpush1.bf16.msra.mxu1 %v14179_v24  ;;  %v14020_v24 = vcombine.high %v401_v3, %v405_v17  ;;  %v14148_v12 = vcombine.high %v529_v14, %v533_v6  ;;  %v393_v34 = vld [vmem:[#allocation5 + $0x850] sm:$0xff]  ;;  %v14147_v52 = vcombine.low %v529_v14, %v533_v6 }
 0x3a8   :  { %v10287_v48 = vpop.f32.mrf.mxu1  ;;  %10580 = vmatprep.subr.bf16.mxu1 %v14172_v25  ;;  %v397_v21 = vld [vmem:[#allocation5 + $0x870] sm:$0xff] }
 0x3a9   :  { %10540 = vmatpush1.bf16.msra.mxu0 %v14043_v33  ;;  %v521_v25 = vld [vmem:[#allocation5 + $0xc50] sm:$0xff]  ;;  %v14012_v1 = vcombine.high %v393_v34, %v397_v21 }
 0x3aa   :  { %10541 = vmatprep.subr.bf16.mxu0 %v14036_v44  ;;  %v525_v53 = vld [vmem:[#allocation5 + $0xc70] sm:$0xff]  ;;  %v14011_v44 = vcombine.low %v393_v34, %v397_v21 }
 0x3ab   :  { %10581 = vmatpush1.bf16.msra.mxu1 %v14171_v57  ;;  %v14140_v43 = vcombine.high %v521_v25, %v525_v53  ;;  %v385_v36 = vld [vmem:[#allocation5 + $0x810] sm:$0xff]  ;;  %v14139_v48 = vcombine.low %v521_v25, %v525_v53 }
 0x3ac   :  { %10582 = vmatprep.subr.bf16.mxu1 %v14164_v10  ;;  %v389_v33 = vld [vmem:[#allocation5 + $0x830] sm:$0xff] }
 0x3ad   :  { %10542 = vmatpush1.bf16.msra.mxu0 %v14035_v2  ;;  %v513_v0 = vld [vmem:[#allocation5 + $0xc10] sm:$0xff]  ;;  %v14004_v10 = vcombine.high %v385_v36, %v389_v33 }
 0x3ae   :  { %10543 = vmatprep.subr.bf16.mxu0 %v14028_v63  ;;  %v517_v57 = vld [vmem:[#allocation5 + $0xc30] sm:$0xff] }
 0x3af   :  { %10583 = vmatpush1.bf16.msra.mxu1 %v14163_v23  ;;  %v14132_v60 = vcombine.high %v513_v0, %v517_v57  ;;  %v505_v46 = vld [vmem:[#allocation5 + $0xbd0] sm:$0xff]  ;;  %v14003_v23 = vcombine.low %v385_v36, %v389_v33  ;;  %v14131_v63 = vcombine.low %v513_v0, %v517_v57 }
 0x3b0   :  { %10584 = vmatprep.subr.bf16.mxu1 %v14156_v37  ;;  %v509_v56 = vld [vmem:[#allocation5 + $0xbf0] sm:$0xff] }
 0x3b1   :  { %10544 = vmatpush1.bf16.msra.mxu0 %v14027_v15  ;;  %v633_v61 = vld [vmem:[#allocation5 + $0xfd0] sm:$0xff]  ;;  %v14124_v37 = vcombine.high %v505_v46, %v509_v56 }
 0x3b2   :  { %10545 = vmatprep.subr.bf16.mxu0 %v14020_v24  ;;  %v637_v2 = vld [vmem:[#allocation5 + $0xff0] sm:$0xff] }
 0x3b3   :  { %10585 = vmatpush1.bf16.msra.mxu1 %v14155_v41  ;;  %v14252_v3 = vcombine.high %v633_v61, %v637_v2  ;;  %v497_v17 = vld [vmem:[#allocation5 + $0xb90] sm:$0xff]  ;;  %v14123_v41 = vcombine.low %v505_v46, %v509_v56  ;;  %v14251_v24 = vcombine.low %v633_v61, %v637_v2 }
 0x3b4   :  { %10586 = vmatprep.subr.bf16.mxu1 %v14148_v12  ;;  %v501_v14 = vld [vmem:[#allocation5 + $0xbb0] sm:$0xff] }
 0x3b5   :  { %10546 = vmatpush1.bf16.msra.mxu0 %v14019_v27  ;;  %v625_v6 = vld [vmem:[#allocation5 + $0xf90] sm:$0xff]  ;;  %v14116_v12 = vcombine.high %v497_v17, %v501_v14 }
 0x3b6   :  { %10547 = vmatprep.subr.bf16.mxu0 %v14012_v1  ;;  %v629_v15 = vld [vmem:[#allocation5 + $0xfb0] sm:$0xff] }
 0x3b7   :  { %10587 = vmatpush1.bf16.msra.mxu1 %v14147_v52  ;;  %v14244_v34 = vcombine.high %v625_v6, %v629_v15  ;;  %v489_v21 = vld [vmem:[#allocation5 + $0xb50] sm:$0xff]  ;;  %v14115_v52 = vcombine.low %v497_v17, %v501_v14  ;;  %v14243_v1 = vcombine.low %v625_v6, %v629_v15 }
 0x3b8   :  { %10588 = vmatprep.subr.bf16.mxu1 %v14140_v43  ;;  %v493_v25 = vld [vmem:[#allocation5 + $0xb70] sm:$0xff] }
 0x3b9   :  { %10548 = vmatpush1.bf16.msra.mxu0 %v14011_v44  ;;  %v617_v53 = vld [vmem:[#allocation5 + $0xf50] sm:$0xff]  ;;  %v14108_v43 = vcombine.high %v489_v21, %v493_v25 }
 0x3ba   :  { %10549 = vmatprep.subr.bf16.mxu0 %v14004_v10  ;;  %v621_v27 = vld [vmem:[#allocation5 + $0xf70] sm:$0xff] }
 0x3bb   :  { %10589 = vmatpush1.bf16.msra.mxu1 %v14139_v48  ;;  %v14236_v36 = vcombine.high %v617_v53, %v621_v27  ;;  %v481_v33 = vld [vmem:[#allocation5 + $0xb10] sm:$0xff]  ;;  %v14107_v48 = vcombine.low %v489_v21, %v493_v25  ;;  %v14235_v10 = vcombine.low %v617_v53, %v621_v27 }
 0x3bc   :  { %10590 = vmatprep.subr.bf16.mxu1 %v14132_v60  ;;  %v485_v0 = vld [vmem:[#allocation5 + $0xb30] sm:$0xff] }
 0x3bd   :  { %10550 = vmatpush1.bf16.msra.mxu0 %v14003_v23  ;;  %v609_v57 = vld [vmem:[#allocation5 + $0xf10] sm:$0xff]  ;;  %v14100_v60 = vcombine.high %v481_v33, %v485_v0 }
 0x3be   :  { %10551 = vmatprep.subr.bf16.mxu0 %v14124_v37  ;;  %v613_v44 = vld [vmem:[#allocation5 + $0xf30] sm:$0xff] }
 0x3bf   :  { %10591 = vmatpush1.bf16.msra.mxu1 %v14131_v63  ;;  %v14228_v46 = vcombine.high %v609_v57, %v613_v44  ;;  %v473_v56 = vld [vmem:[#allocation5 + $0xad0] sm:$0xff]  ;;  %v14099_v63 = vcombine.low %v481_v33, %v485_v0  ;;  %v14227_v37 = vcombine.low %v609_v57, %v613_v44 }
 0x3c0   :  { %10592 = vmatprep.subr.bf16.mxu1 %v14252_v3  ;;  %v477_v61 = vld [vmem:[#allocation5 + $0xaf0] sm:$0xff] }
 0x3c1   :  { %10552 = vmatpush2.bf16.msra.mxu0 %v14123_v41  ;;  %v601_v2 = vld [vmem:[#allocation5 + $0xed0] sm:$0xff]  ;;  %v14092_v3 = vcombine.high %v473_v56, %v477_v61 }
 0x3c2   :  { %10553 = vmatprep.subr.bf16.mxu0 %v14116_v12  ;;  %v605_v23 = vld [vmem:[#allocation5 + $0xef0] sm:$0xff] }
 0x3c3   :  { %10593 = vmatpush2.bf16.msra.mxu1 %v14251_v24  ;;  %v14220_v17 = vcombine.high %v601_v2, %v605_v23  ;;  %v465_v14 = vld [vmem:[#allocation5 + $0xa90] sm:$0xff]  ;;  %v14091_v24 = vcombine.low %v473_v56, %v477_v61  ;;  %v14219_v12 = vcombine.low %v601_v2, %v605_v23 }
 0x3c4   :  { %10594 = vmatprep.subr.bf16.mxu1 %v14244_v34  ;;  %v469_v6 = vld [vmem:[#allocation5 + $0xab0] sm:$0xff] }
 0x3c5   :  { %10554 = vmatpush2.bf16.msra.mxu0 %v14115_v52  ;;  %v593_v15 = vld [vmem:[#allocation5 + $0xe90] sm:$0xff]  ;;  %v14084_v34 = vcombine.high %v465_v14, %v469_v6 }
 0x3c6   :  { %10555 = vmatprep.subr.bf16.mxu0 %v14108_v43  ;;  %v597_v41 = vld [vmem:[#allocation5 + $0xeb0] sm:$0xff] }
 0x3c7   :  { %10595 = vmatpush2.bf16.msra.mxu1 %v14243_v1  ;;  %v14212_v21 = vcombine.high %v593_v15, %v597_v41  ;;  %v457_v25 = vld [vmem:[#allocation5 + $0xa50] sm:$0xff]  ;;  %v14083_v1 = vcombine.low %v465_v14, %v469_v6  ;;  %v14211_v43 = vcombine.low %v593_v15, %v597_v41 }
 0x3c8   :  { %10596 = vmatprep.subr.bf16.mxu1 %v14236_v36  ;;  %v461_v53 = vld [vmem:[#allocation5 + $0xa70] sm:$0xff] }
 0x3c9   :  { %10556 = vmatpush2.bf16.msra.mxu0 %v14107_v48  ;;  %v585_v27 = vld [vmem:[#allocation5 + $0xe50] sm:$0xff]  ;;  %v14076_v36 = vcombine.high %v457_v25, %v461_v53 }
 0x3ca   :  { %10557 = vmatprep.subr.bf16.mxu0 %v14100_v60  ;;  %v589_v52 = vld [vmem:[#allocation5 + $0xe70] sm:$0xff] }
 0x3cb   :  { %10597 = vmatpush2.bf16.msra.mxu1 %v14235_v10  ;;  %v14204_v33 = vcombine.high %v585_v27, %v589_v52  ;;  %v449_v0 = vld [vmem:[#allocation5 + $0xa10] sm:$0xff]  ;;  %v14075_v10 = vcombine.low %v457_v25, %v461_v53  ;;  %v14203_v60 = vcombine.low %v585_v27, %v589_v52 }
 0x3cc   :  { %10598 = vmatprep.subr.bf16.mxu1 %v14228_v46  ;;  %v453_v57 = vld [vmem:[#allocation5 + $0xa30] sm:$0xff] }
 0x3cd   :  { %10558 = vmatpush2.bf16.msra.mxu0 %v14099_v63  ;;  %v577_v44 = vld [vmem:[#allocation5 + $0xe10] sm:$0xff]  ;;  %v14068_v46 = vcombine.high %v449_v0, %v453_v57 }
 0x3ce   :  { %10559 = vmatprep.subr.bf16.mxu0 %v14092_v3  ;;  %v581_v48 = vld [vmem:[#allocation5 + $0xe30] sm:$0xff] }
 0x3cf   :  { %10599 = vmatpush2.bf16.msra.mxu1 %v14227_v37  ;;  %v14196_v56 = vcombine.high %v577_v44, %v581_v48  ;;  %v697_v61 = vld [vmem:[#allocation5 + $0x11d0] sm:$0xff]  ;;  %v14067_v37 = vcombine.low %v449_v0, %v453_v57  ;;  %v14195_v3 = vcombine.low %v577_v44, %v581_v48 }
 0x3d0   :  { %10600 = vmatprep.subr.bf16.mxu1 %v14220_v17  ;;  %v701_v2 = vld [vmem:[#allocation5 + $0x11f0] sm:$0xff] }
 0x3d1   :  { %10560 = vmatpush2.bf16.msra.mxu0 %v14091_v24  ;;  %v825_v23 = vld [vmem:[#allocation5 + $0x15d0] sm:$0xff]  ;;  %v14316_v17 = vcombine.high %v697_v61, %v701_v2 }
 0x3d2   :  { %10561 = vmatprep.subr.bf16.mxu0 %v14084_v34  ;;  %v829_v63 = vld [vmem:[#allocation5 + $0x15f0] sm:$0xff] }
 0x3d3   :  { %10601 = vmatpush2.bf16.msra.mxu1 %v14219_v12  ;;  %v14444_v14 = vcombine.high %v825_v23, %v829_v63  ;;  %v689_v6 = vld [vmem:[#allocation5 + $0x1190] sm:$0xff]  ;;  %v14315_v12 = vcombine.low %v697_v61, %v701_v2  ;;  %v14443_v34 = vcombine.low %v825_v23, %v829_v63 }
 0x3d4   :  { %10602 = vmatprep.subr.bf16.mxu1 %v14212_v21  ;;  %v693_v15 = vld [vmem:[#allocation5 + $0x11b0] sm:$0xff] }
 0x3d5   :  { %10562 = vmatpush2.bf16.msra.mxu0 %v14083_v1  ;;  %v817_v41 = vld [vmem:[#allocation5 + $0x1590] sm:$0xff]  ;;  %v14308_v21 = vcombine.high %v689_v6, %v693_v15  ;;  %v14307_v0 = vcombine.low %v689_v6, %v693_v15 }
 0x3d6   :  { %10563 = vmatprep.subr.bf16.mxu0 %v14076_v36  ;;  %v821_v24 = vld [vmem:[#allocation5 + $0x15b0] sm:$0xff] }
 0x3d7   :  { %10603 = vmatpush2.bf16.msra.mxu1 %v14211_v43  ;;  %v14436_v25 = vcombine.high %v817_v41, %v821_v24  ;;  %v681_v53 = vld [vmem:[#allocation5 + $0x1150] sm:$0xff]  ;;  %v14435_v44 = vcombine.low %v817_v41, %v821_v24 }
 0x3d8   :  { %10604 = vmatprep.subr.bf16.mxu1 %v14204_v33  ;;  %v685_v27 = vld [vmem:[#allocation5 + $0x1170] sm:$0xff] }
 0x3d9   :  { %10564 = vmatpush2.bf16.msra.mxu0 %v14075_v10  ;;  %v809_v1 = vld [vmem:[#allocation5 + $0x1550] sm:$0xff]  ;;  %v14300_v48 = vcombine.high %v681_v53, %v685_v27 }
 0x3da   :  { %10565 = vmatprep.subr.bf16.mxu0 %v14068_v46  ;;  %v813_v43 = vld [vmem:[#allocation5 + $0x1570] sm:$0xff] }
 0x3db   :  { %10605 = vmatpush2.bf16.msra.mxu1 %v14203_v60  ;;  %v673_v61 = vld [vmem:[#allocation5 + $0x1110] sm:$0xff] }
 0x3dc   :  { %10606 = vmatprep.subr.bf16.mxu1 %v14196_v56  ;;  %v14428_v56 = vcombine.high %v809_v1, %v813_v43  ;;  %v677_v2 = vld [vmem:[#allocation5 + $0x1130] sm:$0xff] }
 0x3dd   :  { %10566 = vmatpush2.bf16.msra.mxu0 %v14067_v37  ;;  %v801_v23 = vld [vmem:[#allocation5 + $0x1510] sm:$0xff]  ;;  %v14292_v6 = vcombine.high %v673_v61, %v677_v2 }
 0x3de   :  { %10617 = vmatprep.subr.bf16.mxu0 %v14316_v17  ;;  %v805_v63 = vld [vmem:[#allocation5 + $0x1530] sm:$0xff]  ;;  %v14299_v17 = vcombine.low %v681_v53, %v685_v27 }
 0x3df   :  { %10607 = vmatpush2.bf16.msra.mxu1 %v14195_v3  ;;  %v14420_v41 = vcombine.high %v801_v23, %v805_v63  ;;  %v665_v24 = vld [vmem:[#allocation5 + $0x10d0] sm:$0xff] }
 0x3e0   :  { %10658 = vmatprep.subr.bf16.mxu1 %v14444_v14  ;;  %v10323_v52 = vpop.f32.mrf.mxu0  ;;  %10568 = vmatmul.mubr.bf16.vlgmr.msra.gmra.mxu0 %v16360_v39  ;;  %v657_v27 = vld [vmem:[#allocation5 + $0x1090] sm:$0xff] }
 0x3e1   :  { %v10324_v36 = vadd.f32 %v10323_v52, %v16555_v18  ;;  %10618 = vmatpush1.bf16.msra.mxu0 %v14315_v12  ;;  %10649 = vmatprep.mubr.bf16.mxu0 %v16370_v19  ;;  %v669_v12 = vld [vmem:[#allocation5 + $0x10f0] sm:$0xff]  ;;  %v14419_v52 = vcombine.low %v801_v23, %v805_v63 }
 0x3e2   :  { %v10364_v33 = vpop.f32.mrf.mxu1  ;;  %10609 = vmatmul.mubr.bf16.vlgmr.msra.gmra.mxu1 %v16364_v40  ;;  %v10325_v57 = vpop.f32.mrf.mxu0  ;;  %10619 = vmatprep.subr.bf16.mxu0 %v14308_v21  ;;  %v797_v21 = vld [vmem:[#allocation5 + $0x14f0] sm:$0xff] }
 0x3e3   :  { %10659 = vmatpush1.bf16.msra.mxu1 %v14443_v34  ;;  %v16565_v10 = vadd.f32 %v10364_v33, %v10324_v36  ;;  %v10326_v60 = vadd.f32 %v10325_v57, %v16560_v30  ;;  %10690 = vmatprep.mubr.bf16.mxu1 %v16375_v22  ;;  %v14427_v30 = vcombine.low %v809_v1, %v813_v43  ;;  %v793_v34 = vld [vmem:[#allocation5 + $0x14d0] sm:$0xff] }
 0x3e4   :  { %v10366_v46 = vpop.f32.mrf.mxu1  ;;  %10660 = vmatprep.subr.bf16.mxu1 %v14436_v25  ;;  %v10327_v18 = vpop.f32.mrf.mxu0  ;;  %v14291_v25 = vcombine.low %v673_v61, %v677_v2  ;;  %v14284_v36 = vcombine.high %v665_v24, %v669_v12  ;;  %v14412_v53 = vcombine.high %v793_v34, %v797_v21  ;;  %v661_v33 = vld [vmem:[#allocation5 + $0x10b0] sm:$0xff]  ;;  %v14283_v43 = vcombine.low %v665_v24, %v669_v12 }
 0x3e5   :  { %v16570_v37 = vadd.f32 %v10366_v46, %v10326_v60  ;;  %10620 = vmatpush1.bf16.msra.mxu0 %v14307_v0  ;;  %v785_v0 = vld [vmem:[#allocation5 + $0x1490] sm:$0xff]  ;;  %v14411_v57 = vcombine.low %v793_v34, %v797_v21  ;;  %v14275_v2 = vcombine.low %v657_v27, %v661_v33 }
 0x3e6   :  { %v10368_v3 = vpop.f32.mrf.mxu1  ;;  %v10328_v14 = vpop.f32.mrf.mxu0  ;;  %10621 = vmatprep.subr.bf16.mxu0 %v14300_v48  ;;  %v789_v1 = vld [vmem:[#allocation5 + $0x14b0] sm:$0xff] }
 0x3e7   :  { %10661 = vmatpush1.bf16.msra.mxu1 %v14435_v44  ;;  %v14276_v44 = vcombine.high %v657_v27, %v661_v33  ;;  %v14404_v48 = vcombine.high %v785_v0, %v789_v1  ;;  %v649_v60 = vld [vmem:[#allocation5 + $0x1050] sm:$0xff]  ;;  %v14403_v18 = vcombine.low %v785_v0, %v789_v1 }
 0x3e8   :  { %v10369_v15 = vpop.f32.mrf.mxu1  ;;  %10662 = vmatprep.subr.bf16.mxu1 %v14428_v56  ;;  %v653_v46 = vld [vmem:[#allocation5 + $0x1070] sm:$0xff] }
 0x3e9   :  { %10622 = vmatpush1.bf16.msra.mxu0 %v14299_v17  ;;  %v777_v56 = vld [vmem:[#allocation5 + $0x1450] sm:$0xff]  ;;  %v14268_v23 = vcombine.high %v649_v60, %v653_v46 }
 0x3ea   :  { %10623 = vmatprep.subr.bf16.mxu0 %v14292_v6  ;;  %v781_v61 = vld [vmem:[#allocation5 + $0x1470] sm:$0xff]  ;;  %v14267_v6 = vcombine.low %v649_v60, %v653_v46 }
 0x3eb   :  { %10663 = vmatpush1.bf16.msra.mxu1 %v14427_v30  ;;  %v14396_v63 = vcombine.high %v777_v56, %v781_v61  ;;  %v641_v3 = vld [vmem:[#allocation5 + $0x1010] sm:$0xff]  ;;  %v14395_v15 = vcombine.low %v777_v56, %v781_v61 }
 0x3ec   :  { %10664 = vmatprep.subr.bf16.mxu1 %v14420_v41  ;;  %v645_v17 = vld [vmem:[#allocation5 + $0x1030] sm:$0xff] }
 0x3ed   :  { %10624 = vmatpush1.bf16.msra.mxu0 %v14291_v25  ;;  %v769_v14 = vld [vmem:[#allocation5 + $0x1410] sm:$0xff]  ;;  %v14260_v41 = vcombine.high %v641_v3, %v645_v17 }
 0x3ee   :  { %10625 = vmatprep.subr.bf16.mxu0 %v14284_v36  ;;  %v773_v30 = vld [vmem:[#allocation5 + $0x1430] sm:$0xff] }
 0x3ef   :  { %10665 = vmatpush1.bf16.msra.mxu1 %v14419_v52  ;;  %v14388_v24 = vcombine.high %v769_v14, %v773_v30  ;;  %v761_v12 = vld [vmem:[#allocation5 + $0x13d0] sm:$0xff]  ;;  %v14259_v52 = vcombine.low %v641_v3, %v645_v17  ;;  %v14387_v36 = vcombine.low %v769_v14, %v773_v30 }
 0x3f0   :  { %10666 = vmatprep.subr.bf16.mxu1 %v14412_v53  ;;  %v765_v34 = vld [vmem:[#allocation5 + $0x13f0] sm:$0xff] }
 0x3f1   :  { %10626 = vmatpush1.bf16.msra.mxu0 %v14283_v43  ;;  %v889_v21 = vld [vmem:[#allocation5 + $0x17d0] sm:$0xff]  ;;  %v14380_v53 = vcombine.high %v761_v12, %v765_v34 }
 0x3f2   :  { %10627 = vmatprep.subr.bf16.mxu0 %v14276_v44  ;;  %v893_v25 = vld [vmem:[#allocation5 + $0x17f0] sm:$0xff] }
 0x3f3   :  { %10667 = vmatpush1.bf16.msra.mxu1 %v14411_v57  ;;  %v14508_v27 = vcombine.high %v889_v21, %v893_v25  ;;  %v753_v33 = vld [vmem:[#allocation5 + $0x1390] sm:$0xff]  ;;  %v14379_v57 = vcombine.low %v761_v12, %v765_v34  ;;  %v14507_v44 = vcombine.low %v889_v21, %v893_v25 }
 0x3f4   :  { %10668 = vmatprep.subr.bf16.mxu1 %v14404_v48  ;;  %v757_v0 = vld [vmem:[#allocation5 + $0x13b0] sm:$0xff] }
 0x3f5   :  { %10628 = vmatpush1.bf16.msra.mxu0 %v14275_v2  ;;  %v881_v1 = vld [vmem:[#allocation5 + $0x1790] sm:$0xff]  ;;  %v14372_v48 = vcombine.high %v753_v33, %v757_v0 }
 0x3f6   :  { %10629 = vmatprep.subr.bf16.mxu0 %v14268_v23  ;;  %v885_v43 = vld [vmem:[#allocation5 + $0x17b0] sm:$0xff] }
 0x3f7   :  { %10669 = vmatpush1.bf16.msra.mxu1 %v14403_v18  ;;  %v14500_v60 = vcombine.high %v881_v1, %v885_v43  ;;  %v745_v46 = vld [vmem:[#allocation5 + $0x1350] sm:$0xff]  ;;  %v14371_v18 = vcombine.low %v753_v33, %v757_v0  ;;  %v14499_v23 = vcombine.low %v881_v1, %v885_v43 }
 0x3f8   :  { %10670 = vmatprep.subr.bf16.mxu1 %v14396_v63  ;;  %v749_v56 = vld [vmem:[#allocation5 + $0x1370] sm:$0xff] }
 0x3f9   :  { %10630 = vmatpush1.bf16.msra.mxu0 %v14267_v6  ;;  %v873_v61 = vld [vmem:[#allocation5 + $0x1750] sm:$0xff]  ;;  %v14364_v63 = vcombine.high %v745_v46, %v749_v56 }
 0x3fa   :  { %10631 = vmatprep.subr.bf16.mxu0 %v14260_v41  ;;  %v877_v2 = vld [vmem:[#allocation5 + $0x1770] sm:$0xff] }
 0x3fb   :  { %10671 = vmatpush1.bf16.msra.mxu1 %v14395_v15  ;;  %v14492_v3 = vcombine.high %v873_v61, %v877_v2  ;;  %v737_v17 = vld [vmem:[#allocation5 + $0x1310] sm:$0xff]  ;;  %v14363_v15 = vcombine.low %v745_v46, %v749_v56  ;;  %v14491_v41 = vcombine.low %v873_v61, %v877_v2 }
 0x3fc   :  { %10672 = vmatprep.subr.bf16.mxu1 %v14388_v24  ;;  %v741_v14 = vld [vmem:[#allocation5 + $0x1330] sm:$0xff] }
 0x3fd   :  { %10632 = vmatpush1.bf16.msra.mxu0 %v14259_v52  ;;  %v865_v30 = vld [vmem:[#allocation5 + $0x1710] sm:$0xff]  ;;  %v14356_v24 = vcombine.high %v737_v17, %v741_v14 }
 0x3fe   :  { %10633 = vmatprep.subr.bf16.mxu0 %v14380_v53  ;;  %v869_v6 = vld [vmem:[#allocation5 + $0x1730] sm:$0xff] }
 0x3ff   :  { %10673 = vmatpush1.bf16.msra.mxu1 %v14387_v36  ;;  %v14484_v12 = vcombine.high %v865_v30, %v869_v6  ;;  %v729_v34 = vld [vmem:[#allocation5 + $0x12d0] sm:$0xff]  ;;  %v14355_v36 = vcombine.low %v737_v17, %v741_v14  ;;  %v14483_v53 = vcombine.low %v865_v30, %v869_v6 }
 0x400   :  { %10674 = vmatprep.subr.bf16.mxu1 %v14508_v27  ;;  %v733_v21 = vld [vmem:[#allocation5 + $0x12f0] sm:$0xff] }
 0x401   :  { %10634 = vmatpush2.bf16.msra.mxu0 %v14379_v57  ;;  %v857_v25 = vld [vmem:[#allocation5 + $0x16d0] sm:$0xff]  ;;  %v14348_v27 = vcombine.high %v729_v34, %v733_v21 }
 0x402   :  { %10635 = vmatprep.subr.bf16.mxu0 %v14372_v48  ;;  %v861_v52 = vld [vmem:[#allocation5 + $0x16f0] sm:$0xff] }
 0x403   :  { %10675 = vmatpush2.bf16.msra.mxu1 %v14507_v44  ;;  %v14476_v33 = vcombine.high %v857_v25, %v861_v52  ;;  %v721_v0 = vld [vmem:[#allocation5 + $0x1290] sm:$0xff]  ;;  %v14347_v44 = vcombine.low %v729_v34, %v733_v21  ;;  %v14475_v48 = vcombine.low %v857_v25, %v861_v52 }
 0x404   :  { %10676 = vmatprep.subr.bf16.mxu1 %v14500_v60  ;;  %v725_v1 = vld [vmem:[#allocation5 + $0x12b0] sm:$0xff] }
 0x405   :  { %10636 = vmatpush2.bf16.msra.mxu0 %v14371_v18  ;;  %v849_v43 = vld [vmem:[#allocation5 + $0x1690] sm:$0xff]  ;;  %v14340_v60 = vcombine.high %v721_v0, %v725_v1 }
 0x406   :  { %10637 = vmatprep.subr.bf16.mxu0 %v14364_v63  ;;  %v853_v57 = vld [vmem:[#allocation5 + $0x16b0] sm:$0xff] }
 0x407   :  { %10677 = vmatpush2.bf16.msra.mxu1 %v14499_v23  ;;  %v14468_v46 = vcombine.high %v849_v43, %v853_v57  ;;  %v713_v56 = vld [vmem:[#allocation5 + $0x1250] sm:$0xff]  ;;  %v14339_v23 = vcombine.low %v721_v0, %v725_v1  ;;  %v14467_v63 = vcombine.low %v849_v43, %v853_v57 }
 0x408   :  { %10678 = vmatprep.subr.bf16.mxu1 %v14492_v3  ;;  %v717_v61 = vld [vmem:[#allocation5 + $0x1270] sm:$0xff] }
 0x409   :  { %10638 = vmatpush2.bf16.msra.mxu0 %v14363_v15  ;;  %v841_v2 = vld [vmem:[#allocation5 + $0x1650] sm:$0xff]  ;;  %v14332_v3 = vcombine.high %v713_v56, %v717_v61 }
 0x40a   :  { %10639 = vmatprep.subr.bf16.mxu0 %v14356_v24  ;;  %v845_v18 = vld [vmem:[#allocation5 + $0x1670] sm:$0xff] }
 0x40b   :  { %10679 = vmatpush2.bf16.msra.mxu1 %v14491_v41  ;;  %v14460_v17 = vcombine.high %v841_v2, %v845_v18  ;;  %v705_v14 = vld [vmem:[#allocation5 + $0x1210] sm:$0xff]  ;;  %v14331_v41 = vcombine.low %v713_v56, %v717_v61  ;;  %v14459_v24 = vcombine.low %v841_v2, %v845_v18 }
 0x40c   :  { %10680 = vmatprep.subr.bf16.mxu1 %v14484_v12  ;;  %v709_v30 = vld [vmem:[#allocation5 + $0x1230] sm:$0xff] }
 0x40d   :  { %10640 = vmatpush2.bf16.msra.mxu0 %v14355_v36  ;;  %v833_v6 = vld [vmem:[#allocation5 + $0x1610] sm:$0xff]  ;;  %v14324_v12 = vcombine.high %v705_v14, %v709_v30 }
 0x40e   :  { %10641 = vmatprep.subr.bf16.mxu0 %v14348_v27  ;;  %v837_v15 = vld [vmem:[#allocation5 + $0x1630] sm:$0xff] }
 0x40f   :  { %10681 = vmatpush2.bf16.msra.mxu1 %v14483_v53  ;;  %v14452_v34 = vcombine.high %v833_v6, %v837_v15  ;;  %v953_v21 = vld [vmem:[#allocation5 + $0x19d0] sm:$0xff]  ;;  %v14323_v53 = vcombine.low %v705_v14, %v709_v30  ;;  %v14451_v27 = vcombine.low %v833_v6, %v837_v15 }
 0x410   :  { %10682 = vmatprep.subr.bf16.mxu1 %v14476_v33  ;;  %v957_v25 = vld [vmem:[#allocation5 + $0x19f0] sm:$0xff] }
 0x411   :  { %10642 = vmatpush2.bf16.msra.mxu0 %v14347_v44  ;;  %v1081_v52 = vld [vmem:[#allocation5 + $0x1dd0] sm:$0xff]  ;;  %v14572_v33 = vcombine.high %v953_v21, %v957_v25 }
 0x412   :  { %10643 = vmatprep.subr.bf16.mxu0 %v14340_v60  ;;  %v1085_v36 = vld [vmem:[#allocation5 + $0x1df0] sm:$0xff] }
 0x413   :  { %10683 = vmatpush2.bf16.msra.mxu1 %v14475_v48  ;;  %v14700_v0 = vcombine.high %v1081_v52, %v1085_v36  ;;  %v945_v1 = vld [vmem:[#allocation5 + $0x1990] sm:$0xff]  ;;  %v14571_v48 = vcombine.low %v953_v21, %v957_v25  ;;  %v14699_v60 = vcombine.low %v1081_v52, %v1085_v36 }
 0x414   :  { %10684 = vmatprep.subr.bf16.mxu1 %v14468_v46  ;;  %v949_v43 = vld [vmem:[#allocation5 + $0x19b0] sm:$0xff] }
 0x415   :  { %10644 = vmatpush2.bf16.msra.mxu0 %v14339_v23  ;;  %v1073_v57 = vld [vmem:[#allocation5 + $0x1d90] sm:$0xff]  ;;  %v14564_v46 = vcombine.high %v945_v1, %v949_v43  ;;  %v14563_v14 = vcombine.low %v945_v1, %v949_v43 }
 0x416   :  { %10645 = vmatprep.subr.bf16.mxu0 %v14332_v3  ;;  %v1077_v44 = vld [vmem:[#allocation5 + $0x1db0] sm:$0xff] }
 0x417   :  { %10685 = vmatpush2.bf16.msra.mxu1 %v14467_v63  ;;  %v14692_v56 = vcombine.high %v1073_v57, %v1077_v44  ;;  %v937_v61 = vld [vmem:[#allocation5 + $0x1950] sm:$0xff]  ;;  %v14691_v6 = vcombine.low %v1073_v57, %v1077_v44 }
 0x418   :  { %10686 = vmatprep.subr.bf16.mxu1 %v14460_v17  ;;  %v941_v2 = vld [vmem:[#allocation5 + $0x1970] sm:$0xff] }
 0x419   :  { %10646 = vmatpush2.bf16.msra.mxu0 %v14331_v41  ;;  %v1065_v23 = vld [vmem:[#allocation5 + $0x1d50] sm:$0xff]  ;;  %v14556_v15 = vcombine.high %v937_v61, %v941_v2 }
 0x41a   :  { %10647 = vmatprep.subr.bf16.mxu0 %v14324_v12  ;;  %v1069_v63 = vld [vmem:[#allocation5 + $0x1d70] sm:$0xff] }
 0x41b   :  { %10687 = vmatpush2.bf16.msra.mxu1 %v14459_v24  ;;  %v929_v21 = vld [vmem:[#allocation5 + $0x1910] sm:$0xff] }
 0x41c   :  { %10688 = vmatprep.subr.bf16.mxu1 %v14452_v34  ;;  %v14684_v34 = vcombine.high %v1065_v23, %v1069_v63  ;;  %v933_v25 = vld [vmem:[#allocation5 + $0x1930] sm:$0xff] }
 0x41d   :  { %10648 = vmatpush2.bf16.msra.mxu0 %v14323_v53  ;;  %v1057_v52 = vld [vmem:[#allocation5 + $0x1d10] sm:$0xff]  ;;  %v14548_v1 = vcombine.high %v929_v21, %v933_v25 }
 0x41e   :  { %10699 = vmatprep.subr.bf16.mxu0 %v14572_v33  ;;  %v1061_v36 = vld [vmem:[#allocation5 + $0x1d30] sm:$0xff]  ;;  %v14555_v33 = vcombine.low %v937_v61, %v941_v2 }
 0x41f   :  { %10689 = vmatpush2.bf16.msra.mxu1 %v14451_v27  ;;  %v14676_v57 = vcombine.high %v1057_v52, %v1061_v36  ;;  %v921_v44 = vld [vmem:[#allocation5 + $0x18d0] sm:$0xff] }
 0x420   :  { %10740 = vmatprep.subr.bf16.mxu1 %v14700_v0  ;;  %v10405_v18 = vpop.f32.mrf.mxu0  ;;  %10650 = vmatmul.mubr.bf16.vlgmr.msra.gmra.mxu0 %v16384_v7  ;;  %v913_v2 = vld [vmem:[#allocation5 + $0x1890] sm:$0xff] }
 0x421   :  { %v10406_v3 = vadd.f32 %v10405_v18, %v16565_v10  ;;  %10700 = vmatpush1.bf16.msra.mxu0 %v14571_v48  ;;  %10731 = vmatprep.mubr.bf16.mxu0 %v16394_v38  ;;  %v925_v48 = vld [vmem:[#allocation5 + $0x18f0] sm:$0xff]  ;;  %v14675_v18 = vcombine.low %v1057_v52, %v1061_v36 }
 0x422   :  { %v10446_v17 = vpop.f32.mrf.mxu1  ;;  %10691 = vmatmul.mubr.bf16.vlgmr.msra.gmra.mxu1 %v16388_v8  ;;  %v10407_v30 = vpop.f32.mrf.mxu0  ;;  %10701 = vmatprep.subr.bf16.mxu0 %v14564_v46  ;;  %v1053_v46 = vld [vmem:[#allocation5 + $0x1cf0] sm:$0xff] }
 0x423   :  { %10741 = vmatpush1.bf16.msra.mxu1 %v14699_v60  ;;  %v16575_v41 = vadd.f32 %v10446_v17, %v10406_v3  ;;  %v10408_v24 = vadd.f32 %v10407_v30, %v16570_v37  ;;  %10772 = vmatprep.mubr.bf16.mxu1 %v16399_v42  ;;  %v14683_v37 = vcombine.low %v1065_v23, %v1069_v63  ;;  %v1049_v60 = vld [vmem:[#allocation5 + $0x1cd0] sm:$0xff] }
 0x424   :  { %v10448_v12 = vpop.f32.mrf.mxu1  ;;  %10742 = vmatprep.subr.bf16.mxu1 %v14692_v56  ;;  %v10409_v10 = vpop.f32.mrf.mxu0  ;;  %v14547_v56 = vcombine.low %v929_v21, %v933_v25  ;;  %v14540_v3 = vcombine.high %v921_v44, %v925_v48  ;;  %v14668_v61 = vcombine.high %v1049_v60, %v1053_v46  ;;  %v917_v17 = vld [vmem:[#allocation5 + $0x18b0] sm:$0xff]  ;;  %v14539_v63 = vcombine.low %v921_v44, %v925_v48 }
 0x425   :  { %v16580_v53 = vadd.f32 %v10448_v12, %v10408_v24  ;;  %10702 = vmatpush1.bf16.msra.mxu0 %v14563_v14  ;;  %v1041_v14 = vld [vmem:[#allocation5 + $0x1c90] sm:$0xff]  ;;  %v14667_v30 = vcombine.low %v1049_v60, %v1053_v46  ;;  %v14531_v25 = vcombine.low %v913_v2, %v917_v17 }
 0x426   :  { %v10450_v27 = vpop.f32.mrf.mxu1  ;;  %v10410_v0 = vpop.f32.mrf.mxu0  ;;  %10703 = vmatprep.subr.bf16.mxu0 %v14556_v15  ;;  %v1045_v23 = vld [vmem:[#allocation5 + $0x1cb0] sm:$0xff] }
 0x427   :  { %10743 = vmatpush1.bf16.msra.mxu1 %v14691_v6  ;;  %v14532_v6 = vcombine.high %v913_v2, %v917_v17  ;;  %v14660_v15 = vcombine.high %v1041_v14, %v1045_v23  ;;  %v905_v24 = vld [vmem:[#allocation5 + $0x1850] sm:$0xff]  ;;  %v14659_v10 = vcombine.low %v1041_v14, %v1045_v23 }
 0x428   :  { %v10451_v43 = vpop.f32.mrf.mxu1  ;;  %10744 = vmatprep.subr.bf16.mxu1 %v14684_v34  ;;  %v909_v12 = vld [vmem:[#allocation5 + $0x1870] sm:$0xff] }
 0x429   :  { %10704 = vmatpush1.bf16.msra.mxu0 %v14555_v33  ;;  %v1033_v34 = vld [vmem:[#allocation5 + $0x1c50] sm:$0xff]  ;;  %v14524_v52 = vcombine.high %v905_v24, %v909_v12 }
 0x42a   :  { %10705 = vmatprep.subr.bf16.mxu0 %v14548_v1  ;;  %v1037_v21 = vld [vmem:[#allocation5 + $0x1c70] sm:$0xff]  ;;  %v14523_v1 = vcombine.low %v905_v24, %v909_v12 }
 0x42b   :  { %10745 = vmatpush1.bf16.msra.mxu1 %v14683_v37  ;;  %v14652_v36 = vcombine.high %v1033_v34, %v1037_v21  ;;  %v897_v27 = vld [vmem:[#allocation5 + $0x1810] sm:$0xff]  ;;  %v14651_v43 = vcombine.low %v1033_v34, %v1037_v21 }
 0x42c   :  { %10746 = vmatprep.subr.bf16.mxu1 %v14676_v57  ;;  %v901_v33 = vld [vmem:[#allocation5 + $0x1830] sm:$0xff] }
 0x42d   :  { %10706 = vmatpush1.bf16.msra.mxu0 %v14547_v56  ;;  %v1025_v0 = vld [vmem:[#allocation5 + $0x1c10] sm:$0xff]  ;;  %v14516_v57 = vcombine.high %v897_v27, %v901_v33 }
 0x42e   :  { %10707 = vmatprep.subr.bf16.mxu0 %v14540_v3  ;;  %v1029_v37 = vld [vmem:[#allocation5 + $0x1c30] sm:$0xff] }
 0x42f   :  { %10747 = vmatpush1.bf16.msra.mxu1 %v14675_v18  ;;  %v14644_v44 = vcombine.high %v1025_v0, %v1029_v37  ;;  %v1017_v48 = vld [vmem:[#allocation5 + $0x1bd0] sm:$0xff]  ;;  %v14515_v18 = vcombine.low %v897_v27, %v901_v33  ;;  %v14643_v3 = vcombine.low %v1025_v0, %v1029_v37 }
 0x430   :  { %10748 = vmatprep.subr.bf16.mxu1 %v14668_v61  ;;  %v1021_v60 = vld [vmem:[#allocation5 + $0x1bf0] sm:$0xff] }
 0x431   :  { %10708 = vmatpush1.bf16.msra.mxu0 %v14539_v63  ;;  %v1145_v46 = vld [vmem:[#allocation5 + $0x1fd0] sm:$0xff]  ;;  %v14636_v61 = vcombine.high %v1017_v48, %v1021_v60 }
 0x432   :  { %10709 = vmatprep.subr.bf16.mxu0 %v14532_v6  ;;  %v1149_v56 = vld [vmem:[#allocation5 + $0x1ff0] sm:$0xff] }
 0x433   :  { %10749 = vmatpush1.bf16.msra.mxu1 %v14667_v30  ;;  %v14764_v2 = vcombine.high %v1145_v46, %v1149_v56  ;;  %v1009_v17 = vld [vmem:[#allocation5 + $0x1b90] sm:$0xff]  ;;  %v14635_v30 = vcombine.low %v1017_v48, %v1021_v60  ;;  %v14763_v6 = vcombine.low %v1145_v46, %v1149_v56 }
 0x434   :  { %10750 = vmatprep.subr.bf16.mxu1 %v14660_v15  ;;  %v1013_v14 = vld [vmem:[#allocation5 + $0x1bb0] sm:$0xff] }
 0x435   :  { %10710 = vmatpush1.bf16.msra.mxu0 %v14531_v25  ;;  %v1137_v23 = vld [vmem:[#allocation5 + $0x1f90] sm:$0xff]  ;;  %v14628_v15 = vcombine.high %v1009_v17, %v1013_v14 }
 0x436   :  { %10711 = vmatprep.subr.bf16.mxu0 %v14524_v52  ;;  %v1141_v63 = vld [vmem:[#allocation5 + $0x1fb0] sm:$0xff] }
 0x437   :  { %10751 = vmatpush1.bf16.msra.mxu1 %v14659_v10  ;;  %v14756_v24 = vcombine.high %v1137_v23, %v1141_v63  ;;  %v1001_v12 = vld [vmem:[#allocation5 + $0x1b50] sm:$0xff]  ;;  %v14627_v10 = vcombine.low %v1009_v17, %v1013_v14  ;;  %v14755_v52 = vcombine.low %v1137_v23, %v1141_v63 }
 0x438   :  { %10752 = vmatprep.subr.bf16.mxu1 %v14652_v36  ;;  %v1005_v34 = vld [vmem:[#allocation5 + $0x1b70] sm:$0xff] }
 0x439   :  { %10712 = vmatpush1.bf16.msra.mxu0 %v14523_v1  ;;  %v1129_v21 = vld [vmem:[#allocation5 + $0x1f50] sm:$0xff]  ;;  %v14620_v36 = vcombine.high %v1001_v12, %v1005_v34 }
 0x43a   :  { %10713 = vmatprep.subr.bf16.mxu0 %v14516_v57  ;;  %v1133_v25 = vld [vmem:[#allocation5 + $0x1f70] sm:$0xff] }
 0x43b   :  { %10753 = vmatpush1.bf16.msra.mxu1 %v14651_v43  ;;  %v14748_v27 = vcombine.high %v1129_v21, %v1133_v25  ;;  %v993_v33 = vld [vmem:[#allocation5 + $0x1b10] sm:$0xff]  ;;  %v14619_v43 = vcombine.low %v1001_v12, %v1005_v34  ;;  %v14747_v57 = vcombine.low %v1129_v21, %v1133_v25 }
 0x43c   :  { %10754 = vmatprep.subr.bf16.mxu1 %v14644_v44  ;;  %v997_v0 = vld [vmem:[#allocation5 + $0x1b30] sm:$0xff] }
 0x43d   :  { %10714 = vmatpush1.bf16.msra.mxu0 %v14515_v18  ;;  %v1121_v37 = vld [vmem:[#allocation5 + $0x1f10] sm:$0xff]  ;;  %v14612_v44 = vcombine.high %v993_v33, %v997_v0 }
 0x43e   :  { %10715 = vmatprep.subr.bf16.mxu0 %v14636_v61  ;;  %v1125_v1 = vld [vmem:[#allocation5 + $0x1f30] sm:$0xff] }
 0x43f   :  { %10755 = vmatpush1.bf16.msra.mxu1 %v14643_v3  ;;  %v14740_v48 = vcombine.high %v1121_v37, %v1125_v1  ;;  %v985_v60 = vld [vmem:[#allocation5 + $0x1ad0] sm:$0xff]  ;;  %v14611_v3 = vcombine.low %v993_v33, %v997_v0  ;;  %v14739_v61 = vcombine.low %v1121_v37, %v1125_v1 }
 0x440   :  { %10756 = vmatprep.subr.bf16.mxu1 %v14764_v2  ;;  %v989_v46 = vld [vmem:[#allocation5 + $0x1af0] sm:$0xff] }
 0x441   :  { %10716 = vmatpush2.bf16.msra.mxu0 %v14635_v30  ;;  %v1113_v56 = vld [vmem:[#allocation5 + $0x1ed0] sm:$0xff]  ;;  %v14604_v2 = vcombine.high %v985_v60, %v989_v46 }
 0x442   :  { %10717 = vmatprep.subr.bf16.mxu0 %v14628_v15  ;;  %v1117_v18 = vld [vmem:[#allocation5 + $0x1ef0] sm:$0xff] }
 0x443   :  { %10757 = vmatpush2.bf16.msra.mxu1 %v14763_v6  ;;  %v14732_v17 = vcombine.high %v1113_v56, %v1117_v18  ;;  %v977_v14 = vld [vmem:[#allocation5 + $0x1a90] sm:$0xff]  ;;  %v14603_v6 = vcombine.low %v985_v60, %v989_v46  ;;  %v14731_v15 = vcombine.low %v1113_v56, %v1117_v18 }
 0x444   :  { %10758 = vmatprep.subr.bf16.mxu1 %v14756_v24  ;;  %v981_v23 = vld [vmem:[#allocation5 + $0x1ab0] sm:$0xff] }
 0x445   :  { %10718 = vmatpush2.bf16.msra.mxu0 %v14627_v10  ;;  %v1105_v63 = vld [vmem:[#allocation5 + $0x1e90] sm:$0xff]  ;;  %v14596_v24 = vcombine.high %v977_v14, %v981_v23 }
 0x446   :  { %10719 = vmatprep.subr.bf16.mxu0 %v14620_v36  ;;  %v1109_v30 = vld [vmem:[#allocation5 + $0x1eb0] sm:$0xff] }
 0x447   :  { %10759 = vmatpush2.bf16.msra.mxu1 %v14755_v52  ;;  %v14724_v12 = vcombine.high %v1105_v63, %v1109_v30  ;;  %v969_v34 = vld [vmem:[#allocation5 + $0x1a50] sm:$0xff]  ;;  %v14595_v52 = vcombine.low %v977_v14, %v981_v23  ;;  %v14723_v36 = vcombine.low %v1105_v63, %v1109_v30  ;;  %v1687_v63 = vsub.s32 5, %v16404_v32 }
 0x448   :  { %10760 = vmatprep.subr.bf16.mxu1 %v14748_v27  ;;  %v973_v21 = vld [vmem:[#allocation5 + $0x1a70] sm:$0xff] }
 0x449   :  { %10720 = vmatpush2.bf16.msra.mxu0 %v14619_v43  ;;  %v1097_v25 = vld [vmem:[#allocation5 + $0x1e50] sm:$0xff]  ;;  %v14588_v27 = vcombine.high %v969_v34, %v973_v21 }
 0x44a   :  { %10721 = vmatprep.subr.bf16.mxu0 %v14612_v44  ;;  %v1101_v10 = vld [vmem:[#allocation5 + $0x1e70] sm:$0xff] }
 0x44b   :  { %10761 = vmatpush2.bf16.msra.mxu1 %v14747_v57  ;;  %v14716_v33 = vcombine.high %v1097_v25, %v1101_v10  ;;  %v961_v0 = vld [vmem:[#allocation5 + $0x1a10] sm:$0xff]  ;;  %v14587_v57 = vcombine.low %v969_v34, %v973_v21  ;;  %v14715_v44 = vcombine.low %v1097_v25, %v1101_v10 }
 0x44c   :  { %10762 = vmatprep.subr.bf16.mxu1 %v14740_v48  ;;  %v965_v37 = vld [vmem:[#allocation5 + $0x1a30] sm:$0xff] }
 0x44d   :  { %10722 = vmatpush2.bf16.msra.mxu0 %v14611_v3  ;;  %v1089_v1 = vld [vmem:[#allocation5 + $0x1e10] sm:$0xff]  ;;  %v14580_v48 = vcombine.high %v961_v0, %v965_v37 }
 0x44e   :  { %10723 = vmatprep.subr.bf16.mxu0 %v14604_v2  ;;  %v1093_v43 = vld [vmem:[#allocation5 + $0x1e30] sm:$0xff]  ;;  %v1683_v2 = vsub.s32 4, %v16404_v32 }
 0x44f   :  { %10763 = vmatpush2.bf16.msra.mxu1 %v14739_v61  ;;  %v14708_v60 = vcombine.high %v1089_v1, %v1093_v43  ;;  %v1209_v46 = vld [vmem:[#allocation5 + $0x21d0] sm:$0xff]  ;;  %v14579_v61 = vcombine.low %v961_v0, %v965_v37 }
 0x450   :  { %10764 = vmatprep.subr.bf16.mxu1 %v14732_v17  ;;  %v1213_v56 = vld [vmem:[#allocation5 + $0x21f0] sm:$0xff]  ;;  %v14707_v17 = vcombine.low %v1089_v1, %v1093_v43 }
 0x451   :  { %10724 = vmatpush2.bf16.msra.mxu0 %v14603_v6  ;;  %v1337_v18 = vld [vmem:[#allocation5 + $0x25d0] sm:$0xff]  ;;  %v14828_v14 = vcombine.high %v1209_v46, %v1213_v56  ;;  %v14827_v21 = vcombine.low %v1209_v46, %v1213_v56 }
 0x452   :  { %10725 = vmatprep.subr.bf16.mxu0 %v14596_v24  ;;  %v1341_v3 = vld [vmem:[#allocation5 + $0x25f0] sm:$0xff] }
 0x453   :  { %10765 = vmatpush2.bf16.msra.mxu1 %v14731_v15  ;;  %v14956_v23 = vcombine.high %v1337_v18, %v1341_v3  ;;  %v1201_v30 = vld [vmem:[#allocation5 + $0x2190] sm:$0xff]  ;;  %v14955_v25 = vcombine.low %v1337_v18, %v1341_v3 }
 0x454   :  { %10766 = vmatprep.subr.bf16.mxu1 %v14724_v12  ;;  %v1205_v6 = vld [vmem:[#allocation5 + $0x21b0] sm:$0xff]  ;;  %v16071_v12 = vld [vmem:[#allocation7] sm:$0xff] }
 0x455   :  { %10726 = vmatpush2.bf16.msra.mxu0 %v14595_v52  ;;  %v1329_v15 = vld [vmem:[#allocation5 + $0x2590] sm:$0xff]  ;;  %v1684_v34 = vrot.slane %v16071_v12, %v1683_v2  ;;  %v14820_v10 = vcombine.high %v1201_v30, %v1205_v6  ;;  %v1688_v52 = vrot.slane %v16071_v12, %v1687_v63 }
 0x456   :  { %10727 = vmatprep.subr.bf16.mxu0 %v14588_v27  ;;  %v1333_v24 = vld [vmem:[#allocation5 + $0x25b0] sm:$0xff] }
 0x457   :  { %10767 = vmatpush2.bf16.msra.mxu1 %v14723_v36  ;;  %v14948_v36 = vcombine.high %v1329_v15, %v1333_v24  ;;  %v1193_v27 = vld [vmem:[#allocation5 + $0x2150] sm:$0xff] }
 0x458   :  { %10768 = vmatprep.subr.bf16.mxu1 %v14716_v33  ;;  %v1197_v33 = vld [vmem:[#allocation5 + $0x2170] sm:$0xff] }
 0x459   :  { %10728 = vmatpush2.bf16.msra.mxu0 %v14587_v57  ;;  %v1321_v37 = vld [vmem:[#allocation5 + $0x2550] sm:$0xff]  ;;  %v14812_v46 = vcombine.high %v1193_v27, %v1197_v33 }
 0x45a   :  { %10729 = vmatprep.subr.bf16.mxu0 %v14580_v48  ;;  %v1325_v1 = vld [vmem:[#allocation5 + $0x2570] sm:$0xff] }
 0x45b   :  { %10769 = vmatpush2.bf16.msra.mxu1 %v14715_v44  ;;  %v14819_v44 = vcombine.low %v1201_v30, %v1205_v6  ;;  %v1185_v2 = vld [vmem:[#allocation5 + $0x2110] sm:$0xff]  ;;  %v14939_v12 = vcombine.low %v1321_v37, %v1325_v1 }
 0x45c   :  { %10770 = vmatprep.subr.bf16.mxu1 %v14708_v60  ;;  %v14947_v60 = vcombine.low %v1329_v15, %v1333_v24  ;;  %v1317_v63 = vld [vmem:[#allocation5 + $0x2530] sm:$0xff]  ;;  %v14811_v15 = vcombine.low %v1193_v27, %v1197_v33 }
 0x45d   :  { %10730 = vmatpush2.bf16.msra.mxu0 %v14579_v61  ;;  %v14940_v61 = vcombine.high %v1321_v37, %v1325_v1  ;;  %v1169_v33 = vld [vmem:[#allocation5 + $0x2090] sm:$0xff] }
 0x45e   :  { %10781 = vmatprep.subr.bf16.mxu0 %v14828_v14  ;;  %v1301_v37 = vld [vmem:[#allocation5 + $0x24b0] sm:$0xff] }
 0x45f   :  { %10771 = vmatpush2.bf16.msra.mxu1 %v14707_v17  ;;  %v1189_v17 = vld [vmem:[#allocation5 + $0x2130] sm:$0xff] }
 0x460   :  { %10822 = vmatprep.subr.bf16.mxu1 %v14956_v23  ;;  %v10487_v0 = vpop.f32.mrf.mxu0  ;;  %10732 = vmatmul.mubr.bf16.vlgmr.msra.gmra.mxu0 %v16410_v55  ;;  %v1313_v23 = vld [vmem:[#allocation5 + $0x2510] sm:$0xff] }
 0x461   :  { %v10488_v43 = vadd.f32 %v10487_v0, %v1684_v34  ;;  %10782 = vmatpush1.bf16.msra.mxu0 %v14827_v21  ;;  %10813 = vmatprep.mubr.bf16.mxu0 %v16426_v9  ;;  %v14804_v34 = vcombine.high %v1185_v2, %v1189_v17  ;;  %v1309_v0 = vld [vmem:[#allocation5 + $0x24f0] sm:$0xff] }
 0x462   :  { %v10528_v57 = vpop.f32.mrf.mxu1  ;;  %10773 = vmatmul.mubr.bf16.vlgmr.msra.gmra.mxu1 %v16418_v62  ;;  %v10489_v48 = vpop.f32.mrf.mxu0  ;;  %10783 = vmatprep.subr.bf16.mxu0 %v14820_v10  ;;  %v1177_v10 = vld [vmem:[#allocation5 + $0x20d0] sm:$0xff] }
 0x463   :  { %10823 = vmatpush1.bf16.msra.mxu1 %v14955_v25  ;;  %v16586_v56 = vadd.f32 %v10528_v57, %v10488_v43  ;;  %v10490_v18 = vadd.f32 %v10489_v48, %v1688_v52  ;;  %10854 = vmatprep.mubr.bf16.mxu1 %v16431_v13  ;;  %v14932_v25 = vcombine.high %v1313_v23, %v1317_v63  ;;  %v1181_v52 = vld [vmem:[#allocation5 + $0x20f0] sm:$0xff] }
 0x464   :  { %v10530_v3 = vpop.f32.mrf.mxu1  ;;  %10824 = vmatprep.subr.bf16.mxu1 %v14948_v36  ;;  %v10491_v14 = vpop.f32.mrf.mxu0  ;;  %v1305_v36 = vld [vmem:[#allocation5 + $0x24d0] sm:$0xff]  ;;  %v14803_v43 = vcombine.low %v1185_v2, %v1189_v17  ;;  %v14931_v57 = vcombine.low %v1313_v23, %v1317_v63  ;;  %v14796_v48 = vcombine.high %v1177_v10, %v1181_v52  ;;  %v14795_v1 = vcombine.low %v1177_v10, %v1181_v52 }
 0x465   :  { %v16590_v30 = vadd.f32 %v10530_v3, %v10490_v18  ;;  %10784 = vmatpush1.bf16.msra.mxu0 %v14819_v44  ;;  %v14924_v27 = vcombine.high %v1305_v36, %v1309_v0  ;;  %v1173_v44 = vld [vmem:[#allocation5 + $0x20b0] sm:$0xff] }
 0x466   :  { %v10532_v6 = vpop.f32.mrf.mxu1  ;;  %v10492_v24 = vpop.f32.mrf.mxu0  ;;  %10785 = vmatprep.subr.bf16.mxu0 %v14812_v46  ;;  %v14923_v46 = vcombine.low %v1305_v36, %v1309_v0  ;;  %v14788_v18 = vcombine.high %v1169_v33, %v1173_v44  ;;  %v1165_v2 = vld [vmem:[#allocation5 + $0x2070] sm:$0xff]  ;;  %v14787_v23 = vcombine.low %v1169_v33, %v1173_v44 }
 0x467   :  { %10825 = vmatpush1.bf16.msra.mxu1 %v14947_v60  ;;  %v1297_v60 = vld [vmem:[#allocation5 + $0x2490] sm:$0xff] }
 0x468   :  { %v10533_v21 = vpop.f32.mrf.mxu1  ;;  %10826 = vmatprep.subr.bf16.mxu1 %v14940_v61  ;;  %v14916_v3 = vcombine.high %v1297_v60, %v1301_v37  ;;  %v1161_v61 = vld [vmem:[#allocation5 + $0x2050] sm:$0xff]  ;;  %v14915_v63 = vcombine.low %v1297_v60, %v1301_v37 }
 0x469   :  { %10786 = vmatpush1.bf16.msra.mxu0 %v14811_v15  ;;  %v1289_v17 = vld [vmem:[#allocation5 + $0x2450] sm:$0xff]  ;;  %v14780_v6 = vcombine.high %v1161_v61, %v1165_v2 }
 0x46a   :  { %10787 = vmatprep.subr.bf16.mxu0 %v14804_v34  ;;  %v1293_v14 = vld [vmem:[#allocation5 + $0x2470] sm:$0xff] }
 0x46b   :  { %10827 = vmatpush1.bf16.msra.mxu1 %v14939_v12  ;;  %v14908_v15 = vcombine.high %v1289_v17, %v1293_v14  ;;  %v1153_v24 = vld [vmem:[#allocation5 + $0x2010] sm:$0xff]  ;;  %v14907_v10 = vcombine.low %v1289_v17, %v1293_v14 }
 0x46c   :  { %10828 = vmatprep.subr.bf16.mxu1 %v14932_v25  ;;  %v1157_v12 = vld [vmem:[#allocation5 + $0x2030] sm:$0xff]  ;;  %v14779_v25 = vcombine.low %v1161_v61, %v1165_v2 }
 0x46d   :  { %10788 = vmatpush1.bf16.msra.mxu0 %v14803_v43  ;;  %v1281_v34 = vld [vmem:[#allocation5 + $0x2410] sm:$0xff]  ;;  %v14772_v52 = vcombine.high %v1153_v24, %v1157_v12 }
 0x46e   :  { %10789 = vmatprep.subr.bf16.mxu0 %v14796_v48  ;;  %v1285_v21 = vld [vmem:[#allocation5 + $0x2430] sm:$0xff] }
 0x46f   :  { %10829 = vmatpush1.bf16.msra.mxu1 %v14931_v57  ;;  %v14900_v36 = vcombine.high %v1281_v34, %v1285_v21  ;;  %v1273_v0 = vld [vmem:[#allocation5 + $0x23d0] sm:$0xff]  ;;  %v14899_v33 = vcombine.low %v1281_v34, %v1285_v21 }
 0x470   :  { %10830 = vmatprep.subr.bf16.mxu1 %v14924_v27  ;;  %v1277_v43 = vld [vmem:[#allocation5 + $0x23f0] sm:$0xff]  ;;  %v14771_v27 = vcombine.low %v1153_v24, %v1157_v12 }
 0x471   :  { %10790 = vmatpush1.bf16.msra.mxu0 %v14795_v1  ;;  %v1401_v57 = vld [vmem:[#allocation5 + $0x27d0] sm:$0xff]  ;;  %v14892_v44 = vcombine.high %v1273_v0, %v1277_v43 }
 0x472   :  { %10791 = vmatprep.subr.bf16.mxu0 %v14788_v18  ;;  %v1405_v48 = vld [vmem:[#allocation5 + $0x27f0] sm:$0xff] }
 0x473   :  { %10831 = vmatpush1.bf16.msra.mxu1 %v14923_v46  ;;  %v15020_v60 = vcombine.high %v1401_v57, %v1405_v48  ;;  %v1265_v37 = vld [vmem:[#allocation5 + $0x2390] sm:$0xff]  ;;  %v15019_v61 = vcombine.low %v1401_v57, %v1405_v48 }
 0x474   :  { %10832 = vmatprep.subr.bf16.mxu1 %v14916_v3  ;;  %v1269_v1 = vld [vmem:[#allocation5 + $0x23b0] sm:$0xff]  ;;  %v14891_v3 = vcombine.low %v1273_v0, %v1277_v43 }
 0x475   :  { %10792 = vmatpush1.bf16.msra.mxu0 %v14787_v23  ;;  %v1393_v46 = vld [vmem:[#allocation5 + $0x2790] sm:$0xff]  ;;  %v14884_v2 = vcombine.high %v1265_v37, %v1269_v1 }
 0x476   :  { %10793 = vmatprep.subr.bf16.mxu0 %v14780_v6  ;;  %v1397_v18 = vld [vmem:[#allocation5 + $0x27b0] sm:$0xff] }
 0x477   :  { %10833 = vmatpush1.bf16.msra.mxu1 %v14915_v63  ;;  %v15012_v17 = vcombine.high %v1393_v46, %v1397_v18  ;;  %v1257_v14 = vld [vmem:[#allocation5 + $0x2350] sm:$0xff]  ;;  %v15011_v24 = vcombine.low %v1393_v46, %v1397_v18 }
 0x478   :  { %10834 = vmatprep.subr.bf16.mxu1 %v14908_v15  ;;  %v1261_v23 = vld [vmem:[#allocation5 + $0x2370] sm:$0xff]  ;;  %v14883_v15 = vcombine.low %v1265_v37, %v1269_v1 }
 0x479   :  { %10794 = vmatpush1.bf16.msra.mxu0 %v14779_v25  ;;  %v1385_v63 = vld [vmem:[#allocation5 + $0x2750] sm:$0xff]  ;;  %v14876_v12 = vcombine.high %v1257_v14, %v1261_v23 }
 0x47a   :  { %10795 = vmatprep.subr.bf16.mxu0 %v14772_v52  ;;  %v1389_v6 = vld [vmem:[#allocation5 + $0x2770] sm:$0xff] }
 0x47b   :  { %10835 = vmatpush1.bf16.msra.mxu1 %v14907_v10  ;;  %v15004_v34 = vcombine.high %v1385_v63, %v1389_v6  ;;  %v1249_v21 = vld [vmem:[#allocation5 + $0x2310] sm:$0xff]  ;;  %v15003_v0 = vcombine.low %v1385_v63, %v1389_v6 }
 0x47c   :  { %10836 = vmatprep.subr.bf16.mxu1 %v14900_v36  ;;  %v1253_v25 = vld [vmem:[#allocation5 + $0x2330] sm:$0xff]  ;;  %v14875_v36 = vcombine.low %v1257_v14, %v1261_v23 }
 0x47d   :  { %10796 = vmatpush1.bf16.msra.mxu0 %v14771_v27  ;;  %v1377_v10 = vld [vmem:[#allocation5 + $0x2710] sm:$0xff]  ;;  %v14868_v43 = vcombine.high %v1249_v21, %v1253_v25 }
 0x47e   :  { %10797 = vmatprep.subr.bf16.mxu0 %v14892_v44  ;;  %v1381_v52 = vld [vmem:[#allocation5 + $0x2730] sm:$0xff] }
 0x47f   :  { %10837 = vmatpush1.bf16.msra.mxu1 %v14899_v33  ;;  %v14996_v57 = vcombine.high %v1377_v10, %v1381_v52  ;;  %v1241_v48 = vld [vmem:[#allocation5 + $0x22d0] sm:$0xff]  ;;  %v14995_v37 = vcombine.low %v1377_v10, %v1381_v52 }
 0x480   :  { %10838 = vmatprep.subr.bf16.mxu1 %v15020_v60  ;;  %v1245_v27 = vld [vmem:[#allocation5 + $0x22f0] sm:$0xff]  ;;  %v14867_v60 = vcombine.low %v1249_v21, %v1253_v25 }
 0x481   :  { %10798 = vmatpush2.bf16.msra.mxu0 %v14891_v3  ;;  %v1369_v33 = vld [vmem:[#allocation5 + $0x26d0] sm:$0xff]  ;;  %v14860_v1 = vcombine.high %v1241_v48, %v1245_v27 }
 0x482   :  { %10799 = vmatprep.subr.bf16.mxu0 %v14884_v2  ;;  %v1373_v44 = vld [vmem:[#allocation5 + $0x26f0] sm:$0xff] }
 0x483   :  { %10839 = vmatpush2.bf16.msra.mxu1 %v15019_v61  ;;  %v14988_v46 = vcombine.high %v1369_v33, %v1373_v44  ;;  %v1233_v18 = vld [vmem:[#allocation5 + $0x2290] sm:$0xff]  ;;  %v14987_v14 = vcombine.low %v1369_v33, %v1373_v44 }
 0x484   :  { %10840 = vmatprep.subr.bf16.mxu1 %v15012_v17  ;;  %v1237_v3 = vld [vmem:[#allocation5 + $0x22b0] sm:$0xff]  ;;  %v14859_v17 = vcombine.low %v1241_v48, %v1245_v27 }
 0x485   :  { %10800 = vmatpush2.bf16.msra.mxu0 %v14883_v15  ;;  %v1361_v61 = vld [vmem:[#allocation5 + $0x2690] sm:$0xff]  ;;  %v14852_v23 = vcombine.high %v1233_v18, %v1237_v3 }
 0x486   :  { %10801 = vmatprep.subr.bf16.mxu0 %v14876_v12  ;;  %v1365_v2 = vld [vmem:[#allocation5 + $0x26b0] sm:$0xff] }
 0x487   :  { %10841 = vmatpush2.bf16.msra.mxu1 %v15011_v24  ;;  %v14980_v63 = vcombine.high %v1361_v61, %v1365_v2  ;;  %v1225_v6 = vld [vmem:[#allocation5 + $0x2250] sm:$0xff]  ;;  %v14979_v21 = vcombine.low %v1361_v61, %v1365_v2 }
 0x488   :  { %10842 = vmatprep.subr.bf16.mxu1 %v15004_v34  ;;  %v1229_v15 = vld [vmem:[#allocation5 + $0x2270] sm:$0xff]  ;;  %v14851_v34 = vcombine.low %v1233_v18, %v1237_v3 }
 0x489   :  { %10802 = vmatpush2.bf16.msra.mxu0 %v14875_v36  ;;  %v1353_v24 = vld [vmem:[#allocation5 + $0x2650] sm:$0xff]  ;;  %v14844_v25 = vcombine.high %v1225_v6, %v1229_v15 }
 0x48a   :  { %10803 = vmatprep.subr.bf16.mxu0 %v14868_v43  ;;  %v1357_v12 = vld [vmem:[#allocation5 + $0x2670] sm:$0xff] }
 0x48b   :  { %10843 = vmatpush2.bf16.msra.mxu1 %v15003_v0  ;;  %v14972_v10 = vcombine.high %v1353_v24, %v1357_v12  ;;  %v1217_v52 = vld [vmem:[#allocation5 + $0x2210] sm:$0xff]  ;;  %v14971_v48 = vcombine.low %v1353_v24, %v1357_v12 }
 0x48c   :  { %10844 = vmatprep.subr.bf16.mxu1 %v14996_v57  ;;  %v1221_v36 = vld [vmem:[#allocation5 + $0x2230] sm:$0xff]  ;;  %v14843_v57 = vcombine.low %v1225_v6, %v1229_v15 }
 0x48d   :  { %10804 = vmatpush2.bf16.msra.mxu0 %v14867_v60  ;;  %v1345_v0 = vld [vmem:[#allocation5 + $0x2610] sm:$0xff]  ;;  %v14836_v27 = vcombine.high %v1217_v52, %v1221_v36 }
 0x48e   :  { %10805 = vmatprep.subr.bf16.mxu0 %v14860_v1  ;;  %v1349_v43 = vld [vmem:[#allocation5 + $0x2630] sm:$0xff] }
 0x48f   :  { %10845 = vmatpush2.bf16.msra.mxu1 %v14995_v37  ;;  %v14964_v33 = vcombine.high %v1345_v0, %v1349_v43  ;;  %v1465_v44 = vld [vmem:[#allocation5 + $0x29d0] sm:$0xff]  ;;  %v14963_v18 = vcombine.low %v1345_v0, %v1349_v43 }
 0x490   :  { %10846 = vmatprep.subr.bf16.mxu1 %v14988_v46  ;;  %v1469_v60 = vld [vmem:[#allocation5 + $0x29f0] sm:$0xff]  ;;  %v14835_v46 = vcombine.low %v1217_v52, %v1221_v36 }
 0x491   :  { %10806 = vmatpush2.bf16.msra.mxu0 %v14859_v17  ;;  %v1593_v37 = vld [vmem:[#allocation5 + $0x2dd0] sm:$0xff]  ;;  %v15084_v3 = vcombine.high %v1465_v44, %v1469_v60 }
 0x492   :  { %10807 = vmatprep.subr.bf16.mxu0 %v14852_v23  ;;  %v1597_v1 = vld [vmem:[#allocation5 + $0x2df0] sm:$0xff] }
 0x493   :  { %10847 = vmatpush2.bf16.msra.mxu1 %v14987_v14  ;;  %v15212_v61 = vcombine.high %v1593_v37, %v1597_v1  ;;  %v1457_v2 = vld [vmem:[#allocation5 + $0x2990] sm:$0xff]  ;;  %v15211_v6 = vcombine.low %v1593_v37, %v1597_v1 }
 0x494   :  { %10848 = vmatprep.subr.bf16.mxu1 %v14980_v63  ;;  %v1461_v17 = vld [vmem:[#allocation5 + $0x29b0] sm:$0xff]  ;;  %v15083_v63 = vcombine.low %v1465_v44, %v1469_v60 }
 0x495   :  { %10808 = vmatpush2.bf16.msra.mxu0 %v14851_v34  ;;  %v1585_v14 = vld [vmem:[#allocation5 + $0x2d90] sm:$0xff]  ;;  %v15076_v15 = vcombine.high %v1457_v2, %v1461_v17  ;;  %v15075_v0 = vcombine.low %v1457_v2, %v1461_v17 }
 0x496   :  { %10809 = vmatprep.subr.bf16.mxu0 %v14844_v25  ;;  %v1589_v23 = vld [vmem:[#allocation5 + $0x2db0] sm:$0xff] }
 0x497   :  { %10849 = vmatpush2.bf16.msra.mxu1 %v14979_v21  ;;  %v15204_v24 = vcombine.high %v1585_v14, %v1589_v23  ;;  %v1449_v12 = vld [vmem:[#allocation5 + $0x2950] sm:$0xff] }
 0x498   :  { %10850 = vmatprep.subr.bf16.mxu1 %v14972_v10  ;;  %v1453_v34 = vld [vmem:[#allocation5 + $0x2970] sm:$0xff] }
 0x499   :  { %10810 = vmatpush2.bf16.msra.mxu0 %v14843_v57  ;;  %v1577_v25 = vld [vmem:[#allocation5 + $0x2d50] sm:$0xff]  ;;  %v15203_v57 = vcombine.low %v1585_v14, %v1589_v23  ;;  %v15067_v2 = vcombine.low %v1449_v12, %v1453_v34 }
 0x49a   :  { %10811 = vmatprep.subr.bf16.mxu0 %v14836_v27  ;;  %v1581_v10 = vld [vmem:[#allocation5 + $0x2d70] sm:$0xff] }
 0x49b   :  { %10851 = vmatpush2.bf16.msra.mxu1 %v14971_v48  ;;  %v15068_v48 = vcombine.high %v1449_v12, %v1453_v34  ;;  %v15196_v60 = vcombine.high %v1577_v25, %v1581_v10  ;;  %v1441_v37 = vld [vmem:[#allocation5 + $0x2910] sm:$0xff] }
 0x49c   :  { %10852 = vmatprep.subr.bf16.mxu1 %v14964_v33  ;;  %v1445_v1 = vld [vmem:[#allocation5 + $0x2930] sm:$0xff] }
 0x49d   :  { %10812 = vmatpush2.bf16.msra.mxu0 %v14835_v46  ;;  %v1569_v46 = vld [vmem:[#allocation5 + $0x2d10] sm:$0xff]  ;;  %v15060_v14 = vcombine.high %v1441_v37, %v1445_v1 }
 0x49e   :  { %10863 = vmatprep.subr.bf16.mxu0 %v15084_v3  ;;  %v1425_v34 = vld [vmem:[#allocation5 + $0x2890] sm:$0xff] }
 0x49f   :  { %10853 = vmatpush2.bf16.msra.mxu1 %v14963_v18  ;;  %v1573_v18 = vld [vmem:[#allocation5 + $0x2d30] sm:$0xff] }
 0x4a0   :  { %10904 = vmatprep.subr.bf16.mxu1 %v15212_v61  ;;  %v10569_v21 = vpop.f32.mrf.mxu0  ;;  %10814 = vmatmul.mubr.bf16.vlgmr.msra.gmra.mxu0 %v16442_v54 }
 0x4a1   :  { %v10570_v52 = vadd.f32 %v10569_v21, %v16586_v56  ;;  %10864 = vmatpush1.bf16.msra.mxu0 %v15083_v63  ;;  %10895 = vmatprep.mubr.bf16.mxu0 %v16454_v47  ;;  %v15188_v63 = vcombine.high %v1569_v46, %v1573_v18  ;;  %v1565_v21 = vld [vmem:[#allocation5 + $0x2cf0] sm:$0xff] }
 0x4a2   :  { %v10610_v36 = vpop.f32.mrf.mxu1  ;;  %10855 = vmatmul.mubr.bf16.vlgmr.msra.gmra.mxu1 %v16448_v35  ;;  %v10571_v43 = vpop.f32.mrf.mxu0  ;;  %10865 = vmatprep.subr.bf16.mxu0 %v15076_v15  ;;  %v1437_v15 = vld [vmem:[#allocation5 + $0x28f0] sm:$0xff] }
 0x4a3   :  { %10905 = vmatpush1.bf16.msra.mxu1 %v15211_v6  ;;  %v16595_v27 = vadd.f32 %v10610_v36, %v10570_v52  ;;  %v10572_v33 = vadd.f32 %v10571_v43, %v16590_v30  ;;  %10936 = vmatprep.mubr.bf16.mxu1 %v16459_v51  ;;  %v15195_v30 = vcombine.low %v1577_v25, %v1581_v10  ;;  %v1433_v6 = vld [vmem:[#allocation5 + $0x28d0] sm:$0xff] }
 0x4a4   :  { %v10612_v44 = vpop.f32.mrf.mxu1  ;;  %10906 = vmatprep.subr.bf16.mxu1 %v15204_v24  ;;  %v10573_v56 = vpop.f32.mrf.mxu0  ;;  %v1561_v24 = vld [vmem:[#allocation5 + $0x2cd0] sm:$0xff]  ;;  %v15059_v52 = vcombine.low %v1441_v37, %v1445_v1  ;;  %v15187_v36 = vcombine.low %v1569_v46, %v1573_v18  ;;  %v15052_v43 = vcombine.high %v1433_v6, %v1437_v15  ;;  %v15051_v10 = vcombine.low %v1433_v6, %v1437_v15 }
 0x4a5   :  { %v16600_v3 = vadd.f32 %v10612_v44, %v10572_v33  ;;  %10866 = vmatpush1.bf16.msra.mxu0 %v15075_v0  ;;  %v15180_v12 = vcombine.high %v1561_v24, %v1565_v21  ;;  %v1429_v0 = vld [vmem:[#allocation5 + $0x28b0] sm:$0xff] }
 0x4a6   :  { %v10614_v61 = vpop.f32.mrf.mxu1  ;;  %v10574_v17 = vpop.f32.mrf.mxu0  ;;  %10867 = vmatprep.subr.bf16.mxu0 %v15068_v48  ;;  %v1557_v25 = vld [vmem:[#allocation5 + $0x2cb0] sm:$0xff]  ;;  %v15179_v48 = vcombine.low %v1561_v24, %v1565_v21  ;;  %v15044_v33 = vcombine.high %v1425_v34, %v1429_v0  ;;  %v15043_v46 = vcombine.low %v1425_v34, %v1429_v0 }
 0x4a7   :  { %10907 = vmatpush1.bf16.msra.mxu1 %v15203_v57  ;;  %v1553_v57 = vld [vmem:[#allocation5 + $0x2c90] sm:$0xff] }
 0x4a8   :  { %v10615_v23 = vpop.f32.mrf.mxu1  ;;  %10908 = vmatprep.subr.bf16.mxu1 %v15196_v60  ;;  %v15172_v44 = vcombine.high %v1553_v57, %v1557_v25  ;;  %v1417_v60 = vld [vmem:[#allocation5 + $0x2850] sm:$0xff]  ;;  %v15171_v18 = vcombine.low %v1553_v57, %v1557_v25 }
 0x4a9   :  { %10868 = vmatpush1.bf16.msra.mxu0 %v15067_v2  ;;  %v1421_v37 = vld [vmem:[#allocation5 + $0x2870] sm:$0xff] }
 0x4aa   :  { %10869 = vmatprep.subr.bf16.mxu0 %v15060_v14  ;;  %v1545_v1 = vld [vmem:[#allocation5 + $0x2c50] sm:$0xff]  ;;  %v15036_v61 = vcombine.high %v1417_v60, %v1421_v37 }
 0x4ab   :  { %10909 = vmatpush1.bf16.msra.mxu1 %v15195_v30  ;;  %v1549_v56 = vld [vmem:[#allocation5 + $0x2c70] sm:$0xff] }
 0x4ac   :  { %10910 = vmatprep.subr.bf16.mxu1 %v15188_v63  ;;  %v15164_v2 = vcombine.high %v1545_v1, %v1549_v56  ;;  %v1409_v17 = vld [vmem:[#allocation5 + $0x2810] sm:$0xff]  ;;  %v15035_v63 = vcombine.low %v1417_v60, %v1421_v37  ;;  %v15163_v6 = vcombine.low %v1545_v1, %v1549_v56 }
 0x4ad   :  { %10870 = vmatpush1.bf16.msra.mxu0 %v15059_v52  ;;  %v1413_v30 = vld [vmem:[#allocation5 + $0x2830] sm:$0xff] }
 0x4ae   :  { %10871 = vmatprep.subr.bf16.mxu0 %v15052_v43  ;;  %v1537_v14 = vld [vmem:[#allocation5 + $0x2c10] sm:$0xff]  ;;  %v15028_v15 = vcombine.high %v1409_v17, %v1413_v30 }
 0x4af   :  { %10911 = vmatpush1.bf16.msra.mxu1 %v15187_v36  ;;  %v1541_v23 = vld [vmem:[#allocation5 + $0x2c30] sm:$0xff] }
 0x4b0   :  { %10912 = vmatprep.subr.bf16.mxu1 %v15180_v12  ;;  %v15156_v24 = vcombine.high %v1537_v14, %v1541_v23  ;;  %v1529_v21 = vld [vmem:[#allocation5 + $0x2bd0] sm:$0xff]  ;;  %v15027_v12 = vcombine.low %v1409_v17, %v1413_v30  ;;  %v15155_v34 = vcombine.low %v1537_v14, %v1541_v23 }
 0x4b1   :  { %10872 = vmatpush1.bf16.msra.mxu0 %v15051_v10  ;;  %v1533_v52 = vld [vmem:[#allocation5 + $0x2bf0] sm:$0xff] }
 0x4b2   :  { %10873 = vmatprep.subr.bf16.mxu0 %v15044_v33  ;;  %v1657_v36 = vld [vmem:[#allocation5 + $0x2fd0] sm:$0xff]  ;;  %v15148_v0 = vcombine.high %v1529_v21, %v1533_v52 }
 0x4b3   :  { %10913 = vmatpush1.bf16.msra.mxu1 %v15179_v48  ;;  %v1661_v43 = vld [vmem:[#allocation5 + $0x2ff0] sm:$0xff] }
 0x4b4   :  { %10914 = vmatprep.subr.bf16.mxu1 %v15172_v44  ;;  %v15276_v57 = vcombine.high %v1657_v36, %v1661_v43  ;;  %v1521_v25 = vld [vmem:[#allocation5 + $0x2b90] sm:$0xff]  ;;  %v15147_v44 = vcombine.low %v1529_v21, %v1533_v52  ;;  %v15275_v60 = vcombine.low %v1657_v36, %v1661_v43 }
 0x4b5   :  { %10874 = vmatpush1.bf16.msra.mxu0 %v15043_v46  ;;  %v1525_v10 = vld [vmem:[#allocation5 + $0x2bb0] sm:$0xff] }
 0x4b6   :  { %10875 = vmatprep.subr.bf16.mxu0 %v15036_v61  ;;  %v1649_v48 = vld [vmem:[#allocation5 + $0x2f90] sm:$0xff]  ;;  %v15140_v37 = vcombine.high %v1521_v25, %v1525_v10 }
 0x4b7   :  { %10915 = vmatpush1.bf16.msra.mxu1 %v15171_v18  ;;  %v1653_v33 = vld [vmem:[#allocation5 + $0x2fb0] sm:$0xff] }
 0x4b8   :  { %10916 = vmatprep.subr.bf16.mxu1 %v15164_v2  ;;  %v15268_v1 = vcombine.high %v1649_v48, %v1653_v33  ;;  %v1513_v56 = vld [vmem:[#allocation5 + $0x2b50] sm:$0xff]  ;;  %v15139_v2 = vcombine.low %v1521_v25, %v1525_v10  ;;  %v15267_v17 = vcombine.low %v1649_v48, %v1653_v33 }
 0x4b9   :  { %10876 = vmatpush1.bf16.msra.mxu0 %v15035_v63  ;;  %v1517_v46 = vld [vmem:[#allocation5 + $0x2b70] sm:$0xff] }
 0x4ba   :  { %10877 = vmatprep.subr.bf16.mxu0 %v15028_v15  ;;  %v1641_v18 = vld [vmem:[#allocation5 + $0x2f50] sm:$0xff]  ;;  %v15132_v30 = vcombine.high %v1513_v56, %v1517_v46 }
 0x4bb   :  { %10917 = vmatpush1.bf16.msra.mxu1 %v15163_v6  ;;  %v1645_v61 = vld [vmem:[#allocation5 + $0x2f70] sm:$0xff] }
 0x4bc   :  { %10918 = vmatprep.subr.bf16.mxu1 %v15156_v24  ;;  %v15260_v14 = vcombine.high %v1641_v18, %v1645_v61  ;;  %v1505_v23 = vld [vmem:[#allocation5 + $0x2b10] sm:$0xff]  ;;  %v15131_v24 = vcombine.low %v1513_v56, %v1517_v46  ;;  %v15259_v21 = vcombine.low %v1641_v18, %v1645_v61 }
 0x4bd   :  { %10878 = vmatpush1.bf16.msra.mxu0 %v15027_v12  ;;  %v1509_v63 = vld [vmem:[#allocation5 + $0x2b30] sm:$0xff] }
 0x4be   :  { %10879 = vmatprep.subr.bf16.mxu0 %v15148_v0  ;;  %v1633_v6 = vld [vmem:[#allocation5 + $0x2f10] sm:$0xff]  ;;  %v15124_v52 = vcombine.high %v1505_v23, %v1509_v63 }
 0x4bf   :  { %10919 = vmatpush1.bf16.msra.mxu1 %v15155_v34  ;;  %v1637_v15 = vld [vmem:[#allocation5 + $0x2f30] sm:$0xff] }
 0x4c0   :  { %10920 = vmatprep.subr.bf16.mxu1 %v15276_v57  ;;  %v15252_v36 = vcombine.high %v1633_v6, %v1637_v15  ;;  %v1497_v43 = vld [vmem:[#allocation5 + $0x2ad0] sm:$0xff]  ;;  %v15123_v57 = vcombine.low %v1505_v23, %v1509_v63  ;;  %v15251_v25 = vcombine.low %v1633_v6, %v1637_v15 }
 0x4c1   :  { %10880 = vmatpush2.bf16.msra.mxu0 %v15147_v44  ;;  %v1501_v12 = vld [vmem:[#allocation5 + $0x2af0] sm:$0xff] }
 0x4c2   :  { %10881 = vmatprep.subr.bf16.mxu0 %v15140_v37  ;;  %v1625_v34 = vld [vmem:[#allocation5 + $0x2ed0] sm:$0xff]  ;;  %v15116_v10 = vcombine.high %v1497_v43, %v1501_v12 }
 0x4c3   :  { %10921 = vmatpush2.bf16.msra.mxu1 %v15275_v60  ;;  %v1629_v0 = vld [vmem:[#allocation5 + $0x2ef0] sm:$0xff] }
 0x4c4   :  { %10922 = vmatprep.subr.bf16.mxu1 %v15268_v1  ;;  %v15244_v48 = vcombine.high %v1625_v34, %v1629_v0  ;;  %v1489_v33 = vld [vmem:[#allocation5 + $0x2a90] sm:$0xff]  ;;  %v15115_v1 = vcombine.low %v1497_v43, %v1501_v12  ;;  %v15243_v56 = vcombine.low %v1625_v34, %v1629_v0  ;;  %v186_v0 = vld [vmem:[#allocation5 + $0x1d8] sm:$0xff] }
 0x4c5   :  { %10882 = vmatpush2.bf16.msra.mxu0 %v15139_v2  ;;  %v1493_v44 = vld [vmem:[#allocation5 + $0x2ab0] sm:$0xff] }
 0x4c6   :  { %10883 = vmatprep.subr.bf16.mxu0 %v15132_v30  ;;  %v1617_v60 = vld [vmem:[#allocation5 + $0x2e90] sm:$0xff]  ;;  %v15108_v46 = vcombine.high %v1489_v33, %v1493_v44 }
 0x4c7   :  { %10923 = vmatpush2.bf16.msra.mxu1 %v15267_v17  ;;  %v1621_v37 = vld [vmem:[#allocation5 + $0x2eb0] sm:$0xff] }
 0x4c8   :  { %10924 = vmatprep.subr.bf16.mxu1 %v15260_v14  ;;  %v15236_v18 = vcombine.high %v1617_v60, %v1621_v37  ;;  %v1481_v61 = vld [vmem:[#allocation5 + $0x2a50] sm:$0xff]  ;;  %v15107_v14 = vcombine.low %v1489_v33, %v1493_v44  ;;  %v15235_v23 = vcombine.low %v1617_v60, %v1621_v37  ;;  %v178_v37 = vld [vmem:[#allocation5 + $0x198] sm:$0xff] }
 0x4c9   :  { %10884 = vmatpush2.bf16.msra.mxu0 %v15131_v24  ;;  %v1485_v2 = vld [vmem:[#allocation5 + $0x2a70] sm:$0xff] }
 0x4ca   :  { %10885 = vmatprep.subr.bf16.mxu0 %v15124_v52  ;;  %v1609_v17 = vld [vmem:[#allocation5 + $0x2e50] sm:$0xff]  ;;  %v15100_v63 = vcombine.high %v1481_v61, %v1485_v2 }
 0x4cb   :  { %10925 = vmatpush2.bf16.msra.mxu1 %v15259_v21  ;;  %v1613_v30 = vld [vmem:[#allocation5 + $0x2e70] sm:$0xff] }
 0x4cc   :  { %10926 = vmatprep.subr.bf16.mxu1 %v15252_v36  ;;  %v15228_v6 = vcombine.high %v1609_v17, %v1613_v30  ;;  %v1473_v15 = vld [vmem:[#allocation5 + $0x2a10] sm:$0xff]  ;;  %v15099_v36 = vcombine.low %v1481_v61, %v1485_v2  ;;  %v15227_v43 = vcombine.low %v1609_v17, %v1613_v30  ;;  %v170_v30 = vld [vmem:[#allocation5 + $0x158] sm:$0xff] }
 0x4cd   :  { %10886 = vmatpush2.bf16.msra.mxu0 %v15123_v57  ;;  %v1477_v24 = vld [vmem:[#allocation5 + $0x2a30] sm:$0xff]  ;;  %v190_v57 = vld [vmem:[#allocation5 + $0x1f8] sm:$0xff] }
 0x4ce   :  { %10887 = vmatprep.subr.bf16.mxu0 %v15116_v10  ;;  %v1601_v21 = vld [vmem:[#allocation5 + $0x2e10] sm:$0xff]  ;;  %v15092_v12 = vcombine.high %v1473_v15, %v1477_v24  ;;  %v318_v10 = vld [vmem:[#allocation5 + $0x5f8] sm:$0xff]  ;;  %v13806_v44 = vcombine.high %v186_v0, %v190_v57 }
 0x4cf   :  { %10927 = vmatpush2.bf16.msra.mxu1 %v15251_v25  ;;  %v1605_v52 = vld [vmem:[#allocation5 + $0x2e30] sm:$0xff]  ;;  %v314_v25 = vld [vmem:[#allocation5 + $0x5d8] sm:$0xff] }
 0x4d0   :  { %10928 = vmatprep.subr.bf16.mxu1 %v15244_v48  ;;  %v15220_v34 = vcombine.high %v1601_v21, %v1605_v52  ;;  %v15091_v48 = vcombine.low %v1473_v15, %v1477_v24  ;;  %v15219_v33 = vcombine.low %v1601_v21, %v1605_v52  ;;  %v13934_v60 = vcombine.high %v314_v25, %v318_v10 }
 0x4d1   :  { %10888 = vmatpush2.bf16.msra.mxu0 %v15115_v1  ;;  %v182_v1 = vld [vmem:[#allocation5 + $0x1b8] sm:$0xff]  ;;  %v13933_v61 = vcombine.low %v314_v25, %v318_v10 }
 0x4d2   :  { %10889 = vmatprep.subr.bf16.mxu0 %v15108_v46  ;;  %v310_v46 = vld [vmem:[#allocation5 + $0x5b8] sm:$0xff]  ;;  %v13798_v2 = vcombine.high %v178_v37, %v182_v1  ;;  %v13797_v21 = vcombine.low %v178_v37, %v182_v1 }
 0x4d3   :  { %10929 = vmatpush2.bf16.msra.mxu1 %v15243_v56  ;;  %v306_v56 = vld [vmem:[#allocation5 + $0x598] sm:$0xff] }
 0x4d4   :  { %10930 = vmatprep.subr.bf16.mxu1 %v15236_v18  ;;  %v13805_v18 = vcombine.low %v186_v0, %v190_v57  ;;  %v13926_v17 = vcombine.high %v306_v56, %v310_v46  ;;  %v162_v25 = vld [vmem:[#allocation5 + $0x118] sm:$0xff] }
 0x4d5   :  { %10890 = vmatpush2.bf16.msra.mxu0 %v15107_v14  ;;  %v174_v14 = vld [vmem:[#allocation5 + $0x178] sm:$0xff] }
 0x4d6   :  { %10891 = vmatprep.subr.bf16.mxu0 %v15100_v63  ;;  %v298_v63 = vld [vmem:[#allocation5 + $0x558] sm:$0xff]  ;;  %v13789_v37 = vcombine.low %v170_v30, %v174_v14 }
 0x4d7   :  { %10931 = vmatpush2.bf16.msra.mxu1 %v15235_v23  ;;  %v166_v10 = vld [vmem:[#allocation5 + $0x138] sm:$0xff] }
 0x4d8   :  { %10932 = vmatprep.subr.bf16.mxu1 %v15228_v6  ;;  %v302_v6 = vld [vmem:[#allocation5 + $0x578] sm:$0xff] }
 0x4d9   :  { %10892 = vmatpush2.bf16.msra.mxu0 %v15099_v36  ;;  %v13925_v36 = vcombine.low %v306_v56, %v310_v46  ;;  %v13918_v57 = vcombine.high %v298_v63, %v302_v6  ;;  %v13782_v56 = vcombine.high %v162_v25, %v166_v10 }
 0x4da   :  { %10893 = vmatprep.subr.bf16.mxu0 %v15092_v12 }
 0x4db   :  { %10933 = vmatpush2.bf16.msra.mxu1 %v15227_v43  ;;  %v13790_v43 = vcombine.high %v170_v30, %v174_v14  ;;  %v146_v14 = vld [vmem:[#allocation5 + $0x98] sm:$0xff] }
 0x4dc   :  { %10934 = vmatprep.subr.bf16.mxu1 %v15220_v34 }
 0x4dd   :  { %10894 = vmatpush2.bf16.msra.mxu0 %v15091_v48  ;;  %v290_v48 = vld [vmem:[#allocation5 + $0x518] sm:$0xff] }
 0x4de   :  { %10945 = vmatprep.subr.bf16.mxu0 %v13806_v44 }
 0x4df   :  { %10935 = vmatpush2.bf16.msra.mxu1 %v15219_v33  ;;  %v294_v33 = vld [vmem:[#allocation5 + $0x538] sm:$0xff] }
 0x4e0   :  { %10986 = vmatprep.subr.bf16.mxu1 %v13934_v60  ;;  %v10651_v23 = vpop.f32.mrf.mxu0  ;;  %10896 = vmatmul.mubr.bf16.vlgmr.msra.gmra.mxu0 %v16472_v26 }
 0x4e1   :  { %v10652_v15 = vadd.f32 %v10651_v23, %v16595_v27  ;;  %10946 = vmatpush1.bf16.msra.mxu0 %v13805_v18  ;;  %10977 = vmatprep.mubr.bf16.mxu0 %v16324_v58  ;;  %v13910_v18 = vcombine.high %v290_v48, %v294_v33  ;;  %v158_v58 = vld [vmem:[#allocation5 + $0xf8] sm:$0xff]  ;;  %v13781_v23 = vcombine.low %v162_v25, %v166_v10 }
 0x4e2   :  { %v10692_v24 = vpop.f32.mrf.mxu1  ;;  %10937 = vmatmul.mubr.bf16.vlgmr.msra.gmra.mxu1 %v16476_v31  ;;  %v10653_v52 = vpop.f32.mrf.mxu0  ;;  %10947 = vmatprep.subr.bf16.mxu0 %v13798_v2  ;;  %v282_v2 = vld [vmem:[#allocation5 + $0x4d8] sm:$0xff] }
 0x4e3   :  { %10987 = vmatpush1.bf16.msra.mxu1 %v13933_v61  ;;  %v16605_v12 = vadd.f32 %v10692_v24, %v10652_v15  ;;  %v10654_v34 = vadd.f32 %v10653_v52, %v16600_v3  ;;  %11018 = vmatprep.mubr.bf16.mxu1 %v16328_v59  ;;  %v13917_v3 = vcombine.low %v298_v63, %v302_v6  ;;  %v154_v61 = vld [vmem:[#allocation5 + $0xd8] sm:$0xff] }
 0x4e4   :  { %v10694_v0 = vpop.f32.mrf.mxu1  ;;  %10988 = vmatprep.subr.bf16.mxu1 %v13926_v17  ;;  %v10655_v27 = vpop.f32.mrf.mxu0  ;;  %v286_v17 = vld [vmem:[#allocation5 + $0x4f8] sm:$0xff]  ;;  %v13909_v59 = vcombine.low %v290_v48, %v294_v33  ;;  %v13774_v15 = vcombine.high %v154_v61, %v158_v58  ;;  %v13773_v6 = vcombine.low %v154_v61, %v158_v58 }
 0x4e5   :  { %v16610_v44 = vadd.f32 %v10694_v0, %v10654_v34  ;;  %10948 = vmatpush1.bf16.msra.mxu0 %v13797_v21  ;;  %v13902_v30 = vcombine.high %v282_v2, %v286_v17  ;;  %v150_v24 = vld [vmem:[#allocation5 + $0xb8] sm:$0xff]  ;;  %v13901_v52 = vcombine.low %v282_v2, %v286_v17 }
 0x4e6   :  { %v10696_v60 = vpop.f32.mrf.mxu1  ;;  %v10656_v1 = vpop.f32.mrf.mxu0  ;;  %10949 = vmatprep.subr.bf16.mxu0 %v13790_v43  ;;  %v274_v21 = vld [vmem:[#allocation5 + $0x498] sm:$0xff]  ;;  %v13765_v10 = vcombine.low %v146_v14, %v150_v24 }
 0x4e7   :  { %10989 = vmatpush1.bf16.msra.mxu1 %v13925_v36  ;;  %v278_v63 = vld [vmem:[#allocation5 + $0x4b8] sm:$0xff]  ;;  %v13766_v36 = vcombine.high %v146_v14, %v150_v24 }
 0x4e8   :  { %v10697_v46 = vpop.f32.mrf.mxu1  ;;  %10990 = vmatprep.subr.bf16.mxu1 %v13918_v57  ;;  %v13894_v43 = vcombine.high %v274_v21, %v278_v63  ;;  %v138_v34 = vld [vmem:[#allocation5 + $0x58] sm:$0xff]  ;;  %v13893_v27 = vcombine.low %v274_v21, %v278_v63 }
 0x4e9   :  { %10950 = vmatpush1.bf16.msra.mxu0 %v13789_v37  ;;  %v142_v0 = vld [vmem:[#allocation5 + $0x78] sm:$0xff] }
 0x4ea   :  { %10951 = vmatprep.subr.bf16.mxu0 %v13782_v56  ;;  %v266_v57 = vld [vmem:[#allocation5 + $0x458] sm:$0xff]  ;;  %v13758_v48 = vcombine.high %v138_v34, %v142_v0  ;;  %v13757_v56 = vcombine.low %v138_v34, %v142_v0 }
 0x4eb   :  { %10991 = vmatpush1.bf16.msra.mxu1 %v13917_v3  ;;  %v270_v25 = vld [vmem:[#allocation5 + $0x478] sm:$0xff] }
 0x4ec   :  { %10992 = vmatprep.subr.bf16.mxu1 %v13910_v18  ;;  %v13886_v33 = vcombine.high %v266_v57, %v270_v25  ;;  %v130_v60 = vld [vmem:[#allocation5 + $0x18] sm:$0xff]  ;;  %v13885_v46 = vcombine.low %v266_v57, %v270_v25 }
 0x4ed   :  { %10952 = vmatpush1.bf16.msra.mxu0 %v13781_v23  ;;  %v134_v37 = vld [vmem:[#allocation5 + $0x38] sm:$0xff] }
 0x4ee   :  { %10953 = vmatprep.subr.bf16.mxu0 %v13774_v15  ;;  %v258_v1 = vld [vmem:[#allocation5 + $0x418] sm:$0xff]  ;;  %v13750_v18 = vcombine.high %v130_v60, %v134_v37 }
 0x4ef   :  { %10993 = vmatpush1.bf16.msra.mxu1 %v13909_v59  ;;  %v262_v3 = vld [vmem:[#allocation5 + $0x438] sm:$0xff]  ;;  %v13749_v59 = vcombine.low %v130_v60, %v134_v37 }
 0x4f0   :  { %10994 = vmatprep.subr.bf16.mxu1 %v13902_v30  ;;  %v13878_v61 = vcombine.high %v258_v1, %v262_v3  ;;  %v250_v58 = vld [vmem:[#allocation5 + $0x3d8] sm:$0xff]  ;;  %v13877_v15 = vcombine.low %v258_v1, %v262_v3 }
 0x4f1   :  { %10954 = vmatpush1.bf16.msra.mxu0 %v13773_v6  ;;  %v254_v2 = vld [vmem:[#allocation5 + $0x3f8] sm:$0xff] }
 0x4f2   :  { %10955 = vmatprep.subr.bf16.mxu0 %v13766_v36  ;;  %v378_v17 = vld [vmem:[#allocation5 + $0x7d8] sm:$0xff]  ;;  %v13870_v30 = vcombine.high %v250_v58, %v254_v2 }
 0x4f3   :  { %10995 = vmatpush1.bf16.msra.mxu1 %v13901_v52  ;;  %v382_v23 = vld [vmem:[#allocation5 + $0x7f8] sm:$0xff]  ;;  %v13869_v52 = vcombine.low %v250_v58, %v254_v2 }
 0x4f4   :  { %10996 = vmatprep.subr.bf16.mxu1 %v13894_v43  ;;  %v13998_v14 = vcombine.high %v378_v17, %v382_v23  ;;  %v242_v24 = vld [vmem:[#allocation5 + $0x398] sm:$0xff]  ;;  %v13997_v36 = vcombine.low %v378_v17, %v382_v23 }
 0x4f5   :  { %10956 = vmatpush1.bf16.msra.mxu0 %v13765_v10  ;;  %v246_v21 = vld [vmem:[#allocation5 + $0x3b8] sm:$0xff] }
 0x4f6   :  { %10957 = vmatprep.subr.bf16.mxu0 %v13758_v48  ;;  %v370_v63 = vld [vmem:[#allocation5 + $0x798] sm:$0xff]  ;;  %v13862_v43 = vcombine.high %v242_v24, %v246_v21 }
 0x4f7   :  { %10997 = vmatpush1.bf16.msra.mxu1 %v13893_v27  ;;  %v374_v6 = vld [vmem:[#allocation5 + $0x7b8] sm:$0xff]  ;;  %v13861_v27 = vcombine.low %v242_v24, %v246_v21 }
 0x4f8   :  { %10998 = vmatprep.subr.bf16.mxu1 %v13886_v33  ;;  %v13990_v34 = vcombine.high %v370_v63, %v374_v6  ;;  %v234_v0 = vld [vmem:[#allocation5 + $0x358] sm:$0xff]  ;;  %v13989_v48 = vcombine.low %v370_v63, %v374_v6 }
 0x4f9   :  { %10958 = vmatpush1.bf16.msra.mxu0 %v13757_v56  ;;  %v238_v57 = vld [vmem:[#allocation5 + $0x378] sm:$0xff] }
 0x4fa   :  { %10959 = vmatprep.subr.bf16.mxu0 %v13750_v18  ;;  %v362_v25 = vld [vmem:[#allocation5 + $0x758] sm:$0xff]  ;;  %v13854_v33 = vcombine.high %v234_v0, %v238_v57 }
 0x4fb   :  { %10999 = vmatpush1.bf16.msra.mxu1 %v13885_v46  ;;  %v366_v10 = vld [vmem:[#allocation5 + $0x778] sm:$0xff]  ;;  %v13853_v46 = vcombine.low %v234_v0, %v238_v57 }
 0x4fc   :  { %11000 = vmatprep.subr.bf16.mxu1 %v13878_v61  ;;  %v13982_v60 = vcombine.high %v362_v25, %v366_v10  ;;  %v226_v37 = vld [vmem:[#allocation5 + $0x318] sm:$0xff]  ;;  %v13981_v18 = vcombine.low %v362_v25, %v366_v10 }
 0x4fd   :  { %10960 = vmatpush1.bf16.msra.mxu0 %v13749_v59  ;;  %v230_v1 = vld [vmem:[#allocation5 + $0x338] sm:$0xff] }
 0x4fe   :  { %10961 = vmatprep.subr.bf16.mxu0 %v13870_v30  ;;  %v354_v3 = vld [vmem:[#allocation5 + $0x718] sm:$0xff]  ;;  %v13846_v61 = vcombine.high %v226_v37, %v230_v1 }
 0x4ff   :  { %11001 = vmatpush1.bf16.msra.mxu1 %v13877_v15  ;;  %v358_v56 = vld [vmem:[#allocation5 + $0x738] sm:$0xff]  ;;  %v13845_v15 = vcombine.low %v226_v37, %v230_v1 }
 0x500   :  { %11002 = vmatprep.subr.bf16.mxu1 %v13998_v14  ;;  %v13974_v58 = vcombine.high %v354_v3, %v358_v56  ;;  %v218_v2 = vld [vmem:[#allocation5 + $0x2d8] sm:$0xff]  ;;  %v13973_v30 = vcombine.low %v354_v3, %v358_v56 }
 0x501   :  { %10962 = vmatpush2.bf16.msra.mxu0 %v13869_v52  ;;  %v222_v17 = vld [vmem:[#allocation5 + $0x2f8] sm:$0xff] }
 0x502   :  { %10963 = vmatprep.subr.bf16.mxu0 %v13862_v43  ;;  %v346_v23 = vld [vmem:[#allocation5 + $0x6d8] sm:$0xff]  ;;  %v13838_v14 = vcombine.high %v218_v2, %v222_v17 }
 0x503   :  { %11003 = vmatpush2.bf16.msra.mxu1 %v13997_v36  ;;  %v350_v59 = vld [vmem:[#allocation5 + $0x6f8] sm:$0xff]  ;;  %v13837_v36 = vcombine.low %v218_v2, %v222_v17 }
 0x504   :  { %11004 = vmatprep.subr.bf16.mxu1 %v13990_v34  ;;  %v13966_v24 = vcombine.high %v346_v23, %v350_v59  ;;  %v210_v21 = vld [vmem:[#allocation5 + $0x298] sm:$0xff]  ;;  %v13965_v43 = vcombine.low %v346_v23, %v350_v59 }
 0x505   :  { %10964 = vmatpush2.bf16.msra.mxu0 %v13861_v27  ;;  %v214_v63 = vld [vmem:[#allocation5 + $0x2b8] sm:$0xff] }
 0x506   :  { %10965 = vmatprep.subr.bf16.mxu0 %v13854_v33  ;;  %v338_v6 = vld [vmem:[#allocation5 + $0x698] sm:$0xff]  ;;  %v13830_v34 = vcombine.high %v210_v21, %v214_v63 }
 0x507   :  { %11005 = vmatpush2.bf16.msra.mxu1 %v13989_v48  ;;  %v342_v52 = vld [vmem:[#allocation5 + $0x6b8] sm:$0xff]  ;;  %v13829_v48 = vcombine.low %v210_v21, %v214_v63 }
 0x508   :  { %11006 = vmatprep.subr.bf16.mxu1 %v13982_v60  ;;  %v13958_v0 = vcombine.high %v338_v6, %v342_v52  ;;  %v202_v57 = vld [vmem:[#allocation5 + $0x258] sm:$0xff]  ;;  %v13957_v33 = vcombine.low %v338_v6, %v342_v52 }
 0x509   :  { %10966 = vmatpush2.bf16.msra.mxu0 %v13853_v46  ;;  %v206_v25 = vld [vmem:[#allocation5 + $0x278] sm:$0xff] }
 0x50a   :  { %10967 = vmatprep.subr.bf16.mxu0 %v13846_v61  ;;  %v330_v10 = vld [vmem:[#allocation5 + $0x658] sm:$0xff]  ;;  %v13822_v60 = vcombine.high %v202_v57, %v206_v25 }
 0x50b   :  { %11007 = vmatpush2.bf16.msra.mxu1 %v13981_v18  ;;  %v334_v27 = vld [vmem:[#allocation5 + $0x678] sm:$0xff]  ;;  %v13821_v18 = vcombine.low %v202_v57, %v206_v25 }
 0x50c   :  { %11008 = vmatprep.subr.bf16.mxu1 %v13974_v58  ;;  %v13950_v37 = vcombine.high %v330_v10, %v334_v27  ;;  %v194_v1 = vld [vmem:[#allocation5 + $0x218] sm:$0xff]  ;;  %v13949_v61 = vcombine.low %v330_v10, %v334_v27 }
 0x50d   :  { %10968 = vmatpush2.bf16.msra.mxu0 %v13845_v15  ;;  %v198_v3 = vld [vmem:[#allocation5 + $0x238] sm:$0xff] }
 0x50e   :  { %10969 = vmatprep.subr.bf16.mxu0 %v13838_v14  ;;  %v322_v56 = vld [vmem:[#allocation5 + $0x618] sm:$0xff]  ;;  %v13814_v58 = vcombine.high %v194_v1, %v198_v3 }
 0x50f   :  { %11009 = vmatpush2.bf16.msra.mxu1 %v13973_v30  ;;  %v326_v46 = vld [vmem:[#allocation5 + $0x638] sm:$0xff]  ;;  %v13813_v30 = vcombine.low %v194_v1, %v198_v3 }
 0x510   :  { %11010 = vmatprep.subr.bf16.mxu1 %v13966_v24  ;;  %v13942_v2 = vcombine.high %v322_v56, %v326_v46  ;;  %v442_v17 = vld [vmem:[#allocation5 + $0x9d8] sm:$0xff]  ;;  %v13941_v14 = vcombine.low %v322_v56, %v326_v46 }
 0x511   :  { %10970 = vmatpush2.bf16.msra.mxu0 %v13837_v36  ;;  %v446_v23 = vld [vmem:[#allocation5 + $0x9f8] sm:$0xff] }
 0x512   :  { %10971 = vmatprep.subr.bf16.mxu0 %v13830_v34  ;;  %v570_v59 = vld [vmem:[#allocation5 + $0xdd8] sm:$0xff]  ;;  %v14062_v24 = vcombine.high %v442_v17, %v446_v23 }
 0x513   :  { %11011 = vmatpush2.bf16.msra.mxu1 %v13965_v43  ;;  %v574_v15 = vld [vmem:[#allocation5 + $0xdf8] sm:$0xff]  ;;  %v14061_v43 = vcombine.low %v442_v17, %v446_v23 }
 0x514   :  { %11012 = vmatprep.subr.bf16.mxu1 %v13958_v0  ;;  %v14190_v21 = vcombine.high %v570_v59, %v574_v15  ;;  %v434_v63 = vld [vmem:[#allocation5 + $0x998] sm:$0xff]  ;;  %v14189_v34 = vcombine.low %v570_v59, %v574_v15 }
 0x515   :  { %10972 = vmatpush2.bf16.msra.mxu0 %v13829_v48  ;;  %v438_v6 = vld [vmem:[#allocation5 + $0x9b8] sm:$0xff] }
 0x516   :  { %10973 = vmatprep.subr.bf16.mxu0 %v13822_v60  ;;  %v562_v52 = vld [vmem:[#allocation5 + $0xd98] sm:$0xff]  ;;  %v14054_v0 = vcombine.high %v434_v63, %v438_v6  ;;  %v14053_v1 = vcombine.low %v434_v63, %v438_v6 }
 0x517   :  { %11013 = vmatpush2.bf16.msra.mxu1 %v13957_v33  ;;  %v566_v36 = vld [vmem:[#allocation5 + $0xdb8] sm:$0xff] }
 0x518   :  { %11014 = vmatprep.subr.bf16.mxu1 %v13950_v37  ;;  %v14182_v57 = vcombine.high %v562_v52, %v566_v36  ;;  %v426_v25 = vld [vmem:[#allocation5 + $0x958] sm:$0xff]  ;;  %v14181_v56 = vcombine.low %v562_v52, %v566_v36 }
 0x519   :  { %10974 = vmatpush2.bf16.msra.mxu0 %v13821_v18  ;;  %v430_v10 = vld [vmem:[#allocation5 + $0x978] sm:$0xff] }
 0x51a   :  { %10975 = vmatprep.subr.bf16.mxu0 %v13814_v58  ;;  %v554_v48 = vld [vmem:[#allocation5 + $0xd58] sm:$0xff]  ;;  %v14046_v46 = vcombine.high %v426_v25, %v430_v10 }
 0x51b   :  { %11015 = vmatpush2.bf16.msra.mxu1 %v13949_v61  ;;  %v558_v33 = vld [vmem:[#allocation5 + $0xd78] sm:$0xff] }
 0x51c   :  { %11016 = vmatprep.subr.bf16.mxu1 %v13942_v2  ;;  %v418_v2 = vld [vmem:[#allocation5 + $0x918] sm:$0xff] }
 0x51d   :  { %10976 = vmatpush2.bf16.msra.mxu0 %v13813_v30  ;;  %v422_v17 = vld [vmem:[#allocation5 + $0x938] sm:$0xff]  ;;  %v14045_v30 = vcombine.low %v426_v25, %v430_v10 }
 0x51e   :  { %11027 = vmatprep.subr.bf16.mxu0 %v14062_v24  ;;  %v550_v23 = vld [vmem:[#allocation5 + $0xd38] sm:$0xff]  ;;  %v14038_v24 = vcombine.high %v418_v2, %v422_v17 }
 0x51f   :  { %11017 = vmatpush2.bf16.msra.mxu1 %v13941_v14  ;;  %v410_v6 = vld [vmem:[#allocation5 + $0x8d8] sm:$0xff] }
 0x520   :  { %11068 = vmatprep.subr.bf16.mxu1 %v14190_v21  ;;  %v10733_v27 = vpop.f32.mrf.mxu0  ;;  %10978 = vmatmul.mubr.bf16.vlgmr.msra.gmra.mxu0 %v16334_v16  ;;  %v14174_v16 = vcombine.high %v554_v48, %v558_v33  ;;  %v538_v52 = vld [vmem:[#allocation5 + $0xcd8] sm:$0xff] }
 0x521   :  { %v10734_v60 = vadd.f32 %v10733_v27, %v16605_v12  ;;  %11028 = vmatpush1.bf16.msra.mxu0 %v14061_v43  ;;  %11059 = vmatprep.mubr.bf16.mxu0 %v16346_v28  ;;  %v414_v28 = vld [vmem:[#allocation5 + $0x8f8] sm:$0xff]  ;;  %v14037_v43 = vcombine.low %v418_v2, %v422_v17 }
 0x522   :  { %v10774_v37 = vpop.f32.mrf.mxu1  ;;  %11019 = vmatmul.mubr.bf16.vlgmr.msra.gmra.mxu1 %v16340_v20  ;;  %v10735_v3 = vpop.f32.mrf.mxu0  ;;  %11029 = vmatprep.subr.bf16.mxu0 %v14054_v0  ;;  %v546_v20 = vld [vmem:[#allocation5 + $0xd18] sm:$0xff] }
 0x523   :  { %11069 = vmatpush1.bf16.msra.mxu1 %v14189_v34  ;;  %v16615_v18 = vadd.f32 %v10774_v37, %v10734_v60  ;;  %v10736_v61 = vadd.f32 %v10735_v3, %v16610_v44  ;;  %11100 = vmatprep.mubr.bf16.mxu1 %v16351_v29  ;;  %v14173_v44 = vcombine.low %v554_v48, %v558_v33  ;;  %v542_v36 = vld [vmem:[#allocation5 + $0xcf8] sm:$0xff] }
 0x524   :  { %v10776_v58 = vpop.f32.mrf.mxu1  ;;  %11070 = vmatprep.subr.bf16.mxu1 %v14182_v57  ;;  %v10737_v12 = vpop.f32.mrf.mxu0  ;;  %v14166_v63 = vcombine.high %v546_v20, %v550_v23  ;;  %v14165_v29 = vcombine.low %v546_v20, %v550_v23  ;;  %v14030_v34 = vcombine.high %v410_v6, %v414_v28  ;;  %v14158_v0 = vcombine.high %v538_v52, %v542_v36  ;;  %v402_v57 = vld [vmem:[#allocation5 + $0x898] sm:$0xff] }
 0x525   :  { %v16620_v59 = vadd.f32 %v10776_v58, %v10736_v61  ;;  %11030 = vmatpush1.bf16.msra.mxu0 %v14053_v1  ;;  %v406_v25 = vld [vmem:[#allocation5 + $0x8b8] sm:$0xff]  ;;  %v14029_v48 = vcombine.low %v410_v6, %v414_v28  ;;  %v14157_v33 = vcombine.low %v538_v52, %v542_v36 }
 0x526   :  { %v10778_v15 = vpop.f32.mrf.mxu1  ;;  %v10738_v14 = vpop.f32.mrf.mxu0  ;;  %11031 = vmatprep.subr.bf16.mxu0 %v14046_v46  ;;  %v530_v10 = vld [vmem:[#allocation5 + $0xc98] sm:$0xff]  ;;  %v14022_v60 = vcombine.high %v402_v57, %v406_v25  ;;  %v14021_v61 = vcombine.low %v402_v57, %v406_v25 }
 0x527   :  { %11071 = vmatpush1.bf16.msra.mxu1 %v14181_v56  ;;  %v534_v27 = vld [vmem:[#allocation5 + $0xcb8] sm:$0xff] }
 0x528   :  { %v10779_v21 = vpop.f32.mrf.mxu1  ;;  %11072 = vmatprep.subr.bf16.mxu1 %v14174_v16  ;;  %v14150_v37 = vcombine.high %v530_v10, %v534_v27  ;;  %v394_v1 = vld [vmem:[#allocation5 + $0x858] sm:$0xff]  ;;  %v14149_v58 = vcombine.low %v530_v10, %v534_v27 }
 0x529   :  { %11032 = vmatpush1.bf16.msra.mxu0 %v14045_v30  ;;  %v398_v3 = vld [vmem:[#allocation5 + $0x878] sm:$0xff] }
 0x52a   :  { %11033 = vmatprep.subr.bf16.mxu0 %v14038_v24  ;;  %v522_v56 = vld [vmem:[#allocation5 + $0xc58] sm:$0xff]  ;;  %v14014_v16 = vcombine.high %v394_v1, %v398_v3  ;;  %v14013_v15 = vcombine.low %v394_v1, %v398_v3 }
 0x52b   :  { %11073 = vmatpush1.bf16.msra.mxu1 %v14173_v44  ;;  %v526_v46 = vld [vmem:[#allocation5 + $0xc78] sm:$0xff] }
 0x52c   :  { %11074 = vmatprep.subr.bf16.mxu1 %v14166_v63  ;;  %v14142_v2 = vcombine.high %v522_v56, %v526_v46  ;;  %v386_v17 = vld [vmem:[#allocation5 + $0x818] sm:$0xff]  ;;  %v14141_v30 = vcombine.low %v522_v56, %v526_v46 }
 0x52d   :  { %11034 = vmatpush1.bf16.msra.mxu0 %v14037_v43  ;;  %v390_v12 = vld [vmem:[#allocation5 + $0x838] sm:$0xff] }
 0x52e   :  { %11035 = vmatprep.subr.bf16.mxu0 %v14030_v34  ;;  %v514_v20 = vld [vmem:[#allocation5 + $0xc18] sm:$0xff]  ;;  %v14006_v14 = vcombine.high %v386_v17, %v390_v12  ;;  %v14005_v28 = vcombine.low %v386_v17, %v390_v12 }
 0x52f   :  { %11075 = vmatpush1.bf16.msra.mxu1 %v14165_v29  ;;  %v518_v23 = vld [vmem:[#allocation5 + $0xc38] sm:$0xff] }
 0x530   :  { %11076 = vmatprep.subr.bf16.mxu1 %v14158_v0  ;;  %v14134_v44 = vcombine.high %v514_v20, %v518_v23  ;;  %v506_v24 = vld [vmem:[#allocation5 + $0xbd8] sm:$0xff]  ;;  %v14133_v52 = vcombine.low %v514_v20, %v518_v23 }
 0x531   :  { %11036 = vmatpush1.bf16.msra.mxu0 %v14029_v48  ;;  %v510_v21 = vld [vmem:[#allocation5 + $0xbf8] sm:$0xff] }
 0x532   :  { %11037 = vmatprep.subr.bf16.mxu0 %v14022_v60  ;;  %v634_v63 = vld [vmem:[#allocation5 + $0xfd8] sm:$0xff]  ;;  %v14126_v36 = vcombine.high %v506_v24, %v510_v21  ;;  %v14125_v25 = vcombine.low %v506_v24, %v510_v21 }
 0x533   :  { %11077 = vmatpush1.bf16.msra.mxu1 %v14157_v33  ;;  %v638_v6 = vld [vmem:[#allocation5 + $0xff8] sm:$0xff] }
 0x534   :  { %11078 = vmatprep.subr.bf16.mxu1 %v14150_v37  ;;  %v14254_v43 = vcombine.high %v634_v63, %v638_v6  ;;  %v498_v29 = vld [vmem:[#allocation5 + $0xb98] sm:$0xff]  ;;  %v14253_v10 = vcombine.low %v634_v63, %v638_v6 }
 0x535   :  { %11038 = vmatpush1.bf16.msra.mxu0 %v14021_v61  ;;  %v502_v34 = vld [vmem:[#allocation5 + $0xbb8] sm:$0xff] }
 0x536   :  { %11039 = vmatprep.subr.bf16.mxu0 %v14014_v16  ;;  %v626_v0 = vld [vmem:[#allocation5 + $0xf98] sm:$0xff]  ;;  %v14118_v27 = vcombine.high %v498_v29, %v502_v34  ;;  %v14117_v3 = vcombine.low %v498_v29, %v502_v34 }
 0x537   :  { %11079 = vmatpush1.bf16.msra.mxu1 %v14149_v58  ;;  %v630_v57 = vld [vmem:[#allocation5 + $0xfb8] sm:$0xff] }
 0x538   :  { %11080 = vmatprep.subr.bf16.mxu1 %v14142_v2  ;;  %v14246_v48 = vcombine.high %v626_v0, %v630_v57  ;;  %v490_v33 = vld [vmem:[#allocation5 + $0xb58] sm:$0xff]  ;;  %v14245_v56 = vcombine.low %v626_v0, %v630_v57 }
 0x539   :  { %11040 = vmatpush1.bf16.msra.mxu0 %v14013_v15  ;;  %v494_v60 = vld [vmem:[#allocation5 + $0xb78] sm:$0xff] }
 0x53a   :  { %11041 = vmatprep.subr.bf16.mxu0 %v14006_v14  ;;  %v618_v37 = vld [vmem:[#allocation5 + $0xf58] sm:$0xff]  ;;  %v14110_v46 = vcombine.high %v490_v33, %v494_v60  ;;  %v14109_v12 = vcombine.low %v490_v33, %v494_v60 }
 0x53b   :  { %11081 = vmatpush1.bf16.msra.mxu1 %v14141_v30  ;;  %v622_v1 = vld [vmem:[#allocation5 + $0xf78] sm:$0xff] }
 0x53c   :  { %11082 = vmatprep.subr.bf16.mxu1 %v14134_v44  ;;  %v14238_v61 = vcombine.high %v618_v37, %v622_v1  ;;  %v482_v58 = vld [vmem:[#allocation5 + $0xb18] sm:$0xff]  ;;  %v14237_v20 = vcombine.low %v618_v37, %v622_v1 }
 0x53d   :  { %11042 = vmatpush1.bf16.msra.mxu0 %v14005_v28  ;;  %v486_v16 = vld [vmem:[#allocation5 + $0xb38] sm:$0xff] }
 0x53e   :  { %11043 = vmatprep.subr.bf16.mxu0 %v14126_v36  ;;  %v610_v2 = vld [vmem:[#allocation5 + $0xf18] sm:$0xff]  ;;  %v14102_v23 = vcombine.high %v482_v58, %v486_v16  ;;  %v14101_v21 = vcombine.low %v482_v58, %v486_v16 }
 0x53f   :  { %11083 = vmatpush1.bf16.msra.mxu1 %v14133_v52  ;;  %v614_v17 = vld [vmem:[#allocation5 + $0xf38] sm:$0xff] }
 0x540   :  { %11084 = vmatprep.subr.bf16.mxu1 %v14254_v43  ;;  %v14230_v15 = vcombine.high %v610_v2, %v614_v17  ;;  %v474_v30 = vld [vmem:[#allocation5 + $0xad8] sm:$0xff]  ;;  %v14229_v63 = vcombine.low %v610_v2, %v614_v17 }
 0x541   :  { %11044 = vmatpush2.bf16.msra.mxu0 %v14125_v25  ;;  %v478_v14 = vld [vmem:[#allocation5 + $0xaf8] sm:$0xff] }
 0x542   :  { %11045 = vmatprep.subr.bf16.mxu0 %v14118_v27  ;;  %v602_v44 = vld [vmem:[#allocation5 + $0xed8] sm:$0xff]  ;;  %v14094_v6 = vcombine.high %v474_v30, %v478_v14  ;;  %v14093_v34 = vcombine.low %v474_v30, %v478_v14 }
 0x543   :  { %11085 = vmatpush2.bf16.msra.mxu1 %v14253_v10  ;;  %v606_v24 = vld [vmem:[#allocation5 + $0xef8] sm:$0xff] }
 0x544   :  { %11086 = vmatprep.subr.bf16.mxu1 %v14246_v48  ;;  %v14222_v28 = vcombine.high %v602_v44, %v606_v24  ;;  %v466_v52 = vld [vmem:[#allocation5 + $0xa98] sm:$0xff]  ;;  %v14221_v0 = vcombine.low %v602_v44, %v606_v24 }
 0x545   :  { %11046 = vmatpush2.bf16.msra.mxu0 %v14117_v3  ;;  %v470_v36 = vld [vmem:[#allocation5 + $0xab8] sm:$0xff] }
 0x546   :  { %11047 = vmatprep.subr.bf16.mxu0 %v14110_v46  ;;  %v594_v43 = vld [vmem:[#allocation5 + $0xe98] sm:$0xff]  ;;  %v14086_v57 = vcombine.high %v466_v52, %v470_v36  ;;  %v14085_v60 = vcombine.low %v466_v52, %v470_v36 }
 0x547   :  { %11087 = vmatpush2.bf16.msra.mxu1 %v14245_v56  ;;  %v598_v29 = vld [vmem:[#allocation5 + $0xeb8] sm:$0xff] }
 0x548   :  { %11088 = vmatprep.subr.bf16.mxu1 %v14238_v61  ;;  %v14214_v25 = vcombine.high %v594_v43, %v598_v29  ;;  %v458_v10 = vld [vmem:[#allocation5 + $0xa58] sm:$0xff]  ;;  %v14213_v37 = vcombine.low %v594_v43, %v598_v29 }
 0x549   :  { %11048 = vmatpush2.bf16.msra.mxu0 %v14109_v12  ;;  %v462_v27 = vld [vmem:[#allocation5 + $0xa78] sm:$0xff] }
 0x54a   :  { %11049 = vmatprep.subr.bf16.mxu0 %v14102_v23  ;;  %v586_v48 = vld [vmem:[#allocation5 + $0xe58] sm:$0xff]  ;;  %v14078_v1 = vcombine.high %v458_v10, %v462_v27  ;;  %v14077_v16 = vcombine.low %v458_v10, %v462_v27 }
 0x54b   :  { %11089 = vmatpush2.bf16.msra.mxu1 %v14237_v20  ;;  %v590_v33 = vld [vmem:[#allocation5 + $0xe78] sm:$0xff] }
 0x54c   :  { %11090 = vmatprep.subr.bf16.mxu1 %v14230_v15  ;;  %v14206_v3 = vcombine.high %v586_v48, %v590_v33  ;;  %v450_v56 = vld [vmem:[#allocation5 + $0xa18] sm:$0xff]  ;;  %v14205_v2 = vcombine.low %v586_v48, %v590_v33 }
 0x54d   :  { %11050 = vmatpush2.bf16.msra.mxu0 %v14101_v21  ;;  %v454_v46 = vld [vmem:[#allocation5 + $0xa38] sm:$0xff] }
 0x54e   :  { %11051 = vmatprep.subr.bf16.mxu0 %v14094_v6  ;;  %v578_v61 = vld [vmem:[#allocation5 + $0xe18] sm:$0xff]  ;;  %v14070_v17 = vcombine.high %v450_v56, %v454_v46  ;;  %v14069_v14 = vcombine.low %v450_v56, %v454_v46 }
 0x54f   :  { %11091 = vmatpush2.bf16.msra.mxu1 %v14229_v63  ;;  %v582_v58 = vld [vmem:[#allocation5 + $0xe38] sm:$0xff] }
 0x550   :  { %11092 = vmatprep.subr.bf16.mxu1 %v14222_v28  ;;  %v14198_v12 = vcombine.high %v578_v61, %v582_v58  ;;  %v698_v20 = vld [vmem:[#allocation5 + $0x11d8] sm:$0xff]  ;;  %v14197_v44 = vcombine.low %v578_v61, %v582_v58 }
 0x551   :  { %11052 = vmatpush2.bf16.msra.mxu0 %v14093_v34  ;;  %v702_v23 = vld [vmem:[#allocation5 + $0x11f8] sm:$0xff] }
 0x552   :  { %11053 = vmatprep.subr.bf16.mxu0 %v14086_v57  ;;  %v826_v15 = vld [vmem:[#allocation5 + $0x15d8] sm:$0xff]  ;;  %v14318_v24 = vcombine.high %v698_v20, %v702_v23  ;;  %v14317_v36 = vcombine.low %v698_v20, %v702_v23 }
 0x553   :  { %11093 = vmatpush2.bf16.msra.mxu1 %v14221_v0  ;;  %v830_v30 = vld [vmem:[#allocation5 + $0x15f8] sm:$0xff] }
 0x554   :  { %11094 = vmatprep.subr.bf16.mxu1 %v14214_v25  ;;  %v14446_v21 = vcombine.high %v826_v15, %v830_v30  ;;  %v690_v63 = vld [vmem:[#allocation5 + $0x1198] sm:$0xff]  ;;  %v14445_v43 = vcombine.low %v826_v15, %v830_v30 }
 0x555   :  { %11054 = vmatpush2.bf16.msra.mxu0 %v14085_v60  ;;  %v694_v6 = vld [vmem:[#allocation5 + $0x11b8] sm:$0xff] }
 0x556   :  { %11055 = vmatprep.subr.bf16.mxu0 %v14078_v1  ;;  %v818_v28 = vld [vmem:[#allocation5 + $0x1598] sm:$0xff]  ;;  %v14310_v29 = vcombine.high %v690_v63, %v694_v6  ;;  %v14309_v60 = vcombine.low %v690_v63, %v694_v6 }
 0x557   :  { %11095 = vmatpush2.bf16.msra.mxu1 %v14213_v37  ;;  %v822_v52 = vld [vmem:[#allocation5 + $0x15b8] sm:$0xff] }
 0x558   :  { %11096 = vmatprep.subr.bf16.mxu1 %v14206_v3  ;;  %v14438_v34 = vcombine.high %v818_v28, %v822_v52  ;;  %v682_v0 = vld [vmem:[#allocation5 + $0x1158] sm:$0xff]  ;;  %v14437_v1 = vcombine.low %v818_v28, %v822_v52 }
 0x559   :  { %11056 = vmatpush2.bf16.msra.mxu0 %v14077_v16  ;;  %v686_v57 = vld [vmem:[#allocation5 + $0x1178] sm:$0xff] }
 0x55a   :  { %11057 = vmatprep.subr.bf16.mxu0 %v14070_v17  ;;  %v810_v10 = vld [vmem:[#allocation5 + $0x1558] sm:$0xff]  ;;  %v14302_v3 = vcombine.high %v682_v0, %v686_v57  ;;  %v14301_v20 = vcombine.low %v682_v0, %v686_v57 }
 0x55b   :  { %11097 = vmatpush2.bf16.msra.mxu1 %v14205_v2  ;;  %v814_v27 = vld [vmem:[#allocation5 + $0x1578] sm:$0xff] }
 0x55c   :  { %11098 = vmatprep.subr.bf16.mxu1 %v14198_v12  ;;  %v674_v58 = vld [vmem:[#allocation5 + $0x1118] sm:$0xff] }
 0x55d   :  { %11058 = vmatpush2.bf16.msra.mxu0 %v14069_v14  ;;  %v678_v16 = vld [vmem:[#allocation5 + $0x1138] sm:$0xff] }
 0x55e   :  { %11109 = vmatprep.subr.bf16.mxu0 %v14318_v24  ;;  %v806_v2 = vld [vmem:[#allocation5 + $0x1538] sm:$0xff]  ;;  %v14294_v15 = vcombine.high %v674_v58, %v678_v16  ;;  %v14293_v63 = vcombine.low %v674_v58, %v678_v16 }
 0x55f   :  { %11099 = vmatpush2.bf16.msra.mxu1 %v14197_v44  ;;  %v666_v44 = vld [vmem:[#allocation5 + $0x10d8] sm:$0xff] }
 0x560   :  { %11150 = vmatprep.subr.bf16.mxu1 %v14446_v21  ;;  %v10815_v25 = vpop.f32.mrf.mxu0  ;;  %11060 = vmatmul.mubr.bf16.vlgmr.msra.gmra.mxu0 %v16360_v39  ;;  %v14430_v39 = vcombine.high %v810_v10, %v814_v27  ;;  %v794_v24 = vld [vmem:[#allocation5 + $0x14d8] sm:$0xff] }
 0x561   :  { %v10816_v48 = vadd.f32 %v10815_v25, %v16615_v18  ;;  %11110 = vmatpush1.bf16.msra.mxu0 %v14317_v36  ;;  %11141 = vmatprep.mubr.bf16.mxu0 %v16370_v19  ;;  %v670_v19 = vld [vmem:[#allocation5 + $0x10f8] sm:$0xff] }
 0x562   :  { %v10856_v33 = vpop.f32.mrf.mxu1  ;;  %11101 = vmatmul.mubr.bf16.vlgmr.msra.gmra.mxu1 %v16364_v40  ;;  %v10817_v37 = vpop.f32.mrf.mxu0  ;;  %11111 = vmatprep.subr.bf16.mxu0 %v14310_v29  ;;  %v802_v40 = vld [vmem:[#allocation5 + $0x1518] sm:$0xff]  ;;  %v14286_v6 = vcombine.high %v666_v44, %v670_v19 }
 0x563   :  { %11151 = vmatpush1.bf16.msra.mxu1 %v14445_v43  ;;  %v16625_v56 = vadd.f32 %v10856_v33, %v10816_v48  ;;  %v10818_v46 = vadd.f32 %v10817_v37, %v16620_v59  ;;  %11182 = vmatprep.mubr.bf16.mxu1 %v16375_v22  ;;  %v14429_v59 = vcombine.low %v810_v10, %v814_v27  ;;  %v798_v21 = vld [vmem:[#allocation5 + $0x14f8] sm:$0xff] }
 0x564   :  { %v10858_v61 = vpop.f32.mrf.mxu1  ;;  %11152 = vmatprep.subr.bf16.mxu1 %v14438_v34  ;;  %v10819_v18 = vpop.f32.mrf.mxu0  ;;  %v14422_v14 = vcombine.high %v802_v40, %v806_v2  ;;  %v14421_v22 = vcombine.low %v802_v40, %v806_v2  ;;  %v14414_v28 = vcombine.high %v794_v24, %v798_v21  ;;  %v658_v52 = vld [vmem:[#allocation5 + $0x1098] sm:$0xff]  ;;  %v14285_v34 = vcombine.low %v666_v44, %v670_v19 }
 0x565   :  { %v16630_v17 = vadd.f32 %v10858_v61, %v10818_v46  ;;  %11112 = vmatpush1.bf16.msra.mxu0 %v14309_v60  ;;  %v662_v36 = vld [vmem:[#allocation5 + $0x10b8] sm:$0xff]  ;;  %v14413_v0 = vcombine.low %v794_v24, %v798_v21 }
 0x566   :  { %v10860_v12 = vpop.f32.mrf.mxu1  ;;  %v10820_v23 = vpop.f32.mrf.mxu0  ;;  %11113 = vmatprep.subr.bf16.mxu0 %v14302_v3  ;;  %v786_v43 = vld [vmem:[#allocation5 + $0x1498] sm:$0xff]  ;;  %v14278_v57 = vcombine.high %v658_v52, %v662_v36  ;;  %v14277_v60 = vcombine.low %v658_v52, %v662_v36 }
 0x567   :  { %11153 = vmatpush1.bf16.msra.mxu1 %v14437_v1  ;;  %v790_v29 = vld [vmem:[#allocation5 + $0x14b8] sm:$0xff] }
 0x568   :  { %v10861_v30 = vpop.f32.mrf.mxu1  ;;  %11154 = vmatprep.subr.bf16.mxu1 %v14430_v39  ;;  %v14406_v25 = vcombine.high %v786_v43, %v790_v29  ;;  %v650_v10 = vld [vmem:[#allocation5 + $0x1058] sm:$0xff]  ;;  %v14405_v37 = vcombine.low %v786_v43, %v790_v29 }
 0x569   :  { %11114 = vmatpush1.bf16.msra.mxu0 %v14301_v20  ;;  %v654_v27 = vld [vmem:[#allocation5 + $0x1078] sm:$0xff] }
 0x56a   :  { %11115 = vmatprep.subr.bf16.mxu0 %v14294_v15  ;;  %v778_v48 = vld [vmem:[#allocation5 + $0x1458] sm:$0xff]  ;;  %v14270_v1 = vcombine.high %v650_v10, %v654_v27  ;;  %v14269_v16 = vcombine.low %v650_v10, %v654_v27 }
 0x56b   :  { %11155 = vmatpush1.bf16.msra.mxu1 %v14429_v59  ;;  %v782_v33 = vld [vmem:[#allocation5 + $0x1478] sm:$0xff] }
 0x56c   :  { %11156 = vmatprep.subr.bf16.mxu1 %v14422_v14  ;;  %v14398_v3 = vcombine.high %v778_v48, %v782_v33  ;;  %v642_v46 = vld [vmem:[#allocation5 + $0x1018] sm:$0xff]  ;;  %v14397_v18 = vcombine.low %v778_v48, %v782_v33 }
 0x56d   :  { %11116 = vmatpush1.bf16.msra.mxu0 %v14293_v63  ;;  %v646_v61 = vld [vmem:[#allocation5 + $0x1038] sm:$0xff] }
 0x56e   :  { %11117 = vmatprep.subr.bf16.mxu0 %v14286_v6  ;;  %v770_v39 = vld [vmem:[#allocation5 + $0x1418] sm:$0xff]  ;;  %v14262_v40 = vcombine.high %v642_v46, %v646_v61  ;;  %v14261_v15 = vcombine.low %v642_v46, %v646_v61 }
 0x56f   :  { %11157 = vmatpush1.bf16.msra.mxu1 %v14421_v22  ;;  %v774_v58 = vld [vmem:[#allocation5 + $0x1438] sm:$0xff] }
 0x570   :  { %11158 = vmatprep.subr.bf16.mxu1 %v14414_v28  ;;  %v14390_v2 = vcombine.high %v770_v39, %v774_v58  ;;  %v762_v12 = vld [vmem:[#allocation5 + $0x13d8] sm:$0xff]  ;;  %v14389_v30 = vcombine.low %v770_v39, %v774_v58 }
 0x571   :  { %11118 = vmatpush1.bf16.msra.mxu0 %v14285_v34  ;;  %v766_v20 = vld [vmem:[#allocation5 + $0x13f8] sm:$0xff] }
 0x572   :  { %11119 = vmatprep.subr.bf16.mxu0 %v14278_v57  ;;  %v890_v23 = vld [vmem:[#allocation5 + $0x17d8] sm:$0xff]  ;;  %v14382_v14 = vcombine.high %v762_v12, %v766_v20  ;;  %v14381_v22 = vcombine.low %v762_v12, %v766_v20 }
 0x573   :  { %11159 = vmatpush1.bf16.msra.mxu1 %v14413_v0  ;;  %v894_v59 = vld [vmem:[#allocation5 + $0x17f8] sm:$0xff] }
 0x574   :  { %11160 = vmatprep.subr.bf16.mxu1 %v14406_v25  ;;  %v14510_v44 = vcombine.high %v890_v23, %v894_v59  ;;  %v754_v19 = vld [vmem:[#allocation5 + $0x1398] sm:$0xff]  ;;  %v14509_v6 = vcombine.low %v890_v23, %v894_v59 }
 0x575   :  { %11120 = vmatpush1.bf16.msra.mxu0 %v14277_v60  ;;  %v758_v24 = vld [vmem:[#allocation5 + $0x13b8] sm:$0xff] }
 0x576   :  { %11121 = vmatprep.subr.bf16.mxu0 %v14270_v1  ;;  %v882_v21 = vld [vmem:[#allocation5 + $0x1798] sm:$0xff]  ;;  %v14374_v28 = vcombine.high %v754_v19, %v758_v24  ;;  %v14373_v0 = vcombine.low %v754_v19, %v758_v24 }
 0x577   :  { %11161 = vmatpush1.bf16.msra.mxu1 %v14405_v37  ;;  %v886_v63 = vld [vmem:[#allocation5 + $0x17b8] sm:$0xff] }
 0x578   :  { %11162 = vmatprep.subr.bf16.mxu1 %v14398_v3  ;;  %v14502_v52 = vcombine.high %v882_v21, %v886_v63  ;;  %v746_v36 = vld [vmem:[#allocation5 + $0x1358] sm:$0xff]  ;;  %v14501_v57 = vcombine.low %v882_v21, %v886_v63 }
 0x579   :  { %11122 = vmatpush1.bf16.msra.mxu0 %v14269_v16  ;;  %v750_v43 = vld [vmem:[#allocation5 + $0x1378] sm:$0xff] }
 0x57a   :  { %11123 = vmatprep.subr.bf16.mxu0 %v14262_v40  ;;  %v874_v29 = vld [vmem:[#allocation5 + $0x1758] sm:$0xff]  ;;  %v14366_v25 = vcombine.high %v746_v36, %v750_v43  ;;  %v14365_v37 = vcombine.low %v746_v36, %v750_v43 }
 0x57b   :  { %11163 = vmatpush1.bf16.msra.mxu1 %v14397_v18  ;;  %v878_v34 = vld [vmem:[#allocation5 + $0x1778] sm:$0xff] }
 0x57c   :  { %11164 = vmatprep.subr.bf16.mxu1 %v14390_v2  ;;  %v14494_v10 = vcombine.high %v874_v29, %v878_v34  ;;  %v738_v27 = vld [vmem:[#allocation5 + $0x1318] sm:$0xff]  ;;  %v14493_v1 = vcombine.low %v874_v29, %v878_v34 }
 0x57d   :  { %11124 = vmatpush1.bf16.msra.mxu0 %v14261_v15  ;;  %v742_v48 = vld [vmem:[#allocation5 + $0x1338] sm:$0xff] }
 0x57e   :  { %11125 = vmatprep.subr.bf16.mxu0 %v14382_v14  ;;  %v866_v33 = vld [vmem:[#allocation5 + $0x1718] sm:$0xff]  ;;  %v14358_v3 = vcombine.high %v738_v27, %v742_v48  ;;  %v14357_v18 = vcombine.low %v738_v27, %v742_v48 }
 0x57f   :  { %11165 = vmatpush1.bf16.msra.mxu1 %v14389_v30  ;;  %v870_v60 = vld [vmem:[#allocation5 + $0x1738] sm:$0xff] }
 0x580   :  { %11166 = vmatprep.subr.bf16.mxu1 %v14510_v44  ;;  %v14486_v46 = vcombine.high %v866_v33, %v870_v60  ;;  %v730_v61 = vld [vmem:[#allocation5 + $0x12d8] sm:$0xff]  ;;  %v14485_v40 = vcombine.low %v866_v33, %v870_v60 }
 0x581   :  { %11126 = vmatpush2.bf16.msra.mxu0 %v14381_v22  ;;  %v734_v39 = vld [vmem:[#allocation5 + $0x12f8] sm:$0xff] }
 0x582   :  { %11127 = vmatprep.subr.bf16.mxu0 %v14374_v28  ;;  %v858_v58 = vld [vmem:[#allocation5 + $0x16d8] sm:$0xff]  ;;  %v14350_v2 = vcombine.high %v730_v61, %v734_v39  ;;  %v14349_v30 = vcombine.low %v730_v61, %v734_v39 }
 0x583   :  { %11167 = vmatpush2.bf16.msra.mxu1 %v14509_v6  ;;  %v862_v16 = vld [vmem:[#allocation5 + $0x16f8] sm:$0xff] }
 0x584   :  { %11168 = vmatprep.subr.bf16.mxu1 %v14502_v52  ;;  %v14478_v12 = vcombine.high %v858_v58, %v862_v16  ;;  %v722_v20 = vld [vmem:[#allocation5 + $0x1298] sm:$0xff]  ;;  %v14477_v14 = vcombine.low %v858_v58, %v862_v16 }
 0x585   :  { %11128 = vmatpush2.bf16.msra.mxu0 %v14373_v0  ;;  %v726_v23 = vld [vmem:[#allocation5 + $0x12b8] sm:$0xff] }
 0x586   :  { %11129 = vmatprep.subr.bf16.mxu0 %v14366_v25  ;;  %v850_v59 = vld [vmem:[#allocation5 + $0x1698] sm:$0xff]  ;;  %v14342_v44 = vcombine.high %v722_v20, %v726_v23  ;;  %v14341_v6 = vcombine.low %v722_v20, %v726_v23 }
 0x587   :  { %11169 = vmatpush2.bf16.msra.mxu1 %v14501_v57  ;;  %v854_v15 = vld [vmem:[#allocation5 + $0x16b8] sm:$0xff] }
 0x588   :  { %11170 = vmatprep.subr.bf16.mxu1 %v14494_v10  ;;  %v14470_v19 = vcombine.high %v850_v59, %v854_v15  ;;  %v714_v24 = vld [vmem:[#allocation5 + $0x1258] sm:$0xff]  ;;  %v14469_v28 = vcombine.low %v850_v59, %v854_v15 }
 0x589   :  { %11130 = vmatpush2.bf16.msra.mxu0 %v14365_v37  ;;  %v718_v21 = vld [vmem:[#allocation5 + $0x1278] sm:$0xff] }
 0x58a   :  { %11131 = vmatprep.subr.bf16.mxu0 %v14358_v3  ;;  %v842_v63 = vld [vmem:[#allocation5 + $0x1658] sm:$0xff]  ;;  %v14334_v52 = vcombine.high %v714_v24, %v718_v21  ;;  %v14333_v57 = vcombine.low %v714_v24, %v718_v21 }
 0x58b   :  { %11171 = vmatpush2.bf16.msra.mxu1 %v14493_v1  ;;  %v846_v22 = vld [vmem:[#allocation5 + $0x1678] sm:$0xff] }
 0x58c   :  { %11172 = vmatprep.subr.bf16.mxu1 %v14486_v46  ;;  %v14462_v36 = vcombine.high %v842_v63, %v846_v22  ;;  %v706_v43 = vld [vmem:[#allocation5 + $0x1218] sm:$0xff]  ;;  %v14461_v25 = vcombine.low %v842_v63, %v846_v22 }
 0x58d   :  { %11132 = vmatpush2.bf16.msra.mxu0 %v14357_v18  ;;  %v710_v29 = vld [vmem:[#allocation5 + $0x1238] sm:$0xff] }
 0x58e   :  { %11133 = vmatprep.subr.bf16.mxu0 %v14350_v2  ;;  %v834_v34 = vld [vmem:[#allocation5 + $0x1618] sm:$0xff]  ;;  %v14326_v10 = vcombine.high %v706_v43, %v710_v29  ;;  %v14325_v1 = vcombine.low %v706_v43, %v710_v29 }
 0x58f   :  { %11173 = vmatpush2.bf16.msra.mxu1 %v14485_v40  ;;  %v838_v0 = vld [vmem:[#allocation5 + $0x1638] sm:$0xff] }
 0x590   :  { %11174 = vmatprep.subr.bf16.mxu1 %v14478_v12  ;;  %v14454_v27 = vcombine.high %v834_v34, %v838_v0  ;;  %v954_v48 = vld [vmem:[#allocation5 + $0x19d8] sm:$0xff]  ;;  %v14453_v3 = vcombine.low %v834_v34, %v838_v0 }
 0x591   :  { %11134 = vmatpush2.bf16.msra.mxu0 %v14349_v30  ;;  %v958_v33 = vld [vmem:[#allocation5 + $0x19f8] sm:$0xff] }
 0x592   :  { %11135 = vmatprep.subr.bf16.mxu0 %v14342_v44  ;;  %v1082_v60 = vld [vmem:[#allocation5 + $0x1dd8] sm:$0xff]  ;;  %v14574_v46 = vcombine.high %v954_v48, %v958_v33  ;;  %v14573_v40 = vcombine.low %v954_v48, %v958_v33 }
 0x593   :  { %11175 = vmatpush2.bf16.msra.mxu1 %v14477_v14  ;;  %v1086_v37 = vld [vmem:[#allocation5 + $0x1df8] sm:$0xff] }
 0x594   :  { %11176 = vmatprep.subr.bf16.mxu1 %v14470_v19  ;;  %v14702_v61 = vcombine.high %v1082_v60, %v1086_v37  ;;  %v946_v39 = vld [vmem:[#allocation5 + $0x1998] sm:$0xff]  ;;  %v14701_v2 = vcombine.low %v1082_v60, %v1086_v37 }
 0x595   :  { %11136 = vmatpush2.bf16.msra.mxu0 %v14341_v6  ;;  %v950_v58 = vld [vmem:[#allocation5 + $0x19b8] sm:$0xff] }
 0x596   :  { %11137 = vmatprep.subr.bf16.mxu0 %v14334_v52  ;;  %v1074_v16 = vld [vmem:[#allocation5 + $0x1d98] sm:$0xff]  ;;  %v14566_v12 = vcombine.high %v946_v39, %v950_v58  ;;  %v14565_v24 = vcombine.low %v946_v39, %v950_v58 }
 0x597   :  { %11177 = vmatpush2.bf16.msra.mxu1 %v14469_v28  ;;  %v1078_v18 = vld [vmem:[#allocation5 + $0x1db8] sm:$0xff] }
 0x598   :  { %11178 = vmatprep.subr.bf16.mxu1 %v14462_v36  ;;  %v14694_v20 = vcombine.high %v1074_v16, %v1078_v18  ;;  %v938_v23 = vld [vmem:[#allocation5 + $0x1958] sm:$0xff]  ;;  %v14693_v63 = vcombine.low %v1074_v16, %v1078_v18 }
 0x599   :  { %11138 = vmatpush2.bf16.msra.mxu0 %v14333_v57  ;;  %v942_v59 = vld [vmem:[#allocation5 + $0x1978] sm:$0xff] }
 0x59a   :  { %11139 = vmatprep.subr.bf16.mxu0 %v14326_v10  ;;  %v1066_v30 = vld [vmem:[#allocation5 + $0x1d58] sm:$0xff]  ;;  %v14558_v22 = vcombine.high %v938_v23, %v942_v59  ;;  %v14557_v57 = vcombine.low %v938_v23, %v942_v59 }
 0x59b   :  { %11179 = vmatpush2.bf16.msra.mxu1 %v14461_v25  ;;  %v1070_v14 = vld [vmem:[#allocation5 + $0x1d78] sm:$0xff] }
 0x59c   :  { %11180 = vmatprep.subr.bf16.mxu1 %v14454_v27  ;;  %v930_v36 = vld [vmem:[#allocation5 + $0x1918] sm:$0xff] }
 0x59d   :  { %11140 = vmatpush2.bf16.msra.mxu0 %v14325_v1  ;;  %v934_v43 = vld [vmem:[#allocation5 + $0x1938] sm:$0xff] }
 0x59e   :  { %11191 = vmatprep.subr.bf16.mxu0 %v14574_v46  ;;  %v1062_v29 = vld [vmem:[#allocation5 + $0x1d38] sm:$0xff]  ;;  %v14550_v10 = vcombine.high %v930_v36, %v934_v43  ;;  %v14549_v1 = vcombine.low %v930_v36, %v934_v43 }
 0x59f   :  { %11181 = vmatpush2.bf16.msra.mxu1 %v14453_v3  ;;  %v922_v33 = vld [vmem:[#allocation5 + $0x18d8] sm:$0xff] }
 0x5a0   :  { %11232 = vmatprep.subr.bf16.mxu1 %v14702_v61  ;;  %v10897_v15 = vpop.f32.mrf.mxu0  ;;  %11142 = vmatmul.mubr.bf16.vlgmr.msra.gmra.mxu0 %v16384_v7  ;;  %v14686_v7 = vcombine.high %v1066_v30, %v1070_v14  ;;  %v1050_v60 = vld [vmem:[#allocation5 + $0x1cd8] sm:$0xff] }
 0x5a1   :  { %v10898_v44 = vadd.f32 %v10897_v15, %v16625_v56  ;;  %11192 = vmatpush1.bf16.msra.mxu0 %v14573_v40  ;;  %11223 = vmatprep.mubr.bf16.mxu0 %v16394_v38  ;;  %v926_v38 = vld [vmem:[#allocation5 + $0x18f8] sm:$0xff] }
 0x5a2   :  { %v10938_v19 = vpop.f32.mrf.mxu1  ;;  %11183 = vmatmul.mubr.bf16.vlgmr.msra.gmra.mxu1 %v16388_v8  ;;  %v10899_v21 = vpop.f32.mrf.mxu0  ;;  %11193 = vmatprep.subr.bf16.mxu0 %v14566_v12  ;;  %v1058_v8 = vld [vmem:[#allocation5 + $0x1d18] sm:$0xff]  ;;  %v14542_v3 = vcombine.high %v922_v33, %v926_v38  ;;  %v14541_v18 = vcombine.low %v922_v33, %v926_v38 }
 0x5a3   :  { %11233 = vmatpush1.bf16.msra.mxu1 %v14701_v2  ;;  %v16635_v6 = vadd.f32 %v10938_v19, %v10898_v44  ;;  %v10900_v28 = vadd.f32 %v10899_v21, %v16630_v17  ;;  %11264 = vmatprep.mubr.bf16.mxu1 %v16399_v42  ;;  %v14685_v17 = vcombine.low %v1066_v30, %v1070_v14  ;;  %v1054_v37 = vld [vmem:[#allocation5 + $0x1cf8] sm:$0xff] }
 0x5a4   :  { %v10940_v52 = vpop.f32.mrf.mxu1  ;;  %11234 = vmatprep.subr.bf16.mxu1 %v14694_v20  ;;  %v10901_v56 = vpop.f32.mrf.mxu0  ;;  %v14678_v48 = vcombine.high %v1058_v8, %v1062_v29  ;;  %v14677_v42 = vcombine.low %v1058_v8, %v1062_v29  ;;  %v14670_v46 = vcombine.high %v1050_v60, %v1054_v37  ;;  %v914_v61 = vld [vmem:[#allocation5 + $0x1898] sm:$0xff]  ;;  %v14669_v40 = vcombine.low %v1050_v60, %v1054_v37 }
 0x5a5   :  { %v16640_v34 = vadd.f32 %v10940_v52, %v10900_v28  ;;  %11194 = vmatpush1.bf16.msra.mxu0 %v14565_v24  ;;  %v918_v39 = vld [vmem:[#allocation5 + $0x18b8] sm:$0xff] }
 0x5a6   :  { %v10942_v0 = vpop.f32.mrf.mxu1  ;;  %v10902_v25 = vpop.f32.mrf.mxu0  ;;  %11195 = vmatprep.subr.bf16.mxu0 %v14558_v22  ;;  %v1042_v58 = vld [vmem:[#allocation5 + $0x1c98] sm:$0xff]  ;;  %v14534_v2 = vcombine.high %v914_v61, %v918_v39  ;;  %v14533_v30 = vcombine.low %v914_v61, %v918_v39 }
 0x5a7   :  { %11235 = vmatpush1.bf16.msra.mxu1 %v14693_v63  ;;  %v1046_v16 = vld [vmem:[#allocation5 + $0x1cb8] sm:$0xff] }
 0x5a8   :  { %v10943_v27 = vpop.f32.mrf.mxu1  ;;  %11236 = vmatprep.subr.bf16.mxu1 %v14686_v7  ;;  %v14662_v12 = vcombine.high %v1042_v58, %v1046_v16  ;;  %v906_v20 = vld [vmem:[#allocation5 + $0x1858] sm:$0xff]  ;;  %v14661_v14 = vcombine.low %v1042_v58, %v1046_v16 }
 0x5a9   :  { %11196 = vmatpush1.bf16.msra.mxu0 %v14557_v57  ;;  %v910_v23 = vld [vmem:[#allocation5 + $0x1878] sm:$0xff] }
 0x5aa   :  { %11197 = vmatprep.subr.bf16.mxu0 %v14550_v10  ;;  %v1034_v59 = vld [vmem:[#allocation5 + $0x1c58] sm:$0xff]  ;;  %v14526_v44 = vcombine.high %v906_v20, %v910_v23  ;;  %v14525_v28 = vcombine.low %v906_v20, %v910_v23 }
 0x5ab   :  { %11237 = vmatpush1.bf16.msra.mxu1 %v14685_v17  ;;  %v1038_v15 = vld [vmem:[#allocation5 + $0x1c78] sm:$0xff] }
 0x5ac   :  { %11238 = vmatprep.subr.bf16.mxu1 %v14678_v48  ;;  %v14654_v19 = vcombine.high %v1034_v59, %v1038_v15  ;;  %v898_v24 = vld [vmem:[#allocation5 + $0x1818] sm:$0xff]  ;;  %v14653_v52 = vcombine.low %v1034_v59, %v1038_v15 }
 0x5ad   :  { %11198 = vmatpush1.bf16.msra.mxu0 %v14549_v1  ;;  %v902_v21 = vld [vmem:[#allocation5 + $0x1838] sm:$0xff] }
 0x5ae   :  { %11199 = vmatprep.subr.bf16.mxu0 %v14542_v3  ;;  %v1026_v63 = vld [vmem:[#allocation5 + $0x1c18] sm:$0xff]  ;;  %v14518_v7 = vcombine.high %v898_v24, %v902_v21  ;;  %v14517_v0 = vcombine.low %v898_v24, %v902_v21 }
 0x5af   :  { %11239 = vmatpush1.bf16.msra.mxu1 %v14677_v42  ;;  %v1030_v22 = vld [vmem:[#allocation5 + $0x1c38] sm:$0xff] }
 0x5b0   :  { %11240 = vmatprep.subr.bf16.mxu1 %v14670_v46  ;;  %v14646_v36 = vcombine.high %v1026_v63, %v1030_v22  ;;  %v1018_v43 = vld [vmem:[#allocation5 + $0x1bd8] sm:$0xff]  ;;  %v14645_v57 = vcombine.low %v1026_v63, %v1030_v22 }
 0x5b1   :  { %11200 = vmatpush1.bf16.msra.mxu0 %v14541_v18  ;;  %v1022_v56 = vld [vmem:[#allocation5 + $0x1bf8] sm:$0xff] }
 0x5b2   :  { %11201 = vmatprep.subr.bf16.mxu0 %v14534_v2  ;;  %v1146_v8 = vld [vmem:[#allocation5 + $0x1fd8] sm:$0xff]  ;;  %v14638_v25 = vcombine.high %v1018_v43, %v1022_v56  ;;  %v14637_v38 = vcombine.low %v1018_v43, %v1022_v56 }
 0x5b3   :  { %11241 = vmatpush1.bf16.msra.mxu1 %v14669_v40  ;;  %v1150_v29 = vld [vmem:[#allocation5 + $0x1ff8] sm:$0xff] }
 0x5b4   :  { %11242 = vmatprep.subr.bf16.mxu1 %v14662_v12  ;;  %v14766_v17 = vcombine.high %v1146_v8, %v1150_v29  ;;  %v1010_v10 = vld [vmem:[#allocation5 + $0x1b98] sm:$0xff]  ;;  %v14765_v60 = vcombine.low %v1146_v8, %v1150_v29 }
 0x5b5   :  { %11202 = vmatpush1.bf16.msra.mxu0 %v14533_v30  ;;  %v1014_v27 = vld [vmem:[#allocation5 + $0x1bb8] sm:$0xff] }
 0x5b6   :  { %11203 = vmatprep.subr.bf16.mxu0 %v14526_v44  ;;  %v1138_v48 = vld [vmem:[#allocation5 + $0x1f98] sm:$0xff]  ;;  %v14630_v37 = vcombine.high %v1010_v10, %v1014_v27  ;;  %v14629_v39 = vcombine.low %v1010_v10, %v1014_v27 }
 0x5b7   :  { %11243 = vmatpush1.bf16.msra.mxu1 %v14661_v14  ;;  %v1142_v33 = vld [vmem:[#allocation5 + $0x1fb8] sm:$0xff] }
 0x5b8   :  { %11244 = vmatprep.subr.bf16.mxu1 %v14654_v19  ;;  %v14758_v1 = vcombine.high %v1138_v48, %v1142_v33  ;;  %v1002_v42 = vld [vmem:[#allocation5 + $0x1b58] sm:$0xff]  ;;  %v14757_v58 = vcombine.low %v1138_v48, %v1142_v33 }
 0x5b9   :  { %11204 = vmatpush1.bf16.msra.mxu0 %v14525_v28  ;;  %v1006_v3 = vld [vmem:[#allocation5 + $0x1b78] sm:$0xff] }
 0x5ba   :  { %11205 = vmatprep.subr.bf16.mxu0 %v14518_v7  ;;  %v1130_v46 = vld [vmem:[#allocation5 + $0x1f58] sm:$0xff]  ;;  %v14622_v16 = vcombine.high %v1002_v42, %v1006_v3  ;;  %v14621_v23 = vcombine.low %v1002_v42, %v1006_v3 }
 0x5bb   :  { %11245 = vmatpush1.bf16.msra.mxu1 %v14653_v52  ;;  %v1134_v61 = vld [vmem:[#allocation5 + $0x1f78] sm:$0xff] }
 0x5bc   :  { %11246 = vmatprep.subr.bf16.mxu1 %v14646_v36  ;;  %v14750_v18 = vcombine.high %v1130_v46, %v1134_v61  ;;  %v994_v40 = vld [vmem:[#allocation5 + $0x1b18] sm:$0xff]  ;;  %v14749_v59 = vcombine.low %v1130_v46, %v1134_v61 }
 0x5bd   :  { %11206 = vmatpush1.bf16.msra.mxu0 %v14517_v0  ;;  %v998_v2 = vld [vmem:[#allocation5 + $0x1b38] sm:$0xff] }
 0x5be   :  { %11207 = vmatprep.subr.bf16.mxu0 %v14638_v25  ;;  %v1122_v12 = vld [vmem:[#allocation5 + $0x1f18] sm:$0xff]  ;;  %v14614_v15 = vcombine.high %v994_v40, %v998_v2  ;;  %v14613_v21 = vcombine.low %v994_v40, %v998_v2 }
 0x5bf   :  { %11247 = vmatpush1.bf16.msra.mxu1 %v14645_v57  ;;  %v1126_v20 = vld [vmem:[#allocation5 + $0x1f38] sm:$0xff] }
 0x5c0   :  { %11248 = vmatprep.subr.bf16.mxu1 %v14766_v17  ;;  %v14742_v30 = vcombine.high %v1122_v12, %v1126_v20  ;;  %v986_v14 = vld [vmem:[#allocation5 + $0x1ad8] sm:$0xff]  ;;  %v14741_v63 = vcombine.low %v1122_v12, %v1126_v20  ;;  %v1691_v12 = vsub.s32 6, %v16404_v32 }
 0x5c1   :  { %11208 = vmatpush2.bf16.msra.mxu0 %v14637_v38  ;;  %v990_v44 = vld [vmem:[#allocation5 + $0x1af8] sm:$0xff] }
 0x5c2   :  { %11209 = vmatprep.subr.bf16.mxu0 %v14630_v37  ;;  %v1114_v19 = vld [vmem:[#allocation5 + $0x1ed8] sm:$0xff]  ;;  %v14606_v22 = vcombine.high %v986_v14, %v990_v44  ;;  %v14605_v56 = vcombine.low %v986_v14, %v990_v44 }
 0x5c3   :  { %11249 = vmatpush2.bf16.msra.mxu1 %v14765_v60  ;;  %v1118_v24 = vld [vmem:[#allocation5 + $0x1ef8] sm:$0xff] }
 0x5c4   :  { %11250 = vmatprep.subr.bf16.mxu1 %v14758_v1  ;;  %v14734_v28 = vcombine.high %v1114_v19, %v1118_v24  ;;  %v978_v52 = vld [vmem:[#allocation5 + $0x1a98] sm:$0xff]  ;;  %v14733_v8 = vcombine.low %v1114_v19, %v1118_v24  ;;  %v16072_v24 = vld [vmem:[#allocation7] sm:$0xff] }
 0x5c5   :  { %11210 = vmatpush2.bf16.msra.mxu0 %v14629_v39  ;;  %v982_v7 = vld [vmem:[#allocation5 + $0x1ab8] sm:$0xff] }
 0x5c6   :  { %11211 = vmatprep.subr.bf16.mxu0 %v14622_v16  ;;  %v1106_v36 = vld [vmem:[#allocation5 + $0x1e98] sm:$0xff]  ;;  %v14598_v29 = vcombine.high %v978_v52, %v982_v7  ;;  %v14597_v27 = vcombine.low %v978_v52, %v982_v7 }
 0x5c7   :  { %11251 = vmatpush2.bf16.msra.mxu1 %v14757_v58  ;;  %v1110_v43 = vld [vmem:[#allocation5 + $0x1eb8] sm:$0xff] }
 0x5c8   :  { %11252 = vmatprep.subr.bf16.mxu1 %v14750_v18  ;;  %v14726_v0 = vcombine.high %v1106_v36, %v1110_v43  ;;  %v970_v57 = vld [vmem:[#allocation5 + $0x1a58] sm:$0xff]  ;;  %v14725_v48 = vcombine.low %v1106_v36, %v1110_v43 }
 0x5c9   :  { %11212 = vmatpush2.bf16.msra.mxu0 %v14621_v23  ;;  %v974_v25 = vld [vmem:[#allocation5 + $0x1a78] sm:$0xff] }
 0x5ca   :  { %11213 = vmatprep.subr.bf16.mxu0 %v14614_v15  ;;  %v1098_v17 = vld [vmem:[#allocation5 + $0x1e58] sm:$0xff]  ;;  %v14590_v33 = vcombine.high %v970_v57, %v974_v25  ;;  %v14589_v3 = vcombine.low %v970_v57, %v974_v25  ;;  %v1695_v15 = vsub.s32 7, %v16404_v32 }
 0x5cb   :  { %11253 = vmatpush2.bf16.msra.mxu1 %v14749_v59  ;;  %v1102_v10 = vld [vmem:[#allocation5 + $0x1e78] sm:$0xff] }
 0x5cc   :  { %11254 = vmatprep.subr.bf16.mxu1 %v14742_v30  ;;  %v14718_v38 = vcombine.high %v1098_v17, %v1102_v10  ;;  %v962_v60 = vld [vmem:[#allocation5 + $0x1a18] sm:$0xff]  ;;  %v14717_v46 = vcombine.low %v1098_v17, %v1102_v10  ;;  %v1696_v52 = vrot.slane %v16072_v24, %v1695_v15 }
 0x5cd   :  { %11214 = vmatpush2.bf16.msra.mxu0 %v14613_v21  ;;  %v966_v37 = vld [vmem:[#allocation5 + $0x1a38] sm:$0xff]  ;;  %v1692_v21 = vrot.slane %v16072_v24, %v1691_v12 }
 0x5ce   :  { %11215 = vmatprep.subr.bf16.mxu0 %v14606_v22  ;;  %v1090_v1 = vld [vmem:[#allocation5 + $0x1e18] sm:$0xff]  ;;  %v14582_v61 = vcombine.high %v962_v60, %v966_v37  ;;  %v14581_v2 = vcombine.low %v962_v60, %v966_v37 }
 0x5cf   :  { %11255 = vmatpush2.bf16.msra.mxu1 %v14741_v63  ;;  %v1094_v42 = vld [vmem:[#allocation5 + $0x1e38] sm:$0xff] }
 0x5d0   :  { %11256 = vmatprep.subr.bf16.mxu1 %v14734_v28  ;;  %v14710_v39 = vcombine.high %v1090_v1, %v1094_v42  ;;  %v1210_v58 = vld [vmem:[#allocation5 + $0x21d8] sm:$0xff]  ;;  %v14709_v20 = vcombine.low %v1090_v1, %v1094_v42 }
 0x5d1   :  { %11216 = vmatpush2.bf16.msra.mxu0 %v14605_v56  ;;  %v1214_v16 = vld [vmem:[#allocation5 + $0x21f8] sm:$0xff] }
 0x5d2   :  { %11217 = vmatprep.subr.bf16.mxu0 %v14598_v29  ;;  %v1338_v18 = vld [vmem:[#allocation5 + $0x25d8] sm:$0xff]  ;;  %v14830_v23 = vcombine.high %v1210_v58, %v1214_v16  ;;  %v14829_v63 = vcombine.low %v1210_v58, %v1214_v16 }
 0x5d3   :  { %11257 = vmatpush2.bf16.msra.mxu1 %v14733_v8  ;;  %v1342_v40 = vld [vmem:[#allocation5 + $0x25f8] sm:$0xff] }
 0x5d4   :  { %11258 = vmatprep.subr.bf16.mxu1 %v14726_v0  ;;  %v14958_v59 = vcombine.high %v1338_v18, %v1342_v40  ;;  %v1202_v30 = vld [vmem:[#allocation5 + $0x2198] sm:$0xff]  ;;  %v14957_v22 = vcombine.low %v1338_v18, %v1342_v40 }
 0x5d5   :  { %11218 = vmatpush2.bf16.msra.mxu0 %v14597_v27  ;;  %v1206_v14 = vld [vmem:[#allocation5 + $0x21b8] sm:$0xff] }
 0x5d6   :  { %11219 = vmatprep.subr.bf16.mxu0 %v14590_v33  ;;  %v1330_v44 = vld [vmem:[#allocation5 + $0x2598] sm:$0xff]  ;;  %v14822_v28 = vcombine.high %v1202_v30, %v1206_v14  ;;  %v14821_v25 = vcombine.low %v1202_v30, %v1206_v14 }
 0x5d7   :  { %11259 = vmatpush2.bf16.msra.mxu1 %v14725_v48  ;;  %v1334_v19 = vld [vmem:[#allocation5 + $0x25b8] sm:$0xff] }
 0x5d8   :  { %11260 = vmatprep.subr.bf16.mxu1 %v14718_v38  ;;  %v14950_v7 = vcombine.high %v1330_v44, %v1334_v19  ;;  %v1194_v36 = vld [vmem:[#allocation5 + $0x2158] sm:$0xff]  ;;  %v14949_v10 = vcombine.low %v1330_v44, %v1334_v19 }
 0x5d9   :  { %11220 = vmatpush2.bf16.msra.mxu0 %v14589_v3  ;;  %v1198_v43 = vld [vmem:[#allocation5 + $0x2178] sm:$0xff] }
 0x5da   :  { %11221 = vmatprep.subr.bf16.mxu0 %v14582_v61  ;;  %v1322_v8 = vld [vmem:[#allocation5 + $0x2558] sm:$0xff]  ;;  %v14814_v27 = vcombine.high %v1194_v36, %v1198_v43  ;;  %v14813_v61 = vcombine.low %v1194_v36, %v1198_v43 }
 0x5db   :  { %11261 = vmatpush2.bf16.msra.mxu1 %v14717_v46  ;;  %v1326_v29 = vld [vmem:[#allocation5 + $0x2578] sm:$0xff] }
 0x5dc   :  { %11262 = vmatprep.subr.bf16.mxu1 %v14710_v39  ;;  %v14942_v60 = vcombine.high %v1322_v8, %v1326_v29  ;;  %v1190_v37 = vld [vmem:[#allocation5 + $0x2138] sm:$0xff]  ;;  %v14941_v58 = vcombine.low %v1322_v8, %v1326_v29 }
 0x5dd   :  { %11222 = vmatpush2.bf16.msra.mxu0 %v14581_v2  ;;  %v1314_v42 = vld [vmem:[#allocation5 + $0x2518] sm:$0xff] }
 0x5de   :  { %11273 = vmatprep.subr.bf16.mxu0 %v14830_v23  ;;  %v1178_v2 = vld [vmem:[#allocation5 + $0x20d8] sm:$0xff] }
 0x5df   :  { %11263 = vmatpush2.bf16.msra.mxu1 %v14709_v20  ;;  %v1306_v12 = vld [vmem:[#allocation5 + $0x24d8] sm:$0xff] }
 0x5e0   :  { %11314 = vmatprep.subr.bf16.mxu1 %v14958_v59  ;;  %v10979_v56 = vpop.f32.mrf.mxu0  ;;  %11224 = vmatmul.mubr.bf16.vlgmr.msra.gmra.mxu0 %v16410_v55  ;;  %v1186_v55 = vld [vmem:[#allocation5 + $0x2118] sm:$0xff] }
 0x5e1   :  { %v10980_v0 = vadd.f32 %v10979_v56, %v1692_v21  ;;  %11274 = vmatpush1.bf16.msra.mxu0 %v14829_v63  ;;  %11305 = vmatprep.mubr.bf16.mxu0 %v16426_v9  ;;  %v14806_v16 = vcombine.high %v1186_v55, %v1190_v37  ;;  %v1182_v9 = vld [vmem:[#allocation5 + $0x20f8] sm:$0xff]  ;;  %v14805_v23 = vcombine.low %v1186_v55, %v1190_v37 }
 0x5e2   :  { %v11020_v57 = vpop.f32.mrf.mxu1  ;;  %11265 = vmatmul.mubr.bf16.vlgmr.msra.gmra.mxu1 %v16418_v62  ;;  %v10981_v17 = vpop.f32.mrf.mxu0  ;;  %11275 = vmatprep.subr.bf16.mxu0 %v14822_v28  ;;  %v1318_v62 = vld [vmem:[#allocation5 + $0x2538] sm:$0xff]  ;;  %v14798_v59 = vcombine.high %v1178_v2, %v1182_v9  ;;  %v14797_v24 = vcombine.low %v1178_v2, %v1182_v9 }
 0x5e3   :  { %11315 = vmatpush1.bf16.msra.mxu1 %v14957_v22  ;;  %v16646_v48 = vadd.f32 %v11020_v57, %v10980_v0  ;;  %v10982_v33 = vadd.f32 %v10981_v17, %v1696_v52  ;;  %11346 = vmatprep.mubr.bf16.mxu1 %v16431_v13  ;;  %v14934_v40 = vcombine.high %v1314_v42, %v1318_v62  ;;  %v1310_v20 = vld [vmem:[#allocation5 + $0x24f8] sm:$0xff] }
 0x5e4   :  { %v11022_v38 = vpop.f32.mrf.mxu1  ;;  %11316 = vmatprep.subr.bf16.mxu1 %v14950_v7  ;;  %v10983_v1 = vpop.f32.mrf.mxu0  ;;  %v14933_v13 = vcombine.low %v1314_v42, %v1318_v62  ;;  %v14926_v15 = vcombine.high %v1306_v12, %v1310_v20  ;;  %v1170_v30 = vld [vmem:[#allocation5 + $0x2098] sm:$0xff]  ;;  %v14925_v21 = vcombine.low %v1306_v12, %v1310_v20 }
 0x5e5   :  { %v16650_v3 = vadd.f32 %v11022_v38, %v10982_v33  ;;  %11276 = vmatpush1.bf16.msra.mxu0 %v14821_v25  ;;  %v1174_v14 = vld [vmem:[#allocation5 + $0x20b8] sm:$0xff] }
 0x5e6   :  { %v11024_v46 = vpop.f32.mrf.mxu1  ;;  %v10984_v39 = vpop.f32.mrf.mxu0  ;;  %11277 = vmatprep.subr.bf16.mxu0 %v14814_v27  ;;  %v1298_v44 = vld [vmem:[#allocation5 + $0x2498] sm:$0xff]  ;;  %v14790_v63 = vcombine.high %v1170_v30, %v1174_v14  ;;  %v14789_v43 = vcombine.low %v1170_v30, %v1174_v14 }
 0x5e7   :  { %11317 = vmatpush1.bf16.msra.mxu1 %v14949_v10  ;;  %v1302_v19 = vld [vmem:[#allocation5 + $0x24b8] sm:$0xff] }
 0x5e8   :  { %v11025_v18 = vpop.f32.mrf.mxu1  ;;  %11318 = vmatprep.subr.bf16.mxu1 %v14942_v60  ;;  %v14918_v22 = vcombine.high %v1298_v44, %v1302_v19  ;;  %v1162_v28 = vld [vmem:[#allocation5 + $0x2058] sm:$0xff]  ;;  %v14917_v56 = vcombine.low %v1298_v44, %v1302_v19 }
 0x5e9   :  { %11278 = vmatpush1.bf16.msra.mxu0 %v14813_v61  ;;  %v1166_v52 = vld [vmem:[#allocation5 + $0x2078] sm:$0xff] }
 0x5ea   :  { %11279 = vmatprep.subr.bf16.mxu0 %v14806_v16  ;;  %v1290_v7 = vld [vmem:[#allocation5 + $0x2458] sm:$0xff]  ;;  %v14782_v8 = vcombine.high %v1162_v28, %v1166_v52  ;;  %v14781_v10 = vcombine.low %v1162_v28, %v1166_v52 }
 0x5eb   :  { %11319 = vmatpush1.bf16.msra.mxu1 %v14941_v58  ;;  %v1294_v36 = vld [vmem:[#allocation5 + $0x2478] sm:$0xff] }
 0x5ec   :  { %11320 = vmatprep.subr.bf16.mxu1 %v14934_v40  ;;  %v14910_v29 = vcombine.high %v1290_v7, %v1294_v36  ;;  %v1154_v0 = vld [vmem:[#allocation5 + $0x2018] sm:$0xff]  ;;  %v14909_v27 = vcombine.low %v1290_v7, %v1294_v36 }
 0x5ed   :  { %11280 = vmatpush1.bf16.msra.mxu0 %v14805_v23  ;;  %v1158_v57 = vld [vmem:[#allocation5 + $0x2038] sm:$0xff] }
 0x5ee   :  { %11281 = vmatprep.subr.bf16.mxu0 %v14798_v59  ;;  %v1282_v25 = vld [vmem:[#allocation5 + $0x2418] sm:$0xff]  ;;  %v14774_v33 = vcombine.high %v1154_v0, %v1158_v57  ;;  %v14773_v42 = vcombine.low %v1154_v0, %v1158_v57 }
 0x5ef   :  { %11321 = vmatpush1.bf16.msra.mxu1 %v14933_v13  ;;  %v1286_v17 = vld [vmem:[#allocation5 + $0x2438] sm:$0xff] }
 0x5f0   :  { %11322 = vmatprep.subr.bf16.mxu1 %v14926_v15  ;;  %v14902_v38 = vcombine.high %v1282_v25, %v1286_v17  ;;  %v1274_v60 = vld [vmem:[#allocation5 + $0x23d8] sm:$0xff]  ;;  %v14901_v62 = vcombine.low %v1282_v25, %v1286_v17 }
 0x5f1   :  { %11282 = vmatpush1.bf16.msra.mxu0 %v14797_v24  ;;  %v1278_v55 = vld [vmem:[#allocation5 + $0x23f8] sm:$0xff] }
 0x5f2   :  { %11283 = vmatprep.subr.bf16.mxu0 %v14790_v63  ;;  %v1402_v37 = vld [vmem:[#allocation5 + $0x27d8] sm:$0xff]  ;;  %v14894_v46 = vcombine.high %v1274_v60, %v1278_v55  ;;  %v14893_v40 = vcombine.low %v1274_v60, %v1278_v55 }
 0x5f3   :  { %11323 = vmatpush1.bf16.msra.mxu1 %v14925_v21  ;;  %v1406_v1 = vld [vmem:[#allocation5 + $0x27f8] sm:$0xff] }
 0x5f4   :  { %11324 = vmatprep.subr.bf16.mxu1 %v14918_v22  ;;  %v15022_v61 = vcombine.high %v1402_v37, %v1406_v1  ;;  %v1266_v39 = vld [vmem:[#allocation5 + $0x2398] sm:$0xff]  ;;  %v15021_v2 = vcombine.low %v1402_v37, %v1406_v1 }
 0x5f5   :  { %11284 = vmatpush1.bf16.msra.mxu0 %v14789_v43  ;;  %v1270_v58 = vld [vmem:[#allocation5 + $0x23b8] sm:$0xff] }
 0x5f6   :  { %11285 = vmatprep.subr.bf16.mxu0 %v14782_v8  ;;  %v1394_v16 = vld [vmem:[#allocation5 + $0x2798] sm:$0xff]  ;;  %v14886_v9 = vcombine.high %v1266_v39, %v1270_v58  ;;  %v14885_v15 = vcombine.low %v1266_v39, %v1270_v58 }
 0x5f7   :  { %11325 = vmatpush1.bf16.msra.mxu1 %v14917_v56  ;;  %v1398_v18 = vld [vmem:[#allocation5 + $0x27b8] sm:$0xff] }
 0x5f8   :  { %11326 = vmatprep.subr.bf16.mxu1 %v14910_v29  ;;  %v15014_v12 = vcombine.high %v1394_v16, %v1398_v18  ;;  %v1258_v20 = vld [vmem:[#allocation5 + $0x2358] sm:$0xff]  ;;  %v15013_v30 = vcombine.low %v1394_v16, %v1398_v18 }
 0x5f9   :  { %11286 = vmatpush1.bf16.msra.mxu0 %v14781_v10  ;;  %v1262_v23 = vld [vmem:[#allocation5 + $0x2378] sm:$0xff] }
 0x5fa   :  { %11287 = vmatprep.subr.bf16.mxu0 %v14774_v33  ;;  %v1386_v13 = vld [vmem:[#allocation5 + $0x2758] sm:$0xff]  ;;  %v14878_v14 = vcombine.high %v1258_v20, %v1262_v23  ;;  %v14877_v22 = vcombine.low %v1258_v20, %v1262_v23 }
 0x5fb   :  { %11327 = vmatpush1.bf16.msra.mxu1 %v14909_v27  ;;  %v1390_v59 = vld [vmem:[#allocation5 + $0x2778] sm:$0xff] }
 0x5fc   :  { %11328 = vmatprep.subr.bf16.mxu1 %v14902_v38  ;;  %v15006_v44 = vcombine.high %v1386_v13, %v1390_v59  ;;  %v1250_v19 = vld [vmem:[#allocation5 + $0x2318] sm:$0xff]  ;;  %v15005_v28 = vcombine.low %v1386_v13, %v1390_v59 }
 0x5fd   :  { %11288 = vmatpush1.bf16.msra.mxu0 %v14773_v42  ;;  %v1254_v24 = vld [vmem:[#allocation5 + $0x2338] sm:$0xff] }
 0x5fe   :  { %11289 = vmatprep.subr.bf16.mxu0 %v14894_v46  ;;  %v1378_v21 = vld [vmem:[#allocation5 + $0x2718] sm:$0xff]  ;;  %v14870_v52 = vcombine.high %v1250_v19, %v1254_v24  ;;  %v14869_v29 = vcombine.low %v1250_v19, %v1254_v24 }
 0x5ff   :  { %11329 = vmatpush1.bf16.msra.mxu1 %v14901_v62  ;;  %v1382_v63 = vld [vmem:[#allocation5 + $0x2738] sm:$0xff] }
 0x600   :  { %11330 = vmatprep.subr.bf16.mxu1 %v15022_v61  ;;  %v14998_v7 = vcombine.high %v1378_v21, %v1382_v63  ;;  %v1242_v36 = vld [vmem:[#allocation5 + $0x22d8] sm:$0xff]  ;;  %v14997_v0 = vcombine.low %v1378_v21, %v1382_v63 }
 0x601   :  { %11290 = vmatpush2.bf16.msra.mxu0 %v14893_v40  ;;  %v1246_v43 = vld [vmem:[#allocation5 + $0x22f8] sm:$0xff] }
 0x602   :  { %11291 = vmatprep.subr.bf16.mxu0 %v14886_v9  ;;  %v1370_v56 = vld [vmem:[#allocation5 + $0x26d8] sm:$0xff]  ;;  %v14862_v57 = vcombine.high %v1242_v36, %v1246_v43  ;;  %v14861_v38 = vcombine.low %v1242_v36, %v1246_v43 }
 0x603   :  { %11331 = vmatpush2.bf16.msra.mxu1 %v15021_v2  ;;  %v1374_v8 = vld [vmem:[#allocation5 + $0x26f8] sm:$0xff] }
 0x604   :  { %11332 = vmatprep.subr.bf16.mxu1 %v15014_v12  ;;  %v14990_v25 = vcombine.high %v1370_v56, %v1374_v8  ;;  %v1234_v17 = vld [vmem:[#allocation5 + $0x2298] sm:$0xff]  ;;  %v14989_v60 = vcombine.low %v1370_v56, %v1374_v8 }
 0x605   :  { %11292 = vmatpush2.bf16.msra.mxu0 %v14885_v15  ;;  %v1238_v10 = vld [vmem:[#allocation5 + $0x22b8] sm:$0xff] }
 0x606   :  { %11293 = vmatprep.subr.bf16.mxu0 %v14878_v14  ;;  %v1362_v27 = vld [vmem:[#allocation5 + $0x2698] sm:$0xff]  ;;  %v14854_v55 = vcombine.high %v1234_v17, %v1238_v10  ;;  %v14853_v61 = vcombine.low %v1234_v17, %v1238_v10 }
 0x607   :  { %11333 = vmatpush2.bf16.msra.mxu1 %v15013_v30  ;;  %v1366_v33 = vld [vmem:[#allocation5 + $0x26b8] sm:$0xff] }
 0x608   :  { %11334 = vmatprep.subr.bf16.mxu1 %v15006_v44  ;;  %v14982_v37 = vcombine.high %v1362_v27, %v1366_v33  ;;  %v1226_v1 = vld [vmem:[#allocation5 + $0x2258] sm:$0xff]  ;;  %v14981_v39 = vcombine.low %v1362_v27, %v1366_v33 }
 0x609   :  { %11294 = vmatpush2.bf16.msra.mxu0 %v14877_v22  ;;  %v1230_v42 = vld [vmem:[#allocation5 + $0x2278] sm:$0xff] }
 0x60a   :  { %11295 = vmatprep.subr.bf16.mxu0 %v14870_v52  ;;  %v1354_v62 = vld [vmem:[#allocation5 + $0x2658] sm:$0xff]  ;;  %v14846_v58 = vcombine.high %v1226_v1, %v1230_v42  ;;  %v14845_v12 = vcombine.low %v1226_v1, %v1230_v42 }
 0x60b   :  { %11335 = vmatpush2.bf16.msra.mxu1 %v15005_v28  ;;  %v1358_v46 = vld [vmem:[#allocation5 + $0x2678] sm:$0xff] }
 0x60c   :  { %11336 = vmatprep.subr.bf16.mxu1 %v14998_v7  ;;  %v14974_v16 = vcombine.high %v1354_v62, %v1358_v46  ;;  %v1218_v18 = vld [vmem:[#allocation5 + $0x2218] sm:$0xff]  ;;  %v14973_v20 = vcombine.low %v1354_v62, %v1358_v46 }
 0x60d   :  { %11296 = vmatpush2.bf16.msra.mxu0 %v14869_v29  ;;  %v1222_v40 = vld [vmem:[#allocation5 + $0x2238] sm:$0xff] }
 0x60e   :  { %11297 = vmatprep.subr.bf16.mxu0 %v14862_v57  ;;  %v1346_v2 = vld [vmem:[#allocation5 + $0x2618] sm:$0xff]  ;;  %v14838_v23 = vcombine.high %v1218_v18, %v1222_v40  ;;  %v14837_v44 = vcombine.low %v1218_v18, %v1222_v40 }
 0x60f   :  { %11337 = vmatpush2.bf16.msra.mxu1 %v14997_v0  ;;  %v1350_v9 = vld [vmem:[#allocation5 + $0x2638] sm:$0xff] }
 0x610   :  { %11338 = vmatprep.subr.bf16.mxu1 %v14990_v25  ;;  %v14966_v13 = vcombine.high %v1346_v2, %v1350_v9  ;;  %v1466_v59 = vld [vmem:[#allocation5 + $0x29d8] sm:$0xff]  ;;  %v14965_v19 = vcombine.low %v1346_v2, %v1350_v9 }
 0x611   :  { %11298 = vmatpush2.bf16.msra.mxu0 %v14861_v38  ;;  %v1470_v15 = vld [vmem:[#allocation5 + $0x29f8] sm:$0xff] }
 0x612   :  { %11299 = vmatprep.subr.bf16.mxu0 %v14854_v55  ;;  %v1594_v30 = vld [vmem:[#allocation5 + $0x2dd8] sm:$0xff]  ;;  %v15086_v24 = vcombine.high %v1466_v59, %v1470_v15  ;;  %v15085_v7 = vcombine.low %v1466_v59, %v1470_v15 }
 0x613   :  { %11339 = vmatpush2.bf16.msra.mxu1 %v14989_v60  ;;  %v1598_v14 = vld [vmem:[#allocation5 + $0x2df8] sm:$0xff] }
 0x614   :  { %11340 = vmatprep.subr.bf16.mxu1 %v14982_v37  ;;  %v15214_v21 = vcombine.high %v1594_v30, %v1598_v14  ;;  %v1458_v63 = vld [vmem:[#allocation5 + $0x2998] sm:$0xff]  ;;  %v15213_v36 = vcombine.low %v1594_v30, %v1598_v14 }
 0x615   :  { %11300 = vmatpush2.bf16.msra.mxu0 %v14853_v61  ;;  %v1462_v22 = vld [vmem:[#allocation5 + $0x29b8] sm:$0xff] }
 0x616   :  { %11301 = vmatprep.subr.bf16.mxu0 %v14846_v58  ;;  %v1586_v28 = vld [vmem:[#allocation5 + $0x2d98] sm:$0xff]  ;;  %v15078_v43 = vcombine.high %v1458_v63, %v1462_v22  ;;  %v15077_v27 = vcombine.low %v1458_v63, %v1462_v22 }
 0x617   :  { %11341 = vmatpush2.bf16.msra.mxu1 %v14981_v39  ;;  %v1590_v52 = vld [vmem:[#allocation5 + $0x2db8] sm:$0xff] }
 0x618   :  { %11342 = vmatprep.subr.bf16.mxu1 %v14974_v16  ;;  %v15206_v56 = vcombine.high %v1586_v28, %v1590_v52  ;;  %v1450_v8 = vld [vmem:[#allocation5 + $0x2958] sm:$0xff]  ;;  %v15205_v38 = vcombine.low %v1586_v28, %v1590_v52 }
 0x619   :  { %11302 = vmatpush2.bf16.msra.mxu0 %v14845_v12  ;;  %v1454_v29 = vld [vmem:[#allocation5 + $0x2978] sm:$0xff] }
 0x61a   :  { %11303 = vmatprep.subr.bf16.mxu0 %v14838_v23  ;;  %v1578_v57 = vld [vmem:[#allocation5 + $0x2d58] sm:$0xff]  ;;  %v15070_v60 = vcombine.high %v1450_v8, %v1454_v29  ;;  %v15069_v58 = vcombine.low %v1450_v8, %v1454_v29 }
 0x61b   :  { %11343 = vmatpush2.bf16.msra.mxu1 %v14973_v20  ;;  %v1582_v25 = vld [vmem:[#allocation5 + $0x2d78] sm:$0xff] }
 0x61c   :  { %11344 = vmatprep.subr.bf16.mxu1 %v14966_v13  ;;  %v1442_v42 = vld [vmem:[#allocation5 + $0x2918] sm:$0xff] }
 0x61d   :  { %11304 = vmatpush2.bf16.msra.mxu0 %v14837_v44  ;;  %v1446_v62 = vld [vmem:[#allocation5 + $0x2938] sm:$0xff] }
 0x61e   :  { %11355 = vmatprep.subr.bf16.mxu0 %v15086_v24  ;;  %v1574_v46 = vld [vmem:[#allocation5 + $0x2d38] sm:$0xff]  ;;  %v15062_v18 = vcombine.high %v1442_v42, %v1446_v62  ;;  %v15061_v23 = vcombine.low %v1442_v42, %v1446_v62 }
 0x61f   :  { %11345 = vmatpush2.bf16.msra.mxu1 %v14965_v19  ;;  %v1434_v9 = vld [vmem:[#allocation5 + $0x28d8] sm:$0xff] }
 0x620   :  { %11396 = vmatprep.subr.bf16.mxu1 %v15214_v21  ;;  %v11061_v0 = vpop.f32.mrf.mxu0  ;;  %11306 = vmatmul.mubr.bf16.vlgmr.msra.gmra.mxu0 %v16442_v54  ;;  %v15198_v54 = vcombine.high %v1578_v57, %v1582_v25  ;;  %v1562_v12 = vld [vmem:[#allocation5 + $0x2cd8] sm:$0xff] }
 0x621   :  { %v11062_v17 = vadd.f32 %v11061_v0, %v16646_v48  ;;  %11356 = vmatpush1.bf16.msra.mxu0 %v15085_v7  ;;  %11387 = vmatprep.mubr.bf16.mxu0 %v16454_v47  ;;  %v1438_v47 = vld [vmem:[#allocation5 + $0x28f8] sm:$0xff] }
 0x622   :  { %v11102_v10 = vpop.f32.mrf.mxu1  ;;  %11347 = vmatmul.mubr.bf16.vlgmr.msra.gmra.mxu1 %v16448_v35  ;;  %v11063_v33 = vpop.f32.mrf.mxu0  ;;  %11357 = vmatprep.subr.bf16.mxu0 %v15078_v43  ;;  %v1570_v35 = vld [vmem:[#allocation5 + $0x2d18] sm:$0xff]  ;;  %v15054_v13 = vcombine.high %v1434_v9, %v1438_v47  ;;  %v15053_v19 = vcombine.low %v1434_v9, %v1438_v47 }
 0x623   :  { %11397 = vmatpush1.bf16.msra.mxu1 %v15213_v36  ;;  %v16655_v55 = vadd.f32 %v11102_v10, %v11062_v17  ;;  %v11064_v37 = vadd.f32 %v11063_v33, %v16650_v3  ;;  %11428 = vmatprep.mubr.bf16.mxu1 %v16459_v51  ;;  %v15197_v3 = vcombine.low %v1578_v57, %v1582_v25  ;;  %v1566_v20 = vld [vmem:[#allocation5 + $0x2cf8] sm:$0xff] }
 0x624   :  { %v11104_v1 = vpop.f32.mrf.mxu1  ;;  %11398 = vmatprep.subr.bf16.mxu1 %v15206_v56  ;;  %v11065_v48 = vpop.f32.mrf.mxu0  ;;  %v15190_v2 = vcombine.high %v1570_v35, %v1574_v46  ;;  %v15189_v51 = vcombine.low %v1570_v35, %v1574_v46  ;;  %v15182_v59 = vcombine.high %v1562_v12, %v1566_v20  ;;  %v1426_v15 = vld [vmem:[#allocation5 + $0x2898] sm:$0xff]  ;;  %v15181_v24 = vcombine.low %v1562_v12, %v1566_v20 }
 0x625   :  { %v16660_v61 = vadd.f32 %v11104_v1, %v11064_v37  ;;  %11358 = vmatpush1.bf16.msra.mxu0 %v15077_v27  ;;  %v1430_v30 = vld [vmem:[#allocation5 + $0x28b8] sm:$0xff] }
 0x626   :  { %v11106_v39 = vpop.f32.mrf.mxu1  ;;  %v11066_v16 = vpop.f32.mrf.mxu0  ;;  %11359 = vmatprep.subr.bf16.mxu0 %v15070_v60  ;;  %v1554_v14 = vld [vmem:[#allocation5 + $0x2c98] sm:$0xff]  ;;  %v15046_v21 = vcombine.high %v1426_v15, %v1430_v30  ;;  %v15045_v36 = vcombine.low %v1426_v15, %v1430_v30 }
 0x627   :  { %11399 = vmatpush1.bf16.msra.mxu1 %v15205_v38  ;;  %v1558_v44 = vld [vmem:[#allocation5 + $0x2cb8] sm:$0xff] }
 0x628   :  { %v11107_v40 = vpop.f32.mrf.mxu1  ;;  %11400 = vmatprep.subr.bf16.mxu1 %v15198_v54  ;;  %v15174_v63 = vcombine.high %v1554_v14, %v1558_v44  ;;  %v1418_v22 = vld [vmem:[#allocation5 + $0x2858] sm:$0xff]  ;;  %v15173_v43 = vcombine.low %v1554_v14, %v1558_v44 }
 0x629   :  { %11360 = vmatpush1.bf16.msra.mxu0 %v15069_v58  ;;  %v1422_v28 = vld [vmem:[#allocation5 + $0x2878] sm:$0xff] }
 0x62a   :  { %11361 = vmatprep.subr.bf16.mxu0 %v15062_v18  ;;  %v1546_v52 = vld [vmem:[#allocation5 + $0x2c58] sm:$0xff]  ;;  %v15038_v56 = vcombine.high %v1418_v22, %v1422_v28  ;;  %v15037_v17 = vcombine.low %v1418_v22, %v1422_v28 }
 0x62b   :  { %11401 = vmatpush1.bf16.msra.mxu1 %v15197_v3  ;;  %v1550_v7 = vld [vmem:[#allocation5 + $0x2c78] sm:$0xff] }
 0x62c   :  { %11402 = vmatprep.subr.bf16.mxu1 %v15190_v2  ;;  %v15166_v8 = vcombine.high %v1546_v52, %v1550_v7  ;;  %v1410_v29 = vld [vmem:[#allocation5 + $0x2818] sm:$0xff]  ;;  %v15165_v10 = vcombine.low %v1546_v52, %v1550_v7 }
 0x62d   :  { %11362 = vmatpush1.bf16.msra.mxu0 %v15061_v23  ;;  %v1414_v0 = vld [vmem:[#allocation5 + $0x2838] sm:$0xff] }
 0x62e   :  { %11363 = vmatprep.subr.bf16.mxu0 %v15054_v13  ;;  %v1538_v57 = vld [vmem:[#allocation5 + $0x2c18] sm:$0xff]  ;;  %v15030_v27 = vcombine.high %v1410_v29, %v1414_v0  ;;  %v15029_v54 = vcombine.low %v1410_v29, %v1414_v0 }
 0x62f   :  { %11403 = vmatpush1.bf16.msra.mxu1 %v15189_v51  ;;  %v1542_v25 = vld [vmem:[#allocation5 + $0x2c38] sm:$0xff] }
 0x630   :  { %11404 = vmatprep.subr.bf16.mxu1 %v15182_v59  ;;  %v15158_v33 = vcombine.high %v1538_v57, %v1542_v25  ;;  %v1530_v38 = vld [vmem:[#allocation5 + $0x2bd8] sm:$0xff]  ;;  %v15157_v42 = vcombine.low %v1538_v57, %v1542_v25 }
 0x631   :  { %11364 = vmatpush1.bf16.msra.mxu0 %v15053_v19  ;;  %v1534_v60 = vld [vmem:[#allocation5 + $0x2bf8] sm:$0xff] }
 0x632   :  { %11365 = vmatprep.subr.bf16.mxu0 %v15046_v21  ;;  %v1658_v37 = vld [vmem:[#allocation5 + $0x2fd8] sm:$0xff]  ;;  %v15150_v62 = vcombine.high %v1530_v38, %v1534_v60  ;;  %v15149_v16 = vcombine.low %v1530_v38, %v1534_v60 }
 0x633   :  { %11405 = vmatpush1.bf16.msra.mxu1 %v15181_v24  ;;  %v1662_v1 = vld [vmem:[#allocation5 + $0x2ff8] sm:$0xff] }
 0x634   :  { %11406 = vmatprep.subr.bf16.mxu1 %v15174_v63  ;;  %v15278_v48 = vcombine.high %v1658_v37, %v1662_v1  ;;  %v1522_v35 = vld [vmem:[#allocation5 + $0x2b98] sm:$0xff]  ;;  %v15277_v3 = vcombine.low %v1658_v37, %v1662_v1 }
 0x635   :  { %11366 = vmatpush1.bf16.msra.mxu0 %v15045_v36  ;;  %v1526_v46 = vld [vmem:[#allocation5 + $0x2bb8] sm:$0xff] }
 0x636   :  { %11367 = vmatprep.subr.bf16.mxu0 %v15038_v56  ;;  %v1650_v39 = vld [vmem:[#allocation5 + $0x2f98] sm:$0xff]  ;;  %v15142_v18 = vcombine.high %v1522_v35, %v1526_v46  ;;  %v15141_v20 = vcombine.low %v1522_v35, %v1526_v46 }
 0x637   :  { %11407 = vmatpush1.bf16.msra.mxu1 %v15173_v43  ;;  %v1654_v58 = vld [vmem:[#allocation5 + $0x2fb8] sm:$0xff] }
 0x638   :  { %11408 = vmatprep.subr.bf16.mxu1 %v15166_v8  ;;  %v15270_v40 = vcombine.high %v1650_v39, %v1654_v58  ;;  %v1514_v2 = vld [vmem:[#allocation5 + $0x2b58] sm:$0xff]  ;;  %v15269_v23 = vcombine.low %v1650_v39, %v1654_v58 }
 0x639   :  { %11368 = vmatpush1.bf16.msra.mxu0 %v15037_v17  ;;  %v1518_v9 = vld [vmem:[#allocation5 + $0x2b78] sm:$0xff] }
 0x63a   :  { %11369 = vmatprep.subr.bf16.mxu0 %v15030_v27  ;;  %v1642_v47 = vld [vmem:[#allocation5 + $0x2f58] sm:$0xff]  ;;  %v15134_v51 = vcombine.high %v1514_v2, %v1518_v9  ;;  %v15133_v44 = vcombine.low %v1514_v2, %v1518_v9 }
 0x63b   :  { %11409 = vmatpush1.bf16.msra.mxu1 %v15165_v10  ;;  %v1646_v12 = vld [vmem:[#allocation5 + $0x2f78] sm:$0xff] }
 0x63c   :  { %11410 = vmatprep.subr.bf16.mxu1 %v15158_v33  ;;  %v15262_v13 = vcombine.high %v1642_v47, %v1646_v12  ;;  %v1506_v59 = vld [vmem:[#allocation5 + $0x2b18] sm:$0xff]  ;;  %v15261_v19 = vcombine.low %v1642_v47, %v1646_v12  ;;  %v11438_v12 = vmax.f32 %v16516_v4, 0.0 }
 0x63d   :  { %11370 = vmatpush1.bf16.msra.mxu0 %v15029_v54  ;;  %v1510_v15 = vld [vmem:[#allocation5 + $0x2b38] sm:$0xff] }
 0x63e   :  { %11371 = vmatprep.subr.bf16.mxu0 %v15150_v62  ;;  %v1634_v30 = vld [vmem:[#allocation5 + $0x2f18] sm:$0xff]  ;;  %v15126_v24 = vcombine.high %v1506_v59, %v1510_v15  ;;  %v15125_v7 = vcombine.low %v1506_v59, %v1510_v15  ;;  %v16664_v59 = vpack.c.bf16 %v11438_v12, %v11438_v12 }
 0x63f   :  { %11411 = vmatpush1.bf16.msra.mxu1 %v15157_v42  ;;  %v1638_v14 = vld [vmem:[#allocation5 + $0x2f38] sm:$0xff] }
 0x640   :  { %11412 = vmatprep.subr.bf16.mxu1 %v15278_v48  ;;  %v15254_v21 = vcombine.high %v1634_v30, %v1638_v14  ;;  %v1498_v63 = vld [vmem:[#allocation5 + $0x2ad8] sm:$0xff]  ;;  %v15253_v36 = vcombine.low %v1634_v30, %v1638_v14 }
 0x641   :  { %11372 = vmatpush2.bf16.msra.mxu0 %v15149_v16  ;;  %v1502_v22 = vld [vmem:[#allocation5 + $0x2af8] sm:$0xff] }
 0x642   :  { %11373 = vmatprep.subr.bf16.mxu0 %v15142_v18  ;;  %v1626_v28 = vld [vmem:[#allocation5 + $0x2ed8] sm:$0xff]  ;;  %v15118_v43 = vcombine.high %v1498_v63, %v1502_v22  ;;  %v15117_v25 = vcombine.low %v1498_v63, %v1502_v22 }
 0x643   :  { %11413 = vmatpush2.bf16.msra.mxu1 %v15277_v3  ;;  %v1630_v52 = vld [vmem:[#allocation5 + $0x2ef8] sm:$0xff] }
 0x644   :  { %11414 = vmatprep.subr.bf16.mxu1 %v15270_v40  ;;  %v15246_v56 = vcombine.high %v1626_v28, %v1630_v52  ;;  %v1490_v8 = vld [vmem:[#allocation5 + $0x2a98] sm:$0xff]  ;;  %v15245_v17 = vcombine.low %v1626_v28, %v1630_v52 }
 0x645   :  { %11374 = vmatpush2.bf16.msra.mxu0 %v15141_v20  ;;  %v1494_v29 = vld [vmem:[#allocation5 + $0x2ab8] sm:$0xff]  ;;  %v11440_v20 = vmax.f32 %v16580_v53, 0.0 }
 0x646   :  { %11375 = vmatprep.subr.bf16.mxu0 %v15134_v51  ;;  %v1618_v0 = vld [vmem:[#allocation5 + $0x2e98] sm:$0xff]  ;;  %v15110_v10 = vcombine.high %v1490_v8, %v1494_v29  ;;  %v15109_v1 = vcombine.low %v1490_v8, %v1494_v29 }
 0x647   :  { %11415 = vmatpush2.bf16.msra.mxu1 %v15269_v23  ;;  %v1622_v57 = vld [vmem:[#allocation5 + $0x2eb8] sm:$0xff]  ;;  %v16667_v14 = vpack.c.bf16 %v11440_v20, %v11440_v20 }
 0x648   :  { %11416 = vmatprep.subr.bf16.mxu1 %v15262_v13  ;;  %v15238_v27 = vcombine.high %v1618_v0, %v1622_v57  ;;  %v1482_v33 = vld [vmem:[#allocation5 + $0x2a58] sm:$0xff]  ;;  %v15237_v54 = vcombine.low %v1618_v0, %v1622_v57 }
 0x649   :  { %11376 = vmatpush2.bf16.msra.mxu0 %v15133_v44  ;;  %v1486_v38 = vld [vmem:[#allocation5 + $0x2a78] sm:$0xff] }
 0x64a   :  { %11377 = vmatprep.subr.bf16.mxu0 %v15126_v24  ;;  %v1610_v60 = vld [vmem:[#allocation5 + $0x2e58] sm:$0xff]  ;;  %v15102_v42 = vcombine.high %v1482_v33, %v1486_v38  ;;  %v15101_v58 = vcombine.low %v1482_v33, %v1486_v38 }
 0x64b   :  { %11417 = vmatpush2.bf16.msra.mxu1 %v15261_v19  ;;  %v1614_v37 = vld [vmem:[#allocation5 + $0x2e78] sm:$0xff] }
 0x64c   :  { %11418 = vmatprep.subr.bf16.mxu1 %v15254_v21  ;;  %v15230_v62 = vcombine.high %v1610_v60, %v1614_v37  ;;  %v1474_v48 = vld [vmem:[#allocation5 + $0x2a18] sm:$0xff]  ;;  %v15229_v16 = vcombine.low %v1610_v60, %v1614_v37 }
 0x64d   :  { %11378 = vmatpush2.bf16.msra.mxu0 %v15125_v7  ;;  %v1478_v35 = vld [vmem:[#allocation5 + $0x2a38] sm:$0xff] }
 0x64e   :  { %11379 = vmatprep.subr.bf16.mxu0 %v15118_v43  ;;  %v1602_v46 = vld [vmem:[#allocation5 + $0x2e18] sm:$0xff]  ;;  %v15094_v3 = vcombine.high %v1474_v48, %v1478_v35  ;;  %v15093_v40 = vcombine.low %v1474_v48, %v1478_v35 }
 0x64f   :  { %11419 = vmatpush2.bf16.msra.mxu1 %v15253_v36  ;;  %v1606_v39 = vld [vmem:[#allocation5 + $0x2e38] sm:$0xff] }
 0x650   :  { %11420 = vmatprep.subr.bf16.mxu1 %v15246_v56  ;;  %v15222_v18 = vcombine.high %v1602_v46, %v1606_v39  ;;  %v15221_v2 = vcombine.low %v1602_v46, %v1606_v39  ;;  %v15652_v9 = vld [vmem:[#allocation8 + $0xe4] ss:$16 sps:$4 sm:$0xff]   ;;  %v15650_v23 = vld [vmem:[#allocation8 + $0xe0] ss:$16 sps:$4 sm:$0xff]  }
 0x651   :  { %11380 = vmatpush2.bf16.msra.mxu0 %v15117_v25  ;;  %v15655_v47 = vld [vmem:[#allocation8 + $0x2e4] ss:$16 sps:$4 sm:$0xff]   ;;  %v15653_v51 = vld [vmem:[#allocation8 + $0x2e0] ss:$16 sps:$4 sm:$0xff]  }
 0x652   :  { %11381 = vmatprep.subr.bf16.mxu0 %v15110_v10  ;;  %v15658_v13 = vld [vmem:[#allocation8 + $0xc4] ss:$16 sps:$4 sm:$0xff]   ;;  %v15656_v53 = vld [vmem:[#allocation8 + $0xc0] ss:$16 sps:$4 sm:$0xff]  }
 0x653   :  { %11421 = vmatpush2.bf16.msra.mxu1 %v15245_v17  ;;  %v15661_v30 = vld [vmem:[#allocation8 + $0x2c4] ss:$16 sps:$4 sm:$0xff]   ;;  %v15659_v24 = vld [vmem:[#allocation8 + $0x2c0] ss:$16 sps:$4 sm:$0xff]  }
 0x654   :  { %11422 = vmatprep.subr.bf16.mxu1 %v15238_v27  ;;  %v15664_v21 = vld [vmem:[#allocation8 + $0xa4] ss:$16 sps:$4 sm:$0xff]   ;;  %v15662_v7 = vld [vmem:[#allocation8 + $0xa0] ss:$16 sps:$4 sm:$0xff]  }
 0x655   :  { %11382 = vmatpush2.bf16.msra.mxu0 %v15109_v1  ;;  %v15665_v43 = vld [vmem:[#allocation8 + $0x2a0] ss:$16 sps:$4 sm:$0xff]   ;;  %v15670_v56 = vld [vmem:[#allocation8 + $0x84] ss:$16 sps:$4 sm:$0xff]  }
 0x656   :  { %11383 = vmatprep.subr.bf16.mxu0 %v15102_v42  ;;  %v15673_v29 = vld [vmem:[#allocation8 + $0x284] ss:$16 sps:$4 sm:$0xff]   ;;  %v15671_v0 = vld [vmem:[#allocation8 + $0x280] ss:$16 sps:$4 sm:$0xff]  }
 0x657   :  { %11423 = vmatpush2.bf16.msra.mxu1 %v15237_v54  ;;  %v15676_v57 = vld [vmem:[#allocation8 + $0x64] ss:$16 sps:$4 sm:$0xff]   ;;  %v15674_v17 = vld [vmem:[#allocation8 + $0x60] ss:$16 sps:$4 sm:$0xff]  }
 0x658   :  { %11424 = vmatprep.subr.bf16.mxu1 %v15230_v62  ;;  %v15679_v25 = vld [vmem:[#allocation8 + $0x264] ss:$16 sps:$4 sm:$0xff]   ;;  %v15677_v10 = vld [vmem:[#allocation8 + $0x260] ss:$16 sps:$4 sm:$0xff]  }
 0x659   :  { %11384 = vmatpush2.bf16.msra.mxu0 %v15101_v58  ;;  %v15682_v27 = vld [vmem:[#allocation8 + $0x44] ss:$16 sps:$4 sm:$0xff]   ;;  %v15680_v38 = vld [vmem:[#allocation8 + $0x40] ss:$16 sps:$4 sm:$0xff]  }
 0x65a   :  { %11385 = vmatprep.subr.bf16.mxu0 %v15094_v3  ;;  %v15685_v33 = vld [vmem:[#allocation8 + $0x244] ss:$16 sps:$4 sm:$0xff]   ;;  %v15683_v60 = vld [vmem:[#allocation8 + $0x240] ss:$16 sps:$4 sm:$0xff]  }
 0x65b   :  { %11425 = vmatpush2.bf16.msra.mxu1 %v15229_v16  ;;  %v15688_v37 = vld [vmem:[#allocation8 + $0x24] ss:$16 sps:$4 sm:$0xff]   ;;  %v15686_v54 = vld [vmem:[#allocation8 + $0x20] ss:$16 sps:$4 sm:$0xff]  }
 0x65c   :  { %11426 = vmatprep.subr.bf16.mxu1 %v15222_v18  ;;  %v15691_v1 = vld [vmem:[#allocation8 + $0x224] ss:$16 sps:$4 sm:$0xff]   ;;  %v15689_v42 = vld [vmem:[#allocation8 + $0x220] ss:$16 sps:$4 sm:$0xff]  }
 0x65d   :  { %11386 = vmatpush2.bf16.msra.mxu0 %v15093_v40  ;;  %v15694_v62 = vld [vmem:[#allocation8 + $0x4] ss:$16 sps:$4 sm:$0xff]   ;;  %v15692_v35 = vld [vmem:[#allocation8] ss:$16 sps:$4 sm:$0xff]  }
 0x65e   :  { %13011 = vmatprep.subr.bf16.mxu0 %v15652_v9  ;;  %v15697_v48 = vld [vmem:[#allocation8 + $0x204] ss:$16 sps:$4 sm:$0xff]   ;;  %v15695_v46 = vld [vmem:[#allocation8 + $0x200] ss:$16 sps:$4 sm:$0xff]  }
 0x65f   :  { %11427 = vmatpush2.bf16.msra.mxu1 %v15221_v2  ;;  %v15700_v39 = vld [vmem:[#allocation8 + $0x1e4] ss:$16 sps:$4 sm:$0xff]   ;;  %v15698_v16 = vld [vmem:[#allocation8 + $0x1e0] ss:$16 sps:$4 sm:$0xff]  }
 0x660   :  { %13052 = vmatprep.subr.bf16.mxu1 %v15655_v47  ;;  %v11143_v15 = vpop.f32.mrf.mxu0  ;;  %11388 = vmatmul.mubr.bf16.vlgmr.msra.gmra.mxu0 %v16472_v26  ;;  %v15703_v58 = vld [vmem:[#allocation8 + $0x3e4] ss:$16 sps:$4 sm:$0xff]   ;;  %v15701_v3 = vld [vmem:[#allocation8 + $0x3e0] ss:$16 sps:$4 sm:$0xff]  }
 0x661   :  { %v11144_v44 = vadd.f32 %v11143_v15, %v16655_v55  ;;  %13012 = vmatpush1.bf16.msra.mxu0 %v15650_v23  ;;  %13043 = vmatprep.mubr.bf16.mxu0 %v16664_v59  ;;  %v15667_v55 = vld [vmem:[#allocation8 + $0x2a4] ss:$16 sps:$4 sm:$0xff]   ;;  %v15704_v2 = vld [vmem:[#allocation8 + $0x1c0] ss:$16 sps:$4 sm:$0xff]  }
 0x662   :  { %v11184_v4 = vpop.f32.mrf.mxu1  ;;  %11429 = vmatmul.mubr.bf16.vlgmr.msra.gmra.mxu1 %v16476_v31  ;;  %v11145_v19 = vpop.f32.mrf.mxu0  ;;  %13013 = vmatprep.subr.bf16.mxu0 %v15658_v13  ;;  %v15706_v18 = vld [vmem:[#allocation8 + $0x1c4] ss:$16 sps:$4 sm:$0xff]   ;;  %v15707_v9 = vld [vmem:[#allocation8 + $0x3c0] ss:$16 sps:$4 sm:$0xff]  }
 0x663   :  { %13053 = vmatpush1.bf16.msra.mxu1 %v15653_v51  ;;  %v16672_v63 = vadd.f32 %v11184_v4, %v11144_v44  ;;  %13084 = vmatprep.mubr.bf16.mxu1 %v16667_v14  ;;  %v11146_v26 = vadd.f32 %v11145_v19, %v16660_v61  ;;  %v15668_v61 = vld [vmem:[#allocation8 + $0x80] ss:$16 sps:$4 sm:$0xff]   ;;  %v15709_v40 = vld [vmem:[#allocation8 + $0x3c4] ss:$16 sps:$4 sm:$0xff]  }
 0x664   :  { %v11186_v22 = vpop.f32.mrf.mxu1  ;;  %v11147_v28 = vpop.f32.mrf.mxu0  ;;  %13054 = vmatprep.subr.bf16.mxu1 %v15661_v30  ;;  %v15712_v47 = vld [vmem:[#allocation8 + $0x1a4] ss:$16 sps:$4 sm:$0xff]   ;;  %v15710_v20 = vld [vmem:[#allocation8 + $0x1a0] ss:$16 sps:$4 sm:$0xff]  }
 0x665   :  { %v16676_v31 = vadd.f32 %v11186_v22, %v11146_v26  ;;  %13014 = vmatpush1.bf16.msra.mxu0 %v15656_v53  ;;  %v15715_v12 = vld [vmem:[#allocation8 + $0x3a4] ss:$16 sps:$4 sm:$0xff]   ;;  %v15713_v23 = vld [vmem:[#allocation8 + $0x3a0] ss:$16 sps:$4 sm:$0xff]  }
 0x666   :  { %v11188_v52 = vpop.f32.mrf.mxu1  ;;  %v11148_v36 = vpop.f32.mrf.mxu0  ;;  %13015 = vmatprep.subr.bf16.mxu0 %v15664_v21  ;;  %v15718_v51 = vld [vmem:[#allocation8 + $0x184] ss:$16 sps:$4 sm:$0xff]   ;;  %v15716_v15 = vld [vmem:[#allocation8 + $0x180] ss:$16 sps:$4 sm:$0xff]  }
 0x667   :  { %13055 = vmatpush1.bf16.msra.mxu1 %v15659_v24  ;;  %v15721_v13 = vld [vmem:[#allocation8 + $0x384] ss:$16 sps:$4 sm:$0xff]   ;;  %v15719_v30 = vld [vmem:[#allocation8 + $0x380] ss:$16 sps:$4 sm:$0xff]  }
 0x668   :  { %v11189_v8 = vpop.f32.mrf.mxu1  ;;  %13056 = vmatprep.subr.bf16.mxu1 %v15667_v55  ;;  %v15724_v44 = vld [vmem:[#allocation8 + $0x164] ss:$16 sps:$4 sm:$0xff]   ;;  %v15722_v53 = vld [vmem:[#allocation8 + $0x160] ss:$16 sps:$4 sm:$0xff]  }
 0x669   :  { %13016 = vmatpush1.bf16.msra.mxu0 %v15662_v7  ;;  %v15727_v4 = vld [vmem:[#allocation8 + $0x364] ss:$16 sps:$4 sm:$0xff]   ;;  %v15725_v19 = vld [vmem:[#allocation8 + $0x360] ss:$16 sps:$4 sm:$0xff]   ;;  %v11437_v8 = vmax.f32 %v16511_v49, 0.0 }
 0x66a   :  { %13017 = vmatprep.subr.bf16.mxu0 %v15670_v56  ;;  %v15730_v24 = vld [vmem:[#allocation8 + $0x144] ss:$16 sps:$4 sm:$0xff]   ;;  %v15728_v26 = vld [vmem:[#allocation8 + $0x140] ss:$16 sps:$4 sm:$0xff]  }
 0x66b   :  { %13057 = vmatpush1.bf16.msra.mxu1 %v15665_v43  ;;  %v15733_v21 = vld [vmem:[#allocation8 + $0x344] ss:$16 sps:$4 sm:$0xff]   ;;  %v15731_v22 = vld [vmem:[#allocation8 + $0x340] ss:$16 sps:$4 sm:$0xff]  }
 0x66c   :  { %13058 = vmatprep.subr.bf16.mxu1 %v15673_v29  ;;  %v15736_v55 = vld [vmem:[#allocation8 + $0x124] ss:$16 sps:$4 sm:$0xff]   ;;  %v15734_v52 = vld [vmem:[#allocation8 + $0x120] ss:$16 sps:$4 sm:$0xff]  }
 0x66d   :  { %13018 = vmatpush1.bf16.msra.mxu0 %v15668_v61  ;;  %v15739_v28 = vld [vmem:[#allocation8 + $0x324] ss:$16 sps:$4 sm:$0xff]   ;;  %v15737_v7 = vld [vmem:[#allocation8 + $0x320] ss:$16 sps:$4 sm:$0xff]  }
 0x66e   :  { %13019 = vmatprep.subr.bf16.mxu0 %v15676_v57  ;;  %v15742_v36 = vld [vmem:[#allocation8 + $0x104] ss:$16 sps:$4 sm:$0xff]   ;;  %v15740_v56 = vld [vmem:[#allocation8 + $0x100] ss:$16 sps:$4 sm:$0xff]  }
 0x66f   :  { %13059 = vmatpush1.bf16.msra.mxu1 %v15671_v0  ;;  %v15745_v43 = vld [vmem:[#allocation8 + $0x304] ss:$16 sps:$4 sm:$0xff]   ;;  %v15743_v29 = vld [vmem:[#allocation8 + $0x300] ss:$16 sps:$4 sm:$0xff]   ;;  %v11439_v0 = vmax.f32 %v16575_v41, 0.0 }
 0x670   :  { %13060 = vmatprep.subr.bf16.mxu1 %v15679_v25  ;;  %v15748_v61 = vld [vmem:[#allocation8 + $0x4e4] ss:$16 sps:$4 sm:$0xff]   ;;  %v11442_v25 = vmax.f32 %v16640_v34, 0.0  ;;  %v15803_v49 = vld [vmem:[#allocation8 + $0x6e0] ss:$16 sps:$4 sm:$0xff]  }
 0x671   :  { %13020 = vmatpush1.bf16.msra.mxu0 %v15674_v17  ;;  %v15805_v57 = vld [vmem:[#allocation8 + $0x6e4] ss:$16 sps:$4 sm:$0xff]   ;;  %v15746_v17 = vld [vmem:[#allocation8 + $0x4e0] ss:$16 sps:$4 sm:$0xff]  }
 0x672   :  { %13021 = vmatprep.subr.bf16.mxu0 %v15682_v27  ;;  %v15751_v27 = vld [vmem:[#allocation8 + $0x4c4] ss:$16 sps:$4 sm:$0xff]  }
 0x673   :  { %13061 = vmatpush1.bf16.msra.mxu1 %v15677_v10  ;;  %v16681_v10 = vpack.c.bf16 %v11437_v8, %v11437_v8  ;;  %v15811_v41 = vld [vmem:[#allocation8 + $0x6c4] ss:$16 sps:$4 sm:$0xff]  }
 0x674   :  { %13062 = vmatprep.subr.bf16.mxu1 %v15685_v33  ;;  %v16683_v33 = vpack.c.bf16 %v11439_v0, %v11439_v0  ;;  %v15859_v8 = vld [vmem:[#allocation8 + $0x7c4] ss:$16 sps:$4 sm:$0xff]   ;;  %v15857_v0 = vld [vmem:[#allocation8 + $0x7c0] ss:$16 sps:$4 sm:$0xff]  }
 0x675   :  { %13022 = vmatpush1.bf16.msra.mxu0 %v15680_v38  ;;  %v16685_v38 = vpack.c.bf16 %v11442_v25, %v11442_v25  ;;  %v15776_v25 = vld [vmem:[#allocation8 + $0x5a0] ss:$16 sps:$4 sm:$0xff]  }
 0x676   :  { %13023 = vmatprep.subr.bf16.mxu0 %v15688_v37 }
 0x677   :  { %13063 = vmatpush1.bf16.msra.mxu1 %v15683_v60 }
 0x678   :  { %13064 = vmatprep.subr.bf16.mxu1 %v15691_v1  ;;  %v15749_v1 = vld [vmem:[#allocation8 + $0x4c0] ss:$16 sps:$4 sm:$0xff]  }
 0x679   :  { %13024 = vmatpush1.bf16.msra.mxu0 %v15686_v54 }
 0x67a   :  { %13025 = vmatprep.subr.bf16.mxu0 %v15694_v62 }
 0x67b   :  { %13065 = vmatpush1.bf16.msra.mxu1 %v15689_v42  ;;  %v15754_v42 = vld [vmem:[#allocation8 + $0x4a4] ss:$16 sps:$4 sm:$0xff]  }
 0x67c   :  { %13066 = vmatprep.subr.bf16.mxu1 %v15697_v48 }
 0x67d   :  { %13026 = vmatpush1.bf16.msra.mxu0 %v15692_v35 }
 0x67e   :  { %13027 = vmatprep.subr.bf16.mxu0 %v15700_v39 }
 0x67f   :  { %13067 = vmatpush1.bf16.msra.mxu1 %v15695_v46  ;;  %v15809_v46 = vld [vmem:[#allocation8 + $0x6c0] ss:$16 sps:$4 sm:$0xff]  }
 0x680   :  { %13068 = vmatprep.subr.bf16.mxu1 %v15703_v58 }
 0x681   :  { %13028 = vmatpush2.bf16.msra.mxu0 %v15698_v16 }
 0x682   :  { %13029 = vmatprep.subr.bf16.mxu0 %v15706_v18 }
 0x683   :  { %13069 = vmatpush2.bf16.msra.mxu1 %v15701_v3  ;;  %v15752_v3 = vld [vmem:[#allocation8 + $0x4a0] ss:$16 sps:$4 sm:$0xff]  }
 0x684   :  { %13070 = vmatprep.subr.bf16.mxu1 %v15709_v40  ;;  %v15757_v40 = vld [vmem:[#allocation8 + $0x484] ss:$16 sps:$4 sm:$0xff]  }
 0x685   :  { %13030 = vmatpush2.bf16.msra.mxu0 %v15704_v2 }
 0x686   :  { %13031 = vmatprep.subr.bf16.mxu0 %v15712_v47  ;;  %v15823_v47 = vld [vmem:[#allocation8 + $0x684] ss:$16 sps:$4 sm:$0xff]  }
 0x687   :  { %13071 = vmatpush2.bf16.msra.mxu1 %v15707_v9  ;;  %v15815_v9 = vld [vmem:[#allocation8 + $0x6a0] ss:$16 sps:$4 sm:$0xff]  }
 0x688   :  { %13072 = vmatprep.subr.bf16.mxu1 %v15715_v12  ;;  %v15760_v12 = vld [vmem:[#allocation8 + $0x464] ss:$16 sps:$4 sm:$0xff]  }
 0x689   :  { %13032 = vmatpush2.bf16.msra.mxu0 %v15710_v20  ;;  %v15821_v20 = vld [vmem:[#allocation8 + $0x680] ss:$16 sps:$4 sm:$0xff]  }
 0x68a   :  { %13033 = vmatprep.subr.bf16.mxu0 %v15718_v51  ;;  %v15758_v51 = vld [vmem:[#allocation8 + $0x460] ss:$16 sps:$4 sm:$0xff]  }
 0x68b   :  { %13073 = vmatpush2.bf16.msra.mxu1 %v15713_v23  ;;  %v15829_v23 = vld [vmem:[#allocation8 + $0x664] ss:$16 sps:$4 sm:$0xff]  }
 0x68c   :  { %13074 = vmatprep.subr.bf16.mxu1 %v15721_v13  ;;  %v15763_v13 = vld [vmem:[#allocation8 + $0x444] ss:$16 sps:$4 sm:$0xff]  }
 0x68d   :  { %13034 = vmatpush2.bf16.msra.mxu0 %v15716_v15  ;;  %v15827_v15 = vld [vmem:[#allocation8 + $0x660] ss:$16 sps:$4 sm:$0xff]  }
 0x68e   :  { %13035 = vmatprep.subr.bf16.mxu0 %v15724_v44  ;;  %v15761_v44 = vld [vmem:[#allocation8 + $0x440] ss:$16 sps:$4 sm:$0xff]  }
 0x68f   :  { %13075 = vmatpush2.bf16.msra.mxu1 %v15719_v30  ;;  %v15835_v30 = vld [vmem:[#allocation8 + $0x644] ss:$16 sps:$4 sm:$0xff]  }
 0x690   :  { %13076 = vmatprep.subr.bf16.mxu1 %v15727_v4  ;;  %v15766_v4 = vld [vmem:[#allocation8 + $0x424] ss:$16 sps:$4 sm:$0xff]  }
 0x691   :  { %13036 = vmatpush2.bf16.msra.mxu0 %v15722_v53  ;;  %v15833_v53 = vld [vmem:[#allocation8 + $0x640] ss:$16 sps:$4 sm:$0xff]  }
 0x692   :  { %13037 = vmatprep.subr.bf16.mxu0 %v15730_v24  ;;  %v15764_v24 = vld [vmem:[#allocation8 + $0x420] ss:$16 sps:$4 sm:$0xff]  }
 0x693   :  { %13077 = vmatpush2.bf16.msra.mxu1 %v15725_v19  ;;  %v15841_v19 = vld [vmem:[#allocation8 + $0x624] ss:$16 sps:$4 sm:$0xff]  }
 0x694   :  { %13078 = vmatprep.subr.bf16.mxu1 %v15733_v21  ;;  %v15769_v21 = vld [vmem:[#allocation8 + $0x404] ss:$16 sps:$4 sm:$0xff]  }
 0x695   :  { %13038 = vmatpush2.bf16.msra.mxu0 %v15728_v26  ;;  %v15839_v26 = vld [vmem:[#allocation8 + $0x620] ss:$16 sps:$4 sm:$0xff]  }
 0x696   :  { %13039 = vmatprep.subr.bf16.mxu0 %v15736_v55  ;;  %v15767_v55 = vld [vmem:[#allocation8 + $0x400] ss:$16 sps:$4 sm:$0xff]  }
 0x697   :  { %13079 = vmatpush2.bf16.msra.mxu1 %v15731_v22  ;;  %v15847_v22 = vld [vmem:[#allocation8 + $0x604] ss:$16 sps:$4 sm:$0xff]  }
 0x698   :  { %13080 = vmatprep.subr.bf16.mxu1 %v15739_v28  ;;  %v15772_v28 = vld [vmem:[#allocation8 + $0x5e4] ss:$16 sps:$4 sm:$0xff]  }
 0x699   :  { %13040 = vmatpush2.bf16.msra.mxu0 %v15734_v52  ;;  %v15845_v52 = vld [vmem:[#allocation8 + $0x600] ss:$16 sps:$4 sm:$0xff]  }
 0x69a   :  { %13041 = vmatprep.subr.bf16.mxu0 %v15742_v36  ;;  %v15770_v36 = vld [vmem:[#allocation8 + $0x5e0] ss:$16 sps:$4 sm:$0xff]  }
 0x69b   :  { %13081 = vmatpush2.bf16.msra.mxu1 %v15737_v7  ;;  %v15853_v7 = vld [vmem:[#allocation8 + $0x7e4] ss:$16 sps:$4 sm:$0xff]  }
 0x69c   :  { %13082 = vmatprep.subr.bf16.mxu1 %v15745_v43  ;;  %v15775_v43 = vld [vmem:[#allocation8 + $0x5c4] ss:$16 sps:$4 sm:$0xff]  }
 0x69d   :  { %13042 = vmatpush2.bf16.msra.mxu0 %v15740_v56  ;;  %v15851_v56 = vld [vmem:[#allocation8 + $0x7e0] ss:$16 sps:$4 sm:$0xff]  }
 0x69e   :  { %13093 = vmatprep.subr.bf16.mxu0 %v15748_v61  ;;  %v15778_v61 = vld [vmem:[#allocation8 + $0x5a4] ss:$16 sps:$4 sm:$0xff]  }
 0x69f   :  { %13083 = vmatpush2.bf16.msra.mxu1 %v15743_v29  ;;  %v15773_v29 = vld [vmem:[#allocation8 + $0x5c0] ss:$16 sps:$4 sm:$0xff]  }
 0x6a0   :  { %13134 = vmatprep.subr.bf16.mxu1 %v15805_v57  ;;  %v11225_v60 = vpop.f32.mrf.mxu0  ;;  %13044 = vmatmul.mubr.bf16.vlgmr.msra.gmra.mxu0 %v16681_v10  ;;  %v15865_v57 = vld [vmem:[#allocation8 + $0x7a4] ss:$16 sps:$4 sm:$0xff]  }
 0x6a1   :  { %v11226_v37 = vadd.f32 %v11225_v60, %v16672_v63  ;;  %13094 = vmatpush1.bf16.msra.mxu0 %v15746_v17  ;;  %13125 = vmatprep.mubr.bf16.mxu0 %v16685_v38  ;;  %v15817_v63 = vld [vmem:[#allocation8 + $0x6a4] ss:$16 sps:$4 sm:$0xff]   ;;  %v15779_v60 = vld [vmem:[#allocation8 + $0x580] ss:$16 sps:$4 sm:$0xff]  }
 0x6a2   :  { %v11266_v34 = vpop.f32.mrf.mxu1  ;;  %13085 = vmatmul.mubr.bf16.vlgmr.msra.gmra.mxu1 %v16683_v33  ;;  %v11227_v54 = vpop.f32.mrf.mxu0  ;;  %13095 = vmatprep.subr.bf16.mxu0 %v15751_v27  ;;  %v15781_v17 = vld [vmem:[#allocation8 + $0x584] ss:$16 sps:$4 sm:$0xff]   ;;  %v15863_v27 = vld [vmem:[#allocation8 + $0x7a0] ss:$16 sps:$4 sm:$0xff]  }
 0x6a3   :  { %v16691_v62 = vadd.f32 %v11266_v34, %v11226_v37  ;;  %v11228_v48 = vadd.f32 %v11227_v54, %v16676_v31  ;;  %13135 = vmatpush1.bf16.msra.mxu1 %v15803_v49  ;;  %v15755_v31 = vld [vmem:[#allocation8 + $0x480] ss:$16 sps:$4 sm:$0xff]   ;;  %v15871_v49 = vld [vmem:[#allocation8 + $0x784] ss:$16 sps:$4 sm:$0xff]  }
 0x6a4   :  { %v11268_v35 = vpop.f32.mrf.mxu1  ;;  %v11229_v39 = vpop.f32.mrf.mxu0  ;;  %13136 = vmatprep.subr.bf16.mxu1 %v15811_v41  ;;  %v15784_v41 = vld [vmem:[#allocation8 + $0x564] ss:$16 sps:$4 sm:$0xff]   ;;  %v15869_v37 = vld [vmem:[#allocation8 + $0x780] ss:$16 sps:$4 sm:$0xff]  }
 0x6a5   :  { %v16694_v58 = vadd.f32 %v11268_v35, %v11228_v48  ;;  %13096 = vmatpush1.bf16.msra.mxu0 %v15749_v1  ;;  %v15877_v34 = vld [vmem:[#allocation8 + $0x764] ss:$16 sps:$4 sm:$0xff]   ;;  %v15782_v1 = vld [vmem:[#allocation8 + $0x560] ss:$16 sps:$4 sm:$0xff]  }
 0x6a6   :  { %v11270_v16 = vpop.f32.mrf.mxu1  ;;  %v11230_v18 = vpop.f32.mrf.mxu0  ;;  %13097 = vmatprep.subr.bf16.mxu0 %v15754_v42  ;;  %v15787_v54 = vld [vmem:[#allocation8 + $0x544] ss:$16 sps:$4 sm:$0xff]   ;;  %v15875_v42 = vld [vmem:[#allocation8 + $0x760] ss:$16 sps:$4 sm:$0xff]  }
 0x6a7   :  { %13137 = vmatpush1.bf16.msra.mxu1 %v15809_v46  ;;  %v15883_v48 = vld [vmem:[#allocation8 + $0x744] ss:$16 sps:$4 sm:$0xff]   ;;  %v15785_v35 = vld [vmem:[#allocation8 + $0x540] ss:$16 sps:$4 sm:$0xff]  }
 0x6a8   :  { %v11271_v2 = vpop.f32.mrf.mxu1  ;;  %13138 = vmatprep.subr.bf16.mxu1 %v15817_v63  ;;  %v15790_v46 = vld [vmem:[#allocation8 + $0x524] ss:$16 sps:$4 sm:$0xff]   ;;  %v15881_v39 = vld [vmem:[#allocation8 + $0x740] ss:$16 sps:$4 sm:$0xff]  }
 0x6a9   :  { %13098 = vmatpush1.bf16.msra.mxu0 %v15752_v3  ;;  %v15889_v63 = vld [vmem:[#allocation8 + $0x724] ss:$16 sps:$4 sm:$0xff]   ;;  %v15788_v16 = vld [vmem:[#allocation8 + $0x520] ss:$16 sps:$4 sm:$0xff]  }
 0x6aa   :  { %13099 = vmatprep.subr.bf16.mxu0 %v15757_v40  ;;  %v15793_v3 = vld [vmem:[#allocation8 + $0x504] ss:$16 sps:$4 sm:$0xff]   ;;  %v15887_v18 = vld [vmem:[#allocation8 + $0x720] ss:$16 sps:$4 sm:$0xff]  }
 0x6ab   :  { %13139 = vmatpush1.bf16.msra.mxu1 %v15815_v9  ;;  %v15895_v40 = vld [vmem:[#allocation8 + $0x704] ss:$16 sps:$4 sm:$0xff]   ;;  %v15791_v2 = vld [vmem:[#allocation8 + $0x500] ss:$16 sps:$4 sm:$0xff]   ;;  %v11441_v9 = vmax.f32 %v16635_v6, 0.0 }
 0x6ac   :  { %13140 = vmatprep.subr.bf16.mxu1 %v15823_v47  ;;  %v15796_v47 = vld [vmem:[#allocation8 + $0xec] ss:$16 sps:$4 sm:$0xff]  }
 0x6ad   :  { %13100 = vmatpush1.bf16.msra.mxu0 %v15755_v31  ;;  %v15893_v31 = vld [vmem:[#allocation8 + $0x700] ss:$16 sps:$4 sm:$0xff]  }
 0x6ae   :  { %13101 = vmatprep.subr.bf16.mxu0 %v15760_v12  ;;  %v15901_v12 = vld [vmem:[#allocation8 + $0x2ec] ss:$16 sps:$4 sm:$0xff]  }
 0x6af   :  { %13141 = vmatpush1.bf16.msra.mxu1 %v15821_v20  ;;  %v15794_v20 = vld [vmem:[#allocation8 + $0xe8] ss:$16 sps:$4 sm:$0xff]  }
 0x6b0   :  { %13142 = vmatprep.subr.bf16.mxu1 %v15829_v23  ;;  %v16697_v23 = vpack.c.bf16 %v11441_v9, %v11441_v9  ;;  %v15890_v9 = vld [vmem:[#allocation8 + $0x4c8] ss:$16 sps:$4 sm:$0xff]  }
 0x6b1   :  { %13102 = vmatpush1.bf16.msra.mxu0 %v15758_v51  ;;  %v15799_v51 = vld [vmem:[#allocation8 + $0xcc] ss:$16 sps:$4 sm:$0xff]  }
 0x6b2   :  { %13103 = vmatprep.subr.bf16.mxu0 %v15763_v13 }
 0x6b3   :  { %13143 = vmatpush1.bf16.msra.mxu1 %v15827_v15 }
 0x6b4   :  { %13144 = vmatprep.subr.bf16.mxu1 %v15835_v30  ;;  %v15797_v30 = vld [vmem:[#allocation8 + $0xc8] ss:$16 sps:$4 sm:$0xff]  }
 0x6b5   :  { %13104 = vmatpush1.bf16.msra.mxu0 %v15761_v44 }
 0x6b6   :  { %13105 = vmatprep.subr.bf16.mxu0 %v15766_v4  ;;  %v15802_v4 = vld [vmem:[#allocation8 + $0xac] ss:$16 sps:$4 sm:$0xff]  }
 0x6b7   :  { %13145 = vmatpush1.bf16.msra.mxu1 %v15833_v53 }
 0x6b8   :  { %13146 = vmatprep.subr.bf16.mxu1 %v15841_v19 }
 0x6b9   :  { %13106 = vmatpush1.bf16.msra.mxu0 %v15764_v24 }
 0x6ba   :  { %13107 = vmatprep.subr.bf16.mxu0 %v15769_v21 }
 0x6bb   :  { %13147 = vmatpush1.bf16.msra.mxu1 %v15839_v26  ;;  %v15800_v26 = vld [vmem:[#allocation8 + $0xa8] ss:$16 sps:$4 sm:$0xff]  }
 0x6bc   :  { %13148 = vmatprep.subr.bf16.mxu1 %v15847_v22 }
 0x6bd   :  { %13108 = vmatpush1.bf16.msra.mxu0 %v15767_v55 }
 0x6be   :  { %13109 = vmatprep.subr.bf16.mxu0 %v15772_v28  ;;  %v15806_v28 = vld [vmem:[#allocation8 + $0x88] ss:$16 sps:$4 sm:$0xff]  }
 0x6bf   :  { %13149 = vmatpush1.bf16.msra.mxu1 %v15845_v52  ;;  %v15812_v52 = vld [vmem:[#allocation8 + $0x68] ss:$16 sps:$4 sm:$0xff]  }
 0x6c0   :  { %13150 = vmatprep.subr.bf16.mxu1 %v15853_v7  ;;  %v15820_v7 = vld [vmem:[#allocation8 + $0x4c] ss:$16 sps:$4 sm:$0xff]  }
 0x6c1   :  { %13110 = vmatpush2.bf16.msra.mxu0 %v15770_v36  ;;  %v15818_v36 = vld [vmem:[#allocation8 + $0x48] ss:$16 sps:$4 sm:$0xff]  }
 0x6c2   :  { %13111 = vmatprep.subr.bf16.mxu0 %v15775_v43  ;;  %v15826_v43 = vld [vmem:[#allocation8 + $0x2c] ss:$16 sps:$4 sm:$0xff]  }
 0x6c3   :  { %13151 = vmatpush2.bf16.msra.mxu1 %v15851_v56  ;;  %v15824_v56 = vld [vmem:[#allocation8 + $0x28] ss:$16 sps:$4 sm:$0xff]  }
 0x6c4   :  { %13152 = vmatprep.subr.bf16.mxu1 %v15859_v8  ;;  %v15832_v8 = vld [vmem:[#allocation8 + $0xc] ss:$16 sps:$4 sm:$0xff]  }
 0x6c5   :  { %13112 = vmatpush2.bf16.msra.mxu0 %v15773_v29  ;;  %v15830_v29 = vld [vmem:[#allocation8 + $0x8] ss:$16 sps:$4 sm:$0xff]  }
 0x6c6   :  { %13113 = vmatprep.subr.bf16.mxu0 %v15778_v61  ;;  %v15838_v61 = vld [vmem:[#allocation8 + $0x1ec] ss:$16 sps:$4 sm:$0xff]  }
 0x6c7   :  { %13153 = vmatpush2.bf16.msra.mxu1 %v15857_v0  ;;  %v15836_v0 = vld [vmem:[#allocation8 + $0x1e8] ss:$16 sps:$4 sm:$0xff]  }
 0x6c8   :  { %13154 = vmatprep.subr.bf16.mxu1 %v15865_v57  ;;  %v15844_v57 = vld [vmem:[#allocation8 + $0x1cc] ss:$16 sps:$4 sm:$0xff]  }
 0x6c9   :  { %13114 = vmatpush2.bf16.msra.mxu0 %v15776_v25  ;;  %v15842_v25 = vld [vmem:[#allocation8 + $0x1c8] ss:$16 sps:$4 sm:$0xff]  }
 0x6ca   :  { %13115 = vmatprep.subr.bf16.mxu0 %v15781_v17  ;;  %v15850_v17 = vld [vmem:[#allocation8 + $0x1ac] ss:$16 sps:$4 sm:$0xff]  }
 0x6cb   :  { %13155 = vmatpush2.bf16.msra.mxu1 %v15863_v27  ;;  %v15848_v27 = vld [vmem:[#allocation8 + $0x1a8] ss:$16 sps:$4 sm:$0xff]  }
 0x6cc   :  { %13156 = vmatprep.subr.bf16.mxu1 %v15871_v49  ;;  %v15856_v49 = vld [vmem:[#allocation8 + $0x18c] ss:$16 sps:$4 sm:$0xff]  }
 0x6cd   :  { %13116 = vmatpush2.bf16.msra.mxu0 %v15779_v60  ;;  %v15854_v60 = vld [vmem:[#allocation8 + $0x188] ss:$16 sps:$4 sm:$0xff]  }
 0x6ce   :  { %13117 = vmatprep.subr.bf16.mxu0 %v15784_v41  ;;  %v15862_v41 = vld [vmem:[#allocation8 + $0x16c] ss:$16 sps:$4 sm:$0xff]  }
 0x6cf   :  { %13157 = vmatpush2.bf16.msra.mxu1 %v15869_v37  ;;  %v15860_v37 = vld [vmem:[#allocation8 + $0x168] ss:$16 sps:$4 sm:$0xff]  }
 0x6d0   :  { %13158 = vmatprep.subr.bf16.mxu1 %v15877_v34  ;;  %v15868_v34 = vld [vmem:[#allocation8 + $0x14c] ss:$16 sps:$4 sm:$0xff]  }
 0x6d1   :  { %13118 = vmatpush2.bf16.msra.mxu0 %v15782_v1  ;;  %v15866_v1 = vld [vmem:[#allocation8 + $0x148] ss:$16 sps:$4 sm:$0xff]  }
 0x6d2   :  { %13119 = vmatprep.subr.bf16.mxu0 %v15787_v54  ;;  %v15874_v54 = vld [vmem:[#allocation8 + $0x12c] ss:$16 sps:$4 sm:$0xff]  }
 0x6d3   :  { %13159 = vmatpush2.bf16.msra.mxu1 %v15875_v42  ;;  %v15872_v42 = vld [vmem:[#allocation8 + $0x128] ss:$16 sps:$4 sm:$0xff]  }
 0x6d4   :  { %13160 = vmatprep.subr.bf16.mxu1 %v15883_v48  ;;  %v15880_v48 = vld [vmem:[#allocation8 + $0x10c] ss:$16 sps:$4 sm:$0xff]  }
 0x6d5   :  { %13120 = vmatpush2.bf16.msra.mxu0 %v15785_v35  ;;  %v15878_v35 = vld [vmem:[#allocation8 + $0x108] ss:$16 sps:$4 sm:$0xff]  }
 0x6d6   :  { %13121 = vmatprep.subr.bf16.mxu0 %v15790_v46  ;;  %v15886_v46 = vld [vmem:[#allocation8 + $0x4ec] ss:$16 sps:$4 sm:$0xff]  }
 0x6d7   :  { %13161 = vmatpush2.bf16.msra.mxu1 %v15881_v39 }
 0x6d8   :  { %13162 = vmatprep.subr.bf16.mxu1 %v15889_v63  ;;  %v15884_v63 = vld [vmem:[#allocation8 + $0x4e8] ss:$16 sps:$4 sm:$0xff]  }
 0x6d9   :  { %13122 = vmatpush2.bf16.msra.mxu0 %v15788_v16  ;;  %v15892_v16 = vld [vmem:[#allocation8 + $0x4cc] ss:$16 sps:$4 sm:$0xff]  }
 0x6da   :  { %13123 = vmatprep.subr.bf16.mxu0 %v15793_v3 }
 0x6db   :  { %13163 = vmatpush2.bf16.msra.mxu1 %v15887_v18 }
 0x6dc   :  { %13164 = vmatprep.subr.bf16.mxu1 %v15895_v40 }
 0x6dd   :  { %13124 = vmatpush2.bf16.msra.mxu0 %v15791_v2 }
 0x6de   :  { %13175 = vmatprep.subr.bf16.mxu0 %v15796_v47 }
 0x6df   :  { %13165 = vmatpush2.bf16.msra.mxu1 %v15893_v31  ;;  %v15898_v31 = vld [vmem:[#allocation8 + $0x4ac] ss:$16 sps:$4 sm:$0xff]  }
 0x6e0   :  { %v11307_v13 = vpop.f32.mrf.mxu0  ;;  %13126 = vmatmul.mubr.bf16.vlgmr.msra.gmra.mxu0 %v16697_v23  ;;  %13216 = vmatprep.subr.bf16.mxu1 %v15901_v12 }
 0x6e1   :  { %v11308_v15 = vadd.f32 %v11307_v13, %v16691_v62  ;;  %13176 = vmatpush1.bf16.msra.mxu0 %v15794_v20  ;;  %13207 = vmatprep.mubr.bf16.mxu0 %v16664_v59  ;;  %v15808_v62 = vld [vmem:[#allocation8 + $0x8c] ss:$16 sps:$4 sm:$0xff]  }
 0x6e2   :  { %v11348_v6 = vpop.f32.mrf.mxu1  ;;  %v16702_v44 = vpop.f32.mrf.mxu0  ;;  %13177 = vmatprep.subr.bf16.mxu0 %v15799_v51  ;;  %v15814_v59 = vld [vmem:[#allocation8 + $0x6c] ss:$16 sps:$4 sm:$0xff]  }
 0x6e3   :  { %v16704_v53 = vadd.f32 %v11348_v6, %v11308_v15  ;;  %v11310_v39 = vadd.f32 %v16702_v44, %v16694_v58  ;;  %v15904_v44 = vld [vmem:[#allocation8 + $0x48c] ss:$16 sps:$4 sm:$0xff]  }
 0x6e4   :  { %v16706_v19 = vpop.f32.mrf.mxu1  ;;  %v11311_v24 = vpop.f32.mrf.mxu0 }
 0x6e5   :  { %13178 = vmatpush1.bf16.msra.mxu0 %v15797_v30  ;;  %v11351_v18 = vadd.f32 %v16706_v19, %v11310_v39  ;;  %v15950_v39 = vld [vmem:[#allocation8 + $0x588] ss:$16 sps:$4 sm:$0xff]  }
 0x6e6   :  { %v11352_v21 = vpop.f32.mrf.mxu1  ;;  %v11312_v22 = vpop.f32.mrf.mxu0  ;;  %13179 = vmatprep.subr.bf16.mxu0 %v15802_v4 }
 0x6e7   :  { %v15902_v21 = vld [vmem:[#allocation8 + $0x488] ss:$16 sps:$4 sm:$0xff]   ;;  %v15910_v22 = vld [vmem:[#allocation8 + $0x46c] ss:$16 sps:$4 sm:$0xff]  }
 0x6e8   :  { %v11353_v55 = vpop.f32.mrf.mxu1 }
 0x6e9   :  { %13180 = vmatpush1.bf16.msra.mxu0 %v15800_v26  ;;  %v15907_v26 = vld [vmem:[#allocation8 + $0x2cc] ss:$16 sps:$4 sm:$0xff]   ;;  %v15908_v55 = vld [vmem:[#allocation8 + $0x468] ss:$16 sps:$4 sm:$0xff]  }
 0x6ea   :  { %13181 = vmatprep.subr.bf16.mxu0 %v15808_v62  ;;  %v15905_v62 = vld [vmem:[#allocation8 + $0x2c8] ss:$16 sps:$4 sm:$0xff]  }
 0x6ed   :  { %13182 = vmatpush1.bf16.msra.mxu0 %v15806_v28  ;;  %v15913_v28 = vld [vmem:[#allocation8 + $0x2ac] ss:$16 sps:$4 sm:$0xff]  }
 0x6ee   :  { %13183 = vmatprep.subr.bf16.mxu0 %v15814_v59  ;;  %v15916_v59 = vld [vmem:[#allocation8 + $0x44c] ss:$16 sps:$4 sm:$0xff]  }
 0x6f1   :  { %13184 = vmatpush1.bf16.msra.mxu0 %v15812_v52  ;;  %v15911_v52 = vld [vmem:[#allocation8 + $0x2a8] ss:$16 sps:$4 sm:$0xff]  }
 0x6f2   :  { %13185 = vmatprep.subr.bf16.mxu0 %v15820_v7  ;;  %v15914_v7 = vld [vmem:[#allocation8 + $0x448] ss:$16 sps:$4 sm:$0xff]  }
 0x6f5   :  { %13186 = vmatpush1.bf16.msra.mxu0 %v15818_v36  ;;  %v15919_v36 = vld [vmem:[#allocation8 + $0x28c] ss:$16 sps:$4 sm:$0xff]  }
 0x6f6   :  { %13187 = vmatprep.subr.bf16.mxu0 %v15826_v43  ;;  %v15922_v43 = vld [vmem:[#allocation8 + $0x42c] ss:$16 sps:$4 sm:$0xff]  }
 0x6f9   :  { %13188 = vmatpush1.bf16.msra.mxu0 %v15824_v56  ;;  %v15917_v56 = vld [vmem:[#allocation8 + $0x288] ss:$16 sps:$4 sm:$0xff]  }
 0x6fa   :  { %13189 = vmatprep.subr.bf16.mxu0 %v15832_v8  ;;  %v15925_v8 = vld [vmem:[#allocation8 + $0x26c] ss:$16 sps:$4 sm:$0xff]  }
 0x6fd   :  { %13190 = vmatpush1.bf16.msra.mxu0 %v15830_v29  ;;  %v15928_v29 = vld [vmem:[#allocation8 + $0x40c] ss:$16 sps:$4 sm:$0xff]  }
 0x6fe   :  { %13191 = vmatprep.subr.bf16.mxu0 %v15838_v61  ;;  %v15923_v61 = vld [vmem:[#allocation8 + $0x268] ss:$16 sps:$4 sm:$0xff]  }
 0x701   :  { %13192 = vmatpush2.bf16.msra.mxu0 %v15836_v0  ;;  %v15926_v0 = vld [vmem:[#allocation8 + $0x408] ss:$16 sps:$4 sm:$0xff]  }
 0x702   :  { %13193 = vmatprep.subr.bf16.mxu0 %v15844_v57  ;;  %v15931_v57 = vld [vmem:[#allocation8 + $0x24c] ss:$16 sps:$4 sm:$0xff]  }
 0x705   :  { %13194 = vmatpush2.bf16.msra.mxu0 %v15842_v25  ;;  %v15934_v25 = vld [vmem:[#allocation8 + $0x5ec] ss:$16 sps:$4 sm:$0xff]  }
 0x706   :  { %13195 = vmatprep.subr.bf16.mxu0 %v15850_v17  ;;  %v15929_v17 = vld [vmem:[#allocation8 + $0x248] ss:$16 sps:$4 sm:$0xff]  }
 0x709   :  { %13196 = vmatpush2.bf16.msra.mxu0 %v15848_v27  ;;  %v15932_v27 = vld [vmem:[#allocation8 + $0x5e8] ss:$16 sps:$4 sm:$0xff]  }
 0x70a   :  { %13197 = vmatprep.subr.bf16.mxu0 %v15856_v49  ;;  %v15937_v49 = vld [vmem:[#allocation8 + $0x22c] ss:$16 sps:$4 sm:$0xff]  }
 0x70d   :  { %13198 = vmatpush2.bf16.msra.mxu0 %v15854_v60  ;;  %v15940_v60 = vld [vmem:[#allocation8 + $0x5cc] ss:$16 sps:$4 sm:$0xff]  }
 0x70e   :  { %13199 = vmatprep.subr.bf16.mxu0 %v15862_v41  ;;  %v15935_v41 = vld [vmem:[#allocation8 + $0x228] ss:$16 sps:$4 sm:$0xff]  }
 0x711   :  { %13200 = vmatpush2.bf16.msra.mxu0 %v15860_v37  ;;  %v15938_v37 = vld [vmem:[#allocation8 + $0x5c8] ss:$16 sps:$4 sm:$0xff]  }
 0x712   :  { %13201 = vmatprep.subr.bf16.mxu0 %v15868_v34  ;;  %v15943_v34 = vld [vmem:[#allocation8 + $0x20c] ss:$16 sps:$4 sm:$0xff]  }
 0x715   :  { %13202 = vmatpush2.bf16.msra.mxu0 %v15866_v1  ;;  %v15946_v1 = vld [vmem:[#allocation8 + $0x5ac] ss:$16 sps:$4 sm:$0xff]  }
 0x716   :  { %13203 = vmatprep.subr.bf16.mxu0 %v15874_v54  ;;  %v15941_v54 = vld [vmem:[#allocation8 + $0x208] ss:$16 sps:$4 sm:$0xff]  }
 0x719   :  { %13204 = vmatpush2.bf16.msra.mxu0 %v15872_v42  ;;  %v15944_v42 = vld [vmem:[#allocation8 + $0x5a8] ss:$16 sps:$4 sm:$0xff]  }
 0x71a   :  { %13205 = vmatprep.subr.bf16.mxu0 %v15880_v48  ;;  %v15949_v48 = vld [vmem:[#allocation8 + $0x3ec] ss:$16 sps:$4 sm:$0xff]  }
 0x71d   :  { %13206 = vmatpush2.bf16.msra.mxu0 %v15878_v35  ;;  %v15952_v35 = vld [vmem:[#allocation8 + $0x58c] ss:$16 sps:$4 sm:$0xff]  }
 0x71e   :  { %13257 = vmatprep.subr.bf16.mxu0 %v15886_v46  ;;  %v15947_v46 = vld [vmem:[#allocation8 + $0x3e8] ss:$16 sps:$4 sm:$0xff]  }
 0x720   :  { %v11389_v3 = vpop.f32.mrf.mxu0  ;;  %13208 = vmatmul.mubr.bf16.vlgmr.msra.gmra.mxu0 %v16681_v10  ;;  %v15896_v10 = vld [vmem:[#allocation8 + $0x4a8] ss:$16 sps:$4 sm:$0xff]  }
 0x721   :  { %v11390_v40 = vadd.f32 %v11389_v3, %v16704_v53  ;;  %13258 = vmatpush1.bf16.msra.mxu0 %v15884_v63  ;;  %13289 = vmatprep.mubr.bf16.mxu0 %v16685_v38  ;;  %v15899_v38 = vld [vmem:[#allocation8 + $0x2e8] ss:$16 sps:$4 sm:$0xff]   ;;  %v15955_v63 = vld [vmem:[#allocation8 + $0x3cc] ss:$16 sps:$4 sm:$0xff]  }
 0x722   :  { %v11430_v2 = vpop.f32.mrf.mxu1  ;;  %v11391_v47 = vpop.f32.mrf.mxu0  ;;  %13259 = vmatprep.subr.bf16.mxu0 %v15892_v16  ;;  %v15958_v16 = vld [vmem:[#allocation8 + $0x56c] ss:$16 sps:$4 sm:$0xff]   ;;  %v15953_v3 = vld [vmem:[#allocation8 + $0x3c8] ss:$16 sps:$4 sm:$0xff]  }
 0x723   :  { %v11431_v58 = vadd.f32 %v11430_v2, %v11390_v40  ;;  %v11392_v12 = vadd.f32 %v11391_v47, %v11351_v18  ;;  %v15956_v18 = vld [vmem:[#allocation8 + $0x568] ss:$16 sps:$4 sm:$0xff]   ;;  %v15961_v40 = vld [vmem:[#allocation8 + $0x3ac] ss:$16 sps:$4 sm:$0xff]  }
 0x724   :  { %v11432_v20 = vpop.f32.mrf.mxu1  ;;  %v11393_v51 = vpop.f32.mrf.mxu0  ;;  %v15964_v2 = vld [vmem:[#allocation8 + $0x54c] ss:$16 sps:$4 sm:$0xff]   ;;  %v15962_v47 = vld [vmem:[#allocation8 + $0x548] ss:$16 sps:$4 sm:$0xff]  }
 0x725   :  { %v11433_v13 = vadd.f32 %v11432_v20, %v11392_v12  ;;  %13260 = vmatpush1.bf16.msra.mxu0 %v15890_v9  ;;  %v11443_v6 = vmax.f32 %v11431_v58, 0.0  ;;  %v15959_v9 = vld [vmem:[#allocation8 + $0x3a8] ss:$16 sps:$4 sm:$0xff]   ;;  %v15970_v58 = vld [vmem:[#allocation8 + $0x52c] ss:$16 sps:$4 sm:$0xff]  }
 0x726   :  { %v11434_v15 = vpop.f32.mrf.mxu1  ;;  %v11394_v30 = vpop.f32.mrf.mxu0  ;;  %13261 = vmatprep.subr.bf16.mxu0 %v15898_v31  ;;  %v15967_v31 = vld [vmem:[#allocation8 + $0x38c] ss:$16 sps:$4 sm:$0xff]   ;;  %v15965_v12 = vld [vmem:[#allocation8 + $0x388] ss:$16 sps:$4 sm:$0xff]  }
 0x727   :  { %v11444_v4 = vmax.f32 %v11433_v13, 0.0  ;;  %v16716_v24 = vpack.c.bf16 %v11443_v6, %v11443_v6  ;;  %v15968_v20 = vld [vmem:[#allocation8 + $0x528] ss:$16 sps:$4 sm:$0xff]   ;;  %v15973_v51 = vld [vmem:[#allocation8 + $0x36c] ss:$16 sps:$4 sm:$0xff]  }
 0x728   :  { %v11435_v53 = vpop.f32.mrf.mxu1  ;;  %v15976_v13 = vld [vmem:[#allocation8 + $0x50c] ss:$16 sps:$4 sm:$0xff]   ;;  %v15971_v15 = vld [vmem:[#allocation8 + $0x368] ss:$16 sps:$4 sm:$0xff]   ;;  %v16721_v30 = vld [vmem:[#allocation10] sm:$0xf] }
 0x729   :  { %v16714_v19 = vpack.c.bf16 %v11444_v4, %v11444_v4  ;;  %13262 = vmatpush1.bf16.msra.mxu0 %v15896_v10  ;;  %v15974_v10 = vld [vmem:[#allocation8 + $0x508] ss:$16 sps:$4 sm:$0xff]   ;;  %v15979_v6 = vld [vmem:[#allocation8 + $0x34c] ss:$16 sps:$4 sm:$0xff]   ;;  %v11714_v53 = vrot.slane %v16721_v30, %v1667_v45 }
 0x72a   :  { %13263 = vmatprep.subr.bf16.mxu0 %v15904_v44  ;;  %v16034_v44 = vld [vmem:[#allocation11 + $0x78] sm:$0xff]   ;;  %v15977_v4 = vld [vmem:[#allocation8 + $0x348] ss:$16 sps:$4 sm:$0xff]  }
 0x72b   :  { %13166 = vmatprep.mubr.bf16.mxu1 %v16714_v19  ;;  %v15985_v45 = vld [vmem:[#allocation8 + $0x30c] ss:$16 sps:$4 sm:$0xff]  }
 0x72c   :  { %13167 = vmatmul.mubr.bf16.vlgmr.msra.gmra.mxu1 %v16716_v24 }
 0x72d   :  { %13217 = vmatpush1.bf16.msra.mxu1 %v15899_v38  ;;  %13248 = vmatprep.mubr.bf16.mxu1 %v16667_v14  ;;  %v15920_v14 = vld [vmem:[#allocation8 + $0x428] ss:$16 sps:$4 sm:$0xff]   ;;  %v15982_v38 = vld [vmem:[#allocation8 + $0x32c] ss:$16 sps:$4 sm:$0xff]  }
 0x72e   :  { %13264 = vmatpush1.bf16.msra.mxu0 %v15902_v21  ;;  %13218 = vmatprep.subr.bf16.mxu1 %v15907_v26  ;;  %v16035_v21 = vld [vmem:[#allocation11 + $0x38] sm:$0xff]   ;;  %v11718_v26 = vrot.slane %v16721_v30, %v1671_v50  ;;  %v16038_v50 = vld [vmem:[#allocation11 + $0x68] sm:$0xff]  }
 0x72f   :  { %13265 = vmatprep.subr.bf16.mxu0 %v15910_v22  ;;  %v16036_v22 = vld [vmem:[#allocation11 + $0x70] sm:$0xff]  }
 0x731   :  { %13219 = vmatpush1.bf16.msra.mxu1 %v15905_v62 }
 0x732   :  { %13266 = vmatpush1.bf16.msra.mxu0 %v15908_v55  ;;  %13220 = vmatprep.subr.bf16.mxu1 %v15913_v28 }
 0x733   :  { %13267 = vmatprep.subr.bf16.mxu0 %v15916_v59  ;;  %v15980_v59 = vld [vmem:[#allocation8 + $0x328] ss:$16 sps:$4 sm:$0xff]  }
 0x735   :  { %13221 = vmatpush1.bf16.msra.mxu1 %v15911_v52 }
 0x736   :  { %13268 = vmatpush1.bf16.msra.mxu0 %v15914_v7  ;;  %13222 = vmatprep.subr.bf16.mxu1 %v15919_v36  ;;  %v16037_v7 = vld [vmem:[#allocation11 + $0x30] sm:$0xff]  }
 0x737   :  { %13269 = vmatprep.subr.bf16.mxu0 %v15922_v43 }
 0x739   :  { %13223 = vmatpush1.bf16.msra.mxu1 %v15917_v56 }
 0x73a   :  { %13270 = vmatpush1.bf16.msra.mxu0 %v15920_v14  ;;  %13224 = vmatprep.subr.bf16.mxu1 %v15925_v8 }
 0x73b   :  { %13271 = vmatprep.subr.bf16.mxu0 %v15928_v29 }
 0x73d   :  { %13225 = vmatpush1.bf16.msra.mxu1 %v15923_v61  ;;  %v15983_v61 = vld [vmem:[#allocation8 + $0x308] ss:$16 sps:$4 sm:$0xff]  }
 0x73e   :  { %13272 = vmatpush1.bf16.msra.mxu0 %v15926_v0  ;;  %13226 = vmatprep.subr.bf16.mxu1 %v15931_v57  ;;  %v16039_v57 = vld [vmem:[#allocation11 + $0x28] sm:$0xff]  }
 0x73f   :  { %13273 = vmatprep.subr.bf16.mxu0 %v15934_v25 }
 0x741   :  { %13227 = vmatpush1.bf16.msra.mxu1 %v15929_v17  ;;  %v16040_v17 = vld [vmem:[#allocation11 + $0x60] sm:$0xff]  }
 0x742   :  { %13274 = vmatpush2.bf16.msra.mxu0 %v15932_v27  ;;  %13228 = vmatprep.subr.bf16.mxu1 %v15937_v49  ;;  %v15986_v27 = vld [vmem:[#allocation8 + $0x6e8] ss:$16 sps:$4 sm:$0xff]   ;;  %v15991_v49 = vld [vmem:[#allocation8 + $0x6cc] ss:$16 sps:$4 sm:$0xff]  }
 0x743   :  { %13275 = vmatprep.subr.bf16.mxu0 %v15940_v60  ;;  %v16041_v60 = vld [vmem:[#allocation11 + $0x20] sm:$0xff]  }
 0x745   :  { %13229 = vmatpush1.bf16.msra.mxu1 %v15935_v41  ;;  %v16042_v41 = vld [vmem:[#allocation11 + $0x58] sm:$0xff]  }
 0x746   :  { %13276 = vmatpush2.bf16.msra.mxu0 %v15938_v37  ;;  %13230 = vmatprep.subr.bf16.mxu1 %v15943_v34  ;;  %v15989_v37 = vld [vmem:[#allocation8 + $0x6c8] ss:$16 sps:$4 sm:$0xff]   ;;  %v15994_v34 = vld [vmem:[#allocation8 + $0x6ac] ss:$16 sps:$4 sm:$0xff]  }
 0x747   :  { %13277 = vmatprep.subr.bf16.mxu0 %v15946_v1  ;;  %v16043_v1 = vld [vmem:[#allocation11 + $0x18] sm:$0xff]  }
 0x749   :  { %13231 = vmatpush1.bf16.msra.mxu1 %v15941_v54  ;;  %v16044_v54 = vld [vmem:[#allocation11 + $0x50] sm:$0xff]  }
 0x74a   :  { %13278 = vmatpush2.bf16.msra.mxu0 %v15944_v42  ;;  %13232 = vmatprep.subr.bf16.mxu1 %v15949_v48  ;;  %v15992_v42 = vld [vmem:[#allocation8 + $0x6a8] ss:$16 sps:$4 sm:$0xff]   ;;  %v15997_v48 = vld [vmem:[#allocation8 + $0x68c] ss:$16 sps:$4 sm:$0xff]  }
 0x74b   :  { %13279 = vmatprep.subr.bf16.mxu0 %v15952_v35  ;;  %v16045_v35 = vld [vmem:[#allocation11 + $0x10] sm:$0xff]  }
 0x74d   :  { %13233 = vmatpush2.bf16.msra.mxu1 %v15947_v46  ;;  %v16046_v46 = vld [vmem:[#allocation11 + $0x48] sm:$0xff]  }
 0x74e   :  { %13280 = vmatpush2.bf16.msra.mxu0 %v15950_v39  ;;  %13234 = vmatprep.subr.bf16.mxu1 %v15955_v63  ;;  %v16000_v39 = vld [vmem:[#allocation8 + $0x66c] ss:$16 sps:$4 sm:$0xff]   ;;  %v16048_v63 = vld [vmem:[#allocation11 + $0x40] sm:$0xff]  }
 0x74f   :  { %13281 = vmatprep.subr.bf16.mxu0 %v15958_v16  ;;  %v15998_v16 = vld [vmem:[#allocation8 + $0x668] ss:$16 sps:$4 sm:$0xff]  }
 0x751   :  { %13235 = vmatpush2.bf16.msra.mxu1 %v15953_v3  ;;  %v16003_v3 = vld [vmem:[#allocation8 + $0x64c] ss:$16 sps:$4 sm:$0xff]  }
 0x752   :  { %13282 = vmatpush2.bf16.msra.mxu0 %v15956_v18  ;;  %13236 = vmatprep.subr.bf16.mxu1 %v15961_v40  ;;  %v16049_v18 = vld [vmem:[#allocation11] sm:$0xff]  }
 0x753   :  { %13283 = vmatprep.subr.bf16.mxu0 %v15964_v2  ;;  %v16001_v40 = vld [vmem:[#allocation8 + $0x648] ss:$16 sps:$4 sm:$0xff]   ;;  %v16006_v2 = vld [vmem:[#allocation8 + $0x62c] ss:$16 sps:$4 sm:$0xff]  }
 0x755   :  { %13237 = vmatpush2.bf16.msra.mxu1 %v15959_v9  ;;  %v16004_v9 = vld [vmem:[#allocation8 + $0x628] ss:$16 sps:$4 sm:$0xff]  }
 0x756   :  { %13284 = vmatpush2.bf16.msra.mxu0 %v15962_v47  ;;  %13238 = vmatprep.subr.bf16.mxu1 %v15967_v31  ;;  %v16009_v47 = vld [vmem:[#allocation8 + $0x60c] ss:$16 sps:$4 sm:$0xff]   ;;  %v16007_v31 = vld [vmem:[#allocation8 + $0x608] ss:$16 sps:$4 sm:$0xff]  }
 0x757   :  { %13285 = vmatprep.subr.bf16.mxu0 %v15970_v58  ;;  %v16012_v58 = vld [vmem:[#allocation8 + $0x7ec] ss:$16 sps:$4 sm:$0xff]  }
 0x759   :  { %13239 = vmatpush2.bf16.msra.mxu1 %v15965_v12  ;;  %v16010_v12 = vld [vmem:[#allocation8 + $0x7e8] ss:$16 sps:$4 sm:$0xff]  }
 0x75a   :  { %13286 = vmatpush2.bf16.msra.mxu0 %v15968_v20  ;;  %13240 = vmatprep.subr.bf16.mxu1 %v15973_v51  ;;  %v16015_v20 = vld [vmem:[#allocation8 + $0x7cc] ss:$16 sps:$4 sm:$0xff]   ;;  %v16013_v51 = vld [vmem:[#allocation8 + $0x7c8] ss:$16 sps:$4 sm:$0xff]  }
 0x75b   :  { %13287 = vmatprep.subr.bf16.mxu0 %v15976_v13  ;;  %v16018_v13 = vld [vmem:[#allocation8 + $0x7ac] ss:$16 sps:$4 sm:$0xff]  }
 0x75d   :  { %13241 = vmatpush2.bf16.msra.mxu1 %v15971_v15  ;;  %v16016_v15 = vld [vmem:[#allocation8 + $0x7a8] ss:$16 sps:$4 sm:$0xff]  }
 0x75e   :  { %13288 = vmatpush2.bf16.msra.mxu0 %v15974_v10  ;;  %13242 = vmatprep.subr.bf16.mxu1 %v15979_v6  ;;  %v16021_v10 = vld [vmem:[#allocation8 + $0x78c] ss:$16 sps:$4 sm:$0xff]   ;;  %v16019_v6 = vld [vmem:[#allocation8 + $0x788] ss:$16 sps:$4 sm:$0xff]  }
 0x75f   :  { %15568 = vmatprep.subr.bf16.mxu0 %v16034_v44  ;;  %v16024_v44 = vld [vmem:[#allocation8 + $0x76c] ss:$16 sps:$4 sm:$0xff]  }
 0x760   :  { %v13045_v62 = vpop.f32.mrf.mxu0 }
 0x761   :  { %v13046_v55 = vadd.f32 %v13045_v62, %v11714_v53  ;;  %13243 = vmatpush2.bf16.msra.mxu1 %v15977_v4  ;;  %13290 = vmatmul.mubr.bf16.vlgmr.msra.gmra.mxu0 %v16697_v23  ;;  %v15988_v23 = vld [vmem:[#allocation8 + $0x6ec] ss:$16 sps:$4 sm:$0xff]   ;;  %v16022_v4 = vld [vmem:[#allocation8 + $0x768] ss:$16 sps:$4 sm:$0xff]  }
 0x762   :  { %v13086_v28 = vpop.f32.mrf.mxu1  ;;  %v13047_v52 = vpop.f32.mrf.mxu0  ;;  %13244 = vmatprep.subr.bf16.mxu1 %v15982_v38  ;;  %15569 = vmatpush3.bf16.msra.mxu0 %v16035_v21  ;;  %v16027_v53 = vld [vmem:[#allocation8 + $0x74c] ss:$16 sps:$4 sm:$0xff]   ;;  %v16025_v38 = vld [vmem:[#allocation8 + $0x748] ss:$16 sps:$4 sm:$0xff]  }
 0x763   :  { %v16730_v36 = vadd.f32 %v13086_v28, %v13046_v55  ;;  %v13048_v43 = vadd.f32 %v13047_v52, %v11718_v26  ;;  %15570 = vmatprep.subr.bf16.mxu0 %v16036_v22  ;;  %v16030_v21 = vld [vmem:[#allocation8 + $0x72c] ss:$16 sps:$4 sm:$0xff]   ;;  %v16028_v62 = vld [vmem:[#allocation8 + $0x728] ss:$16 sps:$4 sm:$0xff]  }
 0x764   :  { %v13088_v56 = vpop.f32.mrf.mxu1  ;;  %v13049_v14 = vpop.f32.mrf.mxu0  ;;  %v16033_v28 = vld [vmem:[#allocation8 + $0x70c] ss:$16 sps:$4 sm:$0xff]  }
 0x765   :  { %v16732_v8 = vadd.f32 %v13088_v56, %v13048_v43  ;;  %13245 = vmatpush2.bf16.msra.mxu1 %v15980_v59  ;;  %v16050_v43 = vld [vmem:[#allocation11 + $0xf8] sm:$0xff]   ;;  %v16054_v14 = vld [vmem:[#allocation11 + $0xe8] sm:$0xff]  }
 0x766   :  { %v13090_v29 = vpop.f32.mrf.mxu1  ;;  %v13050_v0 = vpop.f32.mrf.mxu0  ;;  %13246 = vmatprep.subr.bf16.mxu1 %v15985_v45  ;;  %15571 = vmatpush3.bf16.msra.mxu0 %v16037_v7  ;;  %v16031_v45 = vld [vmem:[#allocation8 + $0x708] ss:$16 sps:$4 sm:$0xff]   ;;  %v16051_v56 = vld [vmem:[#allocation11 + $0xb8] sm:$0xff]  }
 0x767   :  { %15572 = vmatprep.subr.bf16.mxu0 %v16038_v50  ;;  %v16052_v50 = vld [vmem:[#allocation11 + $0xf0] sm:$0xff]   ;;  %v16055_v29 = vld [vmem:[#allocation11 + $0xa8] sm:$0xff]   ;;  %v16058_v0 = vld [vmem:[#allocation11 + $0xd8] sm:$0xff]  }
 0x768   :  { %v13091_v25 = vpop.f32.mrf.mxu1 }
 0x769   :  { %13247 = vmatpush2.bf16.msra.mxu1 %v15983_v61  ;;  %v16057_v61 = vld [vmem:[#allocation11 + $0xa0] sm:$0xff]  }
 0x76a   :  { %13298 = vmatprep.subr.bf16.mxu1 %v15988_v23  ;;  %15573 = vmatpush3.bf16.msra.mxu0 %v16039_v57  ;;  %v16059_v23 = vld [vmem:[#allocation11 + $0x98] sm:$0xff]   ;;  %v16061_v57 = vld [vmem:[#allocation11 + $0x90] sm:$0xff]  }
 0x76b   :  { %15574 = vmatprep.subr.bf16.mxu0 %v16040_v17 }
 0x76c   :  { %13249 = vmatmul.mubr.bf16.vlgmr.msra.gmra.mxu1 %v16683_v33  ;;  %v15995_v33 = vld [vmem:[#allocation8 + $0x688] ss:$16 sps:$4 sm:$0xff]  }
 0x76d   :  { %13299 = vmatpush1.bf16.msra.mxu1 %v15986_v27  ;;  %13330 = vmatprep.mubr.bf16.mxu1 %v16714_v19  ;;  %v16047_v19 = vld [vmem:[#allocation11 + $0x8] sm:$0xff]  }
 0x76e   :  { %13300 = vmatprep.subr.bf16.mxu1 %v15991_v49  ;;  %15575 = vmatpush3.bf16.msra.mxu0 %v16041_v60 }
 0x76f   :  { %15576 = vmatprep.subr.bf16.mxu0 %v16042_v41 }
 0x771   :  { %13301 = vmatpush1.bf16.msra.mxu1 %v15989_v37  ;;  %v16062_v37 = vld [vmem:[#allocation11 + $0xc8] sm:$0xff]  }
 0x772   :  { %13302 = vmatprep.subr.bf16.mxu1 %v15994_v34  ;;  %15577 = vmatpush3.bf16.msra.mxu0 %v16043_v1  ;;  %v16063_v1 = vld [vmem:[#allocation11 + $0x88] sm:$0xff]  }
 0x773   :  { %15578 = vmatprep.subr.bf16.mxu0 %v16044_v54 }
 0x775   :  { %13303 = vmatpush1.bf16.msra.mxu1 %v15992_v42 }
 0x776   :  { %13304 = vmatprep.subr.bf16.mxu1 %v15997_v48  ;;  %15579 = vmatpush3.bf16.msra.mxu0 %v16045_v35 }
 0x777   :  { %15580 = vmatprep.subr.bf16.mxu0 %v16046_v46  ;;  %v16064_v46 = vld [vmem:[#allocation11 + $0xc0] sm:$0xff]  }
 0x779   :  { %13305 = vmatpush1.bf16.msra.mxu1 %v15995_v33 }
 0x77a   :  { %13306 = vmatprep.subr.bf16.mxu1 %v16000_v39  ;;  %15581 = vmatpush3.bf16.msra.mxu0 %v16047_v19  ;;  %v16065_v39 = vld [vmem:[#allocation11 + $0x80] sm:$0xff]  }
 0x77b   :  { %15582 = vmatprep.subr.bf16.mxu0 %v16048_v63 }
 0x77d   :  { %13307 = vmatpush1.bf16.msra.mxu1 %v15998_v16 }
 0x77e   :  { %13308 = vmatprep.subr.bf16.mxu1 %v16003_v3  ;;  %15583 = vmatpush3.bf16.msra.mxu0 %v16049_v18 }
 0x781   :  { %13309 = vmatpush1.bf16.msra.mxu1 %v16001_v40  ;;  %v11722_v40 = vrot.slane %v16721_v30, %v1675_v5 }
 0x782   :  { %13310 = vmatprep.subr.bf16.mxu1 %v16006_v2 }
 0x785   :  { %13311 = vmatpush1.bf16.msra.mxu1 %v16004_v9  ;;  %v11726_v9 = vrot.slane %v16721_v30, %v1679_v11 }
 0x786   :  { %13312 = vmatprep.subr.bf16.mxu1 %v16009_v47 }
 0x789   :  { %13313 = vmatpush1.bf16.msra.mxu1 %v16007_v31 }
 0x78a   :  { %13314 = vmatprep.subr.bf16.mxu1 %v16012_v58 }
 0x78d   :  { %13315 = vmatpush2.bf16.msra.mxu1 %v16010_v12 }
 0x78e   :  { %13316 = vmatprep.subr.bf16.mxu1 %v16015_v20 }
 0x791   :  { %13317 = vmatpush2.bf16.msra.mxu1 %v16013_v51 }
 0x792   :  { %13318 = vmatprep.subr.bf16.mxu1 %v16018_v13 }
 0x795   :  { %13319 = vmatpush2.bf16.msra.mxu1 %v16016_v15 }
 0x796   :  { %13320 = vmatprep.subr.bf16.mxu1 %v16021_v10 }
 0x799   :  { %13321 = vmatpush2.bf16.msra.mxu1 %v16019_v6 }
 0x79a   :  { %13322 = vmatprep.subr.bf16.mxu1 %v16024_v44 }
 0x79d   :  { %13323 = vmatpush2.bf16.msra.mxu1 %v16022_v4 }
 0x79e   :  { %13324 = vmatprep.subr.bf16.mxu1 %v16027_v53 }
 0x7a0   :  { %v13127_v26 = vpop.f32.mrf.mxu0 }
 0x7a1   :  { %v13128_v22 = vadd.f32 %v13127_v26, %v16730_v36  ;;  %13325 = vmatpush2.bf16.msra.mxu1 %v16025_v38  ;;  %v16053_v36 = vld [vmem:[#allocation11 + $0xb0] sm:$0xff]  }
 0x7a2   :  { %v13129_v55 = vpop.f32.mrf.mxu0  ;;  %13326 = vmatprep.subr.bf16.mxu1 %v16030_v21 }
 0x7a3   :  { %v13130_v59 = vadd.f32 %v13129_v55, %v16732_v8  ;;  %v16056_v8 = vld [vmem:[#allocation11 + $0xe0] sm:$0xff]  }
 0x7a4   :  { %v13131_v52 = vpop.f32.mrf.mxu0 }
 0x7a5   :  { %13327 = vmatpush2.bf16.msra.mxu1 %v16028_v62  ;;  %v15535_v52 = vld [vmem:[#allocation13] ss:$0 sm:$0xff] }
 0x7a6   :  { %v13132_v7 = vpop.f32.mrf.mxu0  ;;  %13328 = vmatprep.subr.bf16.mxu1 %v16033_v28 }
 0x7a9   :  { %13329 = vmatpush2.bf16.msra.mxu1 %v16031_v45 }
 0x7aa   :  { %15590 = vmatprep.subr.bf16.mxu1 %v16050_v43 }
 0x7ac   :  { %13331 = vmatmul.mubr.bf16.vlgmr.msra.gmra.mxu1 %v16716_v24  ;;  %v16060_v24 = vld [vmem:[#allocation11 + $0xd0] sm:$0xff]  }
 0x7ad   :  { %15591 = vmatpush3.bf16.msra.mxu1 %v16051_v56 }
 0x7ae   :  { %15592 = vmatprep.subr.bf16.mxu1 %v16052_v50 }
 0x7b1   :  { %15593 = vmatpush3.bf16.msra.mxu1 %v16053_v36 }
 0x7b2   :  { %15594 = vmatprep.subr.bf16.mxu1 %v16054_v14 }
 0x7b5   :  { %15595 = vmatpush3.bf16.msra.mxu1 %v16055_v29 }
 0x7b6   :  { %15596 = vmatprep.subr.bf16.mxu1 %v16056_v8 }
 0x7b9   :  { %15597 = vmatpush3.bf16.msra.mxu1 %v16057_v61 }
 0x7ba   :  { %15598 = vmatprep.subr.bf16.mxu1 %v16058_v0 }
 0x7bd   :  { %15599 = vmatpush3.bf16.msra.mxu1 %v16059_v23 }
 0x7be   :  { %15600 = vmatprep.subr.bf16.mxu1 %v16060_v24 }
 0x7c1   :  { %15601 = vmatpush3.bf16.msra.mxu1 %v16061_v57 }
 0x7c2   :  { %15602 = vmatprep.subr.bf16.mxu1 %v16062_v37 }
 0x7c5   :  { %15603 = vmatpush3.bf16.msra.mxu1 %v16063_v1 }
 0x7c6   :  { %15604 = vmatprep.subr.bf16.mxu1 %v16064_v46 }
 0x7c9   :  { %15605 = vmatpush3.bf16.msra.mxu1 %v16065_v39 }
 0x7e0   :  { %v13209_v25 = vpop.f32.mrf.mxu0 }
 0x7e1   :  { %v13210_v47 = vadd.f32 %v13209_v25, %v11722_v40 }
 0x7e2   :  { %v13211_v17 = vpop.f32.mrf.mxu0 }
 0x7e3   :  { %v13212_v58 = vadd.f32 %v13211_v17, %v11726_v9 }
 0x7e4   :  { %v13213_v27 = vpop.f32.mrf.mxu0 }
 0x7e6   :  { %v13214_v49 = vpop.f32.mrf.mxu0 }
 0x7ec   :  { %v13168_v60 = vpop.f32.mrf.mxu1 }
 0x7ed   :  { %v13169_v41 = vadd.f32 %v13168_v60, %v13128_v22 }
 0x7ee   :  { %v13170_v34 = vpop.f32.mrf.mxu1 }
 0x7ef   :  { %v13171_v54 = vadd.f32 %v13170_v34, %v13130_v59  ;;  %v13339_v42 = vmax.f32 %v13169_v41, 0.0 }
 0x7f0   :  { %v13172_v48 = vpop.f32.mrf.mxu1 }
 0x7f1   :  { %v13340_v35 = vmax.f32 %v13171_v54, 0.0  ;;  %v13343_v63 = vpack.c.bf16 %v13339_v42, %v13339_v42 }
 0x7f2   :  { %v13173_v33 = vpop.f32.mrf.mxu1 }
 0x7f3   :  { %v13344_v19 = vpack.c.bf16 %v13340_v35, %v13340_v35 }
 0x7f5   :  { %13642 = vmatprep.mubr.bf16.mxu0 %v13344_v19 }
 0x7f6   :  { %13643 = vmatmul.mubr.bf16.vlgmr.msra.gmra.mxu0 %v13343_v63 }
 0x821   :  { %v13291_v16 = vpop.f32.mrf.mxu0 }
 0x823   :  { %v13293_v3 = vpop.f32.mrf.mxu0 }
 0x825   :  { %v13295_v18 = vpop.f32.mrf.mxu0 }
 0x827   :  { %v13296_v2 = vpop.f32.mrf.mxu0 }
 0x82c   :  { %v13250_v31 = vpop.f32.mrf.mxu1 }
 0x82d   :  { %v13251_v12 = vadd.f32 %v13250_v31, %v13210_v47 }
 0x82e   :  { %v13252_v20 = vpop.f32.mrf.mxu1 }
 0x82f   :  { %v13253_v51 = vadd.f32 %v13252_v20, %v13212_v58  ;;  %v13292_v13 = vadd.f32 %v13291_v16, %v13251_v12 }
 0x830   :  { %v13254_v15 = vpop.f32.mrf.mxu1 }
 0x831   :  { %v13294_v10 = vadd.f32 %v13293_v3, %v13253_v51 }
 0x832   :  { %v13255_v6 = vpop.f32.mrf.mxu1 }
 0x86c   :  { %v13332_v44 = vpop.f32.mrf.mxu1 }
 0x86d   :  { %v13333_v4 = vadd.f32 %v13332_v44, %v13292_v13 }
 0x86e   :  { %v13334_v53 = vpop.f32.mrf.mxu1 }
 0x86f   :  { %v13335_v38 = vadd.f32 %v13334_v53, %v13294_v10  ;;  %v13341_v5 = vmax.f32 %v13333_v4, 0.0 }
 0x870   :  { %v13336_v21 = vpop.f32.mrf.mxu1 }
 0x871   :  { %v13342_v26 = vmax.f32 %v13335_v38, 0.0  ;;  %v13345_v11 = vpack.c.bf16 %v13341_v5, %v13341_v5 }
 0x872   :  { %v13337_v32 = vpop.f32.mrf.mxu1 }
 0x873   :  { %v13346_v22 = vpack.c.bf16 %v13342_v26, %v13342_v26 }
 0x875   :  { %13682 = vmatprep.mubr.bf16.mxu1 %v13346_v22 }
 0x876   :  { %13683 = vmatmul.mubr.bf16.vlgmr.msra.gmra.mxu1 %v13345_v11 }
 0x8b6   :  { %v15584_v30 = vpop.f32.mrf.mxu0 }
 0x8b8   :  { %v15585_v62 = vpop.f32.mrf.mxu0 }
 0x8b9   :  { %v15586_v55 = vadd.f32 %v15585_v62, %v15584_v30 }
 0x8ba   :  { %v15587_v28 = vpop.f32.mrf.mxu0 }
 0x8bb   :  { %v13645_v43 = vadd.f32 %v15586_v55, %v15535_v52 }
 0x8bc   :  { %v15588_v59 = vpop.f32.mrf.mxu0 }
 0x936   :  { %v15606_v45 = vpop.f32.mrf.mxu1 }
 0x938   :  { %v15607_v7 = vpop.f32.mrf.mxu1 }
 0x939   :  { %v15608_v56 = vadd.f32 %v15607_v7, %v15606_v45 }
 0x93a   :  { %v15609_v50 = vpop.f32.mrf.mxu1 }
 0x93b   :  { %v13685_v36 = vadd.f32 %v15608_v56, %v13645_v43 }
 0x93c   :  { %v15610_v14 = vpop.f32.mrf.mxu1 }
 0x93d   :  { %13690 = vmax.xlane.f32.xlu0 %v13685_v36 }
 0x9c6   :  { %v13691_v29 = vpop.xlane.xlu0 %13690 }
 0x9c7   :  { %v13692_v8 = vsub.f32 %v13685_v36, %v13691_v29 }
 0x9c9   :  { %v13693_v61 = vmul.f32 1.442695, %v13692_v8 }
 0x9cb   :  { %16066 = vpow2.f32 %v13693_v61 }
 0x9d8   :  { %v16067_v0 = vpop.eup %16066 }
 0x9d9   :  { %13695 = vadd.xlane.f32.xlu0 %v16067_v0 }
 0xa62   :  { %v13696_v23 = vpop.xlane.xlu0 %13695 }
 0xa63   :  { %16068 = vlog2.f32 %v13696_v23 }
 0xa70   :  { %v16069_v24 = vpop.eup %16068 }
 0xa71   :  { %v13698_v57 = vmul.f32 0.6931472, %v16069_v24 }
 0xa73   :  { %v13699_v25 = vsub.f32 %v13692_v8, %v13698_v57 }
 0xa75   :  { %13700 = vst [vmem:[#allocation14] sm:$0xff] %v13699_v25 }
 0xa76   :  { %16224 = shalt.err (!%p16221_p11)
}
 0xa77   :  { %13710 = dma.vmem_to_hbm [thread:$0]  %s13708_s6, 128, %s16755_s7, [#allocation4]  }
 0xa78   :  { %16241 = dma.done.wait [#allocation4], 128  }
 0xa79   :  { %16242 = vsyncadd [#allocation4], 4294967168 }
 0xa7a   :  { %13714 = vsyncpa [#allocation3], 1 }
 0xa7b   :  { %13715 = vsyncpa [#allocation6], 1 }
 0xa7c   :  { %13716 = vsyncpa [#allocation9], 1 }
 0xa7d   :  { %13717 = vsyncpa [#allocation12], 1 }
 0xa7e   :  { %13718 = vsyncpa [#allocation4], 1 }

</bundles_post_ra>
